<compile_context>
chip_gen: v7x
topology: tpu7x:2x2x1
jax: 0.10.0
libtpu: 0.0.40
codegen_flags: <defaults>
</compile_context>

<pallas_src>
import jax
import jax.numpy as jnp
from jax import lax
from jax.experimental import pallas as pl
from jax.experimental.pallas import tpu as pltpu

KSIZE = 4                       # every ConvTranspose2d in this model uses k=4
BN_EPS = 1e-5
# (stride, padding) of the 4 ConvT+BN+ReLU blocks; the final ConvT is (2, 1).
BLOCK_CFG = ((1, 0), (2, 1), (2, 1), (2, 1))


# ------------------------------- Pallas kernels ------------------------------

def _matmul_kernel(a_ref, b_ref, o_ref):
    o_ref[...] = jnp.dot(a_ref[...], b_ref[...],
                         preferred_element_type=jnp.float32).astype(o_ref.dtype)


def _bn_relu_matmul_kernel(a_ref, x_ref, scale_ref, shift_ref, o_ref):
    # Fused BatchNorm normalize (precomputed scale/shift) + ReLU on the B operand,
    # then MXU matmul.  VPU prologue is hidden under the MXU.
    xb = x_ref[...].astype(jnp.float32) * scale_ref[...] + shift_ref[...]
    xb = jnp.maximum(xb, 0.0).astype(a_ref.dtype)
    o_ref[...] = jnp.dot(a_ref[...], xb,
                         preferred_element_type=jnp.float32).astype(o_ref.dtype)


def _bn_stats_kernel(x_ref, sum_ref, sq_ref):
    # Accumulate per-channel (per-row) sum and sum-of-squares across the column
    # grid axis.  f32 accumulation even for bf16 activations.
    @pl.when(pl.program_id(0) == 0)
    def _():
        sum_ref[...] = jnp.zeros_like(sum_ref)
        sq_ref[...] = jnp.zeros_like(sq_ref)

    x = x_ref[...].astype(jnp.float32)
    sum_ref[...] += jnp.sum(x, axis=1, keepdims=True)
    sq_ref[...] += jnp.sum(x * x, axis=1, keepdims=True)


def _bias_tanh_kernel(x_ref, b_ref, o_ref):
    y = x_ref[...].astype(jnp.float32) + b_ref[...]
    o_ref[...] = jnp.tanh(y).astype(o_ref.dtype)


# ------------------------------ kernel wrappers -------------------------------

_ROW_TILES = (256, 128, 64, 32, 16, 8)
_COL_TILES = (512, 256, 128)


def _pick_tile(n, candidates):
    for t in candidates:
        if t <= n and n % t == 0:
            return t
    return n  # full extent (always a legal full-dim block)


def pallas_matmul(a, b, out_dtype=jnp.bfloat16):
    """(R, K) @ (K, M) -> (R, M).  Channel-first: M (pixels) is the lane axis."""
    r, k = a.shape
    k2, m = b.shape
    assert k == k2
    tr = _pick_tile(r, _ROW_TILES)
    tc = _pick_tile(m, _COL_TILES)
    return pl.pallas_call(
        _matmul_kernel,
        out_shape=jax.ShapeDtypeStruct((r, m), out_dtype),
        grid=(r // tr, m // tc),
        in_specs=[pl.BlockSpec((tr, k), lambda i, j: (i, 0)),
                  pl.BlockSpec((k, tc), lambda i, j: (0, j))],
        out_specs=pl.BlockSpec((tr, tc), lambda i, j: (i, j)),
        compiler_params=pltpu.CompilerParams(
            dimension_semantics=("parallel", "parallel")),
    )(a, b)


def pallas_bn_relu_matmul(a, x, scale, shift, out_dtype=jnp.bfloat16):
    """(R, K) @ relu(x * scale + shift) with x:(K, M), scale/shift:(K, 1)."""
    r, k = a.shape
    k2, m = x.shape
    assert k == k2
    tr = _pick_tile(r, _ROW_TILES)
    tc = _pick_tile(m, _COL_TILES)
    vec = pl.BlockSpec((k, 1), lambda i, j: (0, 0))
    return pl.pallas_call(
        _bn_relu_matmul_kernel,
        out_shape=jax.ShapeDtypeStruct((r, m), out_dtype),
        grid=(r // tr, m // tc),
        in_specs=[pl.BlockSpec((tr, k), lambda i, j: (i, 0)),
                  pl.BlockSpec((k, tc), lambda i, j: (0, j)),
                  vec, vec],
        out_specs=pl.BlockSpec((tr, tc), lambda i, j: (i, j)),
        compiler_params=pltpu.CompilerParams(
            dimension_semantics=("parallel", "parallel")),
    )(a, x, scale, shift)


def pallas_bn_stats(x):
    """Per-channel sum and sum-of-squares of a (C, M) activation (f32 outputs)."""
    c, m = x.shape
    tc = _pick_tile(m, _COL_TILES)
    return pl.pallas_call(
        _bn_stats_kernel,
        out_shape=(jax.ShapeDtypeStruct((c, 1), jnp.float32),
                   jax.ShapeDtypeStruct((c, 1), jnp.float32)),
        grid=(m // tc,),
        in_specs=[pl.BlockSpec((c, tc), lambda j: (0, j))],
        out_specs=(pl.BlockSpec((c, 1), lambda j: (0, 0)),
                   pl.BlockSpec((c, 1), lambda j: (0, 0))),
        compiler_params=pltpu.CompilerParams(
            dimension_semantics=("arbitrary",)),   # sequential accumulation
    )(x)


def pallas_bias_tanh(x, bias, out_dtype=jnp.float32):
    c, m = x.shape
    tc = _pick_tile(m, _COL_TILES)
    return pl.pallas_call(
        _bias_tanh_kernel,
        out_shape=jax.ShapeDtypeStruct((c, m), out_dtype),
        grid=(m // tc,),
        in_specs=[pl.BlockSpec((c, tc), lambda j: (0, j)),
                  pl.BlockSpec((c, 1), lambda j: (0, 0))],
        out_specs=pl.BlockSpec((c, tc), lambda j: (0, j)),
        compiler_params=pltpu.CompilerParams(
            dimension_semantics=("parallel",)),
    )(x, bias)


# ------------------- plain-JAX glue (layout only, no matmul) ------------------
# TODO(synk): the col2im overlap-add below is XLA-side layout glue (shift-add +
# pixel-shuffle); it is not itself a Pallas kernel.

def _shift_fwd(a, axis):
    """result[i] = a[i-1] along `axis` (zero at i=0)."""
    n = a.shape[axis]
    z = jnp.zeros_like(lax.slice_in_dim(a, 0, 1, axis=axis))
    return jnp.concatenate([z, lax.slice_in_dim(a, 0, n - 1, axis=axis)], axis=axis)


def _shift_bwd(a, axis):
    """result[i] = a[i+1] along `axis` (zero at i=n-1)."""
    n = a.shape[axis]
    z = jnp.zeros_like(lax.slice_in_dim(a, 0, 1, axis=axis))
    return jnp.concatenate([lax.slice_in_dim(a, 1, n, axis=axis), z], axis=axis)


def _col2im_first(y, cout, n):
    """ConvT(k=4, s=1, p=0) on a 1x1 input: pure reshape, out[c,b,ky,kx]=y[(ky,kx,c),b]."""
    y4 = y.reshape(KSIZE, KSIZE, cout, n)
    return jnp.transpose(y4, (2, 3, 0, 1))               # (C, N, 4, 4)


def _col2im_s2p1(y, cout, n, h, w):
    """Overlap-add for ConvT(k=4, stride=2, pad=1), channel-first.

    y: (16*cout, n*h*w) matmul output, rows ordered (ky, kx, cout), columns (n, h, w).
    Returns (cout, n, 2h, 2w).  Shift-and-add + pixel-shuffle: no scatter, no zeros.
    """
    y6 = y.reshape(KSIZE, KSIZE, cout, n, h, w)
    # Row (H) pass: out row 2m+0 <- (h=m, ky=1) + (h=m-1, ky=3); 2m+1 <- (m, 2) + (m+1, 0)
    zr0 = y6[1] + _shift_fwd(y6[3], axis=-2)              # (4, C, N, H, W), axis0 = kx
    zr1 = y6[2] + _shift_bwd(y6[0], axis=-2)
    # Column (W) pass, same structure along kx.
    o00 = zr0[1] + _shift_fwd(zr0[3], axis=-1)            # (C, N, H, W)
    o01 = zr0[2] + _shift_bwd(zr0[0], axis=-1)
    o10 = zr1[1] + _shift_fwd(zr1[3], axis=-1)
    o11 = zr1[2] + _shift_bwd(zr1[0], axis=-1)
    row0 = jnp.stack([o00, o01], axis=-1)                 # (C, N, H, W, 2)
    row1 = jnp.stack([o10, o11], axis=-1)
    full = jnp.stack([row0, row1], axis=3)                # (C, N, H, 2, W, 2)
    return full.reshape(cout, n, 2 * h, 2 * w)


# -------------------------------- the generator -------------------------------

def init_generator_params(key, noise, img_channels, features_g):
    """Deterministic init mirroring the PyTorch module's parameter shapes.

    Each ConvTranspose2d weight (Cin, Cout, 4, 4) is pre-arranged into the
    matmul matrix A[(ky, kx, cout), cin] = w[cin, cout, ky, kx] (bf16)."""
    chans = [noise, features_g * 16, features_g * 8, features_g * 4,
             features_g * 2, img_channels]
    keys = jax.random.split(key, 6)
    blocks = []
    for i in range(4):
        cin, cout = chans[i], chans[i + 1]
        bound = (cout * KSIZE * KSIZE) ** -0.5            # ~ PyTorch default
        w = jax.random.uniform(keys[i], (cin, cout, KSIZE, KSIZE),
                               jnp.float32, -bound, bound)
        a = jnp.transpose(w, (2, 3, 1, 0)).reshape(KSIZE * KSIZE * cout, cin)
        blocks.append({"A": a.astype(jnp.bfloat16),
                       "gamma": jnp.ones((cout, 1), jnp.float32),
                       "beta": jnp.zeros((cout, 1), jnp.float32)})
    cin, cout = chans[4], chans[5]
    bound = (cout * KSIZE * KSIZE) ** -0.5
    w = jax.random.uniform(keys[4], (cin, cout, KSIZE, KSIZE),
                           jnp.float32, -bound, bound)
    a = jnp.transpose(w, (2, 3, 1, 0)).reshape(KSIZE * KSIZE * cout, cin)
    b = jax.random.uniform(keys[5], (cout, 1), jnp.float32, -bound, bound)
    return {"blocks": blocks, "final": {"A": a.astype(jnp.bfloat16), "b": b}}


@jax.jit
def generator_forward(z_nchw, params):
    n = z_nchw.shape[0]
    noise = z_nchw.shape[1]
    # (N, noise, 1, 1) -> channel-first 2D (noise, N)
    x = jnp.transpose(z_nchw.reshape(n, noise), (1, 0)).astype(jnp.bfloat16)
    h = w = 1
    scale = shift = None                                  # no pending BN for block 0

    for li, blk in enumerate(params["blocks"]):
        a = blk["A"]
        cout = a.shape[0] // (KSIZE * KSIZE)
        stride, pad = BLOCK_CFG[li]                       # static Python config

        if scale is None:
            y = pallas_matmul(a, x)                       # (16*Cout, N*H*W) bf16
        else:
            # Previous block's BN normalize + ReLU fused into this matmul.
            y = pallas_bn_relu_matmul(a, x, scale, shift)

        if stride == 1 and pad == 0:                      # first block, 1x1 -> 4x4
            xsp = _col2im_first(y, cout, n)
            h = w = KSIZE
        else:                                             # k=4, s=2, p=1: HxW -> 2Hx2W
            xsp = _col2im_s2p1(y, cout, n, h, w)
            h, w = 2 * h, 2 * w
        x = xsp.reshape(cout, n * h * w)                  # raw pre-BN activation (bf16)

        # BatchNorm batch statistics (training mode: biased batch stats).
        s, sq = pallas_bn_stats(x)
        cnt = float(n * h * w)
        mean = s / cnt
        var = jnp.maximum(sq / cnt - mean * mean, 0.0)    # clamp fp cancellation
        inv_std = lax.rsqrt(var + BN_EPS)
        scale = blk["gamma"] * inv_std
        shift = blk["beta"] - mean * scale                # applied lazily in next matmul

    # Final ConvTranspose2d (with bias) + Tanh; block-4 BN+ReLU fused into its matmul.
    a = params["final"]["A"]
    cout = a.shape[0] // (KSIZE * KSIZE)
    y = pallas_bn_relu_matmul(a, x, scale, shift)         # (16*Cout, N*32*32)
    xsp = _col2im_s2p1(y, cout, n, h, w)                  # (Cout, N, 64, 64)
    h, w = 2 * h, 2 * w
    out = pallas_bias_tanh(xsp.reshape(cout, n * h * w), params["final"]["b"])
    out = out.reshape(cout, n, h, w)
    return jnp.transpose(out, (1, 0, 2, 3))               # NCHW, f32


if __name__ == "__main__":
    batch, noise, img_channels, features_g = 2, 8, 3, 4

    key = jax.random.PRNGKey(0)
    k_param, k_z = jax.random.split(key)
    params = init_generator_params(k_param, noise, img_channels, features_g)
    z = jax.random.normal(k_z, (batch, noise, 1, 1), jnp.float32)

    out = generator_forward(z, params)
    out = jax.block_until_ready(out)

    assert out.shape == (batch, img_channels, 64, 64), out.shape
    assert bool(jnp.all(jnp.isfinite(out)))
    assert bool(jnp.all(jnp.abs(out) <= 1.0 + 1e-6))      # tanh range
    print("KERNEL_OK")
</pallas_src>

<mosaic_0001>
module attributes {stable_mosaic.version = 11 : i64} {
  func.func @_matmul_kernel(%arg0: i32, %arg1: i32, %arg2: memref<256x8xbf16, #tpu.memory_space<vmem>>, %arg3: memref<8x2xbf16, #tpu.memory_space<vmem>>, %arg4: memref<256x2xbf16, #tpu.memory_space<vmem>>) attributes {dimension_semantics = [#tpu.dimension_semantics<parallel>, #tpu.dimension_semantics<parallel>], iteration_bounds = array<i64: 4, 1>, scalar_prefetch = 0 : i64, scratch_operands = 0 : i64, tpu.core_type = #tpu.core_type<tc>, window_params = [{transform_indices = @transform_0, window_bounds = array<i64: 256, 8>}, {transform_indices = @transform_1, window_bounds = array<i64: 8, 2>}, {transform_indices = @transform_2, window_bounds = array<i64: 256, 2>}]} {
    %c0 = arith.constant 0 : index
    %c0_0 = arith.constant 0 : index
    %0 = vector.load %arg2[%c0, %c0_0] : memref<256x8xbf16, #tpu.memory_space<vmem>>, vector<256x8xbf16>
    %c0_1 = arith.constant 0 : index
    %c0_2 = arith.constant 0 : index
    %1 = vector.load %arg3[%c0_1, %c0_2] : memref<8x2xbf16, #tpu.memory_space<vmem>>, vector<8x2xbf16>
    %cst = arith.constant dense<0.000000e+00> : vector<256x2xf32>
    %2 = tpu.matmul %0, %1, %cst {dimension_numbers = #tpu.dot_dimension_numbers<[1], [0], [0], [1], [0, 0, 1, 1], [], []>} : vector<256x8xbf16>, vector<8x2xbf16>, vector<256x2xf32> -> vector<256x2xf32>
    %3 = arith.truncf %2 : vector<256x2xf32> to vector<256x2xbf16>
    %c0_3 = arith.constant 0 : index
    %c0_4 = arith.constant 0 : index
    %4 = vector.load %arg4[%c0_3, %c0_4] : memref<256x2xbf16, #tpu.memory_space<vmem>>, vector<256x2xbf16>
    tpu.vector_store %arg4[%c0_3, %c0_4], %3 {strides = array<i32>} : memref<256x2xbf16, #tpu.memory_space<vmem>>, vector<256x2xbf16>,
    return
  }
  func.func @transform_0(%arg0: i32, %arg1: i32) -> (i32, i32) {
    %c0_i32 = arith.constant 0 : i32
    %c0_i32_0 = arith.constant 0 : i32
    return %arg0, %c0_i32 : i32, i32
  }
  func.func @transform_1(%arg0: i32, %arg1: i32) -> (i32, i32) {
    %c0_i32 = arith.constant 0 : i32
    %c0_i32_0 = arith.constant 0 : i32
    return %c0_i32, %arg1 : i32, i32
  }
  func.func @transform_2(%arg0: i32, %arg1: i32) -> (i32, i32) {
    %c0_i32 = arith.constant 0 : i32
    return %arg0, %arg1 : i32, i32
  }
}

module attributes {stable_mosaic.version = 11 : i64} {
  func.func @_bn_relu_matmul_kernel(%arg0: i32, %arg1: i32, %arg2: memref<256x64xbf16, #tpu.memory_space<vmem>>, %arg3: memref<64x32xbf16, #tpu.memory_space<vmem>>, %arg4: memref<64x1xf32, #tpu.memory_space<vmem>>, %arg5: memref<64x1xf32, #tpu.memory_space<vmem>>, %arg6: memref<256x32xbf16, #tpu.memory_space<vmem>>) attributes {dimension_semantics = [#tpu.dimension_semantics<parallel>, #tpu.dimension_semantics<parallel>], iteration_bounds = array<i64: 2, 1>, scalar_prefetch = 0 : i64, scratch_operands = 0 : i64, tpu.core_type = #tpu.core_type<tc>, window_params = [{transform_indices = @transform_0, window_bounds = array<i64: 256, 64>}, {transform_indices = @transform_1, window_bounds = array<i64: 64, 32>}, {pipeline_mode = #tpu.pipeline_mode<synchronous>, transform_indices = @transform_2, window_bounds = array<i64: 64, 1>}, {pipeline_mode = #tpu.pipeline_mode<synchronous>, transform_indices = @transform_3, window_bounds = array<i64: 64, 1>}, {transform_indices = @transform_4, window_bounds = array<i64: 256, 32>}]} {
    %c0 = arith.constant 0 : index
    %c0_0 = arith.constant 0 : index
    %0 = vector.load %arg3[%c0, %c0_0] : memref<64x32xbf16, #tpu.memory_space<vmem>>, vector<64x32xbf16>
    %1 = arith.extf %0 : vector<64x32xbf16> to vector<64x32xf32>
    %c0_1 = arith.constant 0 : index
    %c0_2 = arith.constant 0 : index
    %2 = vector.load %arg4[%c0_1, %c0_2] : memref<64x1xf32, #tpu.memory_space<vmem>>, vector<64x1xf32>
    %3 = vector.broadcast %2 : vector<64x1xf32> to vector<64x32xf32>
    %4 = arith.mulf %1, %3 : vector<64x32xf32>
    %c0_3 = arith.constant 0 : index
    %c0_4 = arith.constant 0 : index
    %5 = vector.load %arg5[%c0_3, %c0_4] : memref<64x1xf32, #tpu.memory_space<vmem>>, vector<64x1xf32>
    %6 = vector.broadcast %5 : vector<64x1xf32> to vector<64x32xf32>
    %7 = arith.addf %4, %6 : vector<64x32xf32>
    %cst = arith.constant 0.000000e+00 : f32
    %8 = vector.broadcast %cst : f32 to vector<64x32xf32>
    %9 = arith.maximumf %7, %8 : vector<64x32xf32>
    %10 = arith.truncf %9 : vector<64x32xf32> to vector<64x32xbf16>
    %c0_5 = arith.constant 0 : index
    %c0_6 = arith.constant 0 : index
    %11 = vector.load %arg2[%c0_5, %c0_6] : memref<256x64xbf16, #tpu.memory_space<vmem>>, vector<256x64xbf16>
    %cst_7 = arith.constant dense<0.000000e+00> : vector<256x32xf32>
    %12 = tpu.matmul %11, %10, %cst_7 {dimension_numbers = #tpu.dot_dimension_numbers<[1], [0], [0], [1], [0, 0, 1, 1], [], []>} : vector<256x64xbf16>, vector<64x32xbf16>, vector<256x32xf32> -> vector<256x32xf32>
    %13 = arith.truncf %12 : vector<256x32xf32> to vector<256x32xbf16>
    %c0_8 = arith.constant 0 : index
    %c0_9 = arith.constant 0 : index
    %14 = vector.load %arg6[%c0_8, %c0_9] : memref<256x32xbf16, #tpu.memory_space<vmem>>, vector<256x32xbf16>
    tpu.vector_store %arg6[%c0_8, %c0_9], %13 {strides = array<i32>} : memref<256x32xbf16, #tpu.memory_space<vmem>>, vector<256x32xbf16>,
    return
  }
  func.func @transform_0(%arg0: i32, %arg1: i32) -> (i32, i32) {
    %c0_i32 = arith.constant 0 : i32
    %c0_i32_0 = arith.constant 0 : i32
    return %arg0, %c0_i32 : i32, i32
  }
  func.func @transform_1(%arg0: i32, %arg1: i32) -> (i32, i32) {
    %c0_i32 = arith.constant 0 : i32
    %c0_i32_0 = arith.constant 0 : i32
    return %c0_i32, %arg1 : i32, i32
  }
  func.func @transform_2(%arg0: i32, %arg1: i32) -> (i32, i32) {
    %c0_i32 = arith.constant 0 : i32
    %c0_i32_0 = arith.constant 0 : i32
    %c0_i32_1 = arith.constant 0 : i32
    return %c0_i32, %c0_i32_0 : i32, i32
  }
  func.func @transform_3(%arg0: i32, %arg1: i32) -> (i32, i32) {
    %c0_i32 = arith.constant 0 : i32
    %c0_i32_0 = arith.constant 0 : i32
    %c0_i32_1 = arith.constant 0 : i32
    return %c0_i32, %c0_i32_0 : i32, i32
  }
  func.func @transform_4(%arg0: i32, %arg1: i32) -> (i32, i32) {
    %c0_i32 = arith.constant 0 : i32
    return %arg0, %arg1 : i32, i32
  }
}

module attributes {stable_mosaic.version = 11 : i64} {
  func.func @_bn_stats_kernel(%arg0: i32, %arg1: memref<64x32xbf16, #tpu.memory_space<vmem>>, %arg2: memref<64x1xf32, #tpu.memory_space<vmem>>, %arg3: memref<64x1xf32, #tpu.memory_space<vmem>>) attributes {dimension_semantics = [#tpu.dimension_semantics<arbitrary>], iteration_bounds = array<i64: 1>, scalar_prefetch = 0 : i64, scratch_operands = 0 : i64, tpu.core_type = #tpu.core_type<tc>, window_params = [{transform_indices = @transform_0, window_bounds = array<i64: 64, 32>}, {pipeline_mode = #tpu.pipeline_mode<synchronous>, transform_indices = @transform_1, window_bounds = array<i64: 64, 1>}, {pipeline_mode = #tpu.pipeline_mode<synchronous>, transform_indices = @transform_2, window_bounds = array<i64: 64, 1>}]} {
    %c0_i32 = arith.constant 0 : i32
    %0 = arith.cmpi eq, %arg0, %c0_i32 : i32
    %1 = arith.extui %0 : i1 to i32
    %c0_i32_0 = arith.constant 0 : i32
    %2 = arith.cmpi ne, %1, %c0_i32_0 : i32
    scf.if %2 {
      %cst_11 = arith.constant 0.000000e+00 : f32
      %16 = vector.broadcast %cst_11 : f32 to vector<64x1xf32>
      %c0_12 = arith.constant 0 : index
      %c0_13 = arith.constant 0 : index
      %17 = vector.load %arg2[%c0_12, %c0_13] : memref<64x1xf32, #tpu.memory_space<vmem>>, vector<64x1xf32>
      tpu.vector_store %arg2[%c0_12, %c0_13], %16 {strides = array<i32>} : memref<64x1xf32, #tpu.memory_space<vmem>>, vector<64x1xf32>,
      %cst_14 = arith.constant 0.000000e+00 : f32
      %18 = vector.broadcast %cst_14 : f32 to vector<64x1xf32>
      %c0_15 = arith.constant 0 : index
      %c0_16 = arith.constant 0 : index
      %19 = vector.load %arg3[%c0_15, %c0_16] : memref<64x1xf32, #tpu.memory_space<vmem>>, vector<64x1xf32>
      tpu.vector_store %arg3[%c0_15, %c0_16], %18 {strides = array<i32>} : memref<64x1xf32, #tpu.memory_space<vmem>>, vector<64x1xf32>,
    } else {
    }
    %c0 = arith.constant 0 : index
    %c0_1 = arith.constant 0 : index
    %3 = vector.load %arg1[%c0, %c0_1] : memref<64x32xbf16, #tpu.memory_space<vmem>>, vector<64x32xbf16>
    %4 = arith.extf %3 : vector<64x32xbf16> to vector<64x32xf32>
    %c0_2 = arith.constant 0 : index
    %c0_3 = arith.constant 0 : index
    %5 = vector.load %arg2[%c0_2, %c0_3] : memref<64x1xf32, #tpu.memory_space<vmem>>, vector<64x1xf32>
    %cst = arith.constant dense<0.000000e+00> : vector<64xf32>
    %6 = vector.multi_reduction <add>, %4, %cst [1] : vector<64x32xf32> to vector<64xf32>
    %7 = vector.shape_cast %6 : vector<64xf32> to vector<64x1xf32>
    %8 = arith.addf %5, %7 : vector<64x1xf32>
    %c0_4 = arith.constant 0 : index
    %c0_5 = arith.constant 0 : index
    %9 = vector.load %arg2[%c0_4, %c0_5] : memref<64x1xf32, #tpu.memory_space<vmem>>, vector<64x1xf32>
    tpu.vector_store %arg2[%c0_4, %c0_5], %8 {strides = array<i32>} : memref<64x1xf32, #tpu.memory_space<vmem>>, vector<64x1xf32>,
    %c0_6 = arith.constant 0 : index
    %c0_7 = arith.constant 0 : index
    %10 = vector.load %arg3[%c0_6, %c0_7] : memref<64x1xf32, #tpu.memory_space<vmem>>, vector<64x1xf32>
    %11 = arith.mulf %4, %4 : vector<64x32xf32>
    %cst_8 = arith.constant dense<0.000000e+00> : vector<64xf32>
    %12 = vector.multi_reduction <add>, %11, %cst_8 [1] : vector<64x32xf32> to vector<64xf32>
    %13 = vector.shape_cast %12 : vector<64xf32> to vector<64x1xf32>
    %14 = arith.addf %10, %13 : vector<64x1xf32>
    %c0_9 = arith.constant 0 : index
    %c0_10 = arith.constant 0 : index
    %15 = vector.load %arg3[%c0_9, %c0_10] : memref<64x1xf32, #tpu.memory_space<vmem>>, vector<64x1xf32>
    tpu.vector_store %arg3[%c0_9, %c0_10], %14 {strides = array<i32>} : memref<64x1xf32, #tpu.memory_space<vmem>>, vector<64x1xf32>,
    return
  }
  func.func @transform_0(%arg0: i32) -> (i32, i32) {
    %c0_i32 = arith.constant 0 : i32
    %c0_i32_0 = arith.constant 0 : i32
    return %c0_i32, %arg0 : i32, i32
  }
  func.func @transform_1(%arg0: i32) -> (i32, i32) {
    %c0_i32 = arith.constant 0 : i32
    %c0_i32_0 = arith.constant 0 : i32
    %c0_i32_1 = arith.constant 0 : i32
    return %c0_i32, %c0_i32_0 : i32, i32
  }
  func.func @transform_2(%arg0: i32) -> (i32, i32) {
    %c0_i32 = arith.constant 0 : i32
    %c0_i32_0 = arith.constant 0 : i32
    %c0_i32_1 = arith.constant 0 : i32
    return %c0_i32, %c0_i32_0 : i32, i32
  }
}

module attributes {stable_mosaic.version = 11 : i64} {
  func.func @_bn_stats_kernel(%arg0: i32, %arg1: memref<32x128xbf16, #tpu.memory_space<vmem>>, %arg2: memref<32x1xf32, #tpu.memory_space<vmem>>, %arg3: memref<32x1xf32, #tpu.memory_space<vmem>>) attributes {dimension_semantics = [#tpu.dimension_semantics<arbitrary>], iteration_bounds = array<i64: 1>, scalar_prefetch = 0 : i64, scratch_operands = 0 : i64, tpu.core_type = #tpu.core_type<tc>, window_params = [{transform_indices = @transform_0, window_bounds = array<i64: 32, 128>}, {pipeline_mode = #tpu.pipeline_mode<synchronous>, transform_indices = @transform_1, window_bounds = array<i64: 32, 1>}, {pipeline_mode = #tpu.pipeline_mode<synchronous>, transform_indices = @transform_2, window_bounds = array<i64: 32, 1>}]} {
    %c0_i32 = arith.constant 0 : i32
    %0 = arith.cmpi eq, %arg0, %c0_i32 : i32
    %1 = arith.extui %0 : i1 to i32
    %c0_i32_0 = arith.constant 0 : i32
    %2 = arith.cmpi ne, %1, %c0_i32_0 : i32
    scf.if %2 {
      %cst_11 = arith.constant 0.000000e+00 : f32
      %16 = vector.broadcast %cst_11 : f32 to vector<32x1xf32>
      %c0_12 = arith.constant 0 : index
      %c0_13 = arith.constant 0 : index
      %17 = vector.load %arg2[%c0_12, %c0_13] : memref<32x1xf32, #tpu.memory_space<vmem>>, vector<32x1xf32>
      tpu.vector_store %arg2[%c0_12, %c0_13], %16 {strides = array<i32>} : memref<32x1xf32, #tpu.memory_space<vmem>>, vector<32x1xf32>,
      %cst_14 = arith.constant 0.000000e+00 : f32
      %18 = vector.broadcast %cst_14 : f32 to vector<32x1xf32>
      %c0_15 = arith.constant 0 : index
      %c0_16 = arith.constant 0 : index
      %19 = vector.load %arg3[%c0_15, %c0_16] : memref<32x1xf32, #tpu.memory_space<vmem>>, vector<32x1xf32>
      tpu.vector_store %arg3[%c0_15, %c0_16], %18 {strides = array<i32>} : memref<32x1xf32, #tpu.memory_space<vmem>>, vector<32x1xf32>,
    } else {
    }
    %c0 = arith.constant 0 : index
    %c0_1 = arith.constant 0 : index
    %3 = vector.load %arg1[%c0, %c0_1] : memref<32x128xbf16, #tpu.memory_space<vmem>>, vector<32x128xbf16>
    %4 = arith.extf %3 : vector<32x128xbf16> to vector<32x128xf32>
    %c0_2 = arith.constant 0 : index
    %c0_3 = arith.constant 0 : index
    %5 = vector.load %arg2[%c0_2, %c0_3] : memref<32x1xf32, #tpu.memory_space<vmem>>, vector<32x1xf32>
    %cst = arith.constant dense<0.000000e+00> : vector<32xf32>
    %6 = vector.multi_reduction <add>, %4, %cst [1] : vector<32x128xf32> to vector<32xf32>
    %7 = vector.shape_cast %6 : vector<32xf32> to vector<32x1xf32>
    %8 = arith.addf %5, %7 : vector<32x1xf32>
    %c0_4 = arith.constant 0 : index
    %c0_5 = arith.constant 0 : index
    %9 = vector.load %arg2[%c0_4, %c0_5] : memref<32x1xf32, #tpu.memory_space<vmem>>, vector<32x1xf32>
    tpu.vector_store %arg2[%c0_4, %c0_5], %8 {strides = array<i32>} : memref<32x1xf32, #tpu.memory_space<vmem>>, vector<32x1xf32>,
    %c0_6 = arith.constant 0 : index
    %c0_7 = arith.constant 0 : index
    %10 = vector.load %arg3[%c0_6, %c0_7] : memref<32x1xf32, #tpu.memory_space<vmem>>, vector<32x1xf32>
    %11 = arith.mulf %4, %4 : vector<32x128xf32>
    %cst_8 = arith.constant dense<0.000000e+00> : vector<32xf32>
    %12 = vector.multi_reduction <add>, %11, %cst_8 [1] : vector<32x128xf32> to vector<32xf32>
    %13 = vector.shape_cast %12 : vector<32xf32> to vector<32x1xf32>
    %14 = arith.addf %10, %13 : vector<32x1xf32>
    %c0_9 = arith.constant 0 : index
    %c0_10 = arith.constant 0 : index
    %15 = vector.load %arg3[%c0_9, %c0_10] : memref<32x1xf32, #tpu.memory_space<vmem>>, vector<32x1xf32>
    tpu.vector_store %arg3[%c0_9, %c0_10], %14 {strides = array<i32>} : memref<32x1xf32, #tpu.memory_space<vmem>>, vector<32x1xf32>,
    return
  }
  func.func @transform_0(%arg0: i32) -> (i32, i32) {
    %c0_i32 = arith.constant 0 : i32
    %c0_i32_0 = arith.constant 0 : i32
    return %c0_i32, %arg0 : i32, i32
  }
  func.func @transform_1(%arg0: i32) -> (i32, i32) {
    %c0_i32 = arith.constant 0 : i32
    %c0_i32_0 = arith.constant 0 : i32
    %c0_i32_1 = arith.constant 0 : i32
    return %c0_i32, %c0_i32_0 : i32, i32
  }
  func.func @transform_2(%arg0: i32) -> (i32, i32) {
    %c0_i32 = arith.constant 0 : i32
    %c0_i32_0 = arith.constant 0 : i32
    %c0_i32_1 = arith.constant 0 : i32
    return %c0_i32, %c0_i32_0 : i32, i32
  }
}

module attributes {stable_mosaic.version = 11 : i64} {
  func.func @_bn_relu_matmul_kernel(%arg0: i32, %arg1: i32, %arg2: memref<256x32xbf16, #tpu.memory_space<vmem>>, %arg3: memref<32x128xbf16, #tpu.memory_space<vmem>>, %arg4: memref<32x1xf32, #tpu.memory_space<vmem>>, %arg5: memref<32x1xf32, #tpu.memory_space<vmem>>, %arg6: memref<256x128xbf16, #tpu.memory_space<vmem>>) attributes {dimension_semantics = [#tpu.dimension_semantics<parallel>, #tpu.dimension_semantics<parallel>], iteration_bounds = array<i64: 1, 1>, scalar_prefetch = 0 : i64, scratch_operands = 0 : i64, tpu.core_type = #tpu.core_type<tc>, window_params = [{transform_indices = @transform_0, window_bounds = array<i64: 256, 32>}, {transform_indices = @transform_1, window_bounds = array<i64: 32, 128>}, {pipeline_mode = #tpu.pipeline_mode<synchronous>, transform_indices = @transform_2, window_bounds = array<i64: 32, 1>}, {pipeline_mode = #tpu.pipeline_mode<synchronous>, transform_indices = @transform_3, window_bounds = array<i64: 32, 1>}, {transform_indices = @transform_4, window_bounds = array<i64: 256, 128>}]} {
    %c0 = arith.constant 0 : index
    %c0_0 = arith.constant 0 : index
    %0 = vector.load %arg3[%c0, %c0_0] : memref<32x128xbf16, #tpu.memory_space<vmem>>, vector<32x128xbf16>
    %1 = arith.extf %0 : vector<32x128xbf16> to vector<32x128xf32>
    %c0_1 = arith.constant 0 : index
    %c0_2 = arith.constant 0 : index
    %2 = vector.load %arg4[%c0_1, %c0_2] : memref<32x1xf32, #tpu.memory_space<vmem>>, vector<32x1xf32>
    %3 = vector.broadcast %2 : vector<32x1xf32> to vector<32x128xf32>
    %4 = arith.mulf %1, %3 : vector<32x128xf32>
    %c0_3 = arith.constant 0 : index
    %c0_4 = arith.constant 0 : index
    %5 = vector.load %arg5[%c0_3, %c0_4] : memref<32x1xf32, #tpu.memory_space<vmem>>, vector<32x1xf32>
    %6 = vector.broadcast %5 : vector<32x1xf32> to vector<32x128xf32>
    %7 = arith.addf %4, %6 : vector<32x128xf32>
    %cst = arith.constant 0.000000e+00 : f32
    %8 = vector.broadcast %cst : f32 to vector<32x128xf32>
    %9 = arith.maximumf %7, %8 : vector<32x128xf32>
    %10 = arith.truncf %9 : vector<32x128xf32> to vector<32x128xbf16>
    %c0_5 = arith.constant 0 : index
    %c0_6 = arith.constant 0 : index
    %11 = vector.load %arg2[%c0_5, %c0_6] : memref<256x32xbf16, #tpu.memory_space<vmem>>, vector<256x32xbf16>
    %cst_7 = arith.constant dense<0.000000e+00> : vector<256x128xf32>
    %12 = tpu.matmul %11, %10, %cst_7 {dimension_numbers = #tpu.dot_dimension_numbers<[1], [0], [0], [1], [0, 0, 1, 1], [], []>} : vector<256x32xbf16>, vector<32x128xbf16>, vector<256x128xf32> -> vector<256x128xf32>
    %13 = arith.truncf %12 : vector<256x128xf32> to vector<256x128xbf16>
    %c0_8 = arith.constant 0 : index
    %c0_9 = arith.constant 0 : index
    %14 = vector.load %arg6[%c0_8, %c0_9] : memref<256x128xbf16, #tpu.memory_space<vmem>>, vector<256x128xbf16>
    tpu.vector_store %arg6[%c0_8, %c0_9], %13 {strides = array<i32>} : memref<256x128xbf16, #tpu.memory_space<vmem>>, vector<256x128xbf16>,
    return
  }
  func.func @transform_0(%arg0: i32, %arg1: i32) -> (i32, i32) {
    %c0_i32 = arith.constant 0 : i32
    %c0_i32_0 = arith.constant 0 : i32
    return %arg0, %c0_i32 : i32, i32
  }
  func.func @transform_1(%arg0: i32, %arg1: i32) -> (i32, i32) {
    %c0_i32 = arith.constant 0 : i32
    %c0_i32_0 = arith.constant 0 : i32
    return %c0_i32, %arg1 : i32, i32
  }
  func.func @transform_2(%arg0: i32, %arg1: i32) -> (i32, i32) {
    %c0_i32 = arith.constant 0 : i32
    %c0_i32_0 = arith.constant 0 : i32
    %c0_i32_1 = arith.constant 0 : i32
    return %c0_i32, %c0_i32_0 : i32, i32
  }
  func.func @transform_3(%arg0: i32, %arg1: i32) -> (i32, i32) {
    %c0_i32 = arith.constant 0 : i32
    %c0_i32_0 = arith.constant 0 : i32
    %c0_i32_1 = arith.constant 0 : i32
    return %c0_i32, %c0_i32_0 : i32, i32
  }
  func.func @transform_4(%arg0: i32, %arg1: i32) -> (i32, i32) {
    %c0_i32 = arith.constant 0 : i32
    return %arg0, %arg1 : i32, i32
  }
}

module attributes {stable_mosaic.version = 11 : i64} {
  func.func @_bn_stats_kernel(%arg0: i32, %arg1: memref<16x512xbf16, #tpu.memory_space<vmem>>, %arg2: memref<16x1xf32, #tpu.memory_space<vmem>>, %arg3: memref<16x1xf32, #tpu.memory_space<vmem>>) attributes {dimension_semantics = [#tpu.dimension_semantics<arbitrary>], iteration_bounds = array<i64: 1>, scalar_prefetch = 0 : i64, scratch_operands = 0 : i64, tpu.core_type = #tpu.core_type<tc>, window_params = [{transform_indices = @transform_0, window_bounds = array<i64: 16, 512>}, {pipeline_mode = #tpu.pipeline_mode<synchronous>, transform_indices = @transform_1, window_bounds = array<i64: 16, 1>}, {pipeline_mode = #tpu.pipeline_mode<synchronous>, transform_indices = @transform_2, window_bounds = array<i64: 16, 1>}]} {
    %c0_i32 = arith.constant 0 : i32
    %0 = arith.cmpi eq, %arg0, %c0_i32 : i32
    %1 = arith.extui %0 : i1 to i32
    %c0_i32_0 = arith.constant 0 : i32
    %2 = arith.cmpi ne, %1, %c0_i32_0 : i32
    scf.if %2 {
      %cst_11 = arith.constant 0.000000e+00 : f32
      %16 = vector.broadcast %cst_11 : f32 to vector<16x1xf32>
      %c0_12 = arith.constant 0 : index
      %c0_13 = arith.constant 0 : index
      %17 = vector.load %arg2[%c0_12, %c0_13] : memref<16x1xf32, #tpu.memory_space<vmem>>, vector<16x1xf32>
      tpu.vector_store %arg2[%c0_12, %c0_13], %16 {strides = array<i32>} : memref<16x1xf32, #tpu.memory_space<vmem>>, vector<16x1xf32>,
      %cst_14 = arith.constant 0.000000e+00 : f32
      %18 = vector.broadcast %cst_14 : f32 to vector<16x1xf32>
      %c0_15 = arith.constant 0 : index
      %c0_16 = arith.constant 0 : index
      %19 = vector.load %arg3[%c0_15, %c0_16] : memref<16x1xf32, #tpu.memory_space<vmem>>, vector<16x1xf32>
      tpu.vector_store %arg3[%c0_15, %c0_16], %18 {strides = array<i32>} : memref<16x1xf32, #tpu.memory_space<vmem>>, vector<16x1xf32>,
    } else {
    }
    %c0 = arith.constant 0 : index
    %c0_1 = arith.constant 0 : index
    %3 = vector.load %arg1[%c0, %c0_1] : memref<16x512xbf16, #tpu.memory_space<vmem>>, vector<16x512xbf16>
    %4 = arith.extf %3 : vector<16x512xbf16> to vector<16x512xf32>
    %c0_2 = arith.constant 0 : index
    %c0_3 = arith.constant 0 : index
    %5 = vector.load %arg2[%c0_2, %c0_3] : memref<16x1xf32, #tpu.memory_space<vmem>>, vector<16x1xf32>
    %cst = arith.constant dense<0.000000e+00> : vector<16xf32>
    %6 = vector.multi_reduction <add>, %4, %cst [1] : vector<16x512xf32> to vector<16xf32>
    %7 = vector.shape_cast %6 : vector<16xf32> to vector<16x1xf32>
    %8 = arith.addf %5, %7 : vector<16x1xf32>
    %c0_4 = arith.constant 0 : index
    %c0_5 = arith.constant 0 : index
    %9 = vector.load %arg2[%c0_4, %c0_5] : memref<16x1xf32, #tpu.memory_space<vmem>>, vector<16x1xf32>
    tpu.vector_store %arg2[%c0_4, %c0_5], %8 {strides = array<i32>} : memref<16x1xf32, #tpu.memory_space<vmem>>, vector<16x1xf32>,
    %c0_6 = arith.constant 0 : index
    %c0_7 = arith.constant 0 : index
    %10 = vector.load %arg3[%c0_6, %c0_7] : memref<16x1xf32, #tpu.memory_space<vmem>>, vector<16x1xf32>
    %11 = arith.mulf %4, %4 : vector<16x512xf32>
    %cst_8 = arith.constant dense<0.000000e+00> : vector<16xf32>
    %12 = vector.multi_reduction <add>, %11, %cst_8 [1] : vector<16x512xf32> to vector<16xf32>
    %13 = vector.shape_cast %12 : vector<16xf32> to vector<16x1xf32>
    %14 = arith.addf %10, %13 : vector<16x1xf32>
    %c0_9 = arith.constant 0 : index
    %c0_10 = arith.constant 0 : index
    %15 = vector.load %arg3[%c0_9, %c0_10] : memref<16x1xf32, #tpu.memory_space<vmem>>, vector<16x1xf32>
    tpu.vector_store %arg3[%c0_9, %c0_10], %14 {strides = array<i32>} : memref<16x1xf32, #tpu.memory_space<vmem>>, vector<16x1xf32>,
    return
  }
  func.func @transform_0(%arg0: i32) -> (i32, i32) {
    %c0_i32 = arith.constant 0 : i32
    %c0_i32_0 = arith.constant 0 : i32
    return %c0_i32, %arg0 : i32, i32
  }
  func.func @transform_1(%arg0: i32) -> (i32, i32) {
    %c0_i32 = arith.constant 0 : i32
    %c0_i32_0 = arith.constant 0 : i32
    %c0_i32_1 = arith.constant 0 : i32
    return %c0_i32, %c0_i32_0 : i32, i32
  }
  func.func @transform_2(%arg0: i32) -> (i32, i32) {
    %c0_i32 = arith.constant 0 : i32
    %c0_i32_0 = arith.constant 0 : i32
    %c0_i32_1 = arith.constant 0 : i32
    return %c0_i32, %c0_i32_0 : i32, i32
  }
}

module attributes {stable_mosaic.version = 11 : i64} {
  func.func @_bn_relu_matmul_kernel(%arg0: i32, %arg1: i32, %arg2: memref<128x16xbf16, #tpu.memory_space<vmem>>, %arg3: memref<16x512xbf16, #tpu.memory_space<vmem>>, %arg4: memref<16x1xf32, #tpu.memory_space<vmem>>, %arg5: memref<16x1xf32, #tpu.memory_space<vmem>>, %arg6: memref<128x512xbf16, #tpu.memory_space<vmem>>) attributes {dimension_semantics = [#tpu.dimension_semantics<parallel>, #tpu.dimension_semantics<parallel>], iteration_bounds = array<i64: 1, 1>, scalar_prefetch = 0 : i64, scratch_operands = 0 : i64, tpu.core_type = #tpu.core_type<tc>, window_params = [{transform_indices = @transform_0, window_bounds = array<i64: 128, 16>}, {transform_indices = @transform_1, window_bounds = array<i64: 16, 512>}, {pipeline_mode = #tpu.pipeline_mode<synchronous>, transform_indices = @transform_2, window_bounds = array<i64: 16, 1>}, {pipeline_mode = #tpu.pipeline_mode<synchronous>, transform_indices = @transform_3, window_bounds = array<i64: 16, 1>}, {transform_indices = @transform_4, window_bounds = array<i64: 128, 512>}]} {
    %c0 = arith.constant 0 : index
    %c0_0 = arith.constant 0 : index
    %0 = vector.load %arg3[%c0, %c0_0] : memref<16x512xbf16, #tpu.memory_space<vmem>>, vector<16x512xbf16>
    %1 = arith.extf %0 : vector<16x512xbf16> to vector<16x512xf32>
    %c0_1 = arith.constant 0 : index
    %c0_2 = arith.constant 0 : index
    %2 = vector.load %arg4[%c0_1, %c0_2] : memref<16x1xf32, #tpu.memory_space<vmem>>, vector<16x1xf32>
    %3 = vector.broadcast %2 : vector<16x1xf32> to vector<16x512xf32>
    %4 = arith.mulf %1, %3 : vector<16x512xf32>
    %c0_3 = arith.constant 0 : index
    %c0_4 = arith.constant 0 : index
    %5 = vector.load %arg5[%c0_3, %c0_4] : memref<16x1xf32, #tpu.memory_space<vmem>>, vector<16x1xf32>
    %6 = vector.broadcast %5 : vector<16x1xf32> to vector<16x512xf32>
    %7 = arith.addf %4, %6 : vector<16x512xf32>
    %cst = arith.constant 0.000000e+00 : f32
    %8 = vector.broadcast %cst : f32 to vector<16x512xf32>
    %9 = arith.maximumf %7, %8 : vector<16x512xf32>
    %10 = arith.truncf %9 : vector<16x512xf32> to vector<16x512xbf16>
    %c0_5 = arith.constant 0 : index
    %c0_6 = arith.constant 0 : index
    %11 = vector.load %arg2[%c0_5, %c0_6] : memref<128x16xbf16, #tpu.memory_space<vmem>>, vector<128x16xbf16>
    %cst_7 = arith.constant dense<0.000000e+00> : vector<128x512xf32>
    %12 = tpu.matmul %11, %10, %cst_7 {dimension_numbers = #tpu.dot_dimension_numbers<[1], [0], [0], [1], [0, 0, 1, 1], [], []>} : vector<128x16xbf16>, vector<16x512xbf16>, vector<128x512xf32> -> vector<128x512xf32>
    %13 = arith.truncf %12 : vector<128x512xf32> to vector<128x512xbf16>
    %c0_8 = arith.constant 0 : index
    %c0_9 = arith.constant 0 : index
    %14 = vector.load %arg6[%c0_8, %c0_9] : memref<128x512xbf16, #tpu.memory_space<vmem>>, vector<128x512xbf16>
    tpu.vector_store %arg6[%c0_8, %c0_9], %13 {strides = array<i32>} : memref<128x512xbf16, #tpu.memory_space<vmem>>, vector<128x512xbf16>,
    return
  }
  func.func @transform_0(%arg0: i32, %arg1: i32) -> (i32, i32) {
    %c0_i32 = arith.constant 0 : i32
    %c0_i32_0 = arith.constant 0 : i32
    return %arg0, %c0_i32 : i32, i32
  }
  func.func @transform_1(%arg0: i32, %arg1: i32) -> (i32, i32) {
    %c0_i32 = arith.constant 0 : i32
    %c0_i32_0 = arith.constant 0 : i32
    return %c0_i32, %arg1 : i32, i32
  }
  func.func @transform_2(%arg0: i32, %arg1: i32) -> (i32, i32) {
    %c0_i32 = arith.constant 0 : i32
    %c0_i32_0 = arith.constant 0 : i32
    %c0_i32_1 = arith.constant 0 : i32
    return %c0_i32, %c0_i32_0 : i32, i32
  }
  func.func @transform_3(%arg0: i32, %arg1: i32) -> (i32, i32) {
    %c0_i32 = arith.constant 0 : i32
    %c0_i32_0 = arith.constant 0 : i32
    %c0_i32_1 = arith.constant 0 : i32
    return %c0_i32, %c0_i32_0 : i32, i32
  }
  func.func @transform_4(%arg0: i32, %arg1: i32) -> (i32, i32) {
    %c0_i32 = arith.constant 0 : i32
    return %arg0, %arg1 : i32, i32
  }
}

module attributes {stable_mosaic.version = 11 : i64} {
  func.func @_bn_stats_kernel(%arg0: i32, %arg1: memref<8x512xbf16, #tpu.memory_space<vmem>>, %arg2: memref<8x1xf32, #tpu.memory_space<vmem>>, %arg3: memref<8x1xf32, #tpu.memory_space<vmem>>) attributes {dimension_semantics = [#tpu.dimension_semantics<arbitrary>], iteration_bounds = array<i64: 4>, scalar_prefetch = 0 : i64, scratch_operands = 0 : i64, tpu.core_type = #tpu.core_type<tc>, window_params = [{transform_indices = @transform_0, window_bounds = array<i64: 8, 512>}, {pipeline_mode = #tpu.pipeline_mode<synchronous>, transform_indices = @transform_1, window_bounds = array<i64: 8, 1>}, {pipeline_mode = #tpu.pipeline_mode<synchronous>, transform_indices = @transform_2, window_bounds = array<i64: 8, 1>}]} {
    %c0_i32 = arith.constant 0 : i32
    %0 = arith.cmpi eq, %arg0, %c0_i32 : i32
    %1 = arith.extui %0 : i1 to i32
    %c0_i32_0 = arith.constant 0 : i32
    %2 = arith.cmpi ne, %1, %c0_i32_0 : i32
    scf.if %2 {
      %cst_11 = arith.constant 0.000000e+00 : f32
      %16 = vector.broadcast %cst_11 : f32 to vector<8x1xf32>
      %c0_12 = arith.constant 0 : index
      %c0_13 = arith.constant 0 : index
      %17 = vector.load %arg2[%c0_12, %c0_13] : memref<8x1xf32, #tpu.memory_space<vmem>>, vector<8x1xf32>
      tpu.vector_store %arg2[%c0_12, %c0_13], %16 {strides = array<i32>} : memref<8x1xf32, #tpu.memory_space<vmem>>, vector<8x1xf32>,
      %cst_14 = arith.constant 0.000000e+00 : f32
      %18 = vector.broadcast %cst_14 : f32 to vector<8x1xf32>
      %c0_15 = arith.constant 0 : index
      %c0_16 = arith.constant 0 : index
      %19 = vector.load %arg3[%c0_15, %c0_16] : memref<8x1xf32, #tpu.memory_space<vmem>>, vector<8x1xf32>
      tpu.vector_store %arg3[%c0_15, %c0_16], %18 {strides = array<i32>} : memref<8x1xf32, #tpu.memory_space<vmem>>, vector<8x1xf32>,
    } else {
    }
    %c0 = arith.constant 0 : index
    %c0_1 = arith.constant 0 : index
    %3 = vector.load %arg1[%c0, %c0_1] : memref<8x512xbf16, #tpu.memory_space<vmem>>, vector<8x512xbf16>
    %4 = arith.extf %3 : vector<8x512xbf16> to vector<8x512xf32>
    %c0_2 = arith.constant 0 : index
    %c0_3 = arith.constant 0 : index
    %5 = vector.load %arg2[%c0_2, %c0_3] : memref<8x1xf32, #tpu.memory_space<vmem>>, vector<8x1xf32>
    %cst = arith.constant dense<0.000000e+00> : vector<8xf32>
    %6 = vector.multi_reduction <add>, %4, %cst [1] : vector<8x512xf32> to vector<8xf32>
    %7 = vector.shape_cast %6 : vector<8xf32> to vector<8x1xf32>
    %8 = arith.addf %5, %7 : vector<8x1xf32>
    %c0_4 = arith.constant 0 : index
    %c0_5 = arith.constant 0 : index
    %9 = vector.load %arg2[%c0_4, %c0_5] : memref<8x1xf32, #tpu.memory_space<vmem>>, vector<8x1xf32>
    tpu.vector_store %arg2[%c0_4, %c0_5], %8 {strides = array<i32>} : memref<8x1xf32, #tpu.memory_space<vmem>>, vector<8x1xf32>,
    %c0_6 = arith.constant 0 : index
    %c0_7 = arith.constant 0 : index
    %10 = vector.load %arg3[%c0_6, %c0_7] : memref<8x1xf32, #tpu.memory_space<vmem>>, vector<8x1xf32>
    %11 = arith.mulf %4, %4 : vector<8x512xf32>
    %cst_8 = arith.constant dense<0.000000e+00> : vector<8xf32>
    %12 = vector.multi_reduction <add>, %11, %cst_8 [1] : vector<8x512xf32> to vector<8xf32>
    %13 = vector.shape_cast %12 : vector<8xf32> to vector<8x1xf32>
    %14 = arith.addf %10, %13 : vector<8x1xf32>
    %c0_9 = arith.constant 0 : index
    %c0_10 = arith.constant 0 : index
    %15 = vector.load %arg3[%c0_9, %c0_10] : memref<8x1xf32, #tpu.memory_space<vmem>>, vector<8x1xf32>
    tpu.vector_store %arg3[%c0_9, %c0_10], %14 {strides = array<i32>} : memref<8x1xf32, #tpu.memory_space<vmem>>, vector<8x1xf32>,
    return
  }
  func.func @transform_0(%arg0: i32) -> (i32, i32) {
    %c0_i32 = arith.constant 0 : i32
    %c0_i32_0 = arith.constant 0 : i32
    return %c0_i32, %arg0 : i32, i32
  }
  func.func @transform_1(%arg0: i32) -> (i32, i32) {
    %c0_i32 = arith.constant 0 : i32
    %c0_i32_0 = arith.constant 0 : i32
    %c0_i32_1 = arith.constant 0 : i32
    return %c0_i32, %c0_i32_0 : i32, i32
  }
  func.func @transform_2(%arg0: i32) -> (i32, i32) {
    %c0_i32 = arith.constant 0 : i32
    %c0_i32_0 = arith.constant 0 : i32
    %c0_i32_1 = arith.constant 0 : i32
    return %c0_i32, %c0_i32_0 : i32, i32
  }
}

module attributes {stable_mosaic.version = 11 : i64} {
  func.func @_bn_relu_matmul_kernel(%arg0: i32, %arg1: i32, %arg2: memref<16x8xbf16, #tpu.memory_space<vmem>>, %arg3: memref<8x512xbf16, #tpu.memory_space<vmem>>, %arg4: memref<8x1xf32, #tpu.memory_space<vmem>>, %arg5: memref<8x1xf32, #tpu.memory_space<vmem>>, %arg6: memref<16x512xbf16, #tpu.memory_space<vmem>>) attributes {dimension_semantics = [#tpu.dimension_semantics<parallel>, #tpu.dimension_semantics<parallel>], iteration_bounds = array<i64: 3, 4>, scalar_prefetch = 0 : i64, scratch_operands = 0 : i64, tpu.core_type = #tpu.core_type<tc>, window_params = [{transform_indices = @transform_0, window_bounds = array<i64: 16, 8>}, {transform_indices = @transform_1, window_bounds = array<i64: 8, 512>}, {pipeline_mode = #tpu.pipeline_mode<synchronous>, transform_indices = @transform_2, window_bounds = array<i64: 8, 1>}, {pipeline_mode = #tpu.pipeline_mode<synchronous>, transform_indices = @transform_3, window_bounds = array<i64: 8, 1>}, {transform_indices = @transform_4, window_bounds = array<i64: 16, 512>}]} {
    %c0 = arith.constant 0 : index
    %c0_0 = arith.constant 0 : index
    %0 = vector.load %arg3[%c0, %c0_0] : memref<8x512xbf16, #tpu.memory_space<vmem>>, vector<8x512xbf16>
    %1 = arith.extf %0 : vector<8x512xbf16> to vector<8x512xf32>
    %c0_1 = arith.constant 0 : index
    %c0_2 = arith.constant 0 : index
    %2 = vector.load %arg4[%c0_1, %c0_2] : memref<8x1xf32, #tpu.memory_space<vmem>>, vector<8x1xf32>
    %3 = vector.broadcast %2 : vector<8x1xf32> to vector<8x512xf32>
    %4 = arith.mulf %1, %3 : vector<8x512xf32>
    %c0_3 = arith.constant 0 : index
    %c0_4 = arith.constant 0 : index
    %5 = vector.load %arg5[%c0_3, %c0_4] : memref<8x1xf32, #tpu.memory_space<vmem>>, vector<8x1xf32>
    %6 = vector.broadcast %5 : vector<8x1xf32> to vector<8x512xf32>
    %7 = arith.addf %4, %6 : vector<8x512xf32>
    %cst = arith.constant 0.000000e+00 : f32
    %8 = vector.broadcast %cst : f32 to vector<8x512xf32>
    %9 = arith.maximumf %7, %8 : vector<8x512xf32>
    %10 = arith.truncf %9 : vector<8x512xf32> to vector<8x512xbf16>
    %c0_5 = arith.constant 0 : index
    %c0_6 = arith.constant 0 : index
    %11 = vector.load %arg2[%c0_5, %c0_6] : memref<16x8xbf16, #tpu.memory_space<vmem>>, vector<16x8xbf16>
    %cst_7 = arith.constant dense<0.000000e+00> : vector<16x512xf32>
    %12 = tpu.matmul %11, %10, %cst_7 {dimension_numbers = #tpu.dot_dimension_numbers<[1], [0], [0], [1], [0, 0, 1, 1], [], []>} : vector<16x8xbf16>, vector<8x512xbf16>, vector<16x512xf32> -> vector<16x512xf32>
    %13 = arith.truncf %12 : vector<16x512xf32> to vector<16x512xbf16>
    %c0_8 = arith.constant 0 : index
    %c0_9 = arith.constant 0 : index
    %14 = vector.load %arg6[%c0_8, %c0_9] : memref<16x512xbf16, #tpu.memory_space<vmem>>, vector<16x512xbf16>
    tpu.vector_store %arg6[%c0_8, %c0_9], %13 {strides = array<i32>} : memref<16x512xbf16, #tpu.memory_space<vmem>>, vector<16x512xbf16>,
    return
  }
  func.func @transform_0(%arg0: i32, %arg1: i32) -> (i32, i32) {
    %c0_i32 = arith.constant 0 : i32
    %c0_i32_0 = arith.constant 0 : i32
    return %arg0, %c0_i32 : i32, i32
  }
  func.func @transform_1(%arg0: i32, %arg1: i32) -> (i32, i32) {
    %c0_i32 = arith.constant 0 : i32
    %c0_i32_0 = arith.constant 0 : i32
    return %c0_i32, %arg1 : i32, i32
  }
  func.func @transform_2(%arg0: i32, %arg1: i32) -> (i32, i32) {
    %c0_i32 = arith.constant 0 : i32
    %c0_i32_0 = arith.constant 0 : i32
    %c0_i32_1 = arith.constant 0 : i32
    return %c0_i32, %c0_i32_0 : i32, i32
  }
  func.func @transform_3(%arg0: i32, %arg1: i32) -> (i32, i32) {
    %c0_i32 = arith.constant 0 : i32
    %c0_i32_0 = arith.constant 0 : i32
    %c0_i32_1 = arith.constant 0 : i32
    return %c0_i32, %c0_i32_0 : i32, i32
  }
  func.func @transform_4(%arg0: i32, %arg1: i32) -> (i32, i32) {
    %c0_i32 = arith.constant 0 : i32
    return %arg0, %arg1 : i32, i32
  }
}

module attributes {stable_mosaic.version = 11 : i64} {
  func.func @_bias_tanh_kernel(%arg0: i32, %arg1: memref<3x512xbf16, #tpu.memory_space<vmem>>, %arg2: memref<3x1xf32, #tpu.memory_space<vmem>>, %arg3: memref<3x512xf32, #tpu.memory_space<vmem>>) attributes {dimension_semantics = [#tpu.dimension_semantics<parallel>], iteration_bounds = array<i64: 16>, scalar_prefetch = 0 : i64, scratch_operands = 0 : i64, tpu.core_type = #tpu.core_type<tc>, window_params = [{transform_indices = @transform_0, window_bounds = array<i64: 3, 512>}, {pipeline_mode = #tpu.pipeline_mode<synchronous>, transform_indices = @transform_1, window_bounds = array<i64: 3, 1>}, {transform_indices = @transform_2, window_bounds = array<i64: 3, 512>}]} {
    %c0 = arith.constant 0 : index
    %c0_0 = arith.constant 0 : index
    %0 = vector.load %arg1[%c0, %c0_0] : memref<3x512xbf16, #tpu.memory_space<vmem>>, vector<3x512xbf16>
    %1 = arith.extf %0 : vector<3x512xbf16> to vector<3x512xf32>
    %c0_1 = arith.constant 0 : index
    %c0_2 = arith.constant 0 : index
    %2 = vector.load %arg2[%c0_1, %c0_2] : memref<3x1xf32, #tpu.memory_space<vmem>>, vector<3x1xf32>
    %3 = vector.broadcast %2 : vector<3x1xf32> to vector<3x512xf32>
    %4 = arith.addf %1, %3 : vector<3x512xf32>
    %5 = math.tanh %4 : vector<3x512xf32>
    %c0_3 = arith.constant 0 : index
    %c0_4 = arith.constant 0 : index
    %6 = vector.load %arg3[%c0_3, %c0_4] : memref<3x512xf32, #tpu.memory_space<vmem>>, vector<3x512xf32>
    tpu.vector_store %arg3[%c0_3, %c0_4], %5 {strides = array<i32>} : memref<3x512xf32, #tpu.memory_space<vmem>>, vector<3x512xf32>,
    return
  }
  func.func @transform_0(%arg0: i32) -> (i32, i32) {
    %c0_i32 = arith.constant 0 : i32
    %c0_i32_0 = arith.constant 0 : i32
    return %c0_i32, %arg0 : i32, i32
  }
  func.func @transform_1(%arg0: i32) -> (i32, i32) {
    %c0_i32 = arith.constant 0 : i32
    %c0_i32_0 = arith.constant 0 : i32
    %c0_i32_1 = arith.constant 0 : i32
    return %c0_i32, %c0_i32_0 : i32, i32
  }
  func.func @transform_2(%arg0: i32) -> (i32, i32) {
    %c0_i32 = arith.constant 0 : i32
    %c0_i32_0 = arith.constant 0 : i32
    return %c0_i32, %arg0 : i32, i32
  }
}

</mosaic_0001>

<bundles_post_ra>
// kernel: generator_forward.11
= control target key start
LH: loop header
LB: loop body
LE: loop exit
PB: predicated region body
PF: predicated region fallthrough
CT: control target
= control target key end

     0   :  { %vm14_vm0 = vcmask 7168   ;;  %vm55_vm1 = vcmask 261120   ;;  %v181_v2 = vmov 0.0   ;;  %s401_s0 = inlined_call_operand.vmem [shape: bf16[64,32], index: 0, kind: input, shape index: {}]   ;;  %s402_s1 = inlined_call_operand.vmem [shape: f32[64,1], index: 1, kind: output, shape index: {0}]   ;;  %s403_s2 = inlined_call_operand.vmem [shape: f32[64,1], index: 2, kind: output, shape index: {1}]  }
   0x1   :  { %v177_v0 = vld [vmem:[%s401_s0 + $0x8] sm:$0xff]   ;;  %v162_v1 = vld [vmem:[%s401_s0] sm:$0xff]   ;;  %17 = vst.msk [vmem:[%s402_s1 + $0x10] sm:$0xff] %vm14_vm0, %v181_v2  ;;  %15 = vst.msk [vmem:[%s402_s1] sm:$0xff] %vm14_vm0, %v181_v2 }
   0x2   :  { %16 = vst.msk [vmem:[%s402_s1 + $0x8] sm:$0xff] %vm14_vm0, %v181_v2  ;;  %18 = vst.msk [vmem:[%s402_s1 + $0x18] sm:$0xff] %vm14_vm0, %v181_v2  ;;  %v167_v3 = vunpack.c.l.bf16 %v177_v0  ;;  %v163_v4 = vunpack.c.l.bf16 %v162_v1  ;;  %v168_v5 = vunpack.c.h.bf16 %v177_v0  ;;  %v164_v6 = vunpack.c.h.bf16 %v162_v1  ;;  %v178_v7 = vld [vmem:[%s401_s0 + $0x10] sm:$0xff]   ;;  %v179_v14 = vld [vmem:[%s401_s0 + $0x18] sm:$0xff]  }
   0x3   :  { %19 = vst.msk [vmem:[%s402_s1 + $0x20] sm:$0xff] %vm14_vm0, %v181_v2  ;;  %20 = vst.msk [vmem:[%s402_s1 + $0x28] sm:$0xff] %vm14_vm0, %v181_v2  ;;  %v172_v12 = vunpack.c.h.bf16 %v178_v7  ;;  %v171_v13 = vunpack.c.l.bf16 %v178_v7  ;;  %v176_v17 = vunpack.c.h.bf16 %v179_v14  ;;  %v175_v18 = vunpack.c.l.bf16 %v179_v14 }
   0x4   :  { %21 = vst.msk [vmem:[%s402_s1 + $0x30] sm:$0xff] %vm14_vm0, %v181_v2  ;;  %22 = vst.msk [vmem:[%s402_s1 + $0x38] sm:$0xff] %vm14_vm0, %v181_v2  ;;  %v62_v8 = vsel %vm55_vm1, %v167_v3, 0.0  ;;  %v56_v9 = vsel %vm55_vm1, %v163_v4, 0.0  ;;  %v65_v10 = vsel %vm55_vm1, %v168_v5, 0.0  ;;  %v59_v11 = vsel %vm55_vm1, %v164_v6, 0.0 }
   0x5   :  { %63 = vadd.xlane.f32.xlu1 %v62_v8  ;;  %57 = vadd.xlane.f32.xlu0 %v56_v9  ;;  %v71_v15 = vsel %vm55_vm1, %v172_v12, 0.0  ;;  %v68_v16 = vsel %vm55_vm1, %v171_v13, 0.0  ;;  %v77_v19 = vsel %vm55_vm1, %v176_v17, 0.0  ;;  %v74_v20 = vsel %vm55_vm1, %v175_v18, 0.0  ;;  %24 = vst.msk [vmem:[%s403_s2 + $0x8] sm:$0xff] %vm14_vm0, %v181_v2  ;;  %23 = vst.msk [vmem:[%s403_s2] sm:$0xff] %vm14_vm0, %v181_v2 }
   0x6   :  { %v106_v21 = vmul.f32 %v164_v6, %v164_v6  ;;  %v105_v22 = vmul.f32 %v163_v4, %v163_v4  ;;  %v108_v25 = vmul.f32 %v168_v5, %v168_v5  ;;  %v107_v26 = vmul.f32 %v167_v3, %v167_v3  ;;  %25 = vst.msk [vmem:[%s403_s2 + $0x10] sm:$0xff] %vm14_vm0, %v181_v2 }
   0x7   :  { %v110_v29 = vmul.f32 %v172_v12, %v172_v12  ;;  %v109_v30 = vmul.f32 %v171_v13, %v171_v13  ;;  %v112_v33 = vmul.f32 %v176_v17, %v176_v17  ;;  %v111_v34 = vmul.f32 %v175_v18, %v175_v18  ;;  %26 = vst.msk [vmem:[%s403_s2 + $0x18] sm:$0xff] %vm14_vm0, %v181_v2 }
   0x8   :  { %v116_v23 = vsel %vm55_vm1, %v106_v21, 0.0  ;;  %v113_v24 = vsel %vm55_vm1, %v105_v22, 0.0  ;;  %v122_v27 = vsel %vm55_vm1, %v108_v25, 0.0  ;;  %v119_v28 = vsel %vm55_vm1, %v107_v26, 0.0  ;;  %27 = vst.msk [vmem:[%s403_s2 + $0x20] sm:$0xff] %vm14_vm0, %v181_v2  ;;  %28 = vst.msk [vmem:[%s403_s2 + $0x28] sm:$0xff] %vm14_vm0, %v181_v2 }
   0x9   :  { %66 = vadd.xlane.f32.xlu1 %v65_v10  ;;  %60 = vadd.xlane.f32.xlu0 %v59_v11  ;;  %v128_v31 = vsel %vm55_vm1, %v110_v29, 0.0  ;;  %v125_v32 = vsel %vm55_vm1, %v109_v30, 0.0  ;;  %29 = vst.msk [vmem:[%s403_s2 + $0x30] sm:$0xff] %vm14_vm0, %v181_v2  ;;  %30 = vst.msk [vmem:[%s403_s2 + $0x38] sm:$0xff] %vm14_vm0, %v181_v2  ;;  %v134_v35 = vsel %vm55_vm1, %v112_v33, 0.0  ;;  %v131_v36 = vsel %vm55_vm1, %v111_v34, 0.0 }
   0xa   :  { %v49_v37 = vld [vmem:[%s402_s1 + $0x10] sm:$0xff]  ;;  %v47_v38 = vld [vmem:[%s402_s1] sm:$0xff]  ;;  %v50_v43 = vld [vmem:[%s402_s1 + $0x18] sm:$0xff] }
   0xb   :  { %v48_v44 = vld [vmem:[%s402_s1 + $0x8] sm:$0xff]  ;;  %v51_v50 = vld [vmem:[%s402_s1 + $0x20] sm:$0xff]  ;;  %v54_v55 = vld [vmem:[%s402_s1 + $0x38] sm:$0xff] }
   0xc   :  { %v52_v49 = vld [vmem:[%s402_s1 + $0x28] sm:$0xff]  ;;  %v53_v56 = vld [vmem:[%s402_s1 + $0x30] sm:$0xff]  ;;  %v97_v62 = vld [vmem:[%s403_s2] sm:$0xff] }
   0xd   :  { %72 = vadd.xlane.f32.xlu1 %v71_v15  ;;  %69 = vadd.xlane.f32.xlu0 %v68_v16  ;;  %v98_v61 = vld [vmem:[%s403_s2 + $0x8] sm:$0xff]  ;;  %v99_v4 = vld [vmem:[%s403_s2 + $0x10] sm:$0xff] }
   0xe   :  { %v100_v3 = vld [vmem:[%s403_s2 + $0x18] sm:$0xff] }
   0xf   :  { %v102_v9 = vld [vmem:[%s403_s2 + $0x28] sm:$0xff]  ;;  %v101_v10 = vld [vmem:[%s403_s2 + $0x20] sm:$0xff] }
  0x10   :  { %v104_v15 = vld [vmem:[%s403_s2 + $0x38] sm:$0xff]  ;;  %v103_v16 = vld [vmem:[%s403_s2 + $0x30] sm:$0xff] }
  0x11   :  { %78 = vadd.xlane.f32.xlu1 %v77_v19  ;;  %75 = vadd.xlane.f32.xlu0 %v74_v20 }
  0x15   :  { %117 = vadd.xlane.f32.xlu1 %v116_v23  ;;  %114 = vadd.xlane.f32.xlu0 %v113_v24 }
  0x19   :  { %123 = vadd.xlane.f32.xlu1 %v122_v27  ;;  %120 = vadd.xlane.f32.xlu0 %v119_v28 }
  0x1d   :  { %129 = vadd.xlane.f32.xlu1 %v128_v31  ;;  %126 = vadd.xlane.f32.xlu0 %v125_v32 }
  0x21   :  { %135 = vadd.xlane.f32.xlu1 %v134_v35  ;;  %132 = vadd.xlane.f32.xlu0 %v131_v36 }
  0x92   :  { %v64_v39 = vpop.xlane.xlu1 %63  ;;  %v58_v40 = vpop.xlane.xlu0 %57 }
  0x93   :  { %v82_v41 = vadd.f32 %v64_v39, %v49_v37  ;;  %v80_v42 = vadd.f32 %v58_v40, %v47_v38 }
  0x95   :  { %91 = vst.msk [vmem:[%s402_s1 + $0x10] sm:$0xff] %vm14_vm0, %v82_v41  ;;  %89 = vst.msk [vmem:[%s402_s1] sm:$0xff] %vm14_vm0, %v80_v42 }
  0x96   :  { %v67_v45 = vpop.xlane.xlu1 %66  ;;  %v61_v46 = vpop.xlane.xlu0 %60 }
  0x97   :  { %v83_v47 = vadd.f32 %v67_v45, %v50_v43  ;;  %v81_v48 = vadd.f32 %v61_v46, %v48_v44 }
  0x99   :  { %92 = vst.msk [vmem:[%s402_s1 + $0x18] sm:$0xff] %vm14_vm0, %v83_v47  ;;  %90 = vst.msk [vmem:[%s402_s1 + $0x8] sm:$0xff] %vm14_vm0, %v81_v48 }
  0x9a   :  { %v73_v51 = vpop.xlane.xlu1 %72  ;;  %v70_v52 = vpop.xlane.xlu0 %69 }
  0x9b   :  { %v85_v53 = vadd.f32 %v73_v51, %v52_v49  ;;  %v84_v54 = vadd.f32 %v70_v52, %v51_v50 }
  0x9d   :  { %94 = vst.msk [vmem:[%s402_s1 + $0x28] sm:$0xff] %vm14_vm0, %v85_v53  ;;  %93 = vst.msk [vmem:[%s402_s1 + $0x20] sm:$0xff] %vm14_vm0, %v84_v54 }
  0x9e   :  { %v79_v57 = vpop.xlane.xlu1 %78  ;;  %v76_v58 = vpop.xlane.xlu0 %75 }
  0x9f   :  { %v87_v59 = vadd.f32 %v79_v57, %v54_v55  ;;  %v86_v60 = vadd.f32 %v76_v58, %v53_v56 }
  0xa1   :  { %96 = vst.msk [vmem:[%s402_s1 + $0x38] sm:$0xff] %vm14_vm0, %v87_v59  ;;  %95 = vst.msk [vmem:[%s402_s1 + $0x30] sm:$0xff] %vm14_vm0, %v86_v60 }
  0xa2   :  { %v118_v63 = vpop.xlane.xlu1 %117  ;;  %v115_v0 = vpop.xlane.xlu0 %114 }
  0xa3   :  { %v138_v1 = vadd.f32 %v118_v63, %v98_v61  ;;  %v137_v2 = vadd.f32 %v115_v0, %v97_v62 }
  0xa5   :  { %146 = vst.msk [vmem:[%s403_s2 + $0x8] sm:$0xff] %vm14_vm0, %v138_v1  ;;  %145 = vst.msk [vmem:[%s403_s2] sm:$0xff] %vm14_vm0, %v137_v2 }
  0xa6   :  { %v124_v5 = vpop.xlane.xlu1 %123  ;;  %v121_v6 = vpop.xlane.xlu0 %120 }
  0xa7   :  { %v140_v7 = vadd.f32 %v124_v5, %v100_v3  ;;  %v139_v8 = vadd.f32 %v121_v6, %v99_v4 }
  0xa9   :  { %148 = vst.msk [vmem:[%s403_s2 + $0x18] sm:$0xff] %vm14_vm0, %v140_v7  ;;  %147 = vst.msk [vmem:[%s403_s2 + $0x10] sm:$0xff] %vm14_vm0, %v139_v8 }
  0xaa   :  { %v130_v11 = vpop.xlane.xlu1 %129  ;;  %v127_v12 = vpop.xlane.xlu0 %126 }
  0xab   :  { %v142_v13 = vadd.f32 %v130_v11, %v102_v9  ;;  %v141_v14 = vadd.f32 %v127_v12, %v101_v10 }
  0xad   :  { %150 = vst.msk [vmem:[%s403_s2 + $0x28] sm:$0xff] %vm14_vm0, %v142_v13  ;;  %149 = vst.msk [vmem:[%s403_s2 + $0x20] sm:$0xff] %vm14_vm0, %v141_v14 }
  0xae   :  { %v136_v17 = vpop.xlane.xlu1 %135  ;;  %v133_v18 = vpop.xlane.xlu0 %132 }
  0xaf   :  { %v144_v19 = vadd.f32 %v136_v17, %v104_v15  ;;  %v143_v20 = vadd.f32 %v133_v18, %v103_v16 }
  0xb1   :  { %152 = vst.msk [vmem:[%s403_s2 + $0x38] sm:$0xff] %vm14_vm0, %v144_v19  ;;  %151 = vst.msk [vmem:[%s403_s2 + $0x30] sm:$0xff] %vm14_vm0, %v143_v20 }

// kernel: generator_forward.12
= control target key start
LH: loop header
LB: loop body
LE: loop exit
PB: predicated region body
PF: predicated region fallthrough
CT: control target
= control target key end

     0   :  { %s1240_s15 = smov 0   ;;  %s1242_s16 = smov 0   ;;  %s1443_s0 = inlined_call_operand.vmem [shape: bf16[512,64], index: 0, kind: input, shape index: {}]   ;;  %s1444_s1 = inlined_call_operand.vmem [shape: bf16[64,32], index: 1, kind: input, shape index: {}]   ;;  %s1445_s2 = inlined_call_operand.vmem [shape: f32[64,1], index: 2, kind: input, shape index: {}]   ;;  %s1446_s3 = inlined_call_operand.vmem [shape: f32[64,1], index: 3, kind: input, shape index: {}]   ;;  %s1447_s4 = inlined_call_operand.vmem [shape: bf16[512,32], index: 4, kind: output, shape index: {}]  }
   0x1   :  { %s1244_s17 = smov 0  }
   0x2 LB: > { %s26_s18 = sadd.s32 1, %s1208_s16  ;;  %p957_p0 = scmp.ge.s32.totalorder %s1212_s17, 1  ;;  %s1212_s17 = sphi %s1244_s17, %s14_s17   ;;  %s1208_s16 = sphi %s1242_s16, %s1449_s16   ;;  %s1204_s15 = sphi %s1240_s15, %s1448_s15  }
   0x3   : > { %p28_p1 = scmp.ge.s32.totalorder %s26_s18, 2  ;;  %p186_p2 = scmp.lt.s32.totalorder %s1212_s17, 3 }
   0x5   : > { %s1451_s18 = smov (%p28_p1, %s26_s18), 0  ;;  %p187_p3 = pnand %p957_p0, %p186_p2 }
   0x6   : > { %v311_v0 = vld [vmem:[%s1446_s3] sm:$0xff] (!%p187_p3)  ;;  %v1214_v2 = vmov (!%p187_p3), 0   ;;  %v312_v3 = vld [vmem:[%s1446_s3 + $0x8] sm:$0xff] (!%p187_p3)  ;;  %v258_v5 = vld [vmem:[%s1445_s2 + $0x18] sm:$0xff] (!%p187_p3)  ;;  %s958_s29 = sshll.u32 (!%p187_p3), %s1204_s15, 5  ;;  %vm491_vm0 = vcmask (!%p187_p3), 523264  }
   0x7   : > { %190 = sbr.rel (%p187_p3) target bundleno = 416 (0x1a0), region = 36  ;;  %v255_v1 = vld [vmem:[%s1445_s2] sm:$0xff] (!%p187_p3)  ;;  %1173 = vset.pattern.permute.xlu1 (!%p187_p3), %v1214_v2  ;;  %1172 = vset.pattern.permute.xlu0 (!%p187_p3), %v1214_v2  ;;  %v256_v4 = vld [vmem:[%s1445_s2 + $0x8] sm:$0xff] (!%p187_p3)  ;;  %v257_v6 = vld [vmem:[%s1445_s2 + $0x10] sm:$0xff] (!%p187_p3)  ;;  %p220_p4 = scmp.lt.s32.totalorder (!%p187_p3), %s958_s29, 63  ;;  %vm829_vm1 = vcmask (!%p187_p3), 257024  }
   0x8   : > { %321 = vperm.xlu1 (!%p187_p3), %1173, %v311_v0   ;;  %265 = vperm.xlu0 (!%p187_p3), %1172, %v255_v1   ;;  %v314_v7 = vld [vmem:[%s1446_s3 + $0x18] sm:$0xff] (!%p187_p3)  ;;  %v313_v8 = vld [vmem:[%s1446_s3 + $0x10] sm:$0xff] (!%p187_p3)  ;;  %v260_v9 = vld [vmem:[%s1445_s2 + $0x28] sm:$0xff] (!%p187_p3) }
   0x9   : > { %v259_v10 = vld [vmem:[%s1445_s2 + $0x20] sm:$0xff] (!%p187_p3)  ;;  %v316_v11 = vld [vmem:[%s1446_s3 + $0x28] sm:$0xff] (!%p187_p3)  ;;  %v262_v13 = vld [vmem:[%s1445_s2 + $0x38] sm:$0xff] (!%p187_p3) }
   0xa   : > { %v315_v12 = vld [vmem:[%s1446_s3 + $0x20] sm:$0xff] (!%p187_p3)  ;;  %v261_v14 = vld [vmem:[%s1445_s2 + $0x30] sm:$0xff] (!%p187_p3)  ;;  %v318_v15 = vld [vmem:[%s1446_s3 + $0x38] sm:$0xff] (!%p187_p3) }
   0xb   : > { %v317_v16 = vld [vmem:[%s1446_s3 + $0x30] sm:$0xff] (!%p187_p3)  ;;  %v1061_v19 = vld [vmem:[%s1444_s1] sm:$0xff] (!%p187_p3)   ;;  %v1076_v27 = vld [vmem:[%s1444_s1 + $0x8] sm:$0xff] (!%p187_p3)  }
   0xc   : > { %326 = vperm.xlu1 (!%p187_p3), %1173, %v312_v3   ;;  %270 = vperm.xlu0 (!%p187_p3), %1172, %v256_v4   ;;  %v1062_v20 = vunpack.c.l.bf16 (!%p187_p3), %v1061_v19  ;;  %v1063_v24 = vunpack.c.h.bf16 (!%p187_p3), %v1061_v19  ;;  %v1067_v31 = vunpack.c.h.bf16 (!%p187_p3), %v1076_v27  ;;  %v1066_v32 = vunpack.c.l.bf16 (!%p187_p3), %v1076_v27  ;;  %v1077_v42 = vld [vmem:[%s1444_s1 + $0x10] sm:$0xff] (!%p187_p3)   ;;  %v1078_v56 = vld [vmem:[%s1444_s1 + $0x18] sm:$0xff] (!%p187_p3)  }
   0xd   : > { %v1071_v47 = vunpack.c.h.bf16 (!%p187_p3), %v1077_v42  ;;  %v1070_v48 = vunpack.c.l.bf16 (!%p187_p3), %v1077_v42  ;;  %v1075_v61 = vunpack.c.h.bf16 (!%p187_p3), %v1078_v56  ;;  %v1074_v62 = vunpack.c.l.bf16 (!%p187_p3), %v1078_v56 }
   0xe   : > { %s1453_s29 = smov (!%p220_p4, %s958_s29), 63 }
   0xf   : > { %s959_s30 = sshll.u32 %s1453_s29, 2 }
  0x10   : > { %280 = vperm.xlu1 %1173, %v258_v5   ;;  %275 = vperm.xlu0 %1172, %v257_v6   ;;  %s1317_s7 = scalar_lea.vmem %s1443_s0, %s959_s30  ;;  %s1368_s21 = scalar_lea.vmem %s1447_s4, %s959_s30 }
  0x11   : > { %v1174_v17 = vld [vmem:[%s1317_s7] sm:$0xff]   ;;  %v1184_v19 = vld [vmem:[%s1317_s7 + $0x28] sm:$0xff]  }
  0x12   : > { %v1175_v18 = vld [vmem:[%s1317_s7 + $0x40] sm:$0xff]   ;;  %1107 = vmatprep.mubr.msk.bf16.mxu0 %vm491_vm0, %v1174_v17 }
  0x13   : > { %1123 = vmatprep.mubr.msk.bf16.mxu1 %vm491_vm0, %v1175_v18  ;;  %v1182_v17 = vld [vmem:[%s1317_s7 + $0x20] sm:$0xff]  }
  0x14   : > { %336 = vperm.xlu1 %1173, %v314_v7   ;;  %331 = vperm.xlu0 %1172, %v313_v8   ;;  %v1183_v18 = vld [vmem:[%s1317_s7 + $0x60] sm:$0xff]  }
  0x18   : > { %290 = vperm.xlu1 %1173, %v260_v9   ;;  %285 = vperm.xlu0 %1172, %v259_v10  }
  0x1c   : > { %346 = vperm.xlu1 %1173, %v316_v11   ;;  %341 = vperm.xlu0 %1172, %v315_v12   ;;  %v1176_v11 = vld [vmem:[%s1317_s7 + $0x8] sm:$0xff]  }
  0x1d   : > { %v1177_v12 = vld [vmem:[%s1317_s7 + $0x48] sm:$0xff]  }
  0x20   : > { %300 = vperm.xlu1 %1173, %v262_v13   ;;  %295 = vperm.xlu0 %1172, %v261_v14   ;;  %v1178_v13 = vld [vmem:[%s1317_s7 + $0x10] sm:$0xff]  }
  0x21   : > { %v1179_v14 = vld [vmem:[%s1317_s7 + $0x50] sm:$0xff]  }
  0x24   : > { %356 = vperm.xlu1 %1173, %v318_v15   ;;  %351 = vperm.xlu0 %1172, %v317_v16   ;;  %v1180_v15 = vld [vmem:[%s1317_s7 + $0x18] sm:$0xff]  }
  0x25   : > { %v1181_v16 = vld [vmem:[%s1317_s7 + $0x58] sm:$0xff]  }
  0x87   : > { %v322_v21 = vpop.permute.xlu1 %321  ;;  %v266_v22 = vpop.permute.xlu0 %265 }
  0x88   : > { %v303_v23 = vmul.f32 %v1062_v20, %v266_v22  ;;  %v1185_v20 = vld [vmem:[%s1317_s7 + $0x68] sm:$0xff]   ;;  %v1187_v22 = vld [vmem:[%s1317_s7 + $0x70] sm:$0xff]  }
  0x8a   : > { %v359_v28 = vadd.f32 %v322_v21, %v303_v23  ;;  %v1186_v21 = vld [vmem:[%s1317_s7 + $0x30] sm:$0xff]   ;;  %v1188_v23 = vld [vmem:[%s1317_s7 + $0x38] sm:$0xff]  }
  0x8b   : > { %v327_v25 = vpop.permute.xlu1 %326  ;;  %v271_v26 = vpop.permute.xlu0 %270 }
  0x8c   : > { %v304_v29 = vmul.f32 %v1063_v24, %v271_v26  ;;  %v367_v35 = vmax.f32 %v359_v28, 0.0  ;;  %v1189_v24 = vld [vmem:[%s1317_s7 + $0x78] sm:$0xff]  }
  0x8e   : > { %v360_v30 = vadd.f32 %v327_v25, %v304_v29 }
  0x8f   : > { %v281_v33 = vpop.permute.xlu1 %280  ;;  %v276_v34 = vpop.permute.xlu0 %275 }
  0x90   : > { %v368_v36 = vmax.f32 %v360_v30, 0.0  ;;  %v306_v38 = vmul.f32 %v1067_v31, %v281_v33  ;;  %v305_v39 = vmul.f32 %v1066_v32, %v276_v34 }
  0x92   : > { %v375_v37 = vpack.c.bf16 %v368_v36, %v367_v35 }
  0x93   : > { %v337_v40 = vpop.permute.xlu1 %336  ;;  %v332_v41 = vpop.permute.xlu0 %331 }
  0x94   : > { %v362_v43 = vadd.f32 %v337_v40, %v306_v38  ;;  %v361_v44 = vadd.f32 %v332_v41, %v305_v39  ;;  %1099 = vmatprep.subr.bf16.mxu0 %v375_v37  ;;  %1139 = vmatprep.subr.bf16.mxu1 %v375_v37 }
  0x95   : > { %1100 = vmatpush3.bf16.msra.mxu0 %v375_v37  ;;  %1143 = vmatpush3.bf16.msra.mxu1 %v375_v37 }
  0x96   : > { %v370_v45 = vmax.f32 %v362_v43, 0.0  ;;  %v369_v46 = vmax.f32 %v361_v44, 0.0 }
  0x97   : > { %v291_v49 = vpop.permute.xlu1 %290  ;;  %v286_v50 = vpop.permute.xlu0 %285 }
  0x98   : > { %v376_v51 = vpack.c.bf16 %v370_v45, %v369_v46  ;;  %v308_v52 = vmul.f32 %v1071_v47, %v291_v49  ;;  %v307_v53 = vmul.f32 %v1070_v48, %v286_v50 }
  0x9a   : > { %1101 = vmatprep.subr.bf16.mxu0 %v376_v51  ;;  %1140 = vmatprep.subr.bf16.mxu1 %v376_v51 }
  0x9b   : > { %v347_v54 = vpop.permute.xlu1 %346  ;;  %v342_v55 = vpop.permute.xlu0 %341  ;;  %1102 = vmatpush3.bf16.msra.mxu0 %v376_v51  ;;  %1144 = vmatpush3.bf16.msra.mxu1 %v376_v51 }
  0x9c   : > { %v364_v57 = vadd.f32 %v347_v54, %v308_v52  ;;  %v363_v58 = vadd.f32 %v342_v55, %v307_v53 }
  0x9e   : > { %v372_v59 = vmax.f32 %v364_v57, 0.0  ;;  %v371_v60 = vmax.f32 %v363_v58, 0.0 }
  0x9f   : > { %v301_v63 = vpop.permute.xlu1 %300  ;;  %v296_v0 = vpop.permute.xlu0 %295 }
  0xa0   : > { %v377_v1 = vpack.c.bf16 %v372_v59, %v371_v60  ;;  %v310_v2 = vmul.f32 %v1075_v61, %v301_v63  ;;  %v309_v3 = vmul.f32 %v1074_v62, %v296_v0 }
  0xa2   : > { %1103 = vmatprep.subr.bf16.mxu0 %v377_v1  ;;  %1141 = vmatprep.subr.bf16.mxu1 %v377_v1 }
  0xa3   : > { %v357_v4 = vpop.permute.xlu1 %356  ;;  %v352_v5 = vpop.permute.xlu0 %351  ;;  %1104 = vmatpush3.bf16.msra.mxu0 %v377_v1  ;;  %1145 = vmatpush3.bf16.msra.mxu1 %v377_v1 }
  0xa4   : > { %v366_v6 = vadd.f32 %v357_v4, %v310_v2  ;;  %v365_v7 = vadd.f32 %v352_v5, %v309_v3 }
  0xa6   : > { %v374_v8 = vmax.f32 %v366_v6, 0.0  ;;  %v373_v9 = vmax.f32 %v365_v7, 0.0 }
  0xa8   : > { %v378_v10 = vpack.c.bf16 %v374_v8, %v373_v9 }
  0xaa   : > { %1105 = vmatprep.subr.bf16.mxu0 %v378_v10  ;;  %1142 = vmatprep.subr.bf16.mxu1 %v378_v10 }
  0xab   : > { %1106 = vmatpush3.bf16.msra.mxu0 %v378_v10  ;;  %1146 = vmatpush3.bf16.msra.mxu1 %v378_v10 }
  0xae   : > { %1108 = vmatmul.mubr.msk.bf16.vlgmr.msra.gmra.mrb[0].mxu0 %vm491_vm0, %v1176_v11  ;;  %1124 = vmatmul.mubr.msk.bf16.vlgmr.msra.gmra.mrb[0].mxu1 %vm491_vm0, %v1177_v12 }
  0xaf   : > { %1111 = vmatprep.mubr.msk.bf16.mxu0 %vm491_vm0, %v1178_v13  ;;  %1127 = vmatprep.mubr.msk.bf16.mxu1 %vm491_vm0, %v1179_v14 }
  0xb6   : > { %1112 = vmatmul.mubr.msk.bf16.gmra.mrb[4].mxu0 %vm491_vm0, %v1180_v15  ;;  %1128 = vmatmul.mubr.msk.bf16.gmra.mrb[4].mxu1 %vm491_vm0, %v1181_v16 }
  0xb7   : > { %1115 = vmatprep.mubr.msk.bf16.mxu0 %vm491_vm0, %v1182_v17  ;;  %1131 = vmatprep.mubr.msk.bf16.mxu1 %vm491_vm0, %v1183_v18 }
  0xbe   : > { %1116 = vmatmul.mubr.msk.bf16.gmra.mrb[8].mxu0 %vm491_vm0, %v1184_v19  ;;  %1132 = vmatmul.mubr.msk.bf16.gmra.mrb[8].mxu1 %vm491_vm0, %v1185_v20 }
  0xbf   : > { %1119 = vmatprep.mubr.msk.bf16.mxu0 %vm491_vm0, %v1186_v21  ;;  %1135 = vmatprep.mubr.msk.bf16.mxu1 %vm491_vm0, %v1187_v22 }
  0xc6   : > { %1120 = vmatmul.mubr.msk.bf16.gmra.mrb[12].mxu0 %vm491_vm0, %v1188_v23  ;;  %1136 = vmatmul.mubr.msk.bf16.gmra.mrb[12].mxu1 %vm491_vm0, %v1189_v24 }
 0x181   : > { %v1109_v25 = vpop.f32.mrb[0].mxu0  ;;  %v1125_v26 = vpop.f32.mrb[0].mxu1 }
 0x182   : > { %v1030_v27 = vpack.c.bf16 %v1109_v25, %v1109_v25  ;;  %v1046_v28 = vpack.c.bf16 %v1125_v26, %v1125_v26  ;;  %v574_v29 = vpop.f32.mrb[1].mxu0  ;;  %v638_v30 = vpop.f32.mrb[1].mxu1 }
 0x183   : > { %v1028_v31 = vpack.c.bf16 %v574_v29, %v574_v29  ;;  %v1044_v32 = vpack.c.bf16 %v638_v30, %v638_v30  ;;  %v1110_v33 = vpop.f32.mrb[2].mxu0  ;;  %v1126_v34 = vpop.f32.mrb[2].mxu1 }
 0x184   : > { %832 = vst.msk [vmem:[%s1368_s21 + $0x8] sm:$0xf] %vm829_vm1, %v1030_v27  ;;  %848 = vst.msk [vmem:[%s1368_s21 + $0x48] sm:$0xf] %vm829_vm1, %v1046_v28  ;;  %v1031_v35 = vpack.c.bf16 %v1110_v33, %v1110_v33  ;;  %v1047_v36 = vpack.c.bf16 %v1126_v34, %v1126_v34  ;;  %v577_v37 = vpop.f32.mrb[3].mxu0  ;;  %v641_v38 = vpop.f32.mrb[3].mxu1 }
 0x185   : > { %830 = vst.msk [vmem:[%s1368_s21] sm:$0xf] %vm829_vm1, %v1028_v31  ;;  %846 = vst.msk [vmem:[%s1368_s21 + $0x40] sm:$0xf] %vm829_vm1, %v1044_v32  ;;  %v1029_v39 = vpack.c.bf16 %v577_v37, %v577_v37  ;;  %v1045_v40 = vpack.c.bf16 %v641_v38, %v641_v38 }
 0x186   : > { %833 = vst.msk [vmem:[%s1368_s21 + $0xc] sm:$0xf] %vm829_vm1, %v1031_v35  ;;  %849 = vst.msk [vmem:[%s1368_s21 + $0x4c] sm:$0xf] %vm829_vm1, %v1047_v36 }
 0x187   : > { %831 = vst.msk [vmem:[%s1368_s21 + $0x4] sm:$0xf] %vm829_vm1, %v1029_v39  ;;  %847 = vst.msk [vmem:[%s1368_s21 + $0x44] sm:$0xf] %vm829_vm1, %v1045_v40 }
 0x189   : > { %v1113_v41 = vpop.f32.mrb[4].mxu0  ;;  %v1129_v42 = vpop.f32.mrb[4].mxu1 }
 0x18a   : > { %v1034_v43 = vpack.c.bf16 %v1113_v41, %v1113_v41  ;;  %v1050_v44 = vpack.c.bf16 %v1129_v42, %v1129_v42  ;;  %v590_v45 = vpop.f32.mrb[5].mxu0  ;;  %v654_v46 = vpop.f32.mrb[5].mxu1 }
 0x18b   : > { %v1032_v47 = vpack.c.bf16 %v590_v45, %v590_v45  ;;  %v1048_v48 = vpack.c.bf16 %v654_v46, %v654_v46  ;;  %v1114_v49 = vpop.f32.mrb[6].mxu0  ;;  %v1130_v50 = vpop.f32.mrb[6].mxu1 }
 0x18c   : > { %836 = vst.msk [vmem:[%s1368_s21 + $0x18] sm:$0xf] %vm829_vm1, %v1034_v43  ;;  %852 = vst.msk [vmem:[%s1368_s21 + $0x58] sm:$0xf] %vm829_vm1, %v1050_v44  ;;  %v1035_v51 = vpack.c.bf16 %v1114_v49, %v1114_v49  ;;  %v1051_v52 = vpack.c.bf16 %v1130_v50, %v1130_v50  ;;  %v593_v53 = vpop.f32.mrb[7].mxu0  ;;  %v657_v54 = vpop.f32.mrb[7].mxu1 }
 0x18d   : > { %834 = vst.msk [vmem:[%s1368_s21 + $0x10] sm:$0xf] %vm829_vm1, %v1032_v47  ;;  %850 = vst.msk [vmem:[%s1368_s21 + $0x50] sm:$0xf] %vm829_vm1, %v1048_v48  ;;  %v1033_v55 = vpack.c.bf16 %v593_v53, %v593_v53  ;;  %v1049_v56 = vpack.c.bf16 %v657_v54, %v657_v54 }
 0x18e   : > { %837 = vst.msk [vmem:[%s1368_s21 + $0x1c] sm:$0xf] %vm829_vm1, %v1035_v51  ;;  %853 = vst.msk [vmem:[%s1368_s21 + $0x5c] sm:$0xf] %vm829_vm1, %v1051_v52 }
 0x18f   : > { %835 = vst.msk [vmem:[%s1368_s21 + $0x14] sm:$0xf] %vm829_vm1, %v1033_v55  ;;  %851 = vst.msk [vmem:[%s1368_s21 + $0x54] sm:$0xf] %vm829_vm1, %v1049_v56 }
 0x191   : > { %v1117_v57 = vpop.f32.mrb[8].mxu0  ;;  %v1133_v58 = vpop.f32.mrb[8].mxu1 }
 0x192   : > { %v1038_v59 = vpack.c.bf16 %v1117_v57, %v1117_v57  ;;  %v1054_v60 = vpack.c.bf16 %v1133_v58, %v1133_v58  ;;  %v606_v61 = vpop.f32.mrb[9].mxu0  ;;  %v670_v62 = vpop.f32.mrb[9].mxu1 }
 0x193   : > { %v1036_v63 = vpack.c.bf16 %v606_v61, %v606_v61  ;;  %v1052_v0 = vpack.c.bf16 %v670_v62, %v670_v62  ;;  %v1118_v1 = vpop.f32.mrb[10].mxu0  ;;  %v1134_v2 = vpop.f32.mrb[10].mxu1 }
 0x194   : > { %840 = vst.msk [vmem:[%s1368_s21 + $0x28] sm:$0xf] %vm829_vm1, %v1038_v59  ;;  %856 = vst.msk [vmem:[%s1368_s21 + $0x68] sm:$0xf] %vm829_vm1, %v1054_v60  ;;  %v1039_v3 = vpack.c.bf16 %v1118_v1, %v1118_v1  ;;  %v1055_v4 = vpack.c.bf16 %v1134_v2, %v1134_v2  ;;  %v609_v5 = vpop.f32.mrb[11].mxu0  ;;  %v673_v6 = vpop.f32.mrb[11].mxu1 }
 0x195   : > { %838 = vst.msk [vmem:[%s1368_s21 + $0x20] sm:$0xf] %vm829_vm1, %v1036_v63  ;;  %854 = vst.msk [vmem:[%s1368_s21 + $0x60] sm:$0xf] %vm829_vm1, %v1052_v0  ;;  %v1037_v7 = vpack.c.bf16 %v609_v5, %v609_v5  ;;  %v1053_v8 = vpack.c.bf16 %v673_v6, %v673_v6 }
 0x196   : > { %841 = vst.msk [vmem:[%s1368_s21 + $0x2c] sm:$0xf] %vm829_vm1, %v1039_v3  ;;  %857 = vst.msk [vmem:[%s1368_s21 + $0x6c] sm:$0xf] %vm829_vm1, %v1055_v4 }
 0x197   : > { %839 = vst.msk [vmem:[%s1368_s21 + $0x24] sm:$0xf] %vm829_vm1, %v1037_v7  ;;  %855 = vst.msk [vmem:[%s1368_s21 + $0x64] sm:$0xf] %vm829_vm1, %v1053_v8 }
 0x199   : > { %v1121_v9 = vpop.f32.mrb[12].mxu0  ;;  %v1137_v10 = vpop.f32.mrb[12].mxu1 }
 0x19a   : > { %v1042_v11 = vpack.c.bf16 %v1121_v9, %v1121_v9  ;;  %v1058_v12 = vpack.c.bf16 %v1137_v10, %v1137_v10  ;;  %v622_v13 = vpop.f32.mrb[13].mxu0  ;;  %v686_v14 = vpop.f32.mrb[13].mxu1 }
 0x19b   : > { %v1040_v15 = vpack.c.bf16 %v622_v13, %v622_v13  ;;  %v1056_v16 = vpack.c.bf16 %v686_v14, %v686_v14  ;;  %v1122_v17 = vpop.f32.mrb[14].mxu0  ;;  %v1138_v18 = vpop.f32.mrb[14].mxu1 }
 0x19c   : > { %844 = vst.msk [vmem:[%s1368_s21 + $0x38] sm:$0xf] %vm829_vm1, %v1042_v11  ;;  %860 = vst.msk [vmem:[%s1368_s21 + $0x78] sm:$0xf] %vm829_vm1, %v1058_v12  ;;  %v1043_v19 = vpack.c.bf16 %v1122_v17, %v1122_v17  ;;  %v1059_v20 = vpack.c.bf16 %v1138_v18, %v1138_v18  ;;  %v625_v21 = vpop.f32.mrb[15].mxu0  ;;  %v689_v22 = vpop.f32.mrb[15].mxu1 }
 0x19d   : > { %842 = vst.msk [vmem:[%s1368_s21 + $0x30] sm:$0xf] %vm829_vm1, %v1040_v15  ;;  %858 = vst.msk [vmem:[%s1368_s21 + $0x70] sm:$0xf] %vm829_vm1, %v1056_v16  ;;  %v1041_v23 = vpack.c.bf16 %v625_v21, %v625_v21  ;;  %v1057_v24 = vpack.c.bf16 %v689_v22, %v689_v22 }
 0x19e   : > { %845 = vst.msk [vmem:[%s1368_s21 + $0x3c] sm:$0xf] %vm829_vm1, %v1043_v19  ;;  %861 = vst.msk [vmem:[%s1368_s21 + $0x7c] sm:$0xf] %vm829_vm1, %v1059_v20 }
 0x19f   : > { %843 = vst.msk [vmem:[%s1368_s21 + $0x34] sm:$0xf] %vm829_vm1, %v1041_v23  ;;  %859 = vst.msk [vmem:[%s1368_s21 + $0x74] sm:$0xf] %vm829_vm1, %v1057_v24 }
 0x1a0 PF: > { %s14_s17 = sadd.s32 1, %s1212_s17   ;;  %s1448_s15 = smov %s1208_s16 }
 0x1a1   : > { %p11_p5 = scmp.ge.s32.totalorder %s14_s17, 4   ;;  %s1449_s16 = smov %s1451_s18 }
 0x1a3   :  { %13 = sbr.rel (!%p11_p5) target bundleno = 2 (0x2), region = 69 }

// kernel: generator_forward.10
= control target key start
LH: loop header
LB: loop body
LE: loop exit
PB: predicated region body
PF: predicated region fallthrough
CT: control target
= control target key end

     0   :  { %s1005_s9 = smov 0   ;;  %s1007_s10 = smov 0   ;;  %s1148_s0 = inlined_call_operand.vmem [shape: bf16[1024,8], index: 0, kind: input, shape index: {}]   ;;  %s1149_s1 = inlined_call_operand.vmem [shape: bf16[8,2], index: 1, kind: input, shape index: {}]   ;;  %s1150_s2 = inlined_call_operand.vmem [shape: bf16[1024,2], index: 2, kind: output, shape index: {}]  }
   0x1   :  { %s1009_s11 = smov 0  }
   0x2 LB: > { %s24_s12 = sadd.s32 1, %s984_s10  ;;  %p768_p0 = scmp.ge.s32.totalorder %s988_s11, 1  ;;  %s988_s11 = sphi %s1009_s11, %s12_s11   ;;  %s984_s10 = sphi %s1007_s10, %s1152_s10   ;;  %s980_s9 = sphi %s1005_s9, %s1151_s9  }
   0x3   : > { %p26_p1 = scmp.ge.s32.totalorder %s24_s12, 4  ;;  %p136_p2 = scmp.lt.s32.totalorder %s988_s11, 5 }
   0x5   : > { %s1154_s12 = smov (%p26_p1, %s24_s12), 0  ;;  %p137_p3 = pnand %p768_p0, %p136_p2 }
   0x6   : > { %v217_v0 = vld [vmem:[%s1149_s1] sm:$0xf] (!%p137_p3)  ;;  %vm347_vm0 = vcmask (!%p137_p3), 1043456   ;;  %s769_s15 = sshll.u32 (!%p137_p3), %s980_s9, 5  ;;  %vm298_vm1 = vcmask (!%p137_p3), 64512   ;;  %vm640_vm2 = vcmask (!%p137_p3), 11264  }
   0x7   : > { %140 = sbr.rel (%p137_p3) target bundleno = 262 (0x106), region = 28  ;;  %924 = vmatprep.subr.msk.bf16.mxu0 (!%p137_p3), %vm347_vm0, %v217_v0  ;;  %925 = vmatprep.subr.msk.bf16.mxu1 (!%p137_p3), %vm347_vm0, %v217_v0  ;;  %v349_v1 = vsel (!%p137_p3), %vm347_vm0, %v217_v0, 0  ;;  %p166_p4 = scmp.lt.s32.totalorder (!%p137_p3), %s769_s15, 127 }
   0x8   : > { %889 = vmatpush3.bf16.msra.mxu0 (!%p137_p3), %v349_v1  ;;  %923 = vmatpush3.bf16.msra.mxu1 (!%p137_p3), %v349_v1 }
   0xe   : > { %s1156_s15 = smov (!%p166_p4, %s769_s15), 127 }
   0xf   : > { %s770_s16 = sshll.u32 %s1156_s15, 2 }
  0x10   : > { %s1034_s19 = scalar_lea.vmem %s1148_s0, %s770_s16  ;;  %s1073_s22 = scalar_lea.vmem %s1150_s2, %s770_s16 }
  0x11   : > { %v950_v2 = vld [vmem:[%s1034_s19] sm:$0xff]   ;;  %v952_v4 = vld [vmem:[%s1034_s19 + $0x8] sm:$0xff]   ;;  %v954_v6 = vld [vmem:[%s1034_s19 + $0x10] sm:$0xff]  }
  0x12   : > { %v951_v3 = vld [vmem:[%s1034_s19 + $0x40] sm:$0xff]   ;;  %890 = vmatprep.mubr.msk.bf16.mxu0 %vm298_vm1, %v950_v2  ;;  %v953_v5 = vld [vmem:[%s1034_s19 + $0x48] sm:$0xff]   ;;  %v955_v7 = vld [vmem:[%s1034_s19 + $0x50] sm:$0xff]  }
  0x13   : > { %906 = vmatprep.mubr.msk.bf16.mxu1 %vm298_vm1, %v951_v3  ;;  %891 = vmatmul.mubr.msk.bf16.vlgmr.msra.gmra.mrb[0].mxu0 %vm298_vm1, %v952_v4  ;;  %v956_v8 = vld [vmem:[%s1034_s19 + $0x18] sm:$0xff]   ;;  %v958_v10 = vld [vmem:[%s1034_s19 + $0x20] sm:$0xff]   ;;  %v960_v12 = vld [vmem:[%s1034_s19 + $0x28] sm:$0xff]  }
  0x14   : > { %907 = vmatmul.mubr.msk.bf16.vlgmr.msra.gmra.mrb[0].mxu1 %vm298_vm1, %v953_v5  ;;  %894 = vmatprep.mubr.msk.bf16.mxu0 %vm298_vm1, %v954_v6  ;;  %v957_v9 = vld [vmem:[%s1034_s19 + $0x58] sm:$0xff]   ;;  %v959_v11 = vld [vmem:[%s1034_s19 + $0x60] sm:$0xff]   ;;  %v961_v13 = vld [vmem:[%s1034_s19 + $0x68] sm:$0xff]  }
  0x15   : > { %910 = vmatprep.mubr.msk.bf16.mxu1 %vm298_vm1, %v955_v7  ;;  %v962_v14 = vld [vmem:[%s1034_s19 + $0x30] sm:$0xff]   ;;  %v964_v16 = vld [vmem:[%s1034_s19 + $0x38] sm:$0xff]  }
  0x16   : > { %v963_v15 = vld [vmem:[%s1034_s19 + $0x70] sm:$0xff]   ;;  %v965_v17 = vld [vmem:[%s1034_s19 + $0x78] sm:$0xff]  }
  0x1b   : > { %895 = vmatmul.mubr.msk.bf16.gmra.mrb[4].mxu0 %vm298_vm1, %v956_v8 }
  0x1c   : > { %911 = vmatmul.mubr.msk.bf16.gmra.mrb[4].mxu1 %vm298_vm1, %v957_v9  ;;  %898 = vmatprep.mubr.msk.bf16.mxu0 %vm298_vm1, %v958_v10 }
  0x1d   : > { %914 = vmatprep.mubr.msk.bf16.mxu1 %vm298_vm1, %v959_v11 }
  0x23   : > { %899 = vmatmul.mubr.msk.bf16.gmra.mrb[8].mxu0 %vm298_vm1, %v960_v12 }
  0x24   : > { %915 = vmatmul.mubr.msk.bf16.gmra.mrb[8].mxu1 %vm298_vm1, %v961_v13  ;;  %902 = vmatprep.mubr.msk.bf16.mxu0 %vm298_vm1, %v962_v14 }
  0x25   : > { %918 = vmatprep.mubr.msk.bf16.mxu1 %vm298_vm1, %v963_v15 }
  0x2b   : > { %903 = vmatmul.mubr.msk.bf16.gmra.mrb[12].mxu0 %vm298_vm1, %v964_v16 }
  0x2c   : > { %919 = vmatmul.mubr.msk.bf16.gmra.mrb[12].mxu1 %vm298_vm1, %v965_v17 }
  0xe6   : > { %v892_v18 = vpop.f32.mrb[0].mxu0 }
  0xe7   : > { %v841_v19 = vpack.c.bf16 %v892_v18, %v892_v18  ;;  %v908_v20 = vpop.f32.mrb[0].mxu1  ;;  %v385_v21 = vpop.f32.mrb[1].mxu0 }
  0xe8   : > { %v857_v22 = vpack.c.bf16 %v908_v20, %v908_v20  ;;  %v839_v23 = vpack.c.bf16 %v385_v21, %v385_v21  ;;  %v449_v24 = vpop.f32.mrb[1].mxu1  ;;  %v893_v25 = vpop.f32.mrb[2].mxu0 }
  0xe9   : > { %643 = vst.msk [vmem:[%s1073_s22 + $0x8] sm:$0xf] %vm640_vm2, %v841_v19  ;;  %v855_v26 = vpack.c.bf16 %v449_v24, %v449_v24  ;;  %v842_v27 = vpack.c.bf16 %v893_v25, %v893_v25  ;;  %v909_v28 = vpop.f32.mrb[2].mxu1  ;;  %v388_v29 = vpop.f32.mrb[3].mxu0 }
  0xea   : > { %659 = vst.msk [vmem:[%s1073_s22 + $0x48] sm:$0xf] %vm640_vm2, %v857_v22  ;;  %641 = vst.msk [vmem:[%s1073_s22] sm:$0xf] %vm640_vm2, %v839_v23  ;;  %v858_v30 = vpack.c.bf16 %v909_v28, %v909_v28  ;;  %v840_v31 = vpack.c.bf16 %v388_v29, %v388_v29  ;;  %v452_v32 = vpop.f32.mrb[3].mxu1 }
  0xeb   : > { %657 = vst.msk [vmem:[%s1073_s22 + $0x40] sm:$0xf] %vm640_vm2, %v855_v26  ;;  %644 = vst.msk [vmem:[%s1073_s22 + $0xc] sm:$0xf] %vm640_vm2, %v842_v27  ;;  %v856_v33 = vpack.c.bf16 %v452_v32, %v452_v32 }
  0xec   : > { %660 = vst.msk [vmem:[%s1073_s22 + $0x4c] sm:$0xf] %vm640_vm2, %v858_v30  ;;  %642 = vst.msk [vmem:[%s1073_s22 + $0x4] sm:$0xf] %vm640_vm2, %v840_v31 }
  0xed   : > { %658 = vst.msk [vmem:[%s1073_s22 + $0x44] sm:$0xf] %vm640_vm2, %v856_v33 }
  0xee   : > { %v896_v34 = vpop.f32.mrb[4].mxu0 }
  0xef   : > { %v845_v35 = vpack.c.bf16 %v896_v34, %v896_v34  ;;  %v912_v36 = vpop.f32.mrb[4].mxu1  ;;  %v401_v37 = vpop.f32.mrb[5].mxu0 }
  0xf0   : > { %v861_v38 = vpack.c.bf16 %v912_v36, %v912_v36  ;;  %v843_v39 = vpack.c.bf16 %v401_v37, %v401_v37  ;;  %v465_v40 = vpop.f32.mrb[5].mxu1  ;;  %v897_v41 = vpop.f32.mrb[6].mxu0 }
  0xf1   : > { %647 = vst.msk [vmem:[%s1073_s22 + $0x18] sm:$0xf] %vm640_vm2, %v845_v35  ;;  %v859_v42 = vpack.c.bf16 %v465_v40, %v465_v40  ;;  %v846_v43 = vpack.c.bf16 %v897_v41, %v897_v41  ;;  %v913_v44 = vpop.f32.mrb[6].mxu1  ;;  %v404_v45 = vpop.f32.mrb[7].mxu0 }
  0xf2   : > { %663 = vst.msk [vmem:[%s1073_s22 + $0x58] sm:$0xf] %vm640_vm2, %v861_v38  ;;  %645 = vst.msk [vmem:[%s1073_s22 + $0x10] sm:$0xf] %vm640_vm2, %v843_v39  ;;  %v862_v46 = vpack.c.bf16 %v913_v44, %v913_v44  ;;  %v844_v47 = vpack.c.bf16 %v404_v45, %v404_v45  ;;  %v468_v48 = vpop.f32.mrb[7].mxu1 }
  0xf3   : > { %661 = vst.msk [vmem:[%s1073_s22 + $0x50] sm:$0xf] %vm640_vm2, %v859_v42  ;;  %648 = vst.msk [vmem:[%s1073_s22 + $0x1c] sm:$0xf] %vm640_vm2, %v846_v43  ;;  %v860_v49 = vpack.c.bf16 %v468_v48, %v468_v48 }
  0xf4   : > { %664 = vst.msk [vmem:[%s1073_s22 + $0x5c] sm:$0xf] %vm640_vm2, %v862_v46  ;;  %646 = vst.msk [vmem:[%s1073_s22 + $0x14] sm:$0xf] %vm640_vm2, %v844_v47 }
  0xf5   : > { %662 = vst.msk [vmem:[%s1073_s22 + $0x54] sm:$0xf] %vm640_vm2, %v860_v49 }
  0xf6   : > { %v900_v50 = vpop.f32.mrb[8].mxu0 }
  0xf7   : > { %v849_v51 = vpack.c.bf16 %v900_v50, %v900_v50  ;;  %v916_v52 = vpop.f32.mrb[8].mxu1  ;;  %v417_v53 = vpop.f32.mrb[9].mxu0 }
  0xf8   : > { %v865_v54 = vpack.c.bf16 %v916_v52, %v916_v52  ;;  %v847_v55 = vpack.c.bf16 %v417_v53, %v417_v53  ;;  %v481_v56 = vpop.f32.mrb[9].mxu1  ;;  %v901_v57 = vpop.f32.mrb[10].mxu0 }
  0xf9   : > { %651 = vst.msk [vmem:[%s1073_s22 + $0x28] sm:$0xf] %vm640_vm2, %v849_v51  ;;  %v863_v58 = vpack.c.bf16 %v481_v56, %v481_v56  ;;  %v850_v59 = vpack.c.bf16 %v901_v57, %v901_v57  ;;  %v917_v60 = vpop.f32.mrb[10].mxu1  ;;  %v420_v61 = vpop.f32.mrb[11].mxu0 }
  0xfa   : > { %667 = vst.msk [vmem:[%s1073_s22 + $0x68] sm:$0xf] %vm640_vm2, %v865_v54  ;;  %649 = vst.msk [vmem:[%s1073_s22 + $0x20] sm:$0xf] %vm640_vm2, %v847_v55  ;;  %v866_v62 = vpack.c.bf16 %v917_v60, %v917_v60  ;;  %v848_v63 = vpack.c.bf16 %v420_v61, %v420_v61  ;;  %v484_v0 = vpop.f32.mrb[11].mxu1 }
  0xfb   : > { %665 = vst.msk [vmem:[%s1073_s22 + $0x60] sm:$0xf] %vm640_vm2, %v863_v58  ;;  %652 = vst.msk [vmem:[%s1073_s22 + $0x2c] sm:$0xf] %vm640_vm2, %v850_v59  ;;  %v864_v1 = vpack.c.bf16 %v484_v0, %v484_v0 }
  0xfc   : > { %668 = vst.msk [vmem:[%s1073_s22 + $0x6c] sm:$0xf] %vm640_vm2, %v866_v62  ;;  %650 = vst.msk [vmem:[%s1073_s22 + $0x24] sm:$0xf] %vm640_vm2, %v848_v63 }
  0xfd   : > { %666 = vst.msk [vmem:[%s1073_s22 + $0x64] sm:$0xf] %vm640_vm2, %v864_v1 }
  0xfe   : > { %v904_v2 = vpop.f32.mrb[12].mxu0 }
  0xff   : > { %v853_v3 = vpack.c.bf16 %v904_v2, %v904_v2  ;;  %v920_v4 = vpop.f32.mrb[12].mxu1  ;;  %v433_v5 = vpop.f32.mrb[13].mxu0 }
 0x100   : > { %v869_v6 = vpack.c.bf16 %v920_v4, %v920_v4  ;;  %v851_v7 = vpack.c.bf16 %v433_v5, %v433_v5  ;;  %v497_v8 = vpop.f32.mrb[13].mxu1  ;;  %v905_v9 = vpop.f32.mrb[14].mxu0 }
 0x101   : > { %655 = vst.msk [vmem:[%s1073_s22 + $0x38] sm:$0xf] %vm640_vm2, %v853_v3  ;;  %v867_v10 = vpack.c.bf16 %v497_v8, %v497_v8  ;;  %v854_v11 = vpack.c.bf16 %v905_v9, %v905_v9  ;;  %v921_v12 = vpop.f32.mrb[14].mxu1  ;;  %v436_v13 = vpop.f32.mrb[15].mxu0 }
 0x102   : > { %671 = vst.msk [vmem:[%s1073_s22 + $0x78] sm:$0xf] %vm640_vm2, %v869_v6  ;;  %653 = vst.msk [vmem:[%s1073_s22 + $0x30] sm:$0xf] %vm640_vm2, %v851_v7  ;;  %v870_v14 = vpack.c.bf16 %v921_v12, %v921_v12  ;;  %v852_v15 = vpack.c.bf16 %v436_v13, %v436_v13  ;;  %v500_v16 = vpop.f32.mrb[15].mxu1 }
 0x103   : > { %669 = vst.msk [vmem:[%s1073_s22 + $0x70] sm:$0xf] %vm640_vm2, %v867_v10  ;;  %656 = vst.msk [vmem:[%s1073_s22 + $0x3c] sm:$0xf] %vm640_vm2, %v854_v11  ;;  %v868_v17 = vpack.c.bf16 %v500_v16, %v500_v16 }
 0x104   : > { %672 = vst.msk [vmem:[%s1073_s22 + $0x7c] sm:$0xf] %vm640_vm2, %v870_v14  ;;  %654 = vst.msk [vmem:[%s1073_s22 + $0x34] sm:$0xf] %vm640_vm2, %v852_v15 }
 0x105   : > { %670 = vst.msk [vmem:[%s1073_s22 + $0x74] sm:$0xf] %vm640_vm2, %v868_v17 }
 0x106 PF: > { %s12_s11 = sadd.s32 1, %s988_s11   ;;  %s1151_s9 = smov %s984_s10 }
 0x107   : > { %p9_p5 = scmp.ge.s32.totalorder %s12_s11, 6   ;;  %s1152_s10 = smov %s1154_s12 }
 0x109   :  { %11 = sbr.rel (!%p9_p5) target bundleno = 2 (0x2), region = 61 }

// kernel: squeeze.51
= control target key start
LH: loop header
LB: loop body
LE: loop exit
PB: predicated region body
PF: predicated region fallthrough
CT: control target
= control target key end

     0   :  { %vm66_vm0 = vcmask 261120   ;;  %s529_s10 = smov 96   ;;  %s530_s11 = smov 32   ;;  %v531_v29 = vmov 0.0   ;;  %s708_s0 = inlined_call_operand.vmem [shape: bf16[128,32], index: 0, kind: input, shape index: {}]   ;;  %s709_s1 = inlined_call_operand.vmem [shape: bf16[4,32,2,4,4], index: 1, kind: output, shape index: {}]  }
   0x1   :  { %v490_v0 = vld [vmem:[%s708_s0] sm:$0xff]   ;;  %v493_v1 = vld [vmem:[%s708_s0 + $0x8] sm:$0xff]   ;;  %s528_s0 = smov 64  }
   0x2   :  { %v491_v2 = vunpack.c.l.bf16 %v490_v0  ;;  %v492_v3 = vunpack.c.h.bf16 %v490_v0  ;;  %v487_v4 = vunpack.c.l.bf16 %v493_v1  ;;  %v488_v5 = vunpack.c.h.bf16 %v493_v1 }
   0x4   :  { %v508_v6 = vpack.i.bf16 %v492_v3, %v491_v2  ;;  %73 = vst.msk [vmem:[#allocation0 + $0x40] ss:$8 sm:$0xf] %vm66_vm0, %v492_v3   ;;  %75 = vst.msk [vmem:[#allocation0 + $0x40] ss:$8 sm:$0xf0] %vm66_vm0, %v492_v3   ;;  %v513_v7 = vpack.i.bf16 %v488_v5, %v487_v4 }
   0x5   :  { %67 = vst.msk [vmem:[#allocation0] ss:$8 sm:$0xf] %vm66_vm0, %v491_v2   ;;  %68 = vst.msk [vmem:[#allocation0] ss:$8 sm:$0xf0] %vm66_vm0, %v491_v2  }
   0x6   :  { %87 = vst.msk [vmem:[#allocation0 + $0xc0] ss:$8 sm:$0xf] %vm66_vm0, %v488_v5   ;;  %89 = vst.msk [vmem:[#allocation0 + $0xc0] ss:$8 sm:$0xf0] %vm66_vm0, %v488_v5   ;;  %509 = vrot.lane.b32.xlu1 %v508_v6, %s528_s0  ;;  %499 = vrot.lane.b32.xlu0 %v508_v6, %s529_s10 }
   0x7   :  { %80 = vst.msk [vmem:[#allocation0 + $0x80] ss:$8 sm:$0xf] %vm66_vm0, %v487_v4   ;;  %82 = vst.msk [vmem:[#allocation0 + $0x80] ss:$8 sm:$0xf0] %vm66_vm0, %v487_v4  }
   0xa   :  { %514 = vrot.lane.b32.xlu1 %v513_v7, %s528_s0  ;;  %504 = vrot.lane.b32.xlu0 %v513_v7, %s529_s10 }
   0xe   :  { %524 = vrot.lane.b32.xlu1 %v513_v7, %s530_s11  ;;  %519 = vrot.lane.b32.xlu0 %v508_v6, %s530_s11 }
  0x78   :  { %v510_v8 = vpop.permute.xlu1 %509  ;;  %v500_v9 = vpop.permute.xlu0 %499 }
  0x79   :  { %v512_v10 = vunpack.i.h.bf16 %v510_v8  ;;  %v511_v11 = vunpack.i.l.bf16 %v510_v8  ;;  %v502_v12 = vunpack.i.h.bf16 %v500_v9  ;;  %v501_v13 = vunpack.i.l.bf16 %v500_v9 }
  0x7b   :  { %139 = vst.msk [vmem:[#allocation0 + $0x42] ss:$8 sm:$0xf] %vm66_vm0, %v512_v10   ;;  %141 = vst.msk [vmem:[#allocation0 + $0x42] ss:$8 sm:$0xf0] %vm66_vm0, %v512_v10  }
  0x7c   :  { %130 = vst.msk [vmem:[#allocation0 + $0x2] ss:$8 sm:$0xf] %vm66_vm0, %v511_v11   ;;  %132 = vst.msk [vmem:[#allocation0 + $0x2] ss:$8 sm:$0xf0] %vm66_vm0, %v511_v11   ;;  %v515_v14 = vpop.permute.xlu1 %514  ;;  %v505_v15 = vpop.permute.xlu0 %504 }
  0x7d   :  { %104 = vst.msk [vmem:[#allocation0 + $0x41] ss:$8 sm:$0xf] %vm66_vm0, %v502_v12   ;;  %106 = vst.msk [vmem:[#allocation0 + $0x41] ss:$8 sm:$0xf0] %vm66_vm0, %v502_v12   ;;  %v517_v16 = vunpack.i.h.bf16 %v515_v14  ;;  %v516_v17 = vunpack.i.l.bf16 %v515_v14  ;;  %v507_v18 = vunpack.i.h.bf16 %v505_v15  ;;  %v506_v19 = vunpack.i.l.bf16 %v505_v15 }
  0x7e   :  { %95 = vst.msk [vmem:[#allocation0 + $0x1] ss:$8 sm:$0xf] %vm66_vm0, %v501_v13   ;;  %97 = vst.msk [vmem:[#allocation0 + $0x1] ss:$8 sm:$0xf0] %vm66_vm0, %v501_v13  }
  0x7f   :  { %157 = vst.msk [vmem:[#allocation0 + $0xc2] ss:$8 sm:$0xf] %vm66_vm0, %v517_v16   ;;  %159 = vst.msk [vmem:[#allocation0 + $0xc2] ss:$8 sm:$0xf0] %vm66_vm0, %v517_v16  }
  0x80   :  { %148 = vst.msk [vmem:[#allocation0 + $0x82] ss:$8 sm:$0xf] %vm66_vm0, %v516_v17   ;;  %150 = vst.msk [vmem:[#allocation0 + $0x82] ss:$8 sm:$0xf0] %vm66_vm0, %v516_v17   ;;  %v525_v20 = vpop.permute.xlu1 %524  ;;  %v520_v21 = vpop.permute.xlu0 %519 }
  0x81   :  { %122 = vst.msk [vmem:[#allocation0 + $0xc1] ss:$8 sm:$0xf] %vm66_vm0, %v507_v18   ;;  %124 = vst.msk [vmem:[#allocation0 + $0xc1] ss:$8 sm:$0xf0] %vm66_vm0, %v507_v18   ;;  %v527_v22 = vunpack.i.h.bf16 %v525_v20  ;;  %v526_v23 = vunpack.i.l.bf16 %v525_v20  ;;  %v522_v24 = vunpack.i.h.bf16 %v520_v21  ;;  %v521_v25 = vunpack.i.l.bf16 %v520_v21 }
  0x82   :  { %113 = vst.msk [vmem:[#allocation0 + $0x81] ss:$8 sm:$0xf] %vm66_vm0, %v506_v19   ;;  %115 = vst.msk [vmem:[#allocation0 + $0x81] ss:$8 sm:$0xf0] %vm66_vm0, %v506_v19  }
  0x83   :  { %192 = vst.msk [vmem:[#allocation0 + $0xc3] ss:$8 sm:$0xf] %vm66_vm0, %v527_v22   ;;  %194 = vst.msk [vmem:[#allocation0 + $0xc3] ss:$8 sm:$0xf0] %vm66_vm0, %v527_v22  }
  0x84   :  { %183 = vst.msk [vmem:[#allocation0 + $0x83] ss:$8 sm:$0xf] %vm66_vm0, %v526_v23   ;;  %185 = vst.msk [vmem:[#allocation0 + $0x83] ss:$8 sm:$0xf0] %vm66_vm0, %v526_v23  }
  0x85   :  { %174 = vst.msk [vmem:[#allocation0 + $0x43] ss:$8 sm:$0xf] %vm66_vm0, %v522_v24   ;;  %176 = vst.msk [vmem:[#allocation0 + $0x43] ss:$8 sm:$0xf0] %vm66_vm0, %v522_v24  }
  0x86   :  { %165 = vst.msk [vmem:[#allocation0 + $0x3] ss:$8 sm:$0xf] %vm66_vm0, %v521_v25   ;;  %167 = vst.msk [vmem:[#allocation0 + $0x3] ss:$8 sm:$0xf0] %vm66_vm0, %v521_v25  }
  0x8a   :  { %v364_v41 = vld [vmem:[#allocation0 + $0xc0] sm:$0xf]  ;;  %v371_v45 = vld [vmem:[#allocation0 + $0xc8] sm:$0xf]  ;;  %v378_v46 = vld [vmem:[#allocation0 + $0xd0] sm:$0xf] }
  0x8b   :  { %v308_v26 = vld [vmem:[#allocation0 + $0x80] sm:$0xf]  ;;  %v315_v27 = vld [vmem:[#allocation0 + $0x88] sm:$0xf]  ;;  %v322_v28 = vld [vmem:[#allocation0 + $0x90] sm:$0xf]  ;;  %v365_v44 = vpack.c.bf16 %v531_v29, %v364_v41  ;;  %v372_v48 = vpack.c.bf16 %v531_v29, %v371_v45  ;;  %v379_v49 = vpack.c.bf16 %v531_v29, %v378_v46 }
  0x8c   :  { %v309_v30 = vpack.c.bf16 %v531_v29, %v308_v26  ;;  %v316_v31 = vpack.c.bf16 %v531_v29, %v315_v27  ;;  %v323_v32 = vpack.c.bf16 %v531_v29, %v322_v28  ;;  %v329_v33 = vld [vmem:[#allocation0 + $0x98] sm:$0xf]  ;;  %v336_v34 = vld [vmem:[#allocation0 + $0xa0] sm:$0xf]  ;;  %v343_v35 = vld [vmem:[#allocation0 + $0xa8] sm:$0xf] }
  0x8d   :  { %v330_v36 = vpack.c.bf16 %v531_v29, %v329_v33  ;;  %v337_v37 = vpack.c.bf16 %v531_v29, %v336_v34  ;;  %v344_v38 = vpack.c.bf16 %v531_v29, %v343_v35  ;;  %v350_v39 = vld [vmem:[#allocation0 + $0xb0] sm:$0xf]  ;;  %v357_v40 = vld [vmem:[#allocation0 + $0xb8] sm:$0xf]  ;;  %v392_v51 = vld [vmem:[#allocation0 + $0xe0] sm:$0xf] }
  0x8e   :  { %469 = vst [vmem:[%s709_s1 + $0x20] sm:$0x3] %v309_v30  ;;  %470 = vst [vmem:[%s709_s1 + $0x22] sm:$0x3] %v316_v31  ;;  %v351_v42 = vpack.c.bf16 %v531_v29, %v350_v39  ;;  %v358_v43 = vpack.c.bf16 %v531_v29, %v357_v40  ;;  %v385_v47 = vld [vmem:[#allocation0 + $0xd8] sm:$0xf]  ;;  %v393_v54 = vpack.c.bf16 %v531_v29, %v392_v51 }
  0x8f   :  { %471 = vst [vmem:[%s709_s1 + $0x24] sm:$0x3] %v323_v32  ;;  %472 = vst [vmem:[%s709_s1 + $0x26] sm:$0x3] %v330_v36  ;;  %v386_v50 = vpack.c.bf16 %v531_v29, %v385_v47  ;;  %v399_v52 = vld [vmem:[#allocation0 + $0xe8] sm:$0xf] }
  0x90   :  { %473 = vst [vmem:[%s709_s1 + $0x28] sm:$0x3] %v337_v37  ;;  %474 = vst [vmem:[%s709_s1 + $0x2a] sm:$0x3] %v344_v38  ;;  %v406_v53 = vld [vmem:[#allocation0 + $0xf0] sm:$0xf]  ;;  %v400_v55 = vpack.c.bf16 %v531_v29, %v399_v52 }
  0x91   :  { %475 = vst [vmem:[%s709_s1 + $0x2c] sm:$0x3] %v351_v42  ;;  %476 = vst [vmem:[%s709_s1 + $0x2e] sm:$0x3] %v358_v43  ;;  %v407_v56 = vpack.c.bf16 %v531_v29, %v406_v53  ;;  %v413_v57 = vld [vmem:[#allocation0 + $0xf8] sm:$0xf] }
  0x92   :  { %477 = vst [vmem:[%s709_s1 + $0x30] sm:$0x3] %v365_v44  ;;  %v252_v58 = vld [vmem:[#allocation0 + $0x40] sm:$0xf]  ;;  %v259_v59 = vld [vmem:[#allocation0 + $0x48] sm:$0xf]  ;;  %v414_v60 = vpack.c.bf16 %v531_v29, %v413_v57 }
  0x93   :  { %478 = vst [vmem:[%s709_s1 + $0x32] sm:$0x3] %v372_v48  ;;  %479 = vst [vmem:[%s709_s1 + $0x34] sm:$0x3] %v379_v49  ;;  %v253_v61 = vpack.c.bf16 %v531_v29, %v252_v58  ;;  %v260_v62 = vpack.c.bf16 %v531_v29, %v259_v59  ;;  %v266_v63 = vld [vmem:[#allocation0 + $0x50] sm:$0xf] }
  0x94   :  { %480 = vst [vmem:[%s709_s1 + $0x36] sm:$0x3] %v386_v50  ;;  %v273_v0 = vld [vmem:[#allocation0 + $0x58] sm:$0xf]  ;;  %v280_v1 = vld [vmem:[#allocation0 + $0x60] sm:$0xf]  ;;  %v267_v2 = vpack.c.bf16 %v531_v29, %v266_v63 }
  0x95   :  { %481 = vst [vmem:[%s709_s1 + $0x38] sm:$0x3] %v393_v54  ;;  %482 = vst [vmem:[%s709_s1 + $0x3a] sm:$0x3] %v400_v55  ;;  %v274_v3 = vpack.c.bf16 %v531_v29, %v273_v0  ;;  %v281_v4 = vpack.c.bf16 %v531_v29, %v280_v1  ;;  %v287_v5 = vld [vmem:[#allocation0 + $0x68] sm:$0xf] }
  0x96   :  { %483 = vst [vmem:[%s709_s1 + $0x3c] sm:$0x3] %v407_v56  ;;  %v294_v6 = vld [vmem:[#allocation0 + $0x70] sm:$0xf]  ;;  %v301_v7 = vld [vmem:[#allocation0 + $0x78] sm:$0xf]  ;;  %v288_v8 = vpack.c.bf16 %v531_v29, %v287_v5 }
  0x97   :  { %484 = vst [vmem:[%s709_s1 + $0x3e] sm:$0x3] %v414_v60  ;;  %461 = vst [vmem:[%s709_s1 + $0x10] sm:$0x3] %v253_v61  ;;  %v295_v9 = vpack.c.bf16 %v531_v29, %v294_v6  ;;  %v302_v10 = vpack.c.bf16 %v531_v29, %v301_v7  ;;  %v199_v11 = vld [vmem:[#allocation0] sm:$0xf] }
  0x98   :  { %462 = vst [vmem:[%s709_s1 + $0x12] sm:$0x3] %v260_v62  ;;  %v204_v12 = vld [vmem:[#allocation0 + $0x8] sm:$0xf]  ;;  %v210_v13 = vld [vmem:[#allocation0 + $0x10] sm:$0xf]  ;;  %v200_v14 = vpack.c.bf16 %v531_v29, %v199_v11 }
  0x99   :  { %463 = vst [vmem:[%s709_s1 + $0x14] sm:$0x3] %v267_v2  ;;  %464 = vst [vmem:[%s709_s1 + $0x16] sm:$0x3] %v274_v3  ;;  %v205_v15 = vpack.c.bf16 %v531_v29, %v204_v12  ;;  %v211_v16 = vpack.c.bf16 %v531_v29, %v210_v13  ;;  %v217_v17 = vld [vmem:[#allocation0 + $0x18] sm:$0xf] }
  0x9a   :  { %465 = vst [vmem:[%s709_s1 + $0x18] sm:$0x3] %v281_v4  ;;  %v224_v18 = vld [vmem:[#allocation0 + $0x20] sm:$0xf]  ;;  %v231_v19 = vld [vmem:[#allocation0 + $0x28] sm:$0xf]  ;;  %v218_v20 = vpack.c.bf16 %v531_v29, %v217_v17 }
  0x9b   :  { %466 = vst [vmem:[%s709_s1 + $0x1a] sm:$0x3] %v288_v8  ;;  %467 = vst [vmem:[%s709_s1 + $0x1c] sm:$0x3] %v295_v9  ;;  %v225_v21 = vpack.c.bf16 %v531_v29, %v224_v18  ;;  %v232_v22 = vpack.c.bf16 %v531_v29, %v231_v19  ;;  %v238_v23 = vld [vmem:[#allocation0 + $0x30] sm:$0xf] }
  0x9c   :  { %468 = vst [vmem:[%s709_s1 + $0x1e] sm:$0x3] %v302_v10  ;;  %v245_v24 = vld [vmem:[#allocation0 + $0x38] sm:$0xf]  ;;  %202 = vst [vmem:[%s709_s1] sm:$0x3] %v200_v14  ;;  %v239_v25 = vpack.c.bf16 %v531_v29, %v238_v23 }
  0x9d   :  { %454 = vst [vmem:[%s709_s1 + $0x2] sm:$0x3] %v205_v15  ;;  %455 = vst [vmem:[%s709_s1 + $0x4] sm:$0x3] %v211_v16  ;;  %v246_v26 = vpack.c.bf16 %v531_v29, %v245_v24 }
  0x9e   :  { %456 = vst [vmem:[%s709_s1 + $0x6] sm:$0x3] %v218_v20  ;;  %457 = vst [vmem:[%s709_s1 + $0x8] sm:$0x3] %v225_v21 }
  0x9f   :  { %458 = vst [vmem:[%s709_s1 + $0xa] sm:$0x3] %v232_v22  ;;  %459 = vst [vmem:[%s709_s1 + $0xc] sm:$0x3] %v239_v25 }
  0xa0   :  { %460 = vst [vmem:[%s709_s1 + $0xe] sm:$0x3] %v246_v26 }

// kernel: generator_forward.13
= control target key start
LH: loop header
LB: loop body
LE: loop exit
PB: predicated region body
PF: predicated region fallthrough
CT: control target
= control target key end

     0   :  { %vm14_vm0 = vcmask 7168   ;;  %v94_v2 = vmov 0.0   ;;  %s204_s0 = inlined_call_operand.vmem [shape: bf16[32,128], index: 0, kind: input, shape index: {}]   ;;  %s205_s1 = inlined_call_operand.vmem [shape: f32[32,1], index: 1, kind: output, shape index: {0}]   ;;  %s206_s2 = inlined_call_operand.vmem [shape: f32[32,1], index: 2, kind: output, shape index: {1}]  }
   0x1   :  { %v92_v0 = vld [vmem:[%s204_s0 + $0x8] sm:$0xff]   ;;  %v85_v1 = vld [vmem:[%s204_s0] sm:$0xff]   ;;  %17 = vst.msk [vmem:[%s205_s1 + $0x10] sm:$0xff] %vm14_vm0, %v94_v2  ;;  %15 = vst.msk [vmem:[%s205_s1] sm:$0xff] %vm14_vm0, %v94_v2 }
   0x2   :  { %16 = vst.msk [vmem:[%s205_s1 + $0x8] sm:$0xff] %vm14_vm0, %v94_v2  ;;  %18 = vst.msk [vmem:[%s205_s1 + $0x18] sm:$0xff] %vm14_vm0, %v94_v2  ;;  %v90_v3 = vunpack.c.l.bf16 %v92_v0  ;;  %v86_v4 = vunpack.c.l.bf16 %v85_v1  ;;  %v91_v5 = vunpack.c.h.bf16 %v92_v0  ;;  %v87_v6 = vunpack.c.h.bf16 %v85_v1 }
   0x3   :  { %20 = vst.msk [vmem:[%s206_s2 + $0x8] sm:$0xff] %vm14_vm0, %v94_v2  ;;  %19 = vst.msk [vmem:[%s206_s2] sm:$0xff] %vm14_vm0, %v94_v2 }
   0x4   :  { %39 = vadd.xlane.f32.xlu1 %v90_v3  ;;  %35 = vadd.xlane.f32.xlu0 %v86_v4  ;;  %v57_v7 = vmul.f32 %v87_v6, %v87_v6  ;;  %v56_v8 = vmul.f32 %v86_v4, %v86_v4  ;;  %v59_v9 = vmul.f32 %v91_v5, %v91_v5 }
   0x5   :  { %v58_v10 = vmul.f32 %v90_v3, %v90_v3  ;;  %21 = vst.msk [vmem:[%s206_s2 + $0x10] sm:$0xff] %vm14_vm0, %v94_v2  ;;  %22 = vst.msk [vmem:[%s206_s2 + $0x18] sm:$0xff] %vm14_vm0, %v94_v2 }
   0x8   :  { %41 = vadd.xlane.f32.xlu1 %v91_v5  ;;  %37 = vadd.xlane.f32.xlu0 %v87_v6  ;;  %v33_v11 = vld [vmem:[%s205_s1 + $0x10] sm:$0xff]  ;;  %v31_v12 = vld [vmem:[%s205_s1] sm:$0xff] }
   0x9   :  { %v34_v17 = vld [vmem:[%s205_s1 + $0x18] sm:$0xff]  ;;  %v32_v18 = vld [vmem:[%s205_s1 + $0x8] sm:$0xff] }
   0xa   :  { %v53_v23 = vld [vmem:[%s206_s2 + $0x8] sm:$0xff]  ;;  %v52_v24 = vld [vmem:[%s206_s2] sm:$0xff] }
   0xc   :  { %62 = vadd.xlane.f32.xlu1 %v57_v7  ;;  %60 = vadd.xlane.f32.xlu0 %v56_v8  ;;  %v55_v29 = vld [vmem:[%s206_s2 + $0x18] sm:$0xff]  ;;  %v54_v30 = vld [vmem:[%s206_s2 + $0x10] sm:$0xff] }
  0x10   :  { %66 = vadd.xlane.f32.xlu1 %v59_v9  ;;  %64 = vadd.xlane.f32.xlu0 %v58_v10 }
  0x91   :  { %v40_v13 = vpop.xlane.xlu1 %39  ;;  %v36_v14 = vpop.xlane.xlu0 %35 }
  0x92   :  { %v45_v15 = vadd.f32 %v40_v13, %v33_v11  ;;  %v43_v16 = vadd.f32 %v36_v14, %v31_v12 }
  0x94   :  { %50 = vst.msk [vmem:[%s205_s1 + $0x10] sm:$0xff] %vm14_vm0, %v45_v15  ;;  %48 = vst.msk [vmem:[%s205_s1] sm:$0xff] %vm14_vm0, %v43_v16 }
  0x95   :  { %v42_v19 = vpop.xlane.xlu1 %41  ;;  %v38_v20 = vpop.xlane.xlu0 %37 }
  0x96   :  { %v46_v21 = vadd.f32 %v42_v19, %v34_v17  ;;  %v44_v22 = vadd.f32 %v38_v20, %v32_v18 }
  0x98   :  { %51 = vst.msk [vmem:[%s205_s1 + $0x18] sm:$0xff] %vm14_vm0, %v46_v21  ;;  %49 = vst.msk [vmem:[%s205_s1 + $0x8] sm:$0xff] %vm14_vm0, %v44_v22 }
  0x99   :  { %v63_v25 = vpop.xlane.xlu1 %62  ;;  %v61_v26 = vpop.xlane.xlu0 %60 }
  0x9a   :  { %v69_v27 = vadd.f32 %v63_v25, %v53_v23  ;;  %v68_v28 = vadd.f32 %v61_v26, %v52_v24 }
  0x9c   :  { %73 = vst.msk [vmem:[%s206_s2 + $0x8] sm:$0xff] %vm14_vm0, %v69_v27  ;;  %72 = vst.msk [vmem:[%s206_s2] sm:$0xff] %vm14_vm0, %v68_v28 }
  0x9d   :  { %v67_v31 = vpop.xlane.xlu1 %66  ;;  %v65_v32 = vpop.xlane.xlu0 %64 }
  0x9e   :  { %v71_v33 = vadd.f32 %v67_v31, %v55_v29  ;;  %v70_v34 = vadd.f32 %v65_v32, %v54_v30 }
  0xa0   :  { %75 = vst.msk [vmem:[%s206_s2 + $0x18] sm:$0xff] %vm14_vm0, %v71_v33  ;;  %74 = vst.msk [vmem:[%s206_s2 + $0x10] sm:$0xff] %vm14_vm0, %v70_v34 }

// kernel: squeeze.63
= control target key start
LH: loop header
LB: loop body
LE: loop exit
PB: predicated region body
PF: predicated region fallthrough
CT: control target
= control target key end

     0   :  { %vm258_vm0 = vcmask 130048   ;;  %s2137_s22 = smov 96   ;;  %s2138_s23 = smov 80   ;;  %s2831_s0 = inlined_call_operand.vmem [shape: bf16[64,128], index: 0, kind: input, shape index: {}]   ;;  %s2832_s1 = inlined_call_operand.vmem [shape: bf16[4,16,2,8,8], index: 1, kind: output, shape index: {}]  }
   0x1   :  { %v2002_v0 = vld [vmem:[%s2831_s0] sm:$0xff]   ;;  %v2010_v1 = vld [vmem:[%s2831_s0 + $0x10] sm:$0xff]   ;;  %v2011_v2 = vld [vmem:[%s2831_s0 + $0x8] sm:$0xff]  }
   0x2   :  { %v2003_v3 = vunpack.c.l.bf16 %v2002_v0  ;;  %v2004_v4 = vunpack.c.h.bf16 %v2002_v0  ;;  %v1995_v5 = vunpack.c.l.bf16 %v2010_v1  ;;  %v1996_v6 = vunpack.c.h.bf16 %v2010_v1  ;;  %v2009_v7 = vld [vmem:[%s2831_s0 + $0x18] sm:$0xff]   ;;  %v2008_v8 = vld [vmem:[%s2831_s0 + $0x20] sm:$0xff]   ;;  %v2007_v9 = vld [vmem:[%s2831_s0 + $0x28] sm:$0xff]  }
   0x3   :  { %v1999_v10 = vunpack.c.l.bf16 %v2011_v2  ;;  %v2000_v11 = vunpack.c.h.bf16 %v2011_v2  ;;  %v1991_v12 = vunpack.c.l.bf16 %v2009_v7  ;;  %v1992_v13 = vunpack.c.h.bf16 %v2009_v7  ;;  %v2006_v14 = vld [vmem:[%s2831_s0 + $0x30] sm:$0xff]   ;;  %v2005_v15 = vld [vmem:[%s2831_s0 + $0x38] sm:$0xff]   ;;  %s2136_s0 = smov 112  }
   0x4   :  { %265 = vst.msk [vmem:[#allocation0 + $0x40] ss:$8 sm:$0xf] %vm258_vm0, %v2004_v4   ;;  %267 = vst.msk [vmem:[#allocation0 + $0x40] ss:$8 sm:$0xf0] %vm258_vm0, %v2004_v4   ;;  %v2176_v16 = vpack.i.bf16 %v2004_v4, %v2003_v3  ;;  %v2026_v17 = vpack.i.bf16 %v1996_v6, %v1995_v5  ;;  %v1987_v18 = vunpack.c.l.bf16 %v2008_v8  ;;  %v1988_v19 = vunpack.c.h.bf16 %v2008_v8 }
   0x5   :  { %259 = vst.msk [vmem:[#allocation0] ss:$8 sm:$0xf] %vm258_vm0, %v2003_v3   ;;  %260 = vst.msk [vmem:[#allocation0] ss:$8 sm:$0xf0] %vm258_vm0, %v2003_v3   ;;  %v2021_v20 = vpack.i.bf16 %v2000_v11, %v1999_v10  ;;  %v1983_v21 = vunpack.c.l.bf16 %v2007_v9  ;;  %v1984_v22 = vunpack.c.h.bf16 %v2007_v9  ;;  %v2031_v23 = vpack.i.bf16 %v1992_v13, %v1991_v12 }
   0x6   :  { %293 = vst.msk [vmem:[#allocation0 + $0x140] ss:$8 sm:$0xf] %vm258_vm0, %v1996_v6   ;;  %295 = vst.msk [vmem:[#allocation0 + $0x140] ss:$8 sm:$0xf0] %vm258_vm0, %v1996_v6   ;;  %2017 = vrot.lane.b32.xlu0 %v2176_v16, %s2136_s0  ;;  %2027 = vrot.lane.b32.xlu1 %v2026_v17, %s2136_s0  ;;  %v1979_v24 = vunpack.c.l.bf16 %v2006_v14  ;;  %v1980_v25 = vunpack.c.h.bf16 %v2006_v14  ;;  %v1975_v26 = vunpack.c.l.bf16 %v2005_v15  ;;  %v1976_v27 = vunpack.c.h.bf16 %v2005_v15 }
   0x7   :  { %286 = vst.msk [vmem:[#allocation0 + $0x100] ss:$8 sm:$0xf] %vm258_vm0, %v1995_v5   ;;  %288 = vst.msk [vmem:[#allocation0 + $0x100] ss:$8 sm:$0xf0] %vm258_vm0, %v1995_v5   ;;  %v2036_v28 = vpack.i.bf16 %v1988_v19, %v1987_v18  ;;  %v2041_v29 = vpack.i.bf16 %v1984_v22, %v1983_v21 }
   0x8   :  { %272 = vst.msk [vmem:[#allocation0 + $0x80] ss:$8 sm:$0xf] %vm258_vm0, %v1999_v10   ;;  %274 = vst.msk [vmem:[#allocation0 + $0x80] ss:$8 sm:$0xf0] %vm258_vm0, %v1999_v10   ;;  %v2046_v30 = vpack.i.bf16 %v1980_v25, %v1979_v24  ;;  %v2051_v31 = vpack.i.bf16 %v1976_v27, %v1975_v26 }
   0x9   :  { %279 = vst.msk [vmem:[#allocation0 + $0xc0] ss:$8 sm:$0xf] %vm258_vm0, %v2000_v11   ;;  %281 = vst.msk [vmem:[#allocation0 + $0xc0] ss:$8 sm:$0xf0] %vm258_vm0, %v2000_v11  }
   0xa   :  { %300 = vst.msk [vmem:[#allocation0 + $0x180] ss:$8 sm:$0xf] %vm258_vm0, %v1991_v12   ;;  %302 = vst.msk [vmem:[#allocation0 + $0x180] ss:$8 sm:$0xf0] %vm258_vm0, %v1991_v12   ;;  %2022 = vrot.lane.b32.xlu0 %v2021_v20, %s2136_s0  ;;  %2032 = vrot.lane.b32.xlu1 %v2031_v23, %s2136_s0 }
   0xb   :  { %307 = vst.msk [vmem:[#allocation0 + $0x1c0] ss:$8 sm:$0xf] %vm258_vm0, %v1992_v13   ;;  %309 = vst.msk [vmem:[#allocation0 + $0x1c0] ss:$8 sm:$0xf0] %vm258_vm0, %v1992_v13  }
   0xc   :  { %314 = vst.msk [vmem:[#allocation0 + $0x200] ss:$8 sm:$0xf] %vm258_vm0, %v1987_v18   ;;  %316 = vst.msk [vmem:[#allocation0 + $0x200] ss:$8 sm:$0xf0] %vm258_vm0, %v1987_v18  }
   0xd   :  { %321 = vst.msk [vmem:[#allocation0 + $0x240] ss:$8 sm:$0xf] %vm258_vm0, %v1988_v19   ;;  %323 = vst.msk [vmem:[#allocation0 + $0x240] ss:$8 sm:$0xf0] %vm258_vm0, %v1988_v19  }
   0xe   :  { %328 = vst.msk [vmem:[#allocation0 + $0x280] ss:$8 sm:$0xf] %vm258_vm0, %v1983_v21   ;;  %330 = vst.msk [vmem:[#allocation0 + $0x280] ss:$8 sm:$0xf0] %vm258_vm0, %v1983_v21   ;;  %2037 = vrot.lane.b32.xlu0 %v2036_v28, %s2136_s0  ;;  %2042 = vrot.lane.b32.xlu1 %v2041_v29, %s2136_s0 }
   0xf   :  { %335 = vst.msk [vmem:[#allocation0 + $0x2c0] ss:$8 sm:$0xf] %vm258_vm0, %v1984_v22   ;;  %337 = vst.msk [vmem:[#allocation0 + $0x2c0] ss:$8 sm:$0xf0] %vm258_vm0, %v1984_v22  }
  0x10   :  { %342 = vst.msk [vmem:[#allocation0 + $0x300] ss:$8 sm:$0xf] %vm258_vm0, %v1979_v24   ;;  %344 = vst.msk [vmem:[#allocation0 + $0x300] ss:$8 sm:$0xf0] %vm258_vm0, %v1979_v24  }
  0x11   :  { %349 = vst.msk [vmem:[#allocation0 + $0x340] ss:$8 sm:$0xf] %vm258_vm0, %v1980_v25   ;;  %351 = vst.msk [vmem:[#allocation0 + $0x340] ss:$8 sm:$0xf0] %vm258_vm0, %v1980_v25  }
  0x12   :  { %356 = vst.msk [vmem:[#allocation0 + $0x380] ss:$8 sm:$0xf] %vm258_vm0, %v1975_v26   ;;  %358 = vst.msk [vmem:[#allocation0 + $0x380] ss:$8 sm:$0xf0] %vm258_vm0, %v1975_v26   ;;  %2047 = vrot.lane.b32.xlu0 %v2046_v30, %s2136_s0  ;;  %2052 = vrot.lane.b32.xlu1 %v2051_v31, %s2136_s0 }
  0x13   :  { %363 = vst.msk [vmem:[#allocation0 + $0x3c0] ss:$8 sm:$0xf] %vm258_vm0, %v1976_v27   ;;  %365 = vst.msk [vmem:[#allocation0 + $0x3c0] ss:$8 sm:$0xf0] %vm258_vm0, %v1976_v27  }
  0x16   :  { %2057 = vrot.lane.b32.xlu0 %v2176_v16, %s2137_s22  ;;  %2062 = vrot.lane.b32.xlu1 %v2021_v20, %s2137_s22 }
  0x1a   :  { %2067 = vrot.lane.b32.xlu0 %v2026_v17, %s2137_s22  ;;  %2072 = vrot.lane.b32.xlu1 %v2031_v23, %s2137_s22 }
  0x1e   :  { %2077 = vrot.lane.b32.xlu0 %v2036_v28, %s2137_s22  ;;  %2082 = vrot.lane.b32.xlu1 %v2041_v29, %s2137_s22 }
  0x22   :  { %2087 = vrot.lane.b32.xlu0 %v2046_v30, %s2137_s22  ;;  %2092 = vrot.lane.b32.xlu1 %v2051_v31, %s2137_s22 }
  0x26   :  { %2097 = vrot.lane.b32.xlu0 %v2176_v16, %s2138_s23  ;;  %2102 = vrot.lane.b32.xlu1 %v2021_v20, %s2138_s23 }
  0x2a   :  { %2107 = vrot.lane.b32.xlu0 %v2026_v17, %s2138_s23  ;;  %2112 = vrot.lane.b32.xlu1 %v2031_v23, %s2138_s23 }
  0x2e   :  { %2117 = vrot.lane.b32.xlu0 %v2036_v28, %s2138_s23  ;;  %2122 = vrot.lane.b32.xlu1 %v2041_v29, %s2138_s23 }
  0x32   :  { %2127 = vrot.lane.b32.xlu0 %v2046_v30, %s2138_s23  ;;  %2132 = vrot.lane.b32.xlu1 %v2051_v31, %s2138_s23 }
  0x78   :  { %v2018_v32 = vpop.permute.xlu0 %2017  ;;  %v2028_v33 = vpop.permute.xlu1 %2027 }
  0x79   :  { %v2020_v34 = vunpack.i.h.bf16 %v2018_v32  ;;  %v2019_v35 = vunpack.i.l.bf16 %v2018_v32  ;;  %v2030_v36 = vunpack.i.h.bf16 %v2028_v33  ;;  %v2029_v37 = vunpack.i.l.bf16 %v2028_v33 }
  0x7b   :  { %380 = vst.msk [vmem:[#allocation0 + $0x41] ss:$8 sm:$0xf] %vm258_vm0, %v2020_v34   ;;  %382 = vst.msk [vmem:[#allocation0 + $0x41] ss:$8 sm:$0xf0] %vm258_vm0, %v2020_v34  }
  0x7c   :  { %371 = vst.msk [vmem:[#allocation0 + $0x1] ss:$8 sm:$0xf] %vm258_vm0, %v2019_v35   ;;  %373 = vst.msk [vmem:[#allocation0 + $0x1] ss:$8 sm:$0xf0] %vm258_vm0, %v2019_v35   ;;  %v2023_v38 = vpop.permute.xlu0 %2022  ;;  %v2033_v39 = vpop.permute.xlu1 %2032 }
  0x7d   :  { %416 = vst.msk [vmem:[#allocation0 + $0x141] ss:$8 sm:$0xf] %vm258_vm0, %v2030_v36   ;;  %418 = vst.msk [vmem:[#allocation0 + $0x141] ss:$8 sm:$0xf0] %vm258_vm0, %v2030_v36   ;;  %v2025_v40 = vunpack.i.h.bf16 %v2023_v38  ;;  %v2024_v41 = vunpack.i.l.bf16 %v2023_v38  ;;  %v2035_v42 = vunpack.i.h.bf16 %v2033_v39  ;;  %v2034_v43 = vunpack.i.l.bf16 %v2033_v39 }
  0x7e   :  { %407 = vst.msk [vmem:[#allocation0 + $0x101] ss:$8 sm:$0xf] %vm258_vm0, %v2029_v37   ;;  %409 = vst.msk [vmem:[#allocation0 + $0x101] ss:$8 sm:$0xf0] %vm258_vm0, %v2029_v37  }
  0x7f   :  { %398 = vst.msk [vmem:[#allocation0 + $0xc1] ss:$8 sm:$0xf] %vm258_vm0, %v2025_v40   ;;  %400 = vst.msk [vmem:[#allocation0 + $0xc1] ss:$8 sm:$0xf0] %vm258_vm0, %v2025_v40  }
  0x80   :  { %389 = vst.msk [vmem:[#allocation0 + $0x81] ss:$8 sm:$0xf] %vm258_vm0, %v2024_v41   ;;  %391 = vst.msk [vmem:[#allocation0 + $0x81] ss:$8 sm:$0xf0] %vm258_vm0, %v2024_v41   ;;  %v2038_v44 = vpop.permute.xlu0 %2037  ;;  %v2043_v45 = vpop.permute.xlu1 %2042 }
  0x81   :  { %434 = vst.msk [vmem:[#allocation0 + $0x1c1] ss:$8 sm:$0xf] %vm258_vm0, %v2035_v42   ;;  %436 = vst.msk [vmem:[#allocation0 + $0x1c1] ss:$8 sm:$0xf0] %vm258_vm0, %v2035_v42   ;;  %v2040_v46 = vunpack.i.h.bf16 %v2038_v44  ;;  %v2039_v47 = vunpack.i.l.bf16 %v2038_v44  ;;  %v2045_v48 = vunpack.i.h.bf16 %v2043_v45  ;;  %v2044_v49 = vunpack.i.l.bf16 %v2043_v45 }
  0x82   :  { %425 = vst.msk [vmem:[#allocation0 + $0x181] ss:$8 sm:$0xf] %vm258_vm0, %v2034_v43   ;;  %427 = vst.msk [vmem:[#allocation0 + $0x181] ss:$8 sm:$0xf0] %vm258_vm0, %v2034_v43  }
  0x83   :  { %452 = vst.msk [vmem:[#allocation0 + $0x241] ss:$8 sm:$0xf] %vm258_vm0, %v2040_v46   ;;  %454 = vst.msk [vmem:[#allocation0 + $0x241] ss:$8 sm:$0xf0] %vm258_vm0, %v2040_v46  }
  0x84   :  { %443 = vst.msk [vmem:[#allocation0 + $0x201] ss:$8 sm:$0xf] %vm258_vm0, %v2039_v47   ;;  %445 = vst.msk [vmem:[#allocation0 + $0x201] ss:$8 sm:$0xf0] %vm258_vm0, %v2039_v47   ;;  %v2048_v50 = vpop.permute.xlu0 %2047  ;;  %v2053_v51 = vpop.permute.xlu1 %2052 }
  0x85   :  { %470 = vst.msk [vmem:[#allocation0 + $0x2c1] ss:$8 sm:$0xf] %vm258_vm0, %v2045_v48   ;;  %472 = vst.msk [vmem:[#allocation0 + $0x2c1] ss:$8 sm:$0xf0] %vm258_vm0, %v2045_v48   ;;  %v2050_v52 = vunpack.i.h.bf16 %v2048_v50  ;;  %v2049_v53 = vunpack.i.l.bf16 %v2048_v50  ;;  %v2055_v54 = vunpack.i.h.bf16 %v2053_v51  ;;  %v2054_v55 = vunpack.i.l.bf16 %v2053_v51 }
  0x86   :  { %461 = vst.msk [vmem:[#allocation0 + $0x281] ss:$8 sm:$0xf] %vm258_vm0, %v2044_v49   ;;  %463 = vst.msk [vmem:[#allocation0 + $0x281] ss:$8 sm:$0xf0] %vm258_vm0, %v2044_v49  }
  0x87   :  { %488 = vst.msk [vmem:[#allocation0 + $0x341] ss:$8 sm:$0xf] %vm258_vm0, %v2050_v52   ;;  %490 = vst.msk [vmem:[#allocation0 + $0x341] ss:$8 sm:$0xf0] %vm258_vm0, %v2050_v52  }
  0x88   :  { %479 = vst.msk [vmem:[#allocation0 + $0x301] ss:$8 sm:$0xf] %vm258_vm0, %v2049_v53   ;;  %481 = vst.msk [vmem:[#allocation0 + $0x301] ss:$8 sm:$0xf0] %vm258_vm0, %v2049_v53   ;;  %v2058_v56 = vpop.permute.xlu0 %2057  ;;  %v2063_v57 = vpop.permute.xlu1 %2062 }
  0x89   :  { %506 = vst.msk [vmem:[#allocation0 + $0x3c1] ss:$8 sm:$0xf] %vm258_vm0, %v2055_v54   ;;  %508 = vst.msk [vmem:[#allocation0 + $0x3c1] ss:$8 sm:$0xf0] %vm258_vm0, %v2055_v54   ;;  %v2060_v58 = vunpack.i.h.bf16 %v2058_v56  ;;  %v2059_v59 = vunpack.i.l.bf16 %v2058_v56  ;;  %v2065_v60 = vunpack.i.h.bf16 %v2063_v57  ;;  %v2064_v61 = vunpack.i.l.bf16 %v2063_v57 }
  0x8a   :  { %497 = vst.msk [vmem:[#allocation0 + $0x381] ss:$8 sm:$0xf] %vm258_vm0, %v2054_v55   ;;  %499 = vst.msk [vmem:[#allocation0 + $0x381] ss:$8 sm:$0xf0] %vm258_vm0, %v2054_v55  }
  0x8b   :  { %523 = vst.msk [vmem:[#allocation0 + $0x42] ss:$8 sm:$0xf] %vm258_vm0, %v2060_v58   ;;  %525 = vst.msk [vmem:[#allocation0 + $0x42] ss:$8 sm:$0xf0] %vm258_vm0, %v2060_v58  }
  0x8c   :  { %514 = vst.msk [vmem:[#allocation0 + $0x2] ss:$8 sm:$0xf] %vm258_vm0, %v2059_v59   ;;  %516 = vst.msk [vmem:[#allocation0 + $0x2] ss:$8 sm:$0xf0] %vm258_vm0, %v2059_v59   ;;  %v2068_v62 = vpop.permute.xlu0 %2067  ;;  %v2073_v63 = vpop.permute.xlu1 %2072 }
  0x8d   :  { %541 = vst.msk [vmem:[#allocation0 + $0xc2] ss:$8 sm:$0xf] %vm258_vm0, %v2065_v60   ;;  %543 = vst.msk [vmem:[#allocation0 + $0xc2] ss:$8 sm:$0xf0] %vm258_vm0, %v2065_v60   ;;  %v2070_v0 = vunpack.i.h.bf16 %v2068_v62  ;;  %v2069_v1 = vunpack.i.l.bf16 %v2068_v62  ;;  %v2075_v2 = vunpack.i.h.bf16 %v2073_v63  ;;  %v2074_v3 = vunpack.i.l.bf16 %v2073_v63 }
  0x8e   :  { %532 = vst.msk [vmem:[#allocation0 + $0x82] ss:$8 sm:$0xf] %vm258_vm0, %v2064_v61   ;;  %534 = vst.msk [vmem:[#allocation0 + $0x82] ss:$8 sm:$0xf0] %vm258_vm0, %v2064_v61  }
  0x8f   :  { %559 = vst.msk [vmem:[#allocation0 + $0x142] ss:$8 sm:$0xf] %vm258_vm0, %v2070_v0   ;;  %561 = vst.msk [vmem:[#allocation0 + $0x142] ss:$8 sm:$0xf0] %vm258_vm0, %v2070_v0  }
  0x90   :  { %550 = vst.msk [vmem:[#allocation0 + $0x102] ss:$8 sm:$0xf] %vm258_vm0, %v2069_v1   ;;  %552 = vst.msk [vmem:[#allocation0 + $0x102] ss:$8 sm:$0xf0] %vm258_vm0, %v2069_v1   ;;  %v2078_v4 = vpop.permute.xlu0 %2077  ;;  %v2083_v5 = vpop.permute.xlu1 %2082 }
  0x91   :  { %577 = vst.msk [vmem:[#allocation0 + $0x1c2] ss:$8 sm:$0xf] %vm258_vm0, %v2075_v2   ;;  %579 = vst.msk [vmem:[#allocation0 + $0x1c2] ss:$8 sm:$0xf0] %vm258_vm0, %v2075_v2   ;;  %v2080_v6 = vunpack.i.h.bf16 %v2078_v4  ;;  %v2079_v7 = vunpack.i.l.bf16 %v2078_v4  ;;  %v2085_v8 = vunpack.i.h.bf16 %v2083_v5  ;;  %v2084_v9 = vunpack.i.l.bf16 %v2083_v5 }
  0x92   :  { %568 = vst.msk [vmem:[#allocation0 + $0x182] ss:$8 sm:$0xf] %vm258_vm0, %v2074_v3   ;;  %570 = vst.msk [vmem:[#allocation0 + $0x182] ss:$8 sm:$0xf0] %vm258_vm0, %v2074_v3  }
  0x93   :  { %595 = vst.msk [vmem:[#allocation0 + $0x242] ss:$8 sm:$0xf] %vm258_vm0, %v2080_v6   ;;  %597 = vst.msk [vmem:[#allocation0 + $0x242] ss:$8 sm:$0xf0] %vm258_vm0, %v2080_v6  }
  0x94   :  { %586 = vst.msk [vmem:[#allocation0 + $0x202] ss:$8 sm:$0xf] %vm258_vm0, %v2079_v7   ;;  %588 = vst.msk [vmem:[#allocation0 + $0x202] ss:$8 sm:$0xf0] %vm258_vm0, %v2079_v7   ;;  %v2088_v10 = vpop.permute.xlu0 %2087  ;;  %v2093_v11 = vpop.permute.xlu1 %2092 }
  0x95   :  { %613 = vst.msk [vmem:[#allocation0 + $0x2c2] ss:$8 sm:$0xf] %vm258_vm0, %v2085_v8   ;;  %615 = vst.msk [vmem:[#allocation0 + $0x2c2] ss:$8 sm:$0xf0] %vm258_vm0, %v2085_v8   ;;  %v2090_v12 = vunpack.i.h.bf16 %v2088_v10  ;;  %v2089_v13 = vunpack.i.l.bf16 %v2088_v10  ;;  %v2095_v14 = vunpack.i.h.bf16 %v2093_v11  ;;  %v2094_v15 = vunpack.i.l.bf16 %v2093_v11 }
  0x96   :  { %604 = vst.msk [vmem:[#allocation0 + $0x282] ss:$8 sm:$0xf] %vm258_vm0, %v2084_v9   ;;  %606 = vst.msk [vmem:[#allocation0 + $0x282] ss:$8 sm:$0xf0] %vm258_vm0, %v2084_v9  }
  0x97   :  { %631 = vst.msk [vmem:[#allocation0 + $0x342] ss:$8 sm:$0xf] %vm258_vm0, %v2090_v12   ;;  %633 = vst.msk [vmem:[#allocation0 + $0x342] ss:$8 sm:$0xf0] %vm258_vm0, %v2090_v12  }
  0x98   :  { %622 = vst.msk [vmem:[#allocation0 + $0x302] ss:$8 sm:$0xf] %vm258_vm0, %v2089_v13   ;;  %624 = vst.msk [vmem:[#allocation0 + $0x302] ss:$8 sm:$0xf0] %vm258_vm0, %v2089_v13   ;;  %v2098_v16 = vpop.permute.xlu0 %2097  ;;  %v2103_v17 = vpop.permute.xlu1 %2102 }
  0x99   :  { %649 = vst.msk [vmem:[#allocation0 + $0x3c2] ss:$8 sm:$0xf] %vm258_vm0, %v2095_v14   ;;  %651 = vst.msk [vmem:[#allocation0 + $0x3c2] ss:$8 sm:$0xf0] %vm258_vm0, %v2095_v14   ;;  %v2100_v18 = vunpack.i.h.bf16 %v2098_v16  ;;  %v2099_v19 = vunpack.i.l.bf16 %v2098_v16  ;;  %v2105_v20 = vunpack.i.h.bf16 %v2103_v17  ;;  %v2104_v21 = vunpack.i.l.bf16 %v2103_v17 }
  0x9a   :  { %640 = vst.msk [vmem:[#allocation0 + $0x382] ss:$8 sm:$0xf] %vm258_vm0, %v2094_v15   ;;  %642 = vst.msk [vmem:[#allocation0 + $0x382] ss:$8 sm:$0xf0] %vm258_vm0, %v2094_v15  }
  0x9b   :  { %666 = vst.msk [vmem:[#allocation0 + $0x43] ss:$8 sm:$0xf] %vm258_vm0, %v2100_v18   ;;  %668 = vst.msk [vmem:[#allocation0 + $0x43] ss:$8 sm:$0xf0] %vm258_vm0, %v2100_v18  }
  0x9c   :  { %657 = vst.msk [vmem:[#allocation0 + $0x3] ss:$8 sm:$0xf] %vm258_vm0, %v2099_v19   ;;  %659 = vst.msk [vmem:[#allocation0 + $0x3] ss:$8 sm:$0xf0] %vm258_vm0, %v2099_v19   ;;  %v2108_v22 = vpop.permute.xlu0 %2107  ;;  %v2113_v23 = vpop.permute.xlu1 %2112 }
  0x9d   :  { %684 = vst.msk [vmem:[#allocation0 + $0xc3] ss:$8 sm:$0xf] %vm258_vm0, %v2105_v20   ;;  %686 = vst.msk [vmem:[#allocation0 + $0xc3] ss:$8 sm:$0xf0] %vm258_vm0, %v2105_v20   ;;  %v2110_v24 = vunpack.i.h.bf16 %v2108_v22  ;;  %v2109_v25 = vunpack.i.l.bf16 %v2108_v22  ;;  %v2115_v26 = vunpack.i.h.bf16 %v2113_v23  ;;  %v2114_v27 = vunpack.i.l.bf16 %v2113_v23 }
  0x9e   :  { %675 = vst.msk [vmem:[#allocation0 + $0x83] ss:$8 sm:$0xf] %vm258_vm0, %v2104_v21   ;;  %677 = vst.msk [vmem:[#allocation0 + $0x83] ss:$8 sm:$0xf0] %vm258_vm0, %v2104_v21  }
  0x9f   :  { %702 = vst.msk [vmem:[#allocation0 + $0x143] ss:$8 sm:$0xf] %vm258_vm0, %v2110_v24   ;;  %704 = vst.msk [vmem:[#allocation0 + $0x143] ss:$8 sm:$0xf0] %vm258_vm0, %v2110_v24  }
  0xa0   :  { %693 = vst.msk [vmem:[#allocation0 + $0x103] ss:$8 sm:$0xf] %vm258_vm0, %v2109_v25   ;;  %695 = vst.msk [vmem:[#allocation0 + $0x103] ss:$8 sm:$0xf0] %vm258_vm0, %v2109_v25   ;;  %v2118_v28 = vpop.permute.xlu0 %2117  ;;  %v2123_v29 = vpop.permute.xlu1 %2122 }
  0xa1   :  { %720 = vst.msk [vmem:[#allocation0 + $0x1c3] ss:$8 sm:$0xf] %vm258_vm0, %v2115_v26   ;;  %722 = vst.msk [vmem:[#allocation0 + $0x1c3] ss:$8 sm:$0xf0] %vm258_vm0, %v2115_v26   ;;  %v2120_v30 = vunpack.i.h.bf16 %v2118_v28  ;;  %v2119_v31 = vunpack.i.l.bf16 %v2118_v28  ;;  %v2125_v32 = vunpack.i.h.bf16 %v2123_v29  ;;  %v2124_v33 = vunpack.i.l.bf16 %v2123_v29 }
  0xa2   :  { %711 = vst.msk [vmem:[#allocation0 + $0x183] ss:$8 sm:$0xf] %vm258_vm0, %v2114_v27   ;;  %713 = vst.msk [vmem:[#allocation0 + $0x183] ss:$8 sm:$0xf0] %vm258_vm0, %v2114_v27  }
  0xa3   :  { %v799_v34 = vld [vmem:[#allocation0] sm:$0xf]  ;;  %v804_v35 = vld [vmem:[#allocation0 + $0x8] sm:$0xf]  ;;  %v810_v36 = vld [vmem:[#allocation0 + $0x10] sm:$0xf] }
  0xa4   :  { %v817_v37 = vld [vmem:[#allocation0 + $0x18] sm:$0xf]  ;;  %v824_v38 = vld [vmem:[#allocation0 + $0x20] sm:$0xf]  ;;  %v831_v39 = vld [vmem:[#allocation0 + $0x28] sm:$0xf]  ;;  %v2128_v50 = vpop.permute.xlu0 %2127  ;;  %v2313_v51 = vpop.permute.xlu1 %2132 }
  0xa5   :  { %v2139_v40 = vmov 0.0   ;;  %738 = vst.msk [vmem:[#allocation0 + $0x243] ss:$8 sm:$0xf] %vm258_vm0, %v2120_v30   ;;  %v838_v44 = vld [vmem:[#allocation0 + $0x30] sm:$0xf]  ;;  %v2130_v58 = vunpack.i.h.bf16 %v2128_v50  ;;  %v2129_v1 = vunpack.i.l.bf16 %v2128_v50  ;;  %v2135_v8 = vunpack.i.h.bf16 %v2313_v51 }
  0xa6   :  { %v800_v41 = vpack.c.bf16 %v2139_v40, %v799_v34  ;;  %v805_v42 = vpack.c.bf16 %v2139_v40, %v804_v35  ;;  %v811_v43 = vpack.c.bf16 %v2139_v40, %v810_v36  ;;  %740 = vst.msk [vmem:[#allocation0 + $0x243] ss:$8 sm:$0xf0] %vm258_vm0, %v2120_v30   ;;  %729 = vst.msk [vmem:[#allocation0 + $0x203] ss:$8 sm:$0xf] %vm258_vm0, %v2119_v31   ;;  %v2134_v15 = vunpack.i.l.bf16 %v2313_v51 }
  0xa7   :  { %731 = vst.msk [vmem:[#allocation0 + $0x203] ss:$8 sm:$0xf0] %vm258_vm0, %v2119_v31   ;;  %756 = vst.msk [vmem:[#allocation0 + $0x2c3] ss:$8 sm:$0xf] %vm258_vm0, %v2125_v32   ;;  %v818_v47 = vpack.c.bf16 %v2139_v40, %v817_v37  ;;  %v825_v48 = vpack.c.bf16 %v2139_v40, %v824_v38  ;;  %v832_v49 = vpack.c.bf16 %v2139_v40, %v831_v39 }
  0xa8   :  { %758 = vst.msk [vmem:[#allocation0 + $0x2c3] ss:$8 sm:$0xf0] %vm258_vm0, %v2125_v32   ;;  %747 = vst.msk [vmem:[#allocation0 + $0x283] ss:$8 sm:$0xf] %vm258_vm0, %v2124_v33   ;;  %v839_v55 = vpack.c.bf16 %v2139_v40, %v838_v44 }
  0xa9   :  { %749 = vst.msk [vmem:[#allocation0 + $0x283] ss:$8 sm:$0xf0] %vm258_vm0, %v2124_v33   ;;  %v845_v45 = vld [vmem:[#allocation0 + $0x38] sm:$0xf]  ;;  %802 = vst [vmem:[%s2832_s1] sm:$0x3] %v800_v41 }
  0xaa   :  { %v852_v46 = vld [vmem:[#allocation0 + $0x40] sm:$0xf]  ;;  %v859_v52 = vld [vmem:[#allocation0 + $0x48] sm:$0xf]  ;;  %v866_v53 = vld [vmem:[#allocation0 + $0x50] sm:$0xf]  ;;  %v846_v56 = vpack.c.bf16 %v2139_v40, %v845_v45 }
  0xab   :  { %v873_v54 = vld [vmem:[#allocation0 + $0x58] sm:$0xf]  ;;  %v853_v57 = vpack.c.bf16 %v2139_v40, %v852_v46  ;;  %1846 = vst [vmem:[%s2832_s1 + $0x2] sm:$0x3] %v805_v42  ;;  %1847 = vst [vmem:[%s2832_s1 + $0x4] sm:$0x3] %v811_v43  ;;  %v860_v62 = vpack.c.bf16 %v2139_v40, %v859_v52  ;;  %v867_v63 = vpack.c.bf16 %v2139_v40, %v866_v53 }
  0xac   :  { %v880_v59 = vld [vmem:[#allocation0 + $0x60] sm:$0xf]  ;;  %v887_v60 = vld [vmem:[#allocation0 + $0x68] sm:$0xf]  ;;  %v894_v61 = vld [vmem:[#allocation0 + $0x70] sm:$0xf]  ;;  %v874_v0 = vpack.c.bf16 %v2139_v40, %v873_v54 }
  0xad   :  { %1848 = vst [vmem:[%s2832_s1 + $0x6] sm:$0x3] %v818_v47  ;;  %1849 = vst [vmem:[%s2832_s1 + $0x8] sm:$0x3] %v825_v48  ;;  %v901_v2 = vld [vmem:[#allocation0 + $0x78] sm:$0xf]  ;;  %v881_v5 = vpack.c.bf16 %v2139_v40, %v880_v59  ;;  %v888_v6 = vpack.c.bf16 %v2139_v40, %v887_v60  ;;  %v895_v7 = vpack.c.bf16 %v2139_v40, %v894_v61 }
  0xae   :  { %1850 = vst [vmem:[%s2832_s1 + $0xa] sm:$0x3] %v832_v49  ;;  %v908_v3 = vld [vmem:[#allocation0 + $0x80] sm:$0xf]  ;;  %v915_v4 = vld [vmem:[#allocation0 + $0x88] sm:$0xf]  ;;  %v902_v12 = vpack.c.bf16 %v2139_v40, %v901_v2 }
  0xaf   :  { %1851 = vst [vmem:[%s2832_s1 + $0xc] sm:$0x3] %v839_v55  ;;  %1852 = vst [vmem:[%s2832_s1 + $0xe] sm:$0x3] %v846_v56  ;;  %v922_v9 = vld [vmem:[#allocation0 + $0x90] sm:$0xf]  ;;  %v909_v13 = vpack.c.bf16 %v2139_v40, %v908_v3  ;;  %v916_v14 = vpack.c.bf16 %v2139_v40, %v915_v4 }
  0xb0   :  { %1853 = vst [vmem:[%s2832_s1 + $0x10] sm:$0x3] %v853_v57  ;;  %774 = vst.msk [vmem:[#allocation0 + $0x343] ss:$8 sm:$0xf] %vm258_vm0, %v2130_v58   ;;  %v923_v19 = vpack.c.bf16 %v2139_v40, %v922_v9 }
  0xb1   :  { %776 = vst.msk [vmem:[#allocation0 + $0x343] ss:$8 sm:$0xf0] %vm258_vm0, %v2130_v58   ;;  %v929_v10 = vld [vmem:[#allocation0 + $0x98] sm:$0xf] }
  0xb2   :  { %v936_v11 = vld [vmem:[#allocation0 + $0xa0] sm:$0xf]  ;;  %1854 = vst [vmem:[%s2832_s1 + $0x12] sm:$0x3] %v860_v62  ;;  %1855 = vst [vmem:[%s2832_s1 + $0x14] sm:$0x3] %v867_v63  ;;  %v930_v20 = vpack.c.bf16 %v2139_v40, %v929_v10 }
  0xb3   :  { %1856 = vst [vmem:[%s2832_s1 + $0x16] sm:$0x3] %v874_v0  ;;  %765 = vst.msk [vmem:[#allocation0 + $0x303] ss:$8 sm:$0xf] %vm258_vm0, %v2129_v1   ;;  %v937_v21 = vpack.c.bf16 %v2139_v40, %v936_v11 }
  0xb4   :  { %767 = vst.msk [vmem:[#allocation0 + $0x303] ss:$8 sm:$0xf0] %vm258_vm0, %v2129_v1   ;;  %v943_v16 = vld [vmem:[#allocation0 + $0xa8] sm:$0xf] }
  0xb5   :  { %v950_v17 = vld [vmem:[#allocation0 + $0xb0] sm:$0xf]  ;;  %v957_v18 = vld [vmem:[#allocation0 + $0xb8] sm:$0xf]  ;;  %1857 = vst [vmem:[%s2832_s1 + $0x18] sm:$0x3] %v881_v5  ;;  %v944_v25 = vpack.c.bf16 %v2139_v40, %v943_v16 }
  0xb6   :  { %1858 = vst [vmem:[%s2832_s1 + $0x1a] sm:$0x3] %v888_v6  ;;  %1859 = vst [vmem:[%s2832_s1 + $0x1c] sm:$0x3] %v895_v7  ;;  %v964_v22 = vld [vmem:[#allocation0 + $0xc0] sm:$0xf]  ;;  %v951_v26 = vpack.c.bf16 %v2139_v40, %v950_v17  ;;  %v958_v27 = vpack.c.bf16 %v2139_v40, %v957_v18 }
  0xb7   :  { %792 = vst.msk [vmem:[#allocation0 + $0x3c3] ss:$8 sm:$0xf] %vm258_vm0, %v2135_v8   ;;  %794 = vst.msk [vmem:[#allocation0 + $0x3c3] ss:$8 sm:$0xf0] %vm258_vm0, %v2135_v8   ;;  %v965_v31 = vpack.c.bf16 %v2139_v40, %v964_v22 }
  0xb8   :  { %v971_v23 = vld [vmem:[#allocation0 + $0xc8] sm:$0xf]  ;;  %v978_v24 = vld [vmem:[#allocation0 + $0xd0] sm:$0xf]  ;;  %1860 = vst [vmem:[%s2832_s1 + $0x1e] sm:$0x3] %v902_v12 }
  0xb9   :  { %1861 = vst [vmem:[%s2832_s1 + $0x20] sm:$0x3] %v909_v13  ;;  %1862 = vst [vmem:[%s2832_s1 + $0x22] sm:$0x3] %v916_v14  ;;  %v985_v28 = vld [vmem:[#allocation0 + $0xd8] sm:$0xf]  ;;  %v972_v32 = vpack.c.bf16 %v2139_v40, %v971_v23  ;;  %v979_v33 = vpack.c.bf16 %v2139_v40, %v978_v24 }
  0xba   :  { %783 = vst.msk [vmem:[#allocation0 + $0x383] ss:$8 sm:$0xf] %vm258_vm0, %v2134_v15   ;;  %785 = vst.msk [vmem:[#allocation0 + $0x383] ss:$8 sm:$0xf0] %vm258_vm0, %v2134_v15   ;;  %v986_v37 = vpack.c.bf16 %v2139_v40, %v985_v28 }
  0xbb   :  { %v992_v29 = vld [vmem:[#allocation0 + $0xe0] sm:$0xf]  ;;  %v999_v30 = vld [vmem:[#allocation0 + $0xe8] sm:$0xf]  ;;  %1863 = vst [vmem:[%s2832_s1 + $0x24] sm:$0x3] %v923_v19 }
  0xbc   :  { %1864 = vst [vmem:[%s2832_s1 + $0x26] sm:$0x3] %v930_v20  ;;  %1865 = vst [vmem:[%s2832_s1 + $0x28] sm:$0x3] %v937_v21  ;;  %v1006_v34 = vld [vmem:[#allocation0 + $0xf0] sm:$0xf]  ;;  %v993_v38 = vpack.c.bf16 %v2139_v40, %v992_v29  ;;  %v1000_v39 = vpack.c.bf16 %v2139_v40, %v999_v30 }
  0xbd   :  { %v1013_v35 = vld [vmem:[#allocation0 + $0xf8] sm:$0xf]  ;;  %v1020_v36 = vld [vmem:[#allocation0 + $0x100] sm:$0xf]  ;;  %1866 = vst [vmem:[%s2832_s1 + $0x2a] sm:$0x3] %v944_v25  ;;  %v1007_v44 = vpack.c.bf16 %v2139_v40, %v1006_v34 }
  0xbe   :  { %1867 = vst [vmem:[%s2832_s1 + $0x2c] sm:$0x3] %v951_v26  ;;  %1868 = vst [vmem:[%s2832_s1 + $0x2e] sm:$0x3] %v958_v27  ;;  %v1027_v41 = vld [vmem:[#allocation0 + $0x108] sm:$0xf]  ;;  %v1014_v45 = vpack.c.bf16 %v2139_v40, %v1013_v35  ;;  %v1021_v46 = vpack.c.bf16 %v2139_v40, %v1020_v36 }
  0xbf   :  { %v1034_v42 = vld [vmem:[#allocation0 + $0x110] sm:$0xf]  ;;  %v1041_v43 = vld [vmem:[#allocation0 + $0x118] sm:$0xf]  ;;  %1869 = vst [vmem:[%s2832_s1 + $0x30] sm:$0x3] %v965_v31  ;;  %v1028_v50 = vpack.c.bf16 %v2139_v40, %v1027_v41 }
  0xc0   :  { %1870 = vst [vmem:[%s2832_s1 + $0x32] sm:$0x3] %v972_v32  ;;  %1871 = vst [vmem:[%s2832_s1 + $0x34] sm:$0x3] %v979_v33  ;;  %v1048_v47 = vld [vmem:[#allocation0 + $0x120] sm:$0xf]  ;;  %v1035_v51 = vpack.c.bf16 %v2139_v40, %v1034_v42  ;;  %v1042_v52 = vpack.c.bf16 %v2139_v40, %v1041_v43 }
  0xc1   :  { %v1055_v48 = vld [vmem:[#allocation0 + $0x128] sm:$0xf]  ;;  %v1062_v49 = vld [vmem:[#allocation0 + $0x130] sm:$0xf]  ;;  %1872 = vst [vmem:[%s2832_s1 + $0x36] sm:$0x3] %v986_v37  ;;  %v1049_v56 = vpack.c.bf16 %v2139_v40, %v1048_v47 }
  0xc2   :  { %1873 = vst [vmem:[%s2832_s1 + $0x38] sm:$0x3] %v993_v38  ;;  %1874 = vst [vmem:[%s2832_s1 + $0x3a] sm:$0x3] %v1000_v39  ;;  %v1069_v53 = vld [vmem:[#allocation0 + $0x138] sm:$0xf]  ;;  %v1056_v57 = vpack.c.bf16 %v2139_v40, %v1055_v48  ;;  %v1063_v58 = vpack.c.bf16 %v2139_v40, %v1062_v49 }
  0xc3   :  { %v1076_v54 = vld [vmem:[#allocation0 + $0x140] sm:$0xf]  ;;  %v1083_v55 = vld [vmem:[#allocation0 + $0x148] sm:$0xf]  ;;  %1875 = vst [vmem:[%s2832_s1 + $0x3c] sm:$0x3] %v1007_v44  ;;  %v1070_v62 = vpack.c.bf16 %v2139_v40, %v1069_v53 }
  0xc4   :  { %1876 = vst [vmem:[%s2832_s1 + $0x3e] sm:$0x3] %v1014_v45  ;;  %1877 = vst [vmem:[%s2832_s1 + $0x40] sm:$0x3] %v1021_v46  ;;  %v1090_v59 = vld [vmem:[#allocation0 + $0x150] sm:$0xf]  ;;  %v1077_v63 = vpack.c.bf16 %v2139_v40, %v1076_v54  ;;  %v1084_v0 = vpack.c.bf16 %v2139_v40, %v1083_v55 }
  0xc5   :  { %v1097_v60 = vld [vmem:[#allocation0 + $0x158] sm:$0xf]  ;;  %v1104_v61 = vld [vmem:[#allocation0 + $0x160] sm:$0xf]  ;;  %1878 = vst [vmem:[%s2832_s1 + $0x42] sm:$0x3] %v1028_v50  ;;  %v1091_v4 = vpack.c.bf16 %v2139_v40, %v1090_v59 }
  0xc6   :  { %1879 = vst [vmem:[%s2832_s1 + $0x44] sm:$0x3] %v1035_v51  ;;  %1880 = vst [vmem:[%s2832_s1 + $0x46] sm:$0x3] %v1042_v52  ;;  %v1111_v1 = vld [vmem:[#allocation0 + $0x168] sm:$0xf]  ;;  %v1098_v5 = vpack.c.bf16 %v2139_v40, %v1097_v60  ;;  %v1105_v6 = vpack.c.bf16 %v2139_v40, %v1104_v61 }
  0xc7   :  { %v1118_v2 = vld [vmem:[#allocation0 + $0x170] sm:$0xf]  ;;  %v1125_v3 = vld [vmem:[#allocation0 + $0x178] sm:$0xf]  ;;  %1881 = vst [vmem:[%s2832_s1 + $0x48] sm:$0x3] %v1049_v56  ;;  %v1112_v10 = vpack.c.bf16 %v2139_v40, %v1111_v1 }
  0xc8   :  { %1882 = vst [vmem:[%s2832_s1 + $0x4a] sm:$0x3] %v1056_v57  ;;  %1883 = vst [vmem:[%s2832_s1 + $0x4c] sm:$0x3] %v1063_v58  ;;  %v1160_v7 = vld [vmem:[#allocation0 + $0x1a0] sm:$0xf]  ;;  %v1119_v11 = vpack.c.bf16 %v2139_v40, %v1118_v2  ;;  %v1126_v12 = vpack.c.bf16 %v2139_v40, %v1125_v3 }
  0xc9   :  { %v1167_v8 = vld [vmem:[#allocation0 + $0x1a8] sm:$0xf]  ;;  %v1174_v9 = vld [vmem:[#allocation0 + $0x1b0] sm:$0xf]  ;;  %1884 = vst [vmem:[%s2832_s1 + $0x4e] sm:$0x3] %v1070_v62  ;;  %v1161_v13 = vpack.c.bf16 %v2139_v40, %v1160_v7 }
  0xca   :  { %1885 = vst [vmem:[%s2832_s1 + $0x50] sm:$0x3] %v1077_v63  ;;  %1886 = vst [vmem:[%s2832_s1 + $0x52] sm:$0x3] %v1084_v0  ;;  %v1168_v14 = vpack.c.bf16 %v2139_v40, %v1167_v8  ;;  %v1175_v15 = vpack.c.bf16 %v2139_v40, %v1174_v9  ;;  %v1181_v16 = vld [vmem:[#allocation0 + $0x1b8] sm:$0xf] }
  0xcb   :  { %v1132_v17 = vld [vmem:[#allocation0 + $0x180] sm:$0xf]  ;;  %v1139_v18 = vld [vmem:[#allocation0 + $0x188] sm:$0xf]  ;;  %1887 = vst [vmem:[%s2832_s1 + $0x54] sm:$0x3] %v1091_v4  ;;  %v1182_v19 = vpack.c.bf16 %v2139_v40, %v1181_v16 }
  0xcc   :  { %1888 = vst [vmem:[%s2832_s1 + $0x56] sm:$0x3] %v1098_v5  ;;  %1889 = vst [vmem:[%s2832_s1 + $0x58] sm:$0x3] %v1105_v6  ;;  %v1146_v20 = vld [vmem:[#allocation0 + $0x190] sm:$0xf]  ;;  %v1133_v23 = vpack.c.bf16 %v2139_v40, %v1132_v17  ;;  %v1140_v24 = vpack.c.bf16 %v2139_v40, %v1139_v18 }
  0xcd   :  { %v1153_v21 = vld [vmem:[#allocation0 + $0x198] sm:$0xf]  ;;  %v1188_v22 = vld [vmem:[#allocation0 + $0x1c0] sm:$0xf]  ;;  %1890 = vst [vmem:[%s2832_s1 + $0x5a] sm:$0x3] %v1112_v10  ;;  %v1147_v28 = vpack.c.bf16 %v2139_v40, %v1146_v20 }
  0xce   :  { %1891 = vst [vmem:[%s2832_s1 + $0x5c] sm:$0x3] %v1119_v11  ;;  %1892 = vst [vmem:[%s2832_s1 + $0x5e] sm:$0x3] %v1126_v12  ;;  %v1195_v25 = vld [vmem:[#allocation0 + $0x1c8] sm:$0xf]  ;;  %v1154_v29 = vpack.c.bf16 %v2139_v40, %v1153_v21  ;;  %v1189_v30 = vpack.c.bf16 %v2139_v40, %v1188_v22 }
  0xcf   :  { %1897 = vst [vmem:[%s2832_s1 + $0x68] sm:$0x3] %v1161_v13  ;;  %1898 = vst [vmem:[%s2832_s1 + $0x6a] sm:$0x3] %v1168_v14  ;;  %v1202_v26 = vld [vmem:[#allocation0 + $0x1d0] sm:$0xf]  ;;  %v1196_v34 = vpack.c.bf16 %v2139_v40, %v1195_v25 }
  0xd0   :  { %1899 = vst [vmem:[%s2832_s1 + $0x6c] sm:$0x3] %v1175_v15  ;;  %v1209_v27 = vld [vmem:[#allocation0 + $0x1d8] sm:$0xf]  ;;  %1900 = vst [vmem:[%s2832_s1 + $0x6e] sm:$0x3] %v1182_v19  ;;  %v1203_v35 = vpack.c.bf16 %v2139_v40, %v1202_v26 }
  0xd1   :  { %v1216_v31 = vld [vmem:[#allocation0 + $0x1e0] sm:$0xf]  ;;  %v1223_v32 = vld [vmem:[#allocation0 + $0x1e8] sm:$0xf]  ;;  %v1230_v33 = vld [vmem:[#allocation0 + $0x1f0] sm:$0xf]  ;;  %v1210_v36 = vpack.c.bf16 %v2139_v40, %v1209_v27 }
  0xd2   :  { %1893 = vst [vmem:[%s2832_s1 + $0x60] sm:$0x3] %v1133_v23  ;;  %1894 = vst [vmem:[%s2832_s1 + $0x62] sm:$0x3] %v1140_v24  ;;  %v1237_v37 = vld [vmem:[#allocation0 + $0x1f8] sm:$0xf]  ;;  %v1217_v41 = vpack.c.bf16 %v2139_v40, %v1216_v31  ;;  %v1224_v42 = vpack.c.bf16 %v2139_v40, %v1223_v32  ;;  %v1231_v43 = vpack.c.bf16 %v2139_v40, %v1230_v33 }
  0xd3   :  { %v1244_v38 = vld [vmem:[#allocation0 + $0x200] sm:$0xf]  ;;  %v1251_v39 = vld [vmem:[#allocation0 + $0x208] sm:$0xf]  ;;  %1895 = vst [vmem:[%s2832_s1 + $0x64] sm:$0x3] %v1147_v28  ;;  %v1238_v49 = vpack.c.bf16 %v2139_v40, %v1237_v37 }
  0xd4   :  { %1896 = vst [vmem:[%s2832_s1 + $0x66] sm:$0x3] %v1154_v29  ;;  %1901 = vst [vmem:[%s2832_s1 + $0x70] sm:$0x3] %v1189_v30  ;;  %v1245_v44 = vpack.c.bf16 %v2139_v40, %v1244_v38  ;;  %v1252_v45 = vpack.c.bf16 %v2139_v40, %v1251_v39  ;;  %v1258_v46 = vld [vmem:[#allocation0 + $0x210] sm:$0xf] }
  0xd5   :  { %v1265_v47 = vld [vmem:[#allocation0 + $0x218] sm:$0xf]  ;;  %v1272_v48 = vld [vmem:[#allocation0 + $0x220] sm:$0xf]  ;;  %1902 = vst [vmem:[%s2832_s1 + $0x72] sm:$0x3] %v1196_v34  ;;  %v1259_v50 = vpack.c.bf16 %v2139_v40, %v1258_v46 }
  0xd6   :  { %1903 = vst [vmem:[%s2832_s1 + $0x74] sm:$0x3] %v1203_v35  ;;  %1904 = vst [vmem:[%s2832_s1 + $0x76] sm:$0x3] %v1210_v36  ;;  %v1266_v51 = vpack.c.bf16 %v2139_v40, %v1265_v47  ;;  %v1273_v52 = vpack.c.bf16 %v2139_v40, %v1272_v48  ;;  %v1279_v53 = vld [vmem:[#allocation0 + $0x228] sm:$0xf] }
  0xd7   :  { %v1286_v54 = vld [vmem:[#allocation0 + $0x230] sm:$0xf]  ;;  %v1293_v55 = vld [vmem:[#allocation0 + $0x238] sm:$0xf]  ;;  %1905 = vst [vmem:[%s2832_s1 + $0x78] sm:$0x3] %v1217_v41  ;;  %v1280_v56 = vpack.c.bf16 %v2139_v40, %v1279_v53 }
  0xd8   :  { %1906 = vst [vmem:[%s2832_s1 + $0x7a] sm:$0x3] %v1224_v42  ;;  %1907 = vst [vmem:[%s2832_s1 + $0x7c] sm:$0x3] %v1231_v43  ;;  %v1287_v57 = vpack.c.bf16 %v2139_v40, %v1286_v54  ;;  %v1294_v58 = vpack.c.bf16 %v2139_v40, %v1293_v55  ;;  %v1300_v59 = vld [vmem:[#allocation0 + $0x240] sm:$0xf] }
  0xd9   :  { %1909 = vst [vmem:[%s2832_s1 + $0x80] sm:$0x3] %v1245_v44  ;;  %1910 = vst [vmem:[%s2832_s1 + $0x82] sm:$0x3] %v1252_v45  ;;  %v1307_v60 = vld [vmem:[#allocation0 + $0x248] sm:$0xf]  ;;  %v1301_v1 = vpack.c.bf16 %v2139_v40, %v1300_v59 }
  0xda   :  { %v1314_v61 = vld [vmem:[#allocation0 + $0x250] sm:$0xf]  ;;  %1908 = vst [vmem:[%s2832_s1 + $0x7e] sm:$0x3] %v1238_v49  ;;  %1911 = vst [vmem:[%s2832_s1 + $0x84] sm:$0x3] %v1259_v50  ;;  %v1308_v2 = vpack.c.bf16 %v2139_v40, %v1307_v60 }
  0xdb   :  { %1912 = vst [vmem:[%s2832_s1 + $0x86] sm:$0x3] %v1266_v51  ;;  %1913 = vst [vmem:[%s2832_s1 + $0x88] sm:$0x3] %v1273_v52  ;;  %v1321_v62 = vld [vmem:[#allocation0 + $0x258] sm:$0xf]  ;;  %v1315_v3 = vpack.c.bf16 %v2139_v40, %v1314_v61 }
  0xdc   :  { %v1328_v63 = vld [vmem:[#allocation0 + $0x260] sm:$0xf]  ;;  %v1335_v0 = vld [vmem:[#allocation0 + $0x268] sm:$0xf]  ;;  %1914 = vst [vmem:[%s2832_s1 + $0x8a] sm:$0x3] %v1280_v56  ;;  %v1322_v7 = vpack.c.bf16 %v2139_v40, %v1321_v62 }
  0xdd   :  { %1915 = vst [vmem:[%s2832_s1 + $0x8c] sm:$0x3] %v1287_v57  ;;  %1916 = vst [vmem:[%s2832_s1 + $0x8e] sm:$0x3] %v1294_v58  ;;  %v1342_v4 = vld [vmem:[#allocation0 + $0x270] sm:$0xf]  ;;  %v1329_v8 = vpack.c.bf16 %v2139_v40, %v1328_v63  ;;  %v1336_v9 = vpack.c.bf16 %v2139_v40, %v1335_v0 }
  0xde   :  { %v1349_v5 = vld [vmem:[#allocation0 + $0x278] sm:$0xf]  ;;  %v1356_v6 = vld [vmem:[#allocation0 + $0x280] sm:$0xf]  ;;  %v1363_v11 = vld [vmem:[#allocation0 + $0x288] sm:$0xf]  ;;  %v1343_v14 = vpack.c.bf16 %v2139_v40, %v1342_v4 }
  0xdf   :  { %v1357_v10 = vpack.c.bf16 %v2139_v40, %v1356_v6  ;;  %v1370_v12 = vld [vmem:[#allocation0 + $0x290] sm:$0xf]  ;;  %v1377_v13 = vld [vmem:[#allocation0 + $0x298] sm:$0xf]  ;;  %v1350_v15 = vpack.c.bf16 %v2139_v40, %v1349_v5  ;;  %1917 = vst [vmem:[%s2832_s1 + $0x90] sm:$0x3] %v1301_v1  ;;  %v1364_v16 = vpack.c.bf16 %v2139_v40, %v1363_v11 }
  0xe0   :  { %1918 = vst [vmem:[%s2832_s1 + $0x92] sm:$0x3] %v1308_v2  ;;  %1919 = vst [vmem:[%s2832_s1 + $0x94] sm:$0x3] %v1315_v3  ;;  %v1371_v17 = vpack.c.bf16 %v2139_v40, %v1370_v12  ;;  %v1378_v18 = vpack.c.bf16 %v2139_v40, %v1377_v13  ;;  %v1384_v19 = vld [vmem:[#allocation0 + $0x2a0] sm:$0xf] }
  0xe1   :  { %v1391_v20 = vld [vmem:[#allocation0 + $0x2a8] sm:$0xf]  ;;  %v1398_v21 = vld [vmem:[#allocation0 + $0x2b0] sm:$0xf]  ;;  %1920 = vst [vmem:[%s2832_s1 + $0x96] sm:$0x3] %v1322_v7  ;;  %v1385_v22 = vpack.c.bf16 %v2139_v40, %v1384_v19 }
  0xe2   :  { %1921 = vst [vmem:[%s2832_s1 + $0x98] sm:$0x3] %v1329_v8  ;;  %1922 = vst [vmem:[%s2832_s1 + $0x9a] sm:$0x3] %v1336_v9  ;;  %v1392_v23 = vpack.c.bf16 %v2139_v40, %v1391_v20  ;;  %v1399_v24 = vpack.c.bf16 %v2139_v40, %v1398_v21  ;;  %v1405_v25 = vld [vmem:[#allocation0 + $0x2b8] sm:$0xf] }
  0xe3   :  { %1925 = vst [vmem:[%s2832_s1 + $0xa0] sm:$0x3] %v1357_v10  ;;  %v1412_v26 = vld [vmem:[#allocation0 + $0x2c0] sm:$0xf]  ;;  %v1419_v27 = vld [vmem:[#allocation0 + $0x2c8] sm:$0xf]  ;;  %v1406_v28 = vpack.c.bf16 %v2139_v40, %v1405_v25 }
  0xe4   :  { %1923 = vst [vmem:[%s2832_s1 + $0x9c] sm:$0x3] %v1343_v14  ;;  %1924 = vst [vmem:[%s2832_s1 + $0x9e] sm:$0x3] %v1350_v15  ;;  %v1413_v29 = vpack.c.bf16 %v2139_v40, %v1412_v26  ;;  %v1420_v30 = vpack.c.bf16 %v2139_v40, %v1419_v27  ;;  %v1426_v31 = vld [vmem:[#allocation0 + $0x2d0] sm:$0xf] }
  0xe5   :  { %1926 = vst [vmem:[%s2832_s1 + $0xa2] sm:$0x3] %v1364_v16  ;;  %1927 = vst [vmem:[%s2832_s1 + $0xa4] sm:$0x3] %v1371_v17  ;;  %v1433_v32 = vld [vmem:[#allocation0 + $0x2d8] sm:$0xf]  ;;  %v1427_v34 = vpack.c.bf16 %v2139_v40, %v1426_v31 }
  0xe6   :  { %1928 = vst [vmem:[%s2832_s1 + $0xa6] sm:$0x3] %v1378_v18  ;;  %v1440_v33 = vld [vmem:[#allocation0 + $0x2e0] sm:$0xf]  ;;  %1929 = vst [vmem:[%s2832_s1 + $0xa8] sm:$0x3] %v1385_v22  ;;  %v1434_v35 = vpack.c.bf16 %v2139_v40, %v1433_v32 }
  0xe7   :  { %1930 = vst [vmem:[%s2832_s1 + $0xaa] sm:$0x3] %v1392_v23  ;;  %1931 = vst [vmem:[%s2832_s1 + $0xac] sm:$0x3] %v1399_v24  ;;  %v1441_v36 = vpack.c.bf16 %v2139_v40, %v1440_v33  ;;  %v1447_v37 = vld [vmem:[#allocation0 + $0x2e8] sm:$0xf] }
  0xe8   :  { %v1454_v38 = vld [vmem:[#allocation0 + $0x2f0] sm:$0xf]  ;;  %v1461_v39 = vld [vmem:[#allocation0 + $0x2f8] sm:$0xf]  ;;  %1932 = vst [vmem:[%s2832_s1 + $0xae] sm:$0x3] %v1406_v28  ;;  %v1448_v41 = vpack.c.bf16 %v2139_v40, %v1447_v37 }
  0xe9   :  { %1933 = vst [vmem:[%s2832_s1 + $0xb0] sm:$0x3] %v1413_v29  ;;  %1934 = vst [vmem:[%s2832_s1 + $0xb2] sm:$0x3] %v1420_v30  ;;  %v1455_v42 = vpack.c.bf16 %v2139_v40, %v1454_v38  ;;  %v1462_v43 = vpack.c.bf16 %v2139_v40, %v1461_v39  ;;  %v1468_v44 = vld [vmem:[#allocation0 + $0x300] sm:$0xf] }
  0xea   :  { %v1475_v45 = vld [vmem:[#allocation0 + $0x308] sm:$0xf]  ;;  %v1482_v46 = vld [vmem:[#allocation0 + $0x310] sm:$0xf]  ;;  %1935 = vst [vmem:[%s2832_s1 + $0xb4] sm:$0x3] %v1427_v34  ;;  %v1469_v47 = vpack.c.bf16 %v2139_v40, %v1468_v44 }
  0xeb   :  { %1936 = vst [vmem:[%s2832_s1 + $0xb6] sm:$0x3] %v1434_v35  ;;  %1937 = vst [vmem:[%s2832_s1 + $0xb8] sm:$0x3] %v1441_v36  ;;  %v1476_v48 = vpack.c.bf16 %v2139_v40, %v1475_v45  ;;  %v1483_v49 = vpack.c.bf16 %v2139_v40, %v1482_v46  ;;  %v1489_v50 = vld [vmem:[#allocation0 + $0x318] sm:$0xf] }
  0xec   :  { %v1496_v51 = vld [vmem:[#allocation0 + $0x320] sm:$0xf]  ;;  %v1503_v52 = vld [vmem:[#allocation0 + $0x328] sm:$0xf]  ;;  %1938 = vst [vmem:[%s2832_s1 + $0xba] sm:$0x3] %v1448_v41  ;;  %v1490_v53 = vpack.c.bf16 %v2139_v40, %v1489_v50 }
  0xed   :  { %1939 = vst [vmem:[%s2832_s1 + $0xbc] sm:$0x3] %v1455_v42  ;;  %1940 = vst [vmem:[%s2832_s1 + $0xbe] sm:$0x3] %v1462_v43  ;;  %v1497_v54 = vpack.c.bf16 %v2139_v40, %v1496_v51  ;;  %v1504_v55 = vpack.c.bf16 %v2139_v40, %v1503_v52  ;;  %v1510_v56 = vld [vmem:[#allocation0 + $0x330] sm:$0xf] }
  0xee   :  { %v1517_v57 = vld [vmem:[#allocation0 + $0x338] sm:$0xf]  ;;  %v1524_v58 = vld [vmem:[#allocation0 + $0x340] sm:$0xf]  ;;  %1941 = vst [vmem:[%s2832_s1 + $0xc0] sm:$0x3] %v1469_v47  ;;  %v1511_v59 = vpack.c.bf16 %v2139_v40, %v1510_v56 }
  0xef   :  { %1942 = vst [vmem:[%s2832_s1 + $0xc2] sm:$0x3] %v1476_v48  ;;  %1943 = vst [vmem:[%s2832_s1 + $0xc4] sm:$0x3] %v1483_v49  ;;  %v1518_v60 = vpack.c.bf16 %v2139_v40, %v1517_v57  ;;  %v1525_v61 = vpack.c.bf16 %v2139_v40, %v1524_v58  ;;  %v1531_v62 = vld [vmem:[#allocation0 + $0x348] sm:$0xf] }
  0xf0   :  { %v1538_v63 = vld [vmem:[#allocation0 + $0x350] sm:$0xf]  ;;  %v1545_v0 = vld [vmem:[#allocation0 + $0x358] sm:$0xf]  ;;  %1944 = vst [vmem:[%s2832_s1 + $0xc6] sm:$0x3] %v1490_v53  ;;  %v1532_v1 = vpack.c.bf16 %v2139_v40, %v1531_v62 }
  0xf1   :  { %1945 = vst [vmem:[%s2832_s1 + $0xc8] sm:$0x3] %v1497_v54  ;;  %1946 = vst [vmem:[%s2832_s1 + $0xca] sm:$0x3] %v1504_v55  ;;  %v1539_v2 = vpack.c.bf16 %v2139_v40, %v1538_v63  ;;  %v1546_v3 = vpack.c.bf16 %v2139_v40, %v1545_v0  ;;  %v1552_v4 = vld [vmem:[#allocation0 + $0x360] sm:$0xf] }
  0xf2   :  { %v1559_v5 = vld [vmem:[#allocation0 + $0x368] sm:$0xf]  ;;  %v1566_v6 = vld [vmem:[#allocation0 + $0x370] sm:$0xf]  ;;  %1947 = vst [vmem:[%s2832_s1 + $0xcc] sm:$0x3] %v1511_v59  ;;  %v1553_v7 = vpack.c.bf16 %v2139_v40, %v1552_v4 }
  0xf3   :  { %1948 = vst [vmem:[%s2832_s1 + $0xce] sm:$0x3] %v1518_v60  ;;  %1949 = vst [vmem:[%s2832_s1 + $0xd0] sm:$0x3] %v1525_v61  ;;  %v1560_v8 = vpack.c.bf16 %v2139_v40, %v1559_v5  ;;  %v1567_v9 = vpack.c.bf16 %v2139_v40, %v1566_v6  ;;  %v1573_v10 = vld [vmem:[#allocation0 + $0x378] sm:$0xf] }
  0xf4   :  { %v1580_v11 = vld [vmem:[#allocation0 + $0x380] sm:$0xf]  ;;  %v1587_v12 = vld [vmem:[#allocation0 + $0x388] sm:$0xf]  ;;  %1950 = vst [vmem:[%s2832_s1 + $0xd2] sm:$0x3] %v1532_v1  ;;  %v1574_v13 = vpack.c.bf16 %v2139_v40, %v1573_v10 }
  0xf5   :  { %1951 = vst [vmem:[%s2832_s1 + $0xd4] sm:$0x3] %v1539_v2  ;;  %1952 = vst [vmem:[%s2832_s1 + $0xd6] sm:$0x3] %v1546_v3  ;;  %v1581_v14 = vpack.c.bf16 %v2139_v40, %v1580_v11  ;;  %v1588_v15 = vpack.c.bf16 %v2139_v40, %v1587_v12  ;;  %v1594_v16 = vld [vmem:[#allocation0 + $0x390] sm:$0xf] }
  0xf6   :  { %v1601_v17 = vld [vmem:[#allocation0 + $0x398] sm:$0xf]  ;;  %v1608_v18 = vld [vmem:[#allocation0 + $0x3a0] sm:$0xf]  ;;  %1953 = vst [vmem:[%s2832_s1 + $0xd8] sm:$0x3] %v1553_v7  ;;  %v1595_v19 = vpack.c.bf16 %v2139_v40, %v1594_v16 }
  0xf7   :  { %1954 = vst [vmem:[%s2832_s1 + $0xda] sm:$0x3] %v1560_v8  ;;  %1955 = vst [vmem:[%s2832_s1 + $0xdc] sm:$0x3] %v1567_v9  ;;  %v1602_v20 = vpack.c.bf16 %v2139_v40, %v1601_v17  ;;  %v1609_v21 = vpack.c.bf16 %v2139_v40, %v1608_v18  ;;  %v1615_v22 = vld [vmem:[#allocation0 + $0x3a8] sm:$0xf] }
  0xf8   :  { %v1622_v23 = vld [vmem:[#allocation0 + $0x3b0] sm:$0xf]  ;;  %v1629_v24 = vld [vmem:[#allocation0 + $0x3b8] sm:$0xf]  ;;  %1956 = vst [vmem:[%s2832_s1 + $0xde] sm:$0x3] %v1574_v13  ;;  %v1616_v25 = vpack.c.bf16 %v2139_v40, %v1615_v22 }
  0xf9   :  { %1957 = vst [vmem:[%s2832_s1 + $0xe0] sm:$0x3] %v1581_v14  ;;  %1958 = vst [vmem:[%s2832_s1 + $0xe2] sm:$0x3] %v1588_v15  ;;  %v1623_v26 = vpack.c.bf16 %v2139_v40, %v1622_v23  ;;  %v1630_v27 = vpack.c.bf16 %v2139_v40, %v1629_v24  ;;  %v1636_v28 = vld [vmem:[#allocation0 + $0x3c0] sm:$0xf] }
  0xfa   :  { %v1643_v29 = vld [vmem:[#allocation0 + $0x3c8] sm:$0xf]  ;;  %v1650_v30 = vld [vmem:[#allocation0 + $0x3d0] sm:$0xf]  ;;  %1959 = vst [vmem:[%s2832_s1 + $0xe4] sm:$0x3] %v1595_v19  ;;  %v1637_v31 = vpack.c.bf16 %v2139_v40, %v1636_v28 }
  0xfb   :  { %1960 = vst [vmem:[%s2832_s1 + $0xe6] sm:$0x3] %v1602_v20  ;;  %1961 = vst [vmem:[%s2832_s1 + $0xe8] sm:$0x3] %v1609_v21  ;;  %v1644_v32 = vpack.c.bf16 %v2139_v40, %v1643_v29  ;;  %v1651_v33 = vpack.c.bf16 %v2139_v40, %v1650_v30  ;;  %v1657_v34 = vld [vmem:[#allocation0 + $0x3d8] sm:$0xf] }
  0xfc   :  { %v1664_v35 = vld [vmem:[#allocation0 + $0x3e0] sm:$0xf]  ;;  %v1671_v36 = vld [vmem:[#allocation0 + $0x3e8] sm:$0xf]  ;;  %1962 = vst [vmem:[%s2832_s1 + $0xea] sm:$0x3] %v1616_v25  ;;  %v1658_v37 = vpack.c.bf16 %v2139_v40, %v1657_v34 }
  0xfd   :  { %1963 = vst [vmem:[%s2832_s1 + $0xec] sm:$0x3] %v1623_v26  ;;  %1964 = vst [vmem:[%s2832_s1 + $0xee] sm:$0x3] %v1630_v27  ;;  %v1665_v38 = vpack.c.bf16 %v2139_v40, %v1664_v35  ;;  %v1672_v39 = vpack.c.bf16 %v2139_v40, %v1671_v36  ;;  %v1678_v41 = vld [vmem:[#allocation0 + $0x3f0] sm:$0xf] }
  0xfe   :  { %v1685_v42 = vld [vmem:[#allocation0 + $0x3f8] sm:$0xf]  ;;  %1965 = vst [vmem:[%s2832_s1 + $0xf0] sm:$0x3] %v1637_v31  ;;  %1966 = vst [vmem:[%s2832_s1 + $0xf2] sm:$0x3] %v1644_v32  ;;  %v1679_v43 = vpack.c.bf16 %v2139_v40, %v1678_v41 }
  0xff   :  { %1967 = vst [vmem:[%s2832_s1 + $0xf4] sm:$0x3] %v1651_v33  ;;  %v1686_v40 = vpack.c.bf16 %v2139_v40, %v1685_v42  ;;  %1968 = vst [vmem:[%s2832_s1 + $0xf6] sm:$0x3] %v1658_v37 }
 0x100   :  { %1969 = vst [vmem:[%s2832_s1 + $0xf8] sm:$0x3] %v1665_v38  ;;  %1970 = vst [vmem:[%s2832_s1 + $0xfa] sm:$0x3] %v1672_v39 }
 0x101   :  { %1971 = vst [vmem:[%s2832_s1 + $0xfc] sm:$0x3] %v1679_v43  ;;  %1972 = vst [vmem:[%s2832_s1 + $0xfe] sm:$0x3] %v1686_v40 }

// kernel: generator_forward.14
= control target key start
LH: loop header
LB: loop body
LE: loop exit
PB: predicated region body
PF: predicated region fallthrough
CT: control target
= control target key end

     0   :  { %v851_v0 = vmov 0   ;;  %vm200_vm0 = vcmask 261120   ;;  %s1019_s3 = inlined_call_operand.vmem [shape: f32[32,1], index: 3, kind: input, shape index: {}]   ;;  %s1020_s2 = inlined_call_operand.vmem [shape: f32[32,1], index: 2, kind: input, shape index: {}]   ;;  %s1021_s0 = inlined_call_operand.vmem [shape: bf16[256,32], index: 0, kind: input, shape index: {}]   ;;  %s1022_s1 = inlined_call_operand.vmem [shape: bf16[32,128], index: 1, kind: input, shape index: {}]   ;;  %s1023_s4 = inlined_call_operand.vmem [shape: bf16[256,128], index: 4, kind: output, shape index: {}]  }
   0x1   :  { %834 = vset.pattern.permute.xlu1 %v851_v0  ;;  %833 = vset.pattern.permute.xlu0 %v851_v0  ;;  %v54_v1 = vld [vmem:[%s1019_s3] sm:$0xff]  ;;  %v55_v3 = vld [vmem:[%s1019_s3 + $0x8] sm:$0xff]  ;;  %v29_v5 = vld [vmem:[%s1020_s2 + $0x18] sm:$0xff] }
   0x2   :  { %v26_v2 = vld [vmem:[%s1020_s2] sm:$0xff]  ;;  %60 = vperm.xlu1 %834, %v54_v1   ;;  %v27_v4 = vld [vmem:[%s1020_s2 + $0x8] sm:$0xff]  ;;  %v28_v6 = vld [vmem:[%s1020_s2 + $0x10] sm:$0xff] }
   0x3   :  { %32 = vperm.xlu0 %833, %v26_v2   ;;  %v57_v7 = vld [vmem:[%s1019_s3 + $0x18] sm:$0xff]  ;;  %v56_v8 = vld [vmem:[%s1019_s3 + $0x10] sm:$0xff]  ;;  %v835_v9 = vld [vmem:[%s1021_s0] sm:$0xff]  }
   0x4   :  { %v836_v10 = vld [vmem:[%s1021_s0 + $0x40] sm:$0xff]   ;;  %796 = vmatprep.mubr.msk.bf16.mxu0 %vm200_vm0, %v835_v9  ;;  %v758_v19 = vld [vmem:[%s1022_s1 + $0x8] sm:$0xff]   ;;  %v839_v41 = vld [vmem:[%s1021_s0 + $0x10] sm:$0xff]  }
   0x5   :  { %812 = vmatprep.mubr.msk.bf16.mxu1 %vm200_vm0, %v836_v10  ;;  %v671_v11 = vld [vmem:[%s1022_s1] sm:$0xff]   ;;  %v677_v23 = vunpack.c.h.bf16 %v758_v19  ;;  %v676_v24 = vunpack.c.l.bf16 %v758_v19  ;;  %v837_v39 = vld [vmem:[%s1021_s0 + $0x8] sm:$0xff]   ;;  %v840_v42 = vld [vmem:[%s1021_s0 + $0x50] sm:$0xff]  }
   0x6   :  { %65 = vperm.xlu1 %834, %v55_v3   ;;  %v672_v12 = vunpack.c.l.bf16 %v671_v11  ;;  %v673_v16 = vunpack.c.h.bf16 %v671_v11  ;;  %v838_v40 = vld [vmem:[%s1021_s0 + $0x48] sm:$0xff]   ;;  %v841_v43 = vld [vmem:[%s1021_s0 + $0x18] sm:$0xff]   ;;  %v843_v45 = vld [vmem:[%s1021_s0 + $0x20] sm:$0xff]  }
   0x7   :  { %37 = vperm.xlu0 %833, %v27_v4   ;;  %v842_v44 = vld [vmem:[%s1021_s0 + $0x58] sm:$0xff]   ;;  %v844_v46 = vld [vmem:[%s1021_s0 + $0x60] sm:$0xff]   ;;  %v845_v47 = vld [vmem:[%s1021_s0 + $0x28] sm:$0xff]  }
   0x8   :  { %v846_v48 = vld [vmem:[%s1021_s0 + $0x68] sm:$0xff]   ;;  %v847_v49 = vld [vmem:[%s1021_s0 + $0x30] sm:$0xff]   ;;  %v849_v51 = vld [vmem:[%s1021_s0 + $0x38] sm:$0xff]  }
   0x9   :  { %v848_v50 = vld [vmem:[%s1021_s0 + $0x70] sm:$0xff]   ;;  %v850_v52 = vld [vmem:[%s1021_s0 + $0x78] sm:$0xff]  }
   0xa   :  { %47 = vperm.xlu1 %834, %v29_v5  }
   0xb   :  { %42 = vperm.xlu0 %833, %v28_v6  }
   0xe   :  { %75 = vperm.xlu1 %834, %v57_v7  }
   0xf   :  { %70 = vperm.xlu0 %833, %v56_v8  }
  0x81   :  { %v61_v13 = vpop.permute.xlu1 %60 }
  0x82   :  { %v33_v14 = vpop.permute.xlu0 %32 }
  0x83   :  { %v50_v15 = vmul.f32 %v672_v12, %v33_v14 }
  0x85   :  { %v66_v17 = vpop.permute.xlu1 %65  ;;  %v78_v20 = vadd.f32 %v61_v13, %v50_v15 }
  0x86   :  { %v38_v18 = vpop.permute.xlu0 %37 }
  0x87   :  { %v51_v21 = vmul.f32 %v673_v16, %v38_v18  ;;  %v82_v27 = vmax.f32 %v78_v20, 0.0 }
  0x89   :  { %v79_v22 = vadd.f32 %v66_v17, %v51_v21  ;;  %v48_v25 = vpop.permute.xlu1 %47 }
  0x8a   :  { %v43_v26 = vpop.permute.xlu0 %42  ;;  %v53_v30 = vmul.f32 %v677_v23, %v48_v25 }
  0x8b   :  { %v83_v28 = vmax.f32 %v79_v22, 0.0  ;;  %v52_v31 = vmul.f32 %v676_v24, %v43_v26 }
  0x8d   :  { %v86_v29 = vpack.c.bf16 %v83_v28, %v82_v27  ;;  %v76_v32 = vpop.permute.xlu1 %75 }
  0x8e   :  { %v71_v33 = vpop.permute.xlu0 %70  ;;  %v81_v34 = vadd.f32 %v76_v32, %v53_v30 }
  0x8f   :  { %v80_v35 = vadd.f32 %v71_v33, %v52_v31  ;;  %792 = vmatprep.subr.bf16.mxu0 %v86_v29  ;;  %828 = vmatprep.subr.bf16.mxu1 %v86_v29 }
  0x90   :  { %793 = vmatpush3.bf16.msra.mxu0 %v86_v29  ;;  %830 = vmatpush3.bf16.msra.mxu1 %v86_v29  ;;  %v85_v36 = vmax.f32 %v81_v34, 0.0 }
  0x91   :  { %v84_v37 = vmax.f32 %v80_v35, 0.0 }
  0x93   :  { %v87_v38 = vpack.c.bf16 %v85_v36, %v84_v37 }
  0x95   :  { %794 = vmatprep.subr.bf16.mxu0 %v87_v38  ;;  %829 = vmatprep.subr.bf16.mxu1 %v87_v38 }
  0x96   :  { %795 = vmatpush3.bf16.msra.mxu0 %v87_v38  ;;  %831 = vmatpush3.bf16.msra.mxu1 %v87_v38 }
  0x99   :  { %797 = vmatmul.mubr.msk.bf16.vlgmr.msra.gmra.mrb[0].mxu0 %vm200_vm0, %v837_v39  ;;  %813 = vmatmul.mubr.msk.bf16.vlgmr.msra.gmra.mrb[0].mxu1 %vm200_vm0, %v838_v40 }
  0x9a   :  { %800 = vmatprep.mubr.msk.bf16.mxu0 %vm200_vm0, %v839_v41  ;;  %816 = vmatprep.mubr.msk.bf16.mxu1 %vm200_vm0, %v840_v42 }
  0xa1   :  { %801 = vmatmul.mubr.msk.bf16.gmra.mrb[4].mxu0 %vm200_vm0, %v841_v43  ;;  %817 = vmatmul.mubr.msk.bf16.gmra.mrb[4].mxu1 %vm200_vm0, %v842_v44 }
  0xa2   :  { %804 = vmatprep.mubr.msk.bf16.mxu0 %vm200_vm0, %v843_v45  ;;  %820 = vmatprep.mubr.msk.bf16.mxu1 %vm200_vm0, %v844_v46 }
  0xa9   :  { %805 = vmatmul.mubr.msk.bf16.gmra.mrb[8].mxu0 %vm200_vm0, %v845_v47  ;;  %821 = vmatmul.mubr.msk.bf16.gmra.mrb[8].mxu1 %vm200_vm0, %v846_v48 }
  0xaa   :  { %808 = vmatprep.mubr.msk.bf16.mxu0 %vm200_vm0, %v847_v49  ;;  %824 = vmatprep.mubr.msk.bf16.mxu1 %vm200_vm0, %v848_v50 }
  0xb1   :  { %809 = vmatmul.mubr.msk.bf16.gmra.mrb[12].mxu0 %vm200_vm0, %v849_v51  ;;  %825 = vmatmul.mubr.msk.bf16.gmra.mrb[12].mxu1 %vm200_vm0, %v850_v52 }
 0x16c   :  { %v798_v53 = vpop.f32.mrb[0].mxu0  ;;  %v814_v54 = vpop.f32.mrb[0].mxu1 }
 0x16d   :  { %v283_v55 = vpop.f32.mrb[1].mxu0  ;;  %v347_v56 = vpop.f32.mrb[1].mxu1 }
 0x16e   :  { %v799_v57 = vpop.f32.mrb[2].mxu0  ;;  %v815_v58 = vpop.f32.mrb[2].mxu1 }
 0x16f   :  { %v686_v59 = vpack.c.bf16 %v799_v57, %v798_v53  ;;  %v726_v60 = vpack.c.bf16 %v815_v58, %v814_v54  ;;  %v286_v61 = vpop.f32.mrb[3].mxu0  ;;  %v350_v62 = vpop.f32.mrb[3].mxu1 }
 0x170   :  { %v681_v63 = vpack.c.bf16 %v286_v61, %v283_v55  ;;  %v721_v0 = vpack.c.bf16 %v350_v62, %v347_v56 }
 0x171   :  { %759 = vst [vmem:[%s1023_s4 + $0x8] sm:$0xff] %v686_v59   ;;  %767 = vst [vmem:[%s1023_s4 + $0x48] sm:$0xff] %v726_v60  }
 0x172   :  { %682 = vst [vmem:[%s1023_s4] sm:$0xff] %v681_v63   ;;  %766 = vst [vmem:[%s1023_s4 + $0x40] sm:$0xff] %v721_v0  }
 0x174   :  { %v802_v1 = vpop.f32.mrb[4].mxu0  ;;  %v818_v2 = vpop.f32.mrb[4].mxu1 }
 0x175   :  { %v299_v3 = vpop.f32.mrb[5].mxu0  ;;  %v363_v4 = vpop.f32.mrb[5].mxu1 }
 0x176   :  { %v803_v5 = vpop.f32.mrb[6].mxu0  ;;  %v819_v6 = vpop.f32.mrb[6].mxu1 }
 0x177   :  { %v696_v7 = vpack.c.bf16 %v803_v5, %v802_v1  ;;  %v736_v8 = vpack.c.bf16 %v819_v6, %v818_v2  ;;  %v302_v9 = vpop.f32.mrb[7].mxu0  ;;  %v366_v10 = vpop.f32.mrb[7].mxu1 }
 0x178   :  { %v691_v11 = vpack.c.bf16 %v302_v9, %v299_v3  ;;  %v731_v12 = vpack.c.bf16 %v366_v10, %v363_v4 }
 0x179   :  { %761 = vst [vmem:[%s1023_s4 + $0x18] sm:$0xff] %v696_v7   ;;  %769 = vst [vmem:[%s1023_s4 + $0x58] sm:$0xff] %v736_v8  }
 0x17a   :  { %760 = vst [vmem:[%s1023_s4 + $0x10] sm:$0xff] %v691_v11   ;;  %768 = vst [vmem:[%s1023_s4 + $0x50] sm:$0xff] %v731_v12  }
 0x17c   :  { %v806_v13 = vpop.f32.mrb[8].mxu0  ;;  %v822_v14 = vpop.f32.mrb[8].mxu1 }
 0x17d   :  { %v315_v15 = vpop.f32.mrb[9].mxu0  ;;  %v379_v16 = vpop.f32.mrb[9].mxu1 }
 0x17e   :  { %v807_v17 = vpop.f32.mrb[10].mxu0  ;;  %v823_v18 = vpop.f32.mrb[10].mxu1 }
 0x17f   :  { %v706_v19 = vpack.c.bf16 %v807_v17, %v806_v13  ;;  %v746_v20 = vpack.c.bf16 %v823_v18, %v822_v14  ;;  %v318_v21 = vpop.f32.mrb[11].mxu0  ;;  %v382_v22 = vpop.f32.mrb[11].mxu1 }
 0x180   :  { %v701_v23 = vpack.c.bf16 %v318_v21, %v315_v15  ;;  %v741_v24 = vpack.c.bf16 %v382_v22, %v379_v16 }
 0x181   :  { %763 = vst [vmem:[%s1023_s4 + $0x28] sm:$0xff] %v706_v19   ;;  %771 = vst [vmem:[%s1023_s4 + $0x68] sm:$0xff] %v746_v20  }
 0x182   :  { %762 = vst [vmem:[%s1023_s4 + $0x20] sm:$0xff] %v701_v23   ;;  %770 = vst [vmem:[%s1023_s4 + $0x60] sm:$0xff] %v741_v24  }
 0x184   :  { %v810_v25 = vpop.f32.mrb[12].mxu0  ;;  %v826_v26 = vpop.f32.mrb[12].mxu1 }
 0x185   :  { %v331_v27 = vpop.f32.mrb[13].mxu0  ;;  %v395_v28 = vpop.f32.mrb[13].mxu1 }
 0x186   :  { %v811_v29 = vpop.f32.mrb[14].mxu0  ;;  %v827_v30 = vpop.f32.mrb[14].mxu1 }
 0x187   :  { %v716_v31 = vpack.c.bf16 %v811_v29, %v810_v25  ;;  %v756_v32 = vpack.c.bf16 %v827_v30, %v826_v26  ;;  %v334_v33 = vpop.f32.mrb[15].mxu0  ;;  %v398_v34 = vpop.f32.mrb[15].mxu1 }
 0x188   :  { %v711_v35 = vpack.c.bf16 %v334_v33, %v331_v27  ;;  %v751_v36 = vpack.c.bf16 %v398_v34, %v395_v28 }
 0x189   :  { %765 = vst [vmem:[%s1023_s4 + $0x38] sm:$0xff] %v716_v31   ;;  %773 = vst [vmem:[%s1023_s4 + $0x78] sm:$0xff] %v756_v32  }
 0x18a   :  { %764 = vst [vmem:[%s1023_s4 + $0x30] sm:$0xff] %v711_v35   ;;  %772 = vst [vmem:[%s1023_s4 + $0x70] sm:$0xff] %v751_v36  }

// kernel: generator_forward.15
= control target key start
LH: loop header
LB: loop body
LE: loop exit
PB: predicated region body
PF: predicated region fallthrough
CT: control target
= control target key end

     0   :  { %vm14_vm0 = vcmask 7168   ;;  %v81_v3 = vmov 0.0   ;;  %s153_s0 = inlined_call_operand.vmem [shape: bf16[16,512], index: 0, kind: input, shape index: {}]   ;;  %s154_s2 = inlined_call_operand.vmem [shape: f32[16,1], index: 2, kind: output, shape index: {1}]   ;;  %s155_s1 = inlined_call_operand.vmem [shape: f32[16,1], index: 1, kind: output, shape index: {0}]  }
   0x1   :  { %v19_v0 = vld [vmem:[%s153_s0] sm:$0xff]  ;;  %v20_v1 = vld [vmem:[%s153_s0 + $0x8] sm:$0xff]  ;;  %v21_v2 = vld [vmem:[%s153_s0 + $0x10] sm:$0xff]  ;;  %17 = vst.msk [vmem:[%s154_s2] sm:$0xff] %vm14_vm0, %v81_v3 }
   0x2   :  { %18 = vst.msk [vmem:[%s154_s2 + $0x8] sm:$0xff] %vm14_vm0, %v81_v3  ;;  %v23_v4 = vunpack.c.l.bf16 %v19_v0  ;;  %v24_v5 = vunpack.c.h.bf16 %v19_v0  ;;  %v25_v6 = vunpack.c.l.bf16 %v20_v1  ;;  %v26_v7 = vunpack.c.h.bf16 %v20_v1  ;;  %v22_v8 = vld [vmem:[%s153_s0 + $0x18] sm:$0xff]  ;;  %15 = vst.msk [vmem:[%s155_s1] sm:$0xff] %vm14_vm0, %v81_v3 }
   0x3   :  { %v27_v9 = vunpack.c.l.bf16 %v21_v2  ;;  %v28_v10 = vunpack.c.h.bf16 %v21_v2  ;;  %v29_v11 = vunpack.c.l.bf16 %v22_v8  ;;  %v30_v15 = vunpack.c.h.bf16 %v22_v8  ;;  %16 = vst.msk [vmem:[%s155_s1 + $0x8] sm:$0xff] %vm14_vm0, %v81_v3 }
   0x4   :  { %v50_v12 = vmul.f32 %v23_v4, %v23_v4  ;;  %v51_v13 = vmul.f32 %v24_v5, %v24_v5  ;;  %v52_v14 = vmul.f32 %v25_v6, %v25_v6  ;;  %v33_v16 = vadd.f32 %v24_v5, %v23_v4 }
   0x5   :  { %v54_v17 = vmul.f32 %v27_v9, %v27_v9  ;;  %v55_v18 = vmul.f32 %v28_v10, %v28_v10  ;;  %v56_v19 = vmul.f32 %v29_v11, %v29_v11  ;;  %v53_v20 = vmul.f32 %v26_v7, %v26_v7 }
   0x6   :  { %v58_v21 = vadd.f32 %v51_v13, %v50_v12  ;;  %v38_v22 = vadd.f32 %v28_v10, %v27_v9  ;;  %v34_v23 = vadd.f32 %v33_v16, %v25_v6  ;;  %v57_v26 = vmul.f32 %v30_v15, %v30_v15 }
   0x7   :  { %v63_v24 = vadd.f32 %v55_v18, %v54_v17 }
   0x8   :  { %v59_v25 = vadd.f32 %v58_v21, %v52_v14  ;;  %v39_v27 = vadd.f32 %v38_v22, %v29_v11  ;;  %v35_v28 = vadd.f32 %v34_v23, %v26_v7  ;;  %v48_v34 = vld [vmem:[%s154_s2] sm:$0xff] }
   0x9   :  { %v64_v29 = vadd.f32 %v63_v24, %v56_v19  ;;  %v31_v33 = vld [vmem:[%s155_s1] sm:$0xff]  ;;  %v49_v40 = vld [vmem:[%s154_s2 + $0x8] sm:$0xff] }
   0xa   :  { %v60_v30 = vadd.f32 %v59_v25, %v53_v20  ;;  %36 = vadd.xlane.f32.xlu0 %v35_v28  ;;  %v40_v31 = vadd.f32 %v39_v27, %v30_v15  ;;  %v32_v39 = vld [vmem:[%s155_s1 + $0x8] sm:$0xff] }
   0xb   :  { %v65_v32 = vadd.f32 %v64_v29, %v57_v26 }
   0xc   :  { %61 = vadd.xlane.f32.xlu1 %v60_v30 }
   0xe   :  { %41 = vadd.xlane.f32.xlu0 %v40_v31 }
  0x10   :  { %66 = vadd.xlane.f32.xlu1 %v65_v32 }
  0x97   :  { %v37_v35 = vpop.xlane.xlu0 %36 }
  0x98   :  { %v43_v37 = vadd.f32 %v37_v35, %v31_v33 }
  0x99   :  { %v62_v36 = vpop.xlane.xlu1 %61 }
  0x9a   :  { %v68_v38 = vadd.f32 %v62_v36, %v48_v34  ;;  %46 = vst.msk [vmem:[%s155_s1] sm:$0xff] %vm14_vm0, %v43_v37 }
  0x9b   :  { %v42_v41 = vpop.xlane.xlu0 %41 }
  0x9c   :  { %70 = vst.msk [vmem:[%s154_s2] sm:$0xff] %vm14_vm0, %v68_v38  ;;  %v44_v43 = vadd.f32 %v42_v41, %v32_v39 }
  0x9d   :  { %v67_v42 = vpop.xlane.xlu1 %66 }
  0x9e   :  { %v69_v44 = vadd.f32 %v67_v42, %v49_v40  ;;  %47 = vst.msk [vmem:[%s155_s1 + $0x8] sm:$0xff] %vm14_vm0, %v44_v43 }
  0xa0   :  { %71 = vst.msk [vmem:[%s154_s2 + $0x8] sm:$0xff] %vm14_vm0, %v69_v44 }

// kernel: squeeze.75
= control target key start
LH: loop header
LB: loop body
LE: loop exit
PB: predicated region body
PF: predicated region fallthrough
CT: control target
= control target key end

     0   :  { %vm258_vm0 = vcmask 130048   ;;  %vm562_vm1 = vcmask 1047556   ;;  %s3896_s22 = smov 96   ;;  %s3897_s23 = smov 80   ;;  %s4660_s0 = inlined_call_operand.vmem [shape: bf16[32,512], index: 0, kind: input, shape index: {}]   ;;  %s4661_s1 = inlined_call_operand.vmem [shape: bf16[4,8,2,16,16], index: 1, kind: output, shape index: {}]  }
   0x1   :  { %v3544_v0 = vld [vmem:[%s4660_s0 + $0x8] sm:$0xff]   ;;  %v3215_v1 = vld [vmem:[%s4660_s0] sm:$0xff]   ;;  %v3542_v2 = vld [vmem:[%s4660_s0 + $0x18] sm:$0xff]   ;;  %s3898_s24 = smov 64   ;;  %s3899_s25 = smov 48  }
   0x2   :  { %v3212_v3 = vunpack.c.l.bf16 %v3544_v0  ;;  %v3213_v4 = vunpack.c.h.bf16 %v3544_v0  ;;  %v3216_v5 = vunpack.c.l.bf16 %v3215_v1  ;;  %v3217_v6 = vunpack.c.h.bf16 %v3215_v1  ;;  %v3543_v7 = vld [vmem:[%s4660_s0 + $0x10] sm:$0xff]   ;;  %v3540_v8 = vld [vmem:[%s4660_s0 + $0x28] sm:$0xff]   ;;  %v3541_v9 = vld [vmem:[%s4660_s0 + $0x20] sm:$0xff]   ;;  %s3900_s26 = smov 32   ;;  %s3901_s27 = smov 16  }
   0x3   :  { %v3204_v10 = vunpack.c.l.bf16 %v3542_v2  ;;  %v3205_v11 = vunpack.c.h.bf16 %v3542_v2  ;;  %v3208_v12 = vunpack.c.l.bf16 %v3543_v7  ;;  %v3209_v13 = vunpack.c.h.bf16 %v3543_v7  ;;  %v3538_v14 = vld [vmem:[%s4660_s0 + $0x38] sm:$0xff]   ;;  %v3539_v15 = vld [vmem:[%s4660_s0 + $0x30] sm:$0xff]   ;;  %s3895_s0 = smov 112  }
   0x4   :  { %212 = vst [vmem:[#allocation1 + $0x18] sm:$0xff] %v3213_v4  ;;  %228 = vst [vmem:[#allocation1 + $0x10] sm:$0xff] %v3212_v3  ;;  %v3196_v16 = vunpack.c.l.bf16 %v3540_v8  ;;  %v3197_v17 = vunpack.c.h.bf16 %v3540_v8  ;;  %v3200_v18 = vunpack.c.l.bf16 %v3541_v9  ;;  %v3201_v19 = vunpack.c.h.bf16 %v3541_v9 }
   0x5   :  { %243 = vst [vmem:[#allocation1 + $0x8] sm:$0xff] %v3217_v6  ;;  %256 = vst [vmem:[#allocation1] sm:$0xff] %v3216_v5  ;;  %v3188_v20 = vunpack.c.l.bf16 %v3538_v14  ;;  %v3189_v21 = vunpack.c.h.bf16 %v3538_v14  ;;  %v3192_v22 = vunpack.c.l.bf16 %v3539_v15  ;;  %v3193_v23 = vunpack.c.h.bf16 %v3539_v15 }
   0x6   :  { %148 = vst [vmem:[#allocation1 + $0x38] sm:$0xff] %v3205_v11  ;;  %164 = vst [vmem:[#allocation1 + $0x30] sm:$0xff] %v3204_v10 }
   0x7   :  { %180 = vst [vmem:[#allocation1 + $0x28] sm:$0xff] %v3209_v13  ;;  %196 = vst [vmem:[#allocation1 + $0x20] sm:$0xff] %v3208_v12 }
   0x8   :  { %84 = vst [vmem:[#allocation1 + $0x58] sm:$0xff] %v3197_v17  ;;  %100 = vst [vmem:[#allocation1 + $0x50] sm:$0xff] %v3196_v16 }
   0x9   :  { %116 = vst [vmem:[#allocation1 + $0x48] sm:$0xff] %v3201_v19  ;;  %132 = vst [vmem:[#allocation1 + $0x40] sm:$0xff] %v3200_v18 }
   0xa   :  { %20 = vst [vmem:[#allocation1 + $0x78] sm:$0xff] %v3189_v21  ;;  %36 = vst [vmem:[#allocation1 + $0x70] sm:$0xff] %v3188_v20 }
   0xb   :  { %52 = vst [vmem:[#allocation1 + $0x68] sm:$0xff] %v3193_v23  ;;  %68 = vst [vmem:[#allocation1 + $0x60] sm:$0xff] %v3192_v22 }
   0xc   :  { %271 = vst.msk [vmem:[#allocation0 + $0xba] sm:$0x40] %vm258_vm0, %v3216_v5   ;;  %290 = vst.msk [vmem:[#allocation0 + $0xc2] sm:$0x40] %vm258_vm0, %v3217_v6  }
   0xd   :  { %328 = vst.msk [vmem:[#allocation0 + $0xd2] sm:$0x40] %vm258_vm0, %v3213_v4   ;;  %259 = vst.msk [vmem:[#allocation0] sm:$0x1] %vm258_vm0, %v3216_v5  }
   0xe   :  { %261 = vst.msk [vmem:[#allocation0 + $0x1f] sm:$0x2] %vm258_vm0, %v3216_v5   ;;  %263 = vst.msk [vmem:[#allocation0 + $0x3e] sm:$0x4] %vm258_vm0, %v3216_v5  }
   0xf   :  { %265 = vst.msk [vmem:[#allocation0 + $0x5d] sm:$0x8] %vm258_vm0, %v3216_v5   ;;  %267 = vst.msk [vmem:[#allocation0 + $0x7c] sm:$0x10] %vm258_vm0, %v3216_v5  }
  0x10   :  { %269 = vst.msk [vmem:[#allocation0 + $0x9b] sm:$0x20] %vm258_vm0, %v3216_v5   ;;  %273 = vst.msk [vmem:[#allocation0 + $0xd9] sm:$0x80] %vm258_vm0, %v3216_v5  }
  0x11   :  { %278 = vst.msk [vmem:[#allocation0 + $0x8] sm:$0x1] %vm258_vm0, %v3217_v6   ;;  %280 = vst.msk [vmem:[#allocation0 + $0x27] sm:$0x2] %vm258_vm0, %v3217_v6  }
  0x12   :  { %282 = vst.msk [vmem:[#allocation0 + $0x46] sm:$0x4] %vm258_vm0, %v3217_v6   ;;  %284 = vst.msk [vmem:[#allocation0 + $0x65] sm:$0x8] %vm258_vm0, %v3217_v6  }
  0x13   :  { %286 = vst.msk [vmem:[#allocation0 + $0x84] sm:$0x10] %vm258_vm0, %v3217_v6   ;;  %288 = vst.msk [vmem:[#allocation0 + $0xa3] sm:$0x20] %vm258_vm0, %v3217_v6  }
  0x14   :  { %292 = vst.msk [vmem:[#allocation0 + $0xe1] sm:$0x80] %vm258_vm0, %v3217_v6   ;;  %316 = vst.msk [vmem:[#allocation0 + $0x18] sm:$0x1] %vm258_vm0, %v3213_v4  }
  0x15   :  { %318 = vst.msk [vmem:[#allocation0 + $0x37] sm:$0x2] %vm258_vm0, %v3213_v4   ;;  %320 = vst.msk [vmem:[#allocation0 + $0x56] sm:$0x4] %vm258_vm0, %v3213_v4  }
  0x16   :  { %322 = vst.msk [vmem:[#allocation0 + $0x75] sm:$0x8] %vm258_vm0, %v3213_v4   ;;  %324 = vst.msk [vmem:[#allocation0 + $0x94] sm:$0x10] %vm258_vm0, %v3213_v4  }
  0x17   :  { %326 = vst.msk [vmem:[#allocation0 + $0xb3] sm:$0x20] %vm258_vm0, %v3213_v4   ;;  %330 = vst.msk [vmem:[#allocation0 + $0xf1] sm:$0x80] %vm258_vm0, %v3213_v4  }
  0x18   :  { %v559_v24 = vld [vmem:[#allocation1] ss:$8 sm:$0xf]   ;;  %v561_v25 = vld [vmem:[#allocation1 - $0x1f] ss:$8 sm:$0xf0]  }
  0x19   :  { %v563_v26 = vsel %vm562_vm1, %v561_v25, %v559_v24  ;;  %v572_v27 = vld [vmem:[#allocation1 + $0x2] ss:$8 sm:$0xf]   ;;  %v574_v28 = vld [vmem:[#allocation1 - $0x1d] ss:$8 sm:$0xf0]  }
  0x1a   :  { %v576_v29 = vsel %vm562_vm1, %v574_v28, %v572_v27  ;;  %v611_v30 = vld [vmem:[#allocation1 + $0x20] ss:$8 sm:$0xf]   ;;  %v613_v31 = vld [vmem:[#allocation1 + $0x1] ss:$8 sm:$0xf0]  }
  0x1b   :  { %v3615_v32 = vpack.i.bf16 %v576_v29, %v563_v26  ;;  %v615_v33 = vsel %vm562_vm1, %v613_v31, %v611_v30  ;;  %v624_v34 = vld [vmem:[#allocation1 + $0x22] ss:$8 sm:$0xf]   ;;  %v626_v35 = vld [vmem:[#allocation1 + $0x3] ss:$8 sm:$0xf0]  }
  0x1c   :  { %v628_v36 = vsel %vm562_vm1, %v626_v35, %v624_v34  ;;  %v585_v37 = vld [vmem:[#allocation1 + $0x4] ss:$8 sm:$0xf]   ;;  %v587_v38 = vld [vmem:[#allocation1 - $0x1b] ss:$8 sm:$0xf0]  }
  0x1d   :  { %3616 = vrot.lane.b32.xlu0 %v3615_v32, %s3895_s0  ;;  %v3625_v39 = vpack.i.bf16 %v628_v36, %v615_v33  ;;  %v589_v40 = vsel %vm562_vm1, %v587_v38, %v585_v37  ;;  %v598_v41 = vld [vmem:[#allocation1 + $0x6] ss:$8 sm:$0xf]   ;;  %v600_v42 = vld [vmem:[#allocation1 - $0x19] ss:$8 sm:$0xf0]  }
  0x1e   :  { %v602_v43 = vsel %vm562_vm1, %v600_v42, %v598_v41  ;;  %v637_v44 = vld [vmem:[#allocation1 + $0x24] ss:$8 sm:$0xf]   ;;  %v639_v45 = vld [vmem:[#allocation1 + $0x5] ss:$8 sm:$0xf0]  }
  0x1f   :  { %3626 = vrot.lane.b32.xlu1 %v3625_v39, %s3895_s0  ;;  %v3620_v46 = vpack.i.bf16 %v602_v43, %v589_v40  ;;  %v641_v47 = vsel %vm562_vm1, %v639_v45, %v637_v44  ;;  %v650_v48 = vld [vmem:[#allocation1 + $0x26] ss:$8 sm:$0xf]   ;;  %v652_v49 = vld [vmem:[#allocation1 + $0x7] ss:$8 sm:$0xf0]  }
  0x20   :  { %v654_v50 = vsel %vm562_vm1, %v652_v49, %v650_v48  ;;  %v689_v51 = vld [vmem:[#allocation1 + $0x44] ss:$8 sm:$0xf]   ;;  %v691_v52 = vld [vmem:[#allocation1 + $0x25] ss:$8 sm:$0xf0]  }
  0x21   :  { %3621 = vrot.lane.b32.xlu0 %v3620_v46, %s3895_s0  ;;  %v3630_v53 = vpack.i.bf16 %v654_v50, %v641_v47  ;;  %v693_v54 = vsel %vm562_vm1, %v691_v52, %v689_v51  ;;  %v702_v55 = vld [vmem:[#allocation1 + $0x46] ss:$8 sm:$0xf]   ;;  %v704_v56 = vld [vmem:[#allocation1 + $0x27] ss:$8 sm:$0xf0]  }
  0x22   :  { %v706_v57 = vsel %vm562_vm1, %v704_v56, %v702_v55  ;;  %v663_v58 = vld [vmem:[#allocation1 + $0x40] ss:$8 sm:$0xf]   ;;  %v665_v59 = vld [vmem:[#allocation1 + $0x21] ss:$8 sm:$0xf0]  }
  0x23   :  { %3631 = vrot.lane.b32.xlu1 %v3630_v53, %s3895_s0  ;;  %v3640_v60 = vpack.i.bf16 %v706_v57, %v693_v54  ;;  %v667_v61 = vsel %vm562_vm1, %v665_v59, %v663_v58  ;;  %v676_v62 = vld [vmem:[#allocation1 + $0x42] ss:$8 sm:$0xf]   ;;  %v678_v63 = vld [vmem:[#allocation1 + $0x23] ss:$8 sm:$0xf0]  }
  0x24   :  { %v680_v0 = vsel %vm562_vm1, %v678_v63, %v676_v62  ;;  %v741_v1 = vld [vmem:[#allocation1 + $0x64] ss:$8 sm:$0xf]   ;;  %v743_v2 = vld [vmem:[#allocation1 + $0x45] ss:$8 sm:$0xf0]  }
  0x25   :  { %v3635_v3 = vpack.i.bf16 %v680_v0, %v667_v61  ;;  %v745_v4 = vsel %vm562_vm1, %v743_v2, %v741_v1  ;;  %v754_v5 = vld [vmem:[#allocation1 + $0x66] ss:$8 sm:$0xf]   ;;  %v756_v6 = vld [vmem:[#allocation1 + $0x47] ss:$8 sm:$0xf0]  }
  0x26   :  { %v758_v7 = vsel %vm562_vm1, %v756_v6, %v754_v5  ;;  %v715_v8 = vld [vmem:[#allocation1 + $0x60] ss:$8 sm:$0xf]   ;;  %v717_v9 = vld [vmem:[#allocation1 + $0x41] ss:$8 sm:$0xf0]  }
  0x27   :  { %3641 = vrot.lane.b32.xlu1 %v3640_v60, %s3895_s0  ;;  %3636 = vrot.lane.b32.xlu0 %v3635_v3, %s3895_s0  ;;  %v3650_v10 = vpack.i.bf16 %v758_v7, %v745_v4  ;;  %v719_v11 = vsel %vm562_vm1, %v717_v9, %v715_v8  ;;  %v728_v12 = vld [vmem:[#allocation1 + $0x62] ss:$8 sm:$0xf]   ;;  %v730_v13 = vld [vmem:[#allocation1 + $0x43] ss:$8 sm:$0xf0]  }
  0x28   :  { %v732_v14 = vsel %vm562_vm1, %v730_v13, %v728_v12  ;;  %v792_v15 = vld [vmem:[#allocation1 + $0x4] ss:$8 sm:$0xf]   ;;  %v794_v16 = vld [vmem:[#allocation1 - $0x1b] ss:$8 sm:$0xf0]  }
  0x29   :  { %v3645_v17 = vpack.i.bf16 %v732_v14, %v719_v11  ;;  %v796_v18 = vsel %vm562_vm1, %v794_v16, %v792_v15  ;;  %v805_v19 = vld [vmem:[#allocation1 + $0x6] ss:$8 sm:$0xf]   ;;  %v807_v20 = vld [vmem:[#allocation1 - $0x19] ss:$8 sm:$0xf0]  }
  0x2a   :  { %v809_v21 = vsel %vm562_vm1, %v807_v20, %v805_v19  ;;  %v766_v22 = vld [vmem:[#allocation1] ss:$8 sm:$0xf]   ;;  %v768_v23 = vld [vmem:[#allocation1 - $0x1f] ss:$8 sm:$0xf0]  }
  0x2b   :  { %3651 = vrot.lane.b32.xlu1 %v3650_v10, %s3895_s0  ;;  %3646 = vrot.lane.b32.xlu0 %v3645_v17, %s3895_s0  ;;  %v3660_v24 = vpack.i.bf16 %v809_v21, %v796_v18  ;;  %v770_v25 = vsel %vm562_vm1, %v768_v23, %v766_v22  ;;  %v779_v26 = vld [vmem:[#allocation1 + $0x2] ss:$8 sm:$0xf]   ;;  %v781_v27 = vld [vmem:[#allocation1 - $0x1d] ss:$8 sm:$0xf0]  }
  0x2c   :  { %v783_v28 = vsel %vm562_vm1, %v781_v27, %v779_v26  ;;  %v844_v29 = vld [vmem:[#allocation1 + $0x24] ss:$8 sm:$0xf]   ;;  %v846_v30 = vld [vmem:[#allocation1 + $0x5] ss:$8 sm:$0xf0]  }
  0x2d   :  { %v3655_v31 = vpack.i.bf16 %v783_v28, %v770_v25  ;;  %v848_v32 = vsel %vm562_vm1, %v846_v30, %v844_v29  ;;  %v857_v33 = vld [vmem:[#allocation1 + $0x26] ss:$8 sm:$0xf]   ;;  %v859_v34 = vld [vmem:[#allocation1 + $0x7] ss:$8 sm:$0xf0]  }
  0x2e   :  { %v861_v35 = vsel %vm562_vm1, %v859_v34, %v857_v33  ;;  %v818_v36 = vld [vmem:[#allocation1 + $0x20] ss:$8 sm:$0xf]   ;;  %v820_v37 = vld [vmem:[#allocation1 + $0x1] ss:$8 sm:$0xf0]  }
  0x2f   :  { %3661 = vrot.lane.b32.xlu1 %v3660_v24, %s3896_s22  ;;  %3656 = vrot.lane.b32.xlu0 %v3655_v31, %s3896_s22  ;;  %v3670_v38 = vpack.i.bf16 %v861_v35, %v848_v32  ;;  %v822_v39 = vsel %vm562_vm1, %v820_v37, %v818_v36  ;;  %v831_v40 = vld [vmem:[#allocation1 + $0x22] ss:$8 sm:$0xf]   ;;  %v833_v41 = vld [vmem:[#allocation1 + $0x3] ss:$8 sm:$0xf0]  }
  0x30   :  { %v835_v42 = vsel %vm562_vm1, %v833_v41, %v831_v40  ;;  %v896_v43 = vld [vmem:[#allocation1 + $0x44] ss:$8 sm:$0xf]   ;;  %v898_v44 = vld [vmem:[#allocation1 + $0x25] ss:$8 sm:$0xf0]  }
  0x31   :  { %v3665_v45 = vpack.i.bf16 %v835_v42, %v822_v39  ;;  %v900_v46 = vsel %vm562_vm1, %v898_v44, %v896_v43  ;;  %v909_v47 = vld [vmem:[#allocation1 + $0x46] ss:$8 sm:$0xf]   ;;  %v911_v48 = vld [vmem:[#allocation1 + $0x27] ss:$8 sm:$0xf0]  }
  0x32   :  { %v913_v49 = vsel %vm562_vm1, %v911_v48, %v909_v47  ;;  %v870_v50 = vld [vmem:[#allocation1 + $0x40] ss:$8 sm:$0xf]   ;;  %v872_v51 = vld [vmem:[#allocation1 + $0x21] ss:$8 sm:$0xf0]  }
  0x33   :  { %3671 = vrot.lane.b32.xlu1 %v3670_v38, %s3896_s22  ;;  %3666 = vrot.lane.b32.xlu0 %v3665_v45, %s3896_s22  ;;  %v3680_v52 = vpack.i.bf16 %v913_v49, %v900_v46  ;;  %v874_v53 = vsel %vm562_vm1, %v872_v51, %v870_v50  ;;  %v883_v54 = vld [vmem:[#allocation1 + $0x42] ss:$8 sm:$0xf]   ;;  %v885_v55 = vld [vmem:[#allocation1 + $0x23] ss:$8 sm:$0xf0]  }
  0x34   :  { %v887_v56 = vsel %vm562_vm1, %v885_v55, %v883_v54  ;;  %v948_v57 = vld [vmem:[#allocation1 + $0x64] ss:$8 sm:$0xf]   ;;  %v950_v58 = vld [vmem:[#allocation1 + $0x45] ss:$8 sm:$0xf0]  }
  0x35   :  { %v3675_v59 = vpack.i.bf16 %v887_v56, %v874_v53  ;;  %v952_v60 = vsel %vm562_vm1, %v950_v58, %v948_v57  ;;  %v961_v61 = vld [vmem:[#allocation1 + $0x66] ss:$8 sm:$0xf]   ;;  %v963_v62 = vld [vmem:[#allocation1 + $0x47] ss:$8 sm:$0xf0]  }
  0x36   :  { %v965_v63 = vsel %vm562_vm1, %v963_v62, %v961_v61  ;;  %v922_v0 = vld [vmem:[#allocation1 + $0x60] ss:$8 sm:$0xf]   ;;  %v924_v1 = vld [vmem:[#allocation1 + $0x41] ss:$8 sm:$0xf0]  }
  0x37   :  { %3681 = vrot.lane.b32.xlu1 %v3680_v52, %s3896_s22  ;;  %3676 = vrot.lane.b32.xlu0 %v3675_v59, %s3896_s22  ;;  %v3690_v2 = vpack.i.bf16 %v965_v63, %v952_v60  ;;  %v926_v3 = vsel %vm562_vm1, %v924_v1, %v922_v0  ;;  %v935_v4 = vld [vmem:[#allocation1 + $0x62] ss:$8 sm:$0xf]   ;;  %v937_v5 = vld [vmem:[#allocation1 + $0x43] ss:$8 sm:$0xf0]  }
  0x38   :  { %v939_v6 = vsel %vm562_vm1, %v937_v5, %v935_v4  ;;  %v999_v7 = vld [vmem:[#allocation1 + $0x4] ss:$8 sm:$0xf]   ;;  %v1001_v8 = vld [vmem:[#allocation1 - $0x1b] ss:$8 sm:$0xf0]  }
  0x39   :  { %v3685_v9 = vpack.i.bf16 %v939_v6, %v926_v3  ;;  %v1003_v10 = vsel %vm562_vm1, %v1001_v8, %v999_v7  ;;  %v1012_v11 = vld [vmem:[#allocation1 + $0x6] ss:$8 sm:$0xf]   ;;  %v1014_v12 = vld [vmem:[#allocation1 - $0x19] ss:$8 sm:$0xf0]  }
  0x3a   :  { %v1016_v13 = vsel %vm562_vm1, %v1014_v12, %v1012_v11  ;;  %v973_v14 = vld [vmem:[#allocation1] ss:$8 sm:$0xf]   ;;  %v975_v15 = vld [vmem:[#allocation1 - $0x1f] ss:$8 sm:$0xf0]  }
  0x3b   :  { %3691 = vrot.lane.b32.xlu1 %v3690_v2, %s3896_s22  ;;  %3686 = vrot.lane.b32.xlu0 %v3685_v9, %s3896_s22  ;;  %v3700_v16 = vpack.i.bf16 %v1016_v13, %v1003_v10  ;;  %v977_v17 = vsel %vm562_vm1, %v975_v15, %v973_v14  ;;  %v986_v18 = vld [vmem:[#allocation1 + $0x2] ss:$8 sm:$0xf]   ;;  %v988_v19 = vld [vmem:[#allocation1 - $0x1d] ss:$8 sm:$0xf0]  }
  0x3c   :  { %v990_v20 = vsel %vm562_vm1, %v988_v19, %v986_v18  ;;  %v1051_v21 = vld [vmem:[#allocation1 + $0x24] ss:$8 sm:$0xf]   ;;  %v1053_v22 = vld [vmem:[#allocation1 + $0x5] ss:$8 sm:$0xf0]  }
  0x3d   :  { %v3695_v23 = vpack.i.bf16 %v990_v20, %v977_v17  ;;  %v1055_v24 = vsel %vm562_vm1, %v1053_v22, %v1051_v21  ;;  %v1064_v25 = vld [vmem:[#allocation1 + $0x26] ss:$8 sm:$0xf]   ;;  %v1066_v26 = vld [vmem:[#allocation1 + $0x7] ss:$8 sm:$0xf0]  }
  0x3e   :  { %v1068_v27 = vsel %vm562_vm1, %v1066_v26, %v1064_v25  ;;  %v1025_v28 = vld [vmem:[#allocation1 + $0x20] ss:$8 sm:$0xf]   ;;  %v1027_v29 = vld [vmem:[#allocation1 + $0x1] ss:$8 sm:$0xf0]  }
  0x3f   :  { %3701 = vrot.lane.b32.xlu1 %v3700_v16, %s3897_s23  ;;  %3696 = vrot.lane.b32.xlu0 %v3695_v23, %s3897_s23  ;;  %v3710_v30 = vpack.i.bf16 %v1068_v27, %v1055_v24  ;;  %v1029_v31 = vsel %vm562_vm1, %v1027_v29, %v1025_v28  ;;  %v1038_v32 = vld [vmem:[#allocation1 + $0x22] ss:$8 sm:$0xf]   ;;  %v1040_v33 = vld [vmem:[#allocation1 + $0x3] ss:$8 sm:$0xf0]  }
  0x40   :  { %v1042_v34 = vsel %vm562_vm1, %v1040_v33, %v1038_v32  ;;  %v1103_v35 = vld [vmem:[#allocation1 + $0x44] ss:$8 sm:$0xf]   ;;  %v1105_v36 = vld [vmem:[#allocation1 + $0x25] ss:$8 sm:$0xf0]  }
  0x41   :  { %v3705_v37 = vpack.i.bf16 %v1042_v34, %v1029_v31  ;;  %v1107_v38 = vsel %vm562_vm1, %v1105_v36, %v1103_v35  ;;  %v1116_v39 = vld [vmem:[#allocation1 + $0x46] ss:$8 sm:$0xf]   ;;  %v1118_v40 = vld [vmem:[#allocation1 + $0x27] ss:$8 sm:$0xf0]  }
  0x42   :  { %v1120_v41 = vsel %vm562_vm1, %v1118_v40, %v1116_v39  ;;  %v1077_v42 = vld [vmem:[#allocation1 + $0x40] ss:$8 sm:$0xf]   ;;  %v1079_v43 = vld [vmem:[#allocation1 + $0x21] ss:$8 sm:$0xf0]  }
  0x43   :  { %3711 = vrot.lane.b32.xlu1 %v3710_v30, %s3897_s23  ;;  %3706 = vrot.lane.b32.xlu0 %v3705_v37, %s3897_s23  ;;  %v3720_v44 = vpack.i.bf16 %v1120_v41, %v1107_v38  ;;  %v1081_v45 = vsel %vm562_vm1, %v1079_v43, %v1077_v42  ;;  %v1090_v46 = vld [vmem:[#allocation1 + $0x42] ss:$8 sm:$0xf]   ;;  %v1092_v47 = vld [vmem:[#allocation1 + $0x23] ss:$8 sm:$0xf0]  }
  0x44   :  { %v1094_v48 = vsel %vm562_vm1, %v1092_v47, %v1090_v46  ;;  %v1155_v49 = vld [vmem:[#allocation1 + $0x64] ss:$8 sm:$0xf]   ;;  %v1157_v50 = vld [vmem:[#allocation1 + $0x45] ss:$8 sm:$0xf0]  }
  0x45   :  { %v3715_v51 = vpack.i.bf16 %v1094_v48, %v1081_v45  ;;  %v1159_v52 = vsel %vm562_vm1, %v1157_v50, %v1155_v49  ;;  %v1168_v53 = vld [vmem:[#allocation1 + $0x66] ss:$8 sm:$0xf]   ;;  %v1170_v54 = vld [vmem:[#allocation1 + $0x47] ss:$8 sm:$0xf0]  }
  0x46   :  { %v1172_v55 = vsel %vm562_vm1, %v1170_v54, %v1168_v53  ;;  %v1129_v56 = vld [vmem:[#allocation1 + $0x60] ss:$8 sm:$0xf]   ;;  %v1131_v57 = vld [vmem:[#allocation1 + $0x41] ss:$8 sm:$0xf0]  }
  0x47   :  { %3721 = vrot.lane.b32.xlu1 %v3720_v44, %s3897_s23  ;;  %3716 = vrot.lane.b32.xlu0 %v3715_v51, %s3897_s23  ;;  %v3730_v58 = vpack.i.bf16 %v1172_v55, %v1159_v52  ;;  %v1133_v59 = vsel %vm562_vm1, %v1131_v57, %v1129_v56  ;;  %v1142_v60 = vld [vmem:[#allocation1 + $0x62] ss:$8 sm:$0xf]   ;;  %v1144_v61 = vld [vmem:[#allocation1 + $0x43] ss:$8 sm:$0xf0]  }
  0x48   :  { %v1146_v62 = vsel %vm562_vm1, %v1144_v61, %v1142_v60  ;;  %v1206_v63 = vld [vmem:[#allocation1 + $0x4] ss:$8 sm:$0xf]   ;;  %v1208_v0 = vld [vmem:[#allocation1 - $0x1b] ss:$8 sm:$0xf0]  }
  0x49   :  { %v3725_v1 = vpack.i.bf16 %v1146_v62, %v1133_v59  ;;  %v1210_v2 = vsel %vm562_vm1, %v1208_v0, %v1206_v63  ;;  %v1219_v3 = vld [vmem:[#allocation1 + $0x6] ss:$8 sm:$0xf]   ;;  %v1221_v4 = vld [vmem:[#allocation1 - $0x19] ss:$8 sm:$0xf0]  }
  0x4a   :  { %v1223_v5 = vsel %vm562_vm1, %v1221_v4, %v1219_v3  ;;  %v1180_v6 = vld [vmem:[#allocation1] ss:$8 sm:$0xf]   ;;  %v1182_v7 = vld [vmem:[#allocation1 - $0x1f] ss:$8 sm:$0xf0]  }
  0x4b   :  { %3731 = vrot.lane.b32.xlu1 %v3730_v58, %s3897_s23  ;;  %3726 = vrot.lane.b32.xlu0 %v3725_v1, %s3897_s23  ;;  %v3740_v8 = vpack.i.bf16 %v1223_v5, %v1210_v2  ;;  %v1184_v9 = vsel %vm562_vm1, %v1182_v7, %v1180_v6  ;;  %v1193_v10 = vld [vmem:[#allocation1 + $0x2] ss:$8 sm:$0xf]   ;;  %v1195_v11 = vld [vmem:[#allocation1 - $0x1d] ss:$8 sm:$0xf0]  }
  0x4c   :  { %v1197_v12 = vsel %vm562_vm1, %v1195_v11, %v1193_v10  ;;  %v1258_v13 = vld [vmem:[#allocation1 + $0x24] ss:$8 sm:$0xf]   ;;  %v1260_v14 = vld [vmem:[#allocation1 + $0x5] ss:$8 sm:$0xf0]  }
  0x4d   :  { %v3735_v15 = vpack.i.bf16 %v1197_v12, %v1184_v9  ;;  %v1262_v16 = vsel %vm562_vm1, %v1260_v14, %v1258_v13  ;;  %v1271_v17 = vld [vmem:[#allocation1 + $0x26] ss:$8 sm:$0xf]   ;;  %v1273_v18 = vld [vmem:[#allocation1 + $0x7] ss:$8 sm:$0xf0]  }
  0x4e   :  { %v1275_v19 = vsel %vm562_vm1, %v1273_v18, %v1271_v17  ;;  %v1232_v20 = vld [vmem:[#allocation1 + $0x20] ss:$8 sm:$0xf]   ;;  %v1234_v21 = vld [vmem:[#allocation1 + $0x1] ss:$8 sm:$0xf0]  }
  0x4f   :  { %3741 = vrot.lane.b32.xlu1 %v3740_v8, %s3898_s24  ;;  %3736 = vrot.lane.b32.xlu0 %v3735_v15, %s3898_s24  ;;  %v3750_v22 = vpack.i.bf16 %v1275_v19, %v1262_v16  ;;  %v1236_v23 = vsel %vm562_vm1, %v1234_v21, %v1232_v20  ;;  %v1245_v24 = vld [vmem:[#allocation1 + $0x22] ss:$8 sm:$0xf]   ;;  %v1247_v25 = vld [vmem:[#allocation1 + $0x3] ss:$8 sm:$0xf0]  }
  0x50   :  { %v1249_v26 = vsel %vm562_vm1, %v1247_v25, %v1245_v24  ;;  %v1310_v27 = vld [vmem:[#allocation1 + $0x44] ss:$8 sm:$0xf]   ;;  %v1312_v28 = vld [vmem:[#allocation1 + $0x25] ss:$8 sm:$0xf0]  }
  0x51   :  { %v3745_v29 = vpack.i.bf16 %v1249_v26, %v1236_v23  ;;  %v1314_v30 = vsel %vm562_vm1, %v1312_v28, %v1310_v27  ;;  %v1323_v31 = vld [vmem:[#allocation1 + $0x46] ss:$8 sm:$0xf]   ;;  %v1325_v32 = vld [vmem:[#allocation1 + $0x27] ss:$8 sm:$0xf0]  }
  0x52   :  { %v1327_v33 = vsel %vm562_vm1, %v1325_v32, %v1323_v31  ;;  %v1284_v34 = vld [vmem:[#allocation1 + $0x40] ss:$8 sm:$0xf]   ;;  %v1286_v35 = vld [vmem:[#allocation1 + $0x21] ss:$8 sm:$0xf0]  }
  0x53   :  { %3751 = vrot.lane.b32.xlu1 %v3750_v22, %s3898_s24  ;;  %3746 = vrot.lane.b32.xlu0 %v3745_v29, %s3898_s24  ;;  %v3760_v36 = vpack.i.bf16 %v1327_v33, %v1314_v30  ;;  %v1288_v37 = vsel %vm562_vm1, %v1286_v35, %v1284_v34  ;;  %v1297_v38 = vld [vmem:[#allocation1 + $0x42] ss:$8 sm:$0xf]   ;;  %v1299_v39 = vld [vmem:[#allocation1 + $0x23] ss:$8 sm:$0xf0]  }
  0x54   :  { %v1301_v40 = vsel %vm562_vm1, %v1299_v39, %v1297_v38  ;;  %v1362_v41 = vld [vmem:[#allocation1 + $0x64] ss:$8 sm:$0xf]   ;;  %v1364_v42 = vld [vmem:[#allocation1 + $0x45] ss:$8 sm:$0xf0]  }
  0x55   :  { %v3755_v43 = vpack.i.bf16 %v1301_v40, %v1288_v37  ;;  %v1366_v44 = vsel %vm562_vm1, %v1364_v42, %v1362_v41  ;;  %v1375_v45 = vld [vmem:[#allocation1 + $0x66] ss:$8 sm:$0xf]   ;;  %v1377_v46 = vld [vmem:[#allocation1 + $0x47] ss:$8 sm:$0xf0]  }
  0x56   :  { %v1379_v47 = vsel %vm562_vm1, %v1377_v46, %v1375_v45  ;;  %v1336_v48 = vld [vmem:[#allocation1 + $0x60] ss:$8 sm:$0xf]   ;;  %v1338_v49 = vld [vmem:[#allocation1 + $0x41] ss:$8 sm:$0xf0]  }
  0x57   :  { %3761 = vrot.lane.b32.xlu1 %v3760_v36, %s3898_s24  ;;  %3756 = vrot.lane.b32.xlu0 %v3755_v43, %s3898_s24  ;;  %v3770_v50 = vpack.i.bf16 %v1379_v47, %v1366_v44  ;;  %v1340_v51 = vsel %vm562_vm1, %v1338_v49, %v1336_v48  ;;  %v1349_v52 = vld [vmem:[#allocation1 + $0x62] ss:$8 sm:$0xf]   ;;  %v1351_v53 = vld [vmem:[#allocation1 + $0x43] ss:$8 sm:$0xf0]  }
  0x58   :  { %v1353_v54 = vsel %vm562_vm1, %v1351_v53, %v1349_v52  ;;  %v1413_v55 = vld [vmem:[#allocation1 + $0x4] ss:$8 sm:$0xf]   ;;  %v1415_v56 = vld [vmem:[#allocation1 - $0x1b] ss:$8 sm:$0xf0]  }
  0x59   :  { %v3765_v57 = vpack.i.bf16 %v1353_v54, %v1340_v51  ;;  %v1417_v58 = vsel %vm562_vm1, %v1415_v56, %v1413_v55  ;;  %v1426_v59 = vld [vmem:[#allocation1 + $0x6] ss:$8 sm:$0xf]   ;;  %v1428_v60 = vld [vmem:[#allocation1 - $0x19] ss:$8 sm:$0xf0]  }
  0x5a   :  { %v1430_v61 = vsel %vm562_vm1, %v1428_v60, %v1426_v59  ;;  %v1387_v62 = vld [vmem:[#allocation1] ss:$8 sm:$0xf]   ;;  %v1389_v63 = vld [vmem:[#allocation1 - $0x1f] ss:$8 sm:$0xf0]  }
  0x5b   :  { %3771 = vrot.lane.b32.xlu1 %v3770_v50, %s3898_s24  ;;  %3766 = vrot.lane.b32.xlu0 %v3765_v57, %s3898_s24  ;;  %v3780_v0 = vpack.i.bf16 %v1430_v61, %v1417_v58  ;;  %v1391_v1 = vsel %vm562_vm1, %v1389_v63, %v1387_v62  ;;  %v1400_v2 = vld [vmem:[#allocation1 + $0x2] ss:$8 sm:$0xf]   ;;  %v1402_v3 = vld [vmem:[#allocation1 - $0x1d] ss:$8 sm:$0xf0]  }
  0x5c   :  { %v1404_v4 = vsel %vm562_vm1, %v1402_v3, %v1400_v2  ;;  %v1465_v5 = vld [vmem:[#allocation1 + $0x24] ss:$8 sm:$0xf]   ;;  %v1467_v6 = vld [vmem:[#allocation1 + $0x5] ss:$8 sm:$0xf0]  }
  0x5d   :  { %v3775_v7 = vpack.i.bf16 %v1404_v4, %v1391_v1  ;;  %v1469_v8 = vsel %vm562_vm1, %v1467_v6, %v1465_v5  ;;  %v1478_v9 = vld [vmem:[#allocation1 + $0x26] ss:$8 sm:$0xf]   ;;  %v1480_v10 = vld [vmem:[#allocation1 + $0x7] ss:$8 sm:$0xf0]  }
  0x5e   :  { %v1482_v11 = vsel %vm562_vm1, %v1480_v10, %v1478_v9  ;;  %v1439_v12 = vld [vmem:[#allocation1 + $0x20] ss:$8 sm:$0xf]   ;;  %v1441_v13 = vld [vmem:[#allocation1 + $0x1] ss:$8 sm:$0xf0]  }
  0x5f   :  { %3781 = vrot.lane.b32.xlu1 %v3780_v0, %s3899_s25  ;;  %3776 = vrot.lane.b32.xlu0 %v3775_v7, %s3899_s25  ;;  %v3790_v14 = vpack.i.bf16 %v1482_v11, %v1469_v8  ;;  %v1443_v15 = vsel %vm562_vm1, %v1441_v13, %v1439_v12  ;;  %v1452_v16 = vld [vmem:[#allocation1 + $0x22] ss:$8 sm:$0xf]   ;;  %v1454_v17 = vld [vmem:[#allocation1 + $0x3] ss:$8 sm:$0xf0]  }
  0x60   :  { %v1456_v18 = vsel %vm562_vm1, %v1454_v17, %v1452_v16  ;;  %v1517_v19 = vld [vmem:[#allocation1 + $0x44] ss:$8 sm:$0xf]   ;;  %v1519_v20 = vld [vmem:[#allocation1 + $0x25] ss:$8 sm:$0xf0]  }
  0x61   :  { %v3785_v21 = vpack.i.bf16 %v1456_v18, %v1443_v15  ;;  %v1521_v22 = vsel %vm562_vm1, %v1519_v20, %v1517_v19  ;;  %v1530_v23 = vld [vmem:[#allocation1 + $0x46] ss:$8 sm:$0xf]   ;;  %v1532_v24 = vld [vmem:[#allocation1 + $0x27] ss:$8 sm:$0xf0]  }
  0x62   :  { %v1534_v25 = vsel %vm562_vm1, %v1532_v24, %v1530_v23  ;;  %v1491_v26 = vld [vmem:[#allocation1 + $0x40] ss:$8 sm:$0xf]   ;;  %v1493_v27 = vld [vmem:[#allocation1 + $0x21] ss:$8 sm:$0xf0]  }
  0x63   :  { %3791 = vrot.lane.b32.xlu1 %v3790_v14, %s3899_s25  ;;  %3786 = vrot.lane.b32.xlu0 %v3785_v21, %s3899_s25  ;;  %v3800_v28 = vpack.i.bf16 %v1534_v25, %v1521_v22  ;;  %v1495_v29 = vsel %vm562_vm1, %v1493_v27, %v1491_v26  ;;  %v1504_v30 = vld [vmem:[#allocation1 + $0x42] ss:$8 sm:$0xf]   ;;  %v1506_v31 = vld [vmem:[#allocation1 + $0x23] ss:$8 sm:$0xf0]  }
  0x64   :  { %v1508_v32 = vsel %vm562_vm1, %v1506_v31, %v1504_v30  ;;  %v1569_v33 = vld [vmem:[#allocation1 + $0x64] ss:$8 sm:$0xf]   ;;  %v1571_v34 = vld [vmem:[#allocation1 + $0x45] ss:$8 sm:$0xf0]  }
  0x65   :  { %v3795_v35 = vpack.i.bf16 %v1508_v32, %v1495_v29  ;;  %v1573_v36 = vsel %vm562_vm1, %v1571_v34, %v1569_v33  ;;  %v1582_v37 = vld [vmem:[#allocation1 + $0x66] ss:$8 sm:$0xf]   ;;  %v1584_v38 = vld [vmem:[#allocation1 + $0x47] ss:$8 sm:$0xf0]  }
  0x66   :  { %v1586_v39 = vsel %vm562_vm1, %v1584_v38, %v1582_v37  ;;  %v1543_v40 = vld [vmem:[#allocation1 + $0x60] ss:$8 sm:$0xf]   ;;  %v1545_v41 = vld [vmem:[#allocation1 + $0x41] ss:$8 sm:$0xf0]  }
  0x67   :  { %3801 = vrot.lane.b32.xlu1 %v3800_v28, %s3899_s25  ;;  %3796 = vrot.lane.b32.xlu0 %v3795_v35, %s3899_s25  ;;  %v3810_v42 = vpack.i.bf16 %v1586_v39, %v1573_v36  ;;  %v1547_v43 = vsel %vm562_vm1, %v1545_v41, %v1543_v40  ;;  %v1556_v44 = vld [vmem:[#allocation1 + $0x62] ss:$8 sm:$0xf]   ;;  %v1558_v45 = vld [vmem:[#allocation1 + $0x43] ss:$8 sm:$0xf0]  }
  0x68   :  { %v1560_v46 = vsel %vm562_vm1, %v1558_v45, %v1556_v44  ;;  %v1620_v47 = vld [vmem:[#allocation1 + $0x4] ss:$8 sm:$0xf]   ;;  %v1622_v48 = vld [vmem:[#allocation1 - $0x1b] ss:$8 sm:$0xf0]  }
  0x69   :  { %v3805_v49 = vpack.i.bf16 %v1560_v46, %v1547_v43  ;;  %v1624_v50 = vsel %vm562_vm1, %v1622_v48, %v1620_v47  ;;  %v1633_v51 = vld [vmem:[#allocation1 + $0x6] ss:$8 sm:$0xf]   ;;  %v1635_v52 = vld [vmem:[#allocation1 - $0x19] ss:$8 sm:$0xf0]  }
  0x6a   :  { %v1637_v53 = vsel %vm562_vm1, %v1635_v52, %v1633_v51  ;;  %v1594_v54 = vld [vmem:[#allocation1] ss:$8 sm:$0xf]   ;;  %v1596_v55 = vld [vmem:[#allocation1 - $0x1f] ss:$8 sm:$0xf0]  }
  0x6b   :  { %3811 = vrot.lane.b32.xlu1 %v3810_v42, %s3899_s25  ;;  %3806 = vrot.lane.b32.xlu0 %v3805_v49, %s3899_s25  ;;  %v3820_v56 = vpack.i.bf16 %v1637_v53, %v1624_v50  ;;  %v1598_v57 = vsel %vm562_vm1, %v1596_v55, %v1594_v54  ;;  %v1607_v58 = vld [vmem:[#allocation1 + $0x2] ss:$8 sm:$0xf]   ;;  %v1609_v59 = vld [vmem:[#allocation1 - $0x1d] ss:$8 sm:$0xf0]  }
  0x6c   :  { %v1611_v60 = vsel %vm562_vm1, %v1609_v59, %v1607_v58  ;;  %v1672_v61 = vld [vmem:[#allocation1 + $0x24] ss:$8 sm:$0xf]   ;;  %v1674_v62 = vld [vmem:[#allocation1 + $0x5] ss:$8 sm:$0xf0]  }
  0x6d   :  { %v3815_v63 = vpack.i.bf16 %v1611_v60, %v1598_v57  ;;  %v1676_v0 = vsel %vm562_vm1, %v1674_v62, %v1672_v61  ;;  %v1685_v1 = vld [vmem:[#allocation1 + $0x26] ss:$8 sm:$0xf]   ;;  %v1687_v2 = vld [vmem:[#allocation1 + $0x7] ss:$8 sm:$0xf0]  }
  0x6e   :  { %v1689_v3 = vsel %vm562_vm1, %v1687_v2, %v1685_v1  ;;  %v1646_v4 = vld [vmem:[#allocation1 + $0x20] ss:$8 sm:$0xf]   ;;  %v1648_v5 = vld [vmem:[#allocation1 + $0x1] ss:$8 sm:$0xf0]  }
  0x6f   :  { %3821 = vrot.lane.b32.xlu1 %v3820_v56, %s3900_s26  ;;  %3816 = vrot.lane.b32.xlu0 %v3815_v63, %s3900_s26  ;;  %v3830_v6 = vpack.i.bf16 %v1689_v3, %v1676_v0  ;;  %v1650_v7 = vsel %vm562_vm1, %v1648_v5, %v1646_v4  ;;  %v1659_v8 = vld [vmem:[#allocation1 + $0x22] ss:$8 sm:$0xf]   ;;  %v1661_v9 = vld [vmem:[#allocation1 + $0x3] ss:$8 sm:$0xf0]  }
  0x70   :  { %v1663_v10 = vsel %vm562_vm1, %v1661_v9, %v1659_v8  ;;  %v1724_v11 = vld [vmem:[#allocation1 + $0x44] ss:$8 sm:$0xf]   ;;  %v1726_v12 = vld [vmem:[#allocation1 + $0x25] ss:$8 sm:$0xf0]  }
  0x71   :  { %v3825_v13 = vpack.i.bf16 %v1663_v10, %v1650_v7  ;;  %v1728_v14 = vsel %vm562_vm1, %v1726_v12, %v1724_v11  ;;  %v1737_v15 = vld [vmem:[#allocation1 + $0x46] ss:$8 sm:$0xf]   ;;  %v1739_v16 = vld [vmem:[#allocation1 + $0x27] ss:$8 sm:$0xf0]  }
  0x72   :  { %v1741_v17 = vsel %vm562_vm1, %v1739_v16, %v1737_v15  ;;  %v1698_v18 = vld [vmem:[#allocation1 + $0x40] ss:$8 sm:$0xf]   ;;  %v1700_v19 = vld [vmem:[#allocation1 + $0x21] ss:$8 sm:$0xf0]  }
  0x73   :  { %3831 = vrot.lane.b32.xlu1 %v3830_v6, %s3900_s26  ;;  %3826 = vrot.lane.b32.xlu0 %v3825_v13, %s3900_s26  ;;  %v3840_v20 = vpack.i.bf16 %v1741_v17, %v1728_v14  ;;  %v1702_v21 = vsel %vm562_vm1, %v1700_v19, %v1698_v18  ;;  %v1711_v22 = vld [vmem:[#allocation1 + $0x42] ss:$8 sm:$0xf]   ;;  %v1713_v23 = vld [vmem:[#allocation1 + $0x23] ss:$8 sm:$0xf0]  }
  0x74   :  { %v1715_v24 = vsel %vm562_vm1, %v1713_v23, %v1711_v22  ;;  %v1776_v25 = vld [vmem:[#allocation1 + $0x64] ss:$8 sm:$0xf]   ;;  %v1778_v26 = vld [vmem:[#allocation1 + $0x45] ss:$8 sm:$0xf0]  }
  0x75   :  { %v3835_v27 = vpack.i.bf16 %v1715_v24, %v1702_v21  ;;  %v1780_v28 = vsel %vm562_vm1, %v1778_v26, %v1776_v25  ;;  %v1789_v29 = vld [vmem:[#allocation1 + $0x66] ss:$8 sm:$0xf]   ;;  %v1791_v30 = vld [vmem:[#allocation1 + $0x47] ss:$8 sm:$0xf0]  }
  0x76   :  { %v1793_v31 = vsel %vm562_vm1, %v1791_v30, %v1789_v29  ;;  %v1750_v32 = vld [vmem:[#allocation1 + $0x60] ss:$8 sm:$0xf]   ;;  %v1752_v33 = vld [vmem:[#allocation1 + $0x41] ss:$8 sm:$0xf0]  }
  0x77   :  { %3841 = vrot.lane.b32.xlu1 %v3840_v20, %s3900_s26  ;;  %3836 = vrot.lane.b32.xlu0 %v3835_v27, %s3900_s26  ;;  %v3850_v34 = vpack.i.bf16 %v1793_v31, %v1780_v28  ;;  %v1754_v35 = vsel %vm562_vm1, %v1752_v33, %v1750_v32  ;;  %v1763_v36 = vld [vmem:[#allocation1 + $0x62] ss:$8 sm:$0xf]   ;;  %v1765_v37 = vld [vmem:[#allocation1 + $0x43] ss:$8 sm:$0xf0]  }
  0x78   :  { %v1767_v38 = vsel %vm562_vm1, %v1765_v37, %v1763_v36  ;;  %v1827_v39 = vld [vmem:[#allocation1 + $0x4] ss:$8 sm:$0xf]   ;;  %v1829_v40 = vld [vmem:[#allocation1 - $0x1b] ss:$8 sm:$0xf0]  }
  0x79   :  { %v3845_v41 = vpack.i.bf16 %v1767_v38, %v1754_v35  ;;  %v1831_v42 = vsel %vm562_vm1, %v1829_v40, %v1827_v39  ;;  %v1840_v43 = vld [vmem:[#allocation1 + $0x6] ss:$8 sm:$0xf]   ;;  %v1842_v44 = vld [vmem:[#allocation1 - $0x19] ss:$8 sm:$0xf0]  }
  0x7a   :  { %v1844_v45 = vsel %vm562_vm1, %v1842_v44, %v1840_v43  ;;  %v1801_v46 = vld [vmem:[#allocation1] ss:$8 sm:$0xf]   ;;  %v1803_v47 = vld [vmem:[#allocation1 - $0x1f] ss:$8 sm:$0xf0]  }
  0x7b   :  { %3851 = vrot.lane.b32.xlu1 %v3850_v34, %s3900_s26  ;;  %3846 = vrot.lane.b32.xlu0 %v3845_v41, %s3900_s26  ;;  %v3860_v48 = vpack.i.bf16 %v1844_v45, %v1831_v42  ;;  %v1805_v49 = vsel %vm562_vm1, %v1803_v47, %v1801_v46  ;;  %v1814_v50 = vld [vmem:[#allocation1 + $0x2] ss:$8 sm:$0xf]   ;;  %v1816_v51 = vld [vmem:[#allocation1 - $0x1d] ss:$8 sm:$0xf0]  }
  0x7c   :  { %v1818_v52 = vsel %vm562_vm1, %v1816_v51, %v1814_v50  ;;  %v1879_v53 = vld [vmem:[#allocation1 + $0x24] ss:$8 sm:$0xf]   ;;  %v1881_v54 = vld [vmem:[#allocation1 + $0x5] ss:$8 sm:$0xf0]  }
  0x7d   :  { %v3855_v55 = vpack.i.bf16 %v1818_v52, %v1805_v49  ;;  %v1883_v56 = vsel %vm562_vm1, %v1881_v54, %v1879_v53  ;;  %v1892_v57 = vld [vmem:[#allocation1 + $0x26] ss:$8 sm:$0xf]   ;;  %v1894_v58 = vld [vmem:[#allocation1 + $0x7] ss:$8 sm:$0xf0]  }
  0x7e   :  { %v1896_v59 = vsel %vm562_vm1, %v1894_v58, %v1892_v57  ;;  %v1853_v60 = vld [vmem:[#allocation1 + $0x20] ss:$8 sm:$0xf]   ;;  %v1855_v61 = vld [vmem:[#allocation1 + $0x1] ss:$8 sm:$0xf0]  }
  0x7f   :  { %3861 = vrot.lane.b32.xlu1 %v3860_v48, %s3901_s27  ;;  %3856 = vrot.lane.b32.xlu0 %v3855_v55, %s3901_s27  ;;  %v3870_v62 = vpack.i.bf16 %v1896_v59, %v1883_v56  ;;  %v1857_v63 = vsel %vm562_vm1, %v1855_v61, %v1853_v60  ;;  %v1866_v0 = vld [vmem:[#allocation1 + $0x22] ss:$8 sm:$0xf]   ;;  %v1868_v1 = vld [vmem:[#allocation1 + $0x3] ss:$8 sm:$0xf0]  }
  0x80   :  { %v1870_v2 = vsel %vm562_vm1, %v1868_v1, %v1866_v0  ;;  %v1931_v3 = vld [vmem:[#allocation1 + $0x44] ss:$8 sm:$0xf]   ;;  %v1933_v4 = vld [vmem:[#allocation1 + $0x25] ss:$8 sm:$0xf0]  }
  0x81   :  { %v3865_v5 = vpack.i.bf16 %v1870_v2, %v1857_v63  ;;  %v1935_v6 = vsel %vm562_vm1, %v1933_v4, %v1931_v3  ;;  %v1944_v7 = vld [vmem:[#allocation1 + $0x46] ss:$8 sm:$0xf]   ;;  %v1946_v8 = vld [vmem:[#allocation1 + $0x27] ss:$8 sm:$0xf0]  }
  0x82   :  { %v1948_v9 = vsel %vm562_vm1, %v1946_v8, %v1944_v7  ;;  %v1905_v10 = vld [vmem:[#allocation1 + $0x40] ss:$8 sm:$0xf]   ;;  %v1907_v11 = vld [vmem:[#allocation1 + $0x21] ss:$8 sm:$0xf0]  }
  0x83   :  { %3871 = vrot.lane.b32.xlu1 %v3870_v62, %s3901_s27  ;;  %3866 = vrot.lane.b32.xlu0 %v3865_v5, %s3901_s27  ;;  %v3880_v12 = vpack.i.bf16 %v1948_v9, %v1935_v6  ;;  %v1909_v13 = vsel %vm562_vm1, %v1907_v11, %v1905_v10  ;;  %v1918_v14 = vld [vmem:[#allocation1 + $0x42] ss:$8 sm:$0xf]   ;;  %v1920_v15 = vld [vmem:[#allocation1 + $0x23] ss:$8 sm:$0xf0]  }
  0x84   :  { %v1922_v16 = vsel %vm562_vm1, %v1920_v15, %v1918_v14  ;;  %v1983_v17 = vld [vmem:[#allocation1 + $0x64] ss:$8 sm:$0xf]   ;;  %v1985_v18 = vld [vmem:[#allocation1 + $0x45] ss:$8 sm:$0xf0]  }
  0x85   :  { %v3875_v19 = vpack.i.bf16 %v1922_v16, %v1909_v13  ;;  %v4121_v20 = vsel %vm562_vm1, %v1985_v18, %v1983_v17  ;;  %v1996_v21 = vld [vmem:[#allocation1 + $0x66] ss:$8 sm:$0xf]   ;;  %v1998_v22 = vld [vmem:[#allocation1 + $0x47] ss:$8 sm:$0xf0]  }
  0x86   :  { %v4124_v23 = vsel %vm562_vm1, %v1998_v22, %v1996_v21  ;;  %v1957_v24 = vld [vmem:[#allocation1 + $0x60] ss:$8 sm:$0xf]   ;;  %v1959_v25 = vld [vmem:[#allocation1 + $0x41] ss:$8 sm:$0xf0]  }
  0x87   :  { %3881 = vrot.lane.b32.xlu1 %v3880_v12, %s3901_s27  ;;  %3876 = vrot.lane.b32.xlu0 %v3875_v19, %s3901_s27  ;;  %v3890_v26 = vpack.i.bf16 %v4124_v23, %v4121_v20  ;;  %v4131_v27 = vsel %vm562_vm1, %v1959_v25, %v1957_v24  ;;  %v1970_v28 = vld [vmem:[#allocation1 + $0x62] ss:$8 sm:$0xf]   ;;  %v1972_v29 = vld [vmem:[#allocation1 + $0x43] ss:$8 sm:$0xf0]  }
  0x88   :  { %v1974_v30 = vsel %vm562_vm1, %v1972_v29, %v1970_v28  ;;  %v294_v31 = vld [vmem:[#allocation1 + $0x10] sm:$0xff]   ;;  %v332_v32 = vld [vmem:[#allocation1 + $0x20] sm:$0xff]   ;;  %v351_v33 = vld [vmem:[#allocation1 + $0x28] sm:$0xff]  }
  0x89   :  { %v3885_v34 = vpack.i.bf16 %v1974_v30, %v4131_v27  ;;  %309 = vst.msk [vmem:[#allocation0 + $0xca] sm:$0x40] %vm258_vm0, %v294_v31   ;;  %297 = vst.msk [vmem:[#allocation0 + $0x10] sm:$0x1] %vm258_vm0, %v294_v31   ;;  %v389_v35 = vld [vmem:[#allocation1 + $0x38] sm:$0xff]   ;;  %v370_v36 = vld [vmem:[#allocation1 + $0x30] sm:$0xff]  }
  0x8a   :  { %299 = vst.msk [vmem:[#allocation0 + $0x2f] sm:$0x2] %vm258_vm0, %v294_v31   ;;  %301 = vst.msk [vmem:[#allocation0 + $0x4e] sm:$0x4] %vm258_vm0, %v294_v31   ;;  %v408_v37 = vld [vmem:[#allocation1 + $0x40] sm:$0xff]   ;;  %v427_v38 = vld [vmem:[#allocation1 + $0x48] sm:$0xff]  }
  0x8b   :  { %303 = vst.msk [vmem:[#allocation0 + $0x6d] sm:$0x8] %vm258_vm0, %v294_v31   ;;  %305 = vst.msk [vmem:[#allocation0 + $0x8c] sm:$0x10] %vm258_vm0, %v294_v31   ;;  %v465_v39 = vld [vmem:[#allocation1 + $0x58] sm:$0xff]   ;;  %v446_v40 = vld [vmem:[#allocation1 + $0x50] sm:$0xff]   ;;  %3891 = vrot.lane.b32.xlu1 %v3890_v26, %s3901_s27  ;;  %3886 = vrot.lane.b32.xlu0 %v3885_v34, %s3901_s27 }
  0x8c   :  { %307 = vst.msk [vmem:[#allocation0 + $0xab] sm:$0x20] %vm258_vm0, %v294_v31   ;;  %311 = vst.msk [vmem:[#allocation0 + $0xe9] sm:$0x80] %vm258_vm0, %v294_v31   ;;  %v484_v53 = vld [vmem:[#allocation1 + $0x60] sm:$0xff]   ;;  %v503_v54 = vld [vmem:[#allocation1 + $0x68] sm:$0xff]  }
  0x8d   :  { %345 = vst.msk [vmem:[#allocation0 + $0x19b] sm:$0x20] %vm258_vm0, %v332_v32   ;;  %347 = vst.msk [vmem:[#allocation0 + $0x1ba] sm:$0x40] %vm258_vm0, %v332_v32   ;;  %v541_v55 = vld [vmem:[#allocation1 + $0x78] sm:$0xff]   ;;  %v522_v56 = vld [vmem:[#allocation1 + $0x70] sm:$0xff]  }
  0x8e   :  { %364 = vst.msk [vmem:[#allocation0 + $0x1a3] sm:$0x20] %vm258_vm0, %v351_v33   ;;  %366 = vst.msk [vmem:[#allocation0 + $0x1c2] sm:$0x40] %vm258_vm0, %v351_v33  }
  0x8f   :  { %335 = vst.msk [vmem:[#allocation0 + $0x100] sm:$0x1] %vm258_vm0, %v332_v32   ;;  %337 = vst.msk [vmem:[#allocation0 + $0x11f] sm:$0x2] %vm258_vm0, %v332_v32   ;;  %v3617_v41 = vpop.permute.xlu0 %3616 }
  0x90   :  { %339 = vst.msk [vmem:[#allocation0 + $0x13e] sm:$0x4] %vm258_vm0, %v332_v32   ;;  %341 = vst.msk [vmem:[#allocation0 + $0x15d] sm:$0x8] %vm258_vm0, %v332_v32   ;;  %v3619_v42 = vunpack.i.h.bf16 %v3617_v41  ;;  %v3618_v43 = vunpack.i.l.bf16 %v3617_v41 }
  0x91   :  { %343 = vst.msk [vmem:[#allocation0 + $0x17c] sm:$0x10] %vm258_vm0, %v332_v32   ;;  %349 = vst.msk [vmem:[#allocation0 + $0x1d9] sm:$0x80] %vm258_vm0, %v332_v32   ;;  %v3627_v44 = vpop.permute.xlu1 %3626 }
  0x92   :  { %354 = vst.msk [vmem:[#allocation0 + $0x108] sm:$0x1] %vm258_vm0, %v351_v33   ;;  %356 = vst.msk [vmem:[#allocation0 + $0x127] sm:$0x2] %vm258_vm0, %v351_v33   ;;  %v3629_v45 = vunpack.i.h.bf16 %v3627_v44  ;;  %v3628_v46 = vunpack.i.l.bf16 %v3627_v44 }
  0x93   :  { %358 = vst.msk [vmem:[#allocation0 + $0x146] sm:$0x4] %vm258_vm0, %v351_v33   ;;  %360 = vst.msk [vmem:[#allocation0 + $0x165] sm:$0x8] %vm258_vm0, %v351_v33   ;;  %v3622_v47 = vpop.permute.xlu0 %3621 }
  0x94   :  { %362 = vst.msk [vmem:[#allocation0 + $0x184] sm:$0x10] %vm258_vm0, %v351_v33   ;;  %368 = vst.msk [vmem:[#allocation0 + $0x1e1] sm:$0x80] %vm258_vm0, %v351_v33   ;;  %v3624_v48 = vunpack.i.h.bf16 %v3622_v47  ;;  %v3623_v49 = vunpack.i.l.bf16 %v3622_v47 }
  0x95   :  { %402 = vst.msk [vmem:[#allocation0 + $0x1b3] sm:$0x20] %vm258_vm0, %v389_v35   ;;  %404 = vst.msk [vmem:[#allocation0 + $0x1d2] sm:$0x40] %vm258_vm0, %v389_v35   ;;  %v3632_v50 = vpop.permute.xlu1 %3631 }
  0x96   :  { %383 = vst.msk [vmem:[#allocation0 + $0x1ab] sm:$0x20] %vm258_vm0, %v370_v36   ;;  %385 = vst.msk [vmem:[#allocation0 + $0x1ca] sm:$0x40] %vm258_vm0, %v370_v36   ;;  %v3634_v51 = vunpack.i.h.bf16 %v3632_v50  ;;  %v3633_v52 = vunpack.i.l.bf16 %v3632_v50 }
  0x97   :  { %373 = vst.msk [vmem:[#allocation0 + $0x110] sm:$0x1] %vm258_vm0, %v370_v36   ;;  %375 = vst.msk [vmem:[#allocation0 + $0x12f] sm:$0x2] %vm258_vm0, %v370_v36  }
  0x98   :  { %377 = vst.msk [vmem:[#allocation0 + $0x14e] sm:$0x4] %vm258_vm0, %v370_v36   ;;  %379 = vst.msk [vmem:[#allocation0 + $0x16d] sm:$0x8] %vm258_vm0, %v370_v36  }
  0x99   :  { %381 = vst.msk [vmem:[#allocation0 + $0x18c] sm:$0x10] %vm258_vm0, %v370_v36   ;;  %387 = vst.msk [vmem:[#allocation0 + $0x1e9] sm:$0x80] %vm258_vm0, %v370_v36   ;;  %v3642_v57 = vpop.permute.xlu1 %3641  ;;  %v3637_v58 = vpop.permute.xlu0 %3636 }
  0x9a   :  { %392 = vst.msk [vmem:[#allocation0 + $0x118] sm:$0x1] %vm258_vm0, %v389_v35   ;;  %394 = vst.msk [vmem:[#allocation0 + $0x137] sm:$0x2] %vm258_vm0, %v389_v35   ;;  %v3644_v59 = vunpack.i.h.bf16 %v3642_v57  ;;  %v3643_v60 = vunpack.i.l.bf16 %v3642_v57  ;;  %v3639_v61 = vunpack.i.h.bf16 %v3637_v58  ;;  %v3638_v62 = vunpack.i.l.bf16 %v3637_v58 }
  0x9b   :  { %396 = vst.msk [vmem:[#allocation0 + $0x156] sm:$0x4] %vm258_vm0, %v389_v35   ;;  %398 = vst.msk [vmem:[#allocation0 + $0x175] sm:$0x8] %vm258_vm0, %v389_v35  }
  0x9c   :  { %400 = vst.msk [vmem:[#allocation0 + $0x194] sm:$0x10] %vm258_vm0, %v389_v35   ;;  %406 = vst.msk [vmem:[#allocation0 + $0x1f1] sm:$0x80] %vm258_vm0, %v389_v35  }
  0x9d   :  { %419 = vst.msk [vmem:[#allocation0 + $0x27c] sm:$0x10] %vm258_vm0, %v408_v37   ;;  %421 = vst.msk [vmem:[#allocation0 + $0x29b] sm:$0x20] %vm258_vm0, %v408_v37   ;;  %v3652_v63 = vpop.permute.xlu1 %3651  ;;  %v3647_v0 = vpop.permute.xlu0 %3646 }
  0x9e   :  { %411 = vst.msk [vmem:[#allocation0 + $0x200] sm:$0x1] %vm258_vm0, %v408_v37   ;;  %413 = vst.msk [vmem:[#allocation0 + $0x21f] sm:$0x2] %vm258_vm0, %v408_v37   ;;  %v3654_v1 = vunpack.i.h.bf16 %v3652_v63  ;;  %v3653_v2 = vunpack.i.l.bf16 %v3652_v63  ;;  %v3649_v3 = vunpack.i.h.bf16 %v3647_v0  ;;  %v3648_v4 = vunpack.i.l.bf16 %v3647_v0 }
  0x9f   :  { %415 = vst.msk [vmem:[#allocation0 + $0x23e] sm:$0x4] %vm258_vm0, %v408_v37   ;;  %417 = vst.msk [vmem:[#allocation0 + $0x25d] sm:$0x8] %vm258_vm0, %v408_v37  }
  0xa0   :  { %423 = vst.msk [vmem:[#allocation0 + $0x2ba] sm:$0x40] %vm258_vm0, %v408_v37   ;;  %425 = vst.msk [vmem:[#allocation0 + $0x2d9] sm:$0x80] %vm258_vm0, %v408_v37  }
  0xa1   :  { %438 = vst.msk [vmem:[#allocation0 + $0x284] sm:$0x10] %vm258_vm0, %v427_v38   ;;  %440 = vst.msk [vmem:[#allocation0 + $0x2a3] sm:$0x20] %vm258_vm0, %v427_v38   ;;  %v3662_v5 = vpop.permute.xlu1 %3661  ;;  %v3657_v6 = vpop.permute.xlu0 %3656 }
  0xa2   :  { %476 = vst.msk [vmem:[#allocation0 + $0x294] sm:$0x10] %vm258_vm0, %v465_v39   ;;  %478 = vst.msk [vmem:[#allocation0 + $0x2b3] sm:$0x20] %vm258_vm0, %v465_v39   ;;  %v3664_v7 = vunpack.i.h.bf16 %v3662_v5  ;;  %v3663_v8 = vunpack.i.l.bf16 %v3662_v5  ;;  %v3659_v9 = vunpack.i.h.bf16 %v3657_v6  ;;  %v3658_v10 = vunpack.i.l.bf16 %v3657_v6 }
  0xa3   :  { %457 = vst.msk [vmem:[#allocation0 + $0x28c] sm:$0x10] %vm258_vm0, %v446_v40   ;;  %459 = vst.msk [vmem:[#allocation0 + $0x2ab] sm:$0x20] %vm258_vm0, %v446_v40  }
  0xa4   :  { %430 = vst.msk [vmem:[#allocation0 + $0x208] sm:$0x1] %vm258_vm0, %v427_v38   ;;  %432 = vst.msk [vmem:[#allocation0 + $0x227] sm:$0x2] %vm258_vm0, %v427_v38  }
  0xa5   :  { %434 = vst.msk [vmem:[#allocation0 + $0x246] sm:$0x4] %vm258_vm0, %v427_v38   ;;  %436 = vst.msk [vmem:[#allocation0 + $0x265] sm:$0x8] %vm258_vm0, %v427_v38   ;;  %v3672_v11 = vpop.permute.xlu1 %3671  ;;  %v3667_v12 = vpop.permute.xlu0 %3666 }
  0xa6   :  { %442 = vst.msk [vmem:[#allocation0 + $0x2c2] sm:$0x40] %vm258_vm0, %v427_v38   ;;  %444 = vst.msk [vmem:[#allocation0 + $0x2e1] sm:$0x80] %vm258_vm0, %v427_v38   ;;  %v3674_v13 = vunpack.i.h.bf16 %v3672_v11  ;;  %v3673_v14 = vunpack.i.l.bf16 %v3672_v11  ;;  %v3669_v15 = vunpack.i.h.bf16 %v3667_v12  ;;  %v3668_v16 = vunpack.i.l.bf16 %v3667_v12 }
  0xa7   :  { %449 = vst.msk [vmem:[#allocation0 + $0x210] sm:$0x1] %vm258_vm0, %v446_v40   ;;  %451 = vst.msk [vmem:[#allocation0 + $0x22f] sm:$0x2] %vm258_vm0, %v446_v40  }
  0xa8   :  { %453 = vst.msk [vmem:[#allocation0 + $0x24e] sm:$0x4] %vm258_vm0, %v446_v40   ;;  %455 = vst.msk [vmem:[#allocation0 + $0x26d] sm:$0x8] %vm258_vm0, %v446_v40  }
  0xa9   :  { %461 = vst.msk [vmem:[#allocation0 + $0x2ca] sm:$0x40] %vm258_vm0, %v446_v40   ;;  %463 = vst.msk [vmem:[#allocation0 + $0x2e9] sm:$0x80] %vm258_vm0, %v446_v40   ;;  %v3682_v17 = vpop.permute.xlu1 %3681  ;;  %v3677_v18 = vpop.permute.xlu0 %3676 }
  0xaa   :  { %468 = vst.msk [vmem:[#allocation0 + $0x218] sm:$0x1] %vm258_vm0, %v465_v39   ;;  %470 = vst.msk [vmem:[#allocation0 + $0x237] sm:$0x2] %vm258_vm0, %v465_v39   ;;  %v3684_v19 = vunpack.i.h.bf16 %v3682_v17  ;;  %v3683_v20 = vunpack.i.l.bf16 %v3682_v17  ;;  %v3679_v21 = vunpack.i.h.bf16 %v3677_v18  ;;  %v3678_v22 = vunpack.i.l.bf16 %v3677_v18 }
  0xab   :  { %472 = vst.msk [vmem:[#allocation0 + $0x256] sm:$0x4] %vm258_vm0, %v465_v39   ;;  %474 = vst.msk [vmem:[#allocation0 + $0x275] sm:$0x8] %vm258_vm0, %v465_v39  }
  0xac   :  { %480 = vst.msk [vmem:[#allocation0 + $0x2d2] sm:$0x40] %vm258_vm0, %v465_v39   ;;  %482 = vst.msk [vmem:[#allocation0 + $0x2f1] sm:$0x80] %vm258_vm0, %v465_v39  }
  0xad   :  { %581 = vst.msk [vmem:[#allocation0 + $0x41] ss:$8 sm:$0xf] %vm258_vm0, %v3619_v42   ;;  %583 = vst.msk [vmem:[#allocation0 + $0x41] ss:$8 sm:$0xf0] %vm258_vm0, %v3619_v42   ;;  %v3692_v23 = vpop.permute.xlu1 %3691  ;;  %v3687_v24 = vpop.permute.xlu0 %3686 }
  0xae   :  { %568 = vst.msk [vmem:[#allocation0 + $0x1] ss:$8 sm:$0xf] %vm258_vm0, %v3618_v43   ;;  %570 = vst.msk [vmem:[#allocation0 + $0x1] ss:$8 sm:$0xf0] %vm258_vm0, %v3618_v43   ;;  %v3694_v25 = vunpack.i.h.bf16 %v3692_v23  ;;  %v3693_v26 = vunpack.i.l.bf16 %v3692_v23  ;;  %v3689_v27 = vunpack.i.h.bf16 %v3687_v24  ;;  %v3688_v28 = vunpack.i.l.bf16 %v3687_v24 }
  0xaf   :  { %633 = vst.msk [vmem:[#allocation0 + $0x141] ss:$8 sm:$0xf] %vm258_vm0, %v3629_v45   ;;  %635 = vst.msk [vmem:[#allocation0 + $0x141] ss:$8 sm:$0xf0] %vm258_vm0, %v3629_v45  }
  0xb0   :  { %620 = vst.msk [vmem:[#allocation0 + $0x101] ss:$8 sm:$0xf] %vm258_vm0, %v3628_v46   ;;  %622 = vst.msk [vmem:[#allocation0 + $0x101] ss:$8 sm:$0xf0] %vm258_vm0, %v3628_v46  }
  0xb1   :  { %607 = vst.msk [vmem:[#allocation0 + $0xc1] ss:$8 sm:$0xf] %vm258_vm0, %v3624_v48   ;;  %609 = vst.msk [vmem:[#allocation0 + $0xc1] ss:$8 sm:$0xf0] %vm258_vm0, %v3624_v48   ;;  %v3702_v29 = vpop.permute.xlu1 %3701  ;;  %v3697_v30 = vpop.permute.xlu0 %3696 }
  0xb2   :  { %594 = vst.msk [vmem:[#allocation0 + $0x81] ss:$8 sm:$0xf] %vm258_vm0, %v3623_v49   ;;  %596 = vst.msk [vmem:[#allocation0 + $0x81] ss:$8 sm:$0xf0] %vm258_vm0, %v3623_v49   ;;  %v3704_v31 = vunpack.i.h.bf16 %v3702_v29  ;;  %v3703_v32 = vunpack.i.l.bf16 %v3702_v29  ;;  %v3699_v33 = vunpack.i.h.bf16 %v3697_v30  ;;  %v3698_v34 = vunpack.i.l.bf16 %v3697_v30 }
  0xb3   :  { %495 = vst.msk [vmem:[#allocation0 + $0x37c] sm:$0x10] %vm258_vm0, %v484_v53   ;;  %497 = vst.msk [vmem:[#allocation0 + $0x39b] sm:$0x20] %vm258_vm0, %v484_v53  }
  0xb4   :  { %499 = vst.msk [vmem:[#allocation0 + $0x3ba] sm:$0x40] %vm258_vm0, %v484_v53   ;;  %501 = vst.msk [vmem:[#allocation0 + $0x3d9] sm:$0x80] %vm258_vm0, %v484_v53  }
  0xb5   :  { %514 = vst.msk [vmem:[#allocation0 + $0x384] sm:$0x10] %vm258_vm0, %v503_v54   ;;  %516 = vst.msk [vmem:[#allocation0 + $0x3a3] sm:$0x20] %vm258_vm0, %v503_v54   ;;  %v3712_v35 = vpop.permute.xlu1 %3711  ;;  %v3707_v36 = vpop.permute.xlu0 %3706 }
  0xb6   :  { %518 = vst.msk [vmem:[#allocation0 + $0x3c2] sm:$0x40] %vm258_vm0, %v503_v54   ;;  %520 = vst.msk [vmem:[#allocation0 + $0x3e1] sm:$0x80] %vm258_vm0, %v503_v54   ;;  %v3714_v37 = vunpack.i.h.bf16 %v3712_v35  ;;  %v3713_v38 = vunpack.i.l.bf16 %v3712_v35  ;;  %v3709_v39 = vunpack.i.h.bf16 %v3707_v36  ;;  %v3708_v40 = vunpack.i.l.bf16 %v3707_v36 }
  0xb7   :  { %552 = vst.msk [vmem:[#allocation0 + $0x394] sm:$0x10] %vm258_vm0, %v541_v55   ;;  %554 = vst.msk [vmem:[#allocation0 + $0x3b3] sm:$0x20] %vm258_vm0, %v541_v55  }
  0xb8   :  { %556 = vst.msk [vmem:[#allocation0 + $0x3d2] sm:$0x40] %vm258_vm0, %v541_v55   ;;  %558 = vst.msk [vmem:[#allocation0 + $0x3f1] sm:$0x80] %vm258_vm0, %v541_v55  }
  0xb9   :  { %487 = vst.msk [vmem:[#allocation0 + $0x300] sm:$0x1] %vm258_vm0, %v484_v53   ;;  %489 = vst.msk [vmem:[#allocation0 + $0x31f] sm:$0x2] %vm258_vm0, %v484_v53   ;;  %v3722_v41 = vpop.permute.xlu1 %3721  ;;  %v3717_v42 = vpop.permute.xlu0 %3716 }
  0xba   :  { %491 = vst.msk [vmem:[#allocation0 + $0x33e] sm:$0x4] %vm258_vm0, %v484_v53   ;;  %493 = vst.msk [vmem:[#allocation0 + $0x35d] sm:$0x8] %vm258_vm0, %v484_v53   ;;  %v3724_v43 = vunpack.i.h.bf16 %v3722_v41  ;;  %v3723_v44 = vunpack.i.l.bf16 %v3722_v41  ;;  %v3719_v45 = vunpack.i.h.bf16 %v3717_v42  ;;  %v3718_v46 = vunpack.i.l.bf16 %v3717_v42 }
  0xbb   :  { %506 = vst.msk [vmem:[#allocation0 + $0x308] sm:$0x1] %vm258_vm0, %v503_v54   ;;  %508 = vst.msk [vmem:[#allocation0 + $0x327] sm:$0x2] %vm258_vm0, %v503_v54  }
  0xbc   :  { %510 = vst.msk [vmem:[#allocation0 + $0x346] sm:$0x4] %vm258_vm0, %v503_v54   ;;  %512 = vst.msk [vmem:[#allocation0 + $0x365] sm:$0x8] %vm258_vm0, %v503_v54  }
  0xbd   :  { %544 = vst.msk [vmem:[#allocation0 + $0x318] sm:$0x1] %vm258_vm0, %v541_v55   ;;  %546 = vst.msk [vmem:[#allocation0 + $0x337] sm:$0x2] %vm258_vm0, %v541_v55   ;;  %v3732_v47 = vpop.permute.xlu1 %3731  ;;  %v3727_v48 = vpop.permute.xlu0 %3726 }
  0xbe   :  { %548 = vst.msk [vmem:[#allocation0 + $0x356] sm:$0x4] %vm258_vm0, %v541_v55   ;;  %550 = vst.msk [vmem:[#allocation0 + $0x375] sm:$0x8] %vm258_vm0, %v541_v55   ;;  %v3734_v49 = vunpack.i.h.bf16 %v3732_v47  ;;  %v3733_v50 = vunpack.i.l.bf16 %v3732_v47 }
  0xbf   :  { %659 = vst.msk [vmem:[#allocation0 + $0x1c1] ss:$8 sm:$0xf] %vm258_vm0, %v3634_v51   ;;  %661 = vst.msk [vmem:[#allocation0 + $0x1c1] ss:$8 sm:$0xf0] %vm258_vm0, %v3634_v51   ;;  %v3729_v51 = vunpack.i.h.bf16 %v3727_v48 }
  0xc0   :  { %646 = vst.msk [vmem:[#allocation0 + $0x181] ss:$8 sm:$0xf] %vm258_vm0, %v3633_v52   ;;  %648 = vst.msk [vmem:[#allocation0 + $0x181] ss:$8 sm:$0xf0] %vm258_vm0, %v3633_v52   ;;  %v3728_v52 = vunpack.i.l.bf16 %v3727_v48 }
  0xc1   :  { %533 = vst.msk [vmem:[#allocation0 + $0x38c] sm:$0x10] %vm258_vm0, %v522_v56   ;;  %535 = vst.msk [vmem:[#allocation0 + $0x3ab] sm:$0x20] %vm258_vm0, %v522_v56   ;;  %v3742_v53 = vpop.permute.xlu1 %3741  ;;  %v3737_v54 = vpop.permute.xlu0 %3736 }
  0xc2   :  { %537 = vst.msk [vmem:[#allocation0 + $0x3ca] sm:$0x40] %vm258_vm0, %v522_v56   ;;  %539 = vst.msk [vmem:[#allocation0 + $0x3e9] sm:$0x80] %vm258_vm0, %v522_v56   ;;  %v3744_v55 = vunpack.i.h.bf16 %v3742_v53  ;;  %v3739_v57 = vunpack.i.h.bf16 %v3737_v54  ;;  %v3738_v58 = vunpack.i.l.bf16 %v3737_v54 }
  0xc3   :  { %525 = vst.msk [vmem:[#allocation0 + $0x310] sm:$0x1] %vm258_vm0, %v522_v56   ;;  %527 = vst.msk [vmem:[#allocation0 + $0x32f] sm:$0x2] %vm258_vm0, %v522_v56  }
  0xc4   :  { %529 = vst.msk [vmem:[#allocation0 + $0x34e] sm:$0x4] %vm258_vm0, %v522_v56   ;;  %531 = vst.msk [vmem:[#allocation0 + $0x36d] sm:$0x8] %vm258_vm0, %v522_v56   ;;  %v3743_v56 = vunpack.i.l.bf16 %v3742_v53 }
  0xc5   :  { %711 = vst.msk [vmem:[#allocation0 + $0x2c1] ss:$8 sm:$0xf] %vm258_vm0, %v3644_v59   ;;  %713 = vst.msk [vmem:[#allocation0 + $0x2c1] ss:$8 sm:$0xf0] %vm258_vm0, %v3644_v59   ;;  %v3752_v59 = vpop.permute.xlu1 %3751 }
  0xc6   :  { %698 = vst.msk [vmem:[#allocation0 + $0x281] ss:$8 sm:$0xf] %vm258_vm0, %v3643_v60   ;;  %700 = vst.msk [vmem:[#allocation0 + $0x281] ss:$8 sm:$0xf0] %vm258_vm0, %v3643_v60   ;;  %v3747_v60 = vpop.permute.xlu0 %3746 }
  0xc7   :  { %685 = vst.msk [vmem:[#allocation0 + $0x241] ss:$8 sm:$0xf] %vm258_vm0, %v3639_v61   ;;  %687 = vst.msk [vmem:[#allocation0 + $0x241] ss:$8 sm:$0xf0] %vm258_vm0, %v3639_v61   ;;  %v3754_v61 = vunpack.i.h.bf16 %v3752_v59  ;;  %v3749_v63 = vunpack.i.h.bf16 %v3747_v60  ;;  %v3748_v0 = vunpack.i.l.bf16 %v3747_v60 }
  0xc8   :  { %672 = vst.msk [vmem:[#allocation0 + $0x201] ss:$8 sm:$0xf] %vm258_vm0, %v3638_v62   ;;  %674 = vst.msk [vmem:[#allocation0 + $0x201] ss:$8 sm:$0xf0] %vm258_vm0, %v3638_v62   ;;  %v3753_v62 = vunpack.i.l.bf16 %v3752_v59 }
  0xc9   :  { %763 = vst.msk [vmem:[#allocation0 + $0x3c1] ss:$8 sm:$0xf] %vm258_vm0, %v3654_v1   ;;  %765 = vst.msk [vmem:[#allocation0 + $0x3c1] ss:$8 sm:$0xf0] %vm258_vm0, %v3654_v1   ;;  %v3762_v1 = vpop.permute.xlu1 %3761 }
  0xca   :  { %750 = vst.msk [vmem:[#allocation0 + $0x381] ss:$8 sm:$0xf] %vm258_vm0, %v3653_v2   ;;  %752 = vst.msk [vmem:[#allocation0 + $0x381] ss:$8 sm:$0xf0] %vm258_vm0, %v3653_v2   ;;  %v3757_v2 = vpop.permute.xlu0 %3756 }
  0xcb   :  { %737 = vst.msk [vmem:[#allocation0 + $0x341] ss:$8 sm:$0xf] %vm258_vm0, %v3649_v3   ;;  %739 = vst.msk [vmem:[#allocation0 + $0x341] ss:$8 sm:$0xf0] %vm258_vm0, %v3649_v3   ;;  %v3764_v3 = vunpack.i.h.bf16 %v3762_v1  ;;  %v3759_v5 = vunpack.i.h.bf16 %v3757_v2  ;;  %v3758_v6 = vunpack.i.l.bf16 %v3757_v2 }
  0xcc   :  { %724 = vst.msk [vmem:[#allocation0 + $0x301] ss:$8 sm:$0xf] %vm258_vm0, %v3648_v4   ;;  %726 = vst.msk [vmem:[#allocation0 + $0x301] ss:$8 sm:$0xf0] %vm258_vm0, %v3648_v4   ;;  %v3763_v4 = vunpack.i.l.bf16 %v3762_v1 }
  0xcd   :  { %814 = vst.msk [vmem:[#allocation0 + $0xc2] ss:$8 sm:$0xf] %vm258_vm0, %v3664_v7   ;;  %816 = vst.msk [vmem:[#allocation0 + $0xc2] ss:$8 sm:$0xf0] %vm258_vm0, %v3664_v7   ;;  %v3772_v7 = vpop.permute.xlu1 %3771 }
  0xce   :  { %801 = vst.msk [vmem:[#allocation0 + $0x82] ss:$8 sm:$0xf] %vm258_vm0, %v3663_v8   ;;  %803 = vst.msk [vmem:[#allocation0 + $0x82] ss:$8 sm:$0xf0] %vm258_vm0, %v3663_v8   ;;  %v3767_v8 = vpop.permute.xlu0 %3766 }
  0xcf   :  { %788 = vst.msk [vmem:[#allocation0 + $0x42] ss:$8 sm:$0xf] %vm258_vm0, %v3659_v9   ;;  %790 = vst.msk [vmem:[#allocation0 + $0x42] ss:$8 sm:$0xf0] %vm258_vm0, %v3659_v9   ;;  %v3774_v9 = vunpack.i.h.bf16 %v3772_v7  ;;  %v3769_v11 = vunpack.i.h.bf16 %v3767_v8  ;;  %v3768_v12 = vunpack.i.l.bf16 %v3767_v8 }
  0xd0   :  { %775 = vst.msk [vmem:[#allocation0 + $0x2] ss:$8 sm:$0xf] %vm258_vm0, %v3658_v10   ;;  %777 = vst.msk [vmem:[#allocation0 + $0x2] ss:$8 sm:$0xf0] %vm258_vm0, %v3658_v10   ;;  %v3773_v10 = vunpack.i.l.bf16 %v3772_v7 }
  0xd1   :  { %866 = vst.msk [vmem:[#allocation0 + $0x1c2] ss:$8 sm:$0xf] %vm258_vm0, %v3674_v13   ;;  %868 = vst.msk [vmem:[#allocation0 + $0x1c2] ss:$8 sm:$0xf0] %vm258_vm0, %v3674_v13   ;;  %v3782_v13 = vpop.permute.xlu1 %3781 }
  0xd2   :  { %853 = vst.msk [vmem:[#allocation0 + $0x182] ss:$8 sm:$0xf] %vm258_vm0, %v3673_v14   ;;  %855 = vst.msk [vmem:[#allocation0 + $0x182] ss:$8 sm:$0xf0] %vm258_vm0, %v3673_v14   ;;  %v3777_v14 = vpop.permute.xlu0 %3776 }
  0xd3   :  { %840 = vst.msk [vmem:[#allocation0 + $0x142] ss:$8 sm:$0xf] %vm258_vm0, %v3669_v15   ;;  %842 = vst.msk [vmem:[#allocation0 + $0x142] ss:$8 sm:$0xf0] %vm258_vm0, %v3669_v15   ;;  %v3784_v15 = vunpack.i.h.bf16 %v3782_v13  ;;  %v3779_v17 = vunpack.i.h.bf16 %v3777_v14  ;;  %v3778_v18 = vunpack.i.l.bf16 %v3777_v14 }
  0xd4   :  { %827 = vst.msk [vmem:[#allocation0 + $0x102] ss:$8 sm:$0xf] %vm258_vm0, %v3668_v16   ;;  %829 = vst.msk [vmem:[#allocation0 + $0x102] ss:$8 sm:$0xf0] %vm258_vm0, %v3668_v16   ;;  %v3783_v16 = vunpack.i.l.bf16 %v3782_v13 }
  0xd5   :  { %918 = vst.msk [vmem:[#allocation0 + $0x2c2] ss:$8 sm:$0xf] %vm258_vm0, %v3684_v19   ;;  %920 = vst.msk [vmem:[#allocation0 + $0x2c2] ss:$8 sm:$0xf0] %vm258_vm0, %v3684_v19   ;;  %v3792_v19 = vpop.permute.xlu1 %3791 }
  0xd6   :  { %905 = vst.msk [vmem:[#allocation0 + $0x282] ss:$8 sm:$0xf] %vm258_vm0, %v3683_v20   ;;  %907 = vst.msk [vmem:[#allocation0 + $0x282] ss:$8 sm:$0xf0] %vm258_vm0, %v3683_v20   ;;  %v3787_v20 = vpop.permute.xlu0 %3786 }
  0xd7   :  { %892 = vst.msk [vmem:[#allocation0 + $0x242] ss:$8 sm:$0xf] %vm258_vm0, %v3679_v21   ;;  %894 = vst.msk [vmem:[#allocation0 + $0x242] ss:$8 sm:$0xf0] %vm258_vm0, %v3679_v21   ;;  %v3794_v21 = vunpack.i.h.bf16 %v3792_v19  ;;  %v3789_v23 = vunpack.i.h.bf16 %v3787_v20  ;;  %v3788_v24 = vunpack.i.l.bf16 %v3787_v20 }
  0xd8   :  { %879 = vst.msk [vmem:[#allocation0 + $0x202] ss:$8 sm:$0xf] %vm258_vm0, %v3678_v22   ;;  %881 = vst.msk [vmem:[#allocation0 + $0x202] ss:$8 sm:$0xf0] %vm258_vm0, %v3678_v22   ;;  %v3793_v22 = vunpack.i.l.bf16 %v3792_v19 }
  0xd9   :  { %970 = vst.msk [vmem:[#allocation0 + $0x3c2] ss:$8 sm:$0xf] %vm258_vm0, %v3694_v25   ;;  %972 = vst.msk [vmem:[#allocation0 + $0x3c2] ss:$8 sm:$0xf0] %vm258_vm0, %v3694_v25   ;;  %v3802_v25 = vpop.permute.xlu1 %3801 }
  0xda   :  { %957 = vst.msk [vmem:[#allocation0 + $0x382] ss:$8 sm:$0xf] %vm258_vm0, %v3693_v26   ;;  %959 = vst.msk [vmem:[#allocation0 + $0x382] ss:$8 sm:$0xf0] %vm258_vm0, %v3693_v26   ;;  %v3797_v26 = vpop.permute.xlu0 %3796 }
  0xdb   :  { %944 = vst.msk [vmem:[#allocation0 + $0x342] ss:$8 sm:$0xf] %vm258_vm0, %v3689_v27   ;;  %946 = vst.msk [vmem:[#allocation0 + $0x342] ss:$8 sm:$0xf0] %vm258_vm0, %v3689_v27   ;;  %v3804_v27 = vunpack.i.h.bf16 %v3802_v25  ;;  %v3799_v29 = vunpack.i.h.bf16 %v3797_v26  ;;  %v3798_v30 = vunpack.i.l.bf16 %v3797_v26 }
  0xdc   :  { %931 = vst.msk [vmem:[#allocation0 + $0x302] ss:$8 sm:$0xf] %vm258_vm0, %v3688_v28   ;;  %933 = vst.msk [vmem:[#allocation0 + $0x302] ss:$8 sm:$0xf0] %vm258_vm0, %v3688_v28   ;;  %v3803_v28 = vunpack.i.l.bf16 %v3802_v25 }
  0xdd   :  { %1021 = vst.msk [vmem:[#allocation0 + $0xc3] ss:$8 sm:$0xf] %vm258_vm0, %v3704_v31   ;;  %1023 = vst.msk [vmem:[#allocation0 + $0xc3] ss:$8 sm:$0xf0] %vm258_vm0, %v3704_v31   ;;  %v3812_v31 = vpop.permute.xlu1 %3811 }
  0xde   :  { %1008 = vst.msk [vmem:[#allocation0 + $0x83] ss:$8 sm:$0xf] %vm258_vm0, %v3703_v32   ;;  %1010 = vst.msk [vmem:[#allocation0 + $0x83] ss:$8 sm:$0xf0] %vm258_vm0, %v3703_v32   ;;  %v3807_v32 = vpop.permute.xlu0 %3806 }
  0xdf   :  { %995 = vst.msk [vmem:[#allocation0 + $0x43] ss:$8 sm:$0xf] %vm258_vm0, %v3699_v33   ;;  %997 = vst.msk [vmem:[#allocation0 + $0x43] ss:$8 sm:$0xf0] %vm258_vm0, %v3699_v33   ;;  %v3814_v33 = vunpack.i.h.bf16 %v3812_v31  ;;  %v3809_v35 = vunpack.i.h.bf16 %v3807_v32  ;;  %v3808_v36 = vunpack.i.l.bf16 %v3807_v32 }
  0xe0   :  { %982 = vst.msk [vmem:[#allocation0 + $0x3] ss:$8 sm:$0xf] %vm258_vm0, %v3698_v34   ;;  %984 = vst.msk [vmem:[#allocation0 + $0x3] ss:$8 sm:$0xf0] %vm258_vm0, %v3698_v34   ;;  %v3813_v34 = vunpack.i.l.bf16 %v3812_v31 }
  0xe1   :  { %1073 = vst.msk [vmem:[#allocation0 + $0x1c3] ss:$8 sm:$0xf] %vm258_vm0, %v3714_v37   ;;  %1075 = vst.msk [vmem:[#allocation0 + $0x1c3] ss:$8 sm:$0xf0] %vm258_vm0, %v3714_v37   ;;  %v3822_v37 = vpop.permute.xlu1 %3821 }
  0xe2   :  { %1060 = vst.msk [vmem:[#allocation0 + $0x183] ss:$8 sm:$0xf] %vm258_vm0, %v3713_v38   ;;  %1062 = vst.msk [vmem:[#allocation0 + $0x183] ss:$8 sm:$0xf0] %vm258_vm0, %v3713_v38   ;;  %v3817_v38 = vpop.permute.xlu0 %3816 }
  0xe3   :  { %1047 = vst.msk [vmem:[#allocation0 + $0x143] ss:$8 sm:$0xf] %vm258_vm0, %v3709_v39   ;;  %1049 = vst.msk [vmem:[#allocation0 + $0x143] ss:$8 sm:$0xf0] %vm258_vm0, %v3709_v39   ;;  %v3824_v39 = vunpack.i.h.bf16 %v3822_v37  ;;  %v3819_v41 = vunpack.i.h.bf16 %v3817_v38  ;;  %v3818_v42 = vunpack.i.l.bf16 %v3817_v38 }
  0xe4   :  { %1034 = vst.msk [vmem:[#allocation0 + $0x103] ss:$8 sm:$0xf] %vm258_vm0, %v3708_v40   ;;  %1036 = vst.msk [vmem:[#allocation0 + $0x103] ss:$8 sm:$0xf0] %vm258_vm0, %v3708_v40   ;;  %v3823_v40 = vunpack.i.l.bf16 %v3822_v37 }
  0xe5   :  { %1125 = vst.msk [vmem:[#allocation0 + $0x2c3] ss:$8 sm:$0xf] %vm258_vm0, %v3724_v43   ;;  %1127 = vst.msk [vmem:[#allocation0 + $0x2c3] ss:$8 sm:$0xf0] %vm258_vm0, %v3724_v43   ;;  %v3832_v43 = vpop.permute.xlu1 %3831 }
  0xe6   :  { %1112 = vst.msk [vmem:[#allocation0 + $0x283] ss:$8 sm:$0xf] %vm258_vm0, %v3723_v44   ;;  %1114 = vst.msk [vmem:[#allocation0 + $0x283] ss:$8 sm:$0xf0] %vm258_vm0, %v3723_v44   ;;  %v3827_v44 = vpop.permute.xlu0 %3826 }
  0xe7   :  { %1099 = vst.msk [vmem:[#allocation0 + $0x243] ss:$8 sm:$0xf] %vm258_vm0, %v3719_v45   ;;  %1101 = vst.msk [vmem:[#allocation0 + $0x243] ss:$8 sm:$0xf0] %vm258_vm0, %v3719_v45   ;;  %v3834_v45 = vunpack.i.h.bf16 %v3832_v43  ;;  %v3829_v47 = vunpack.i.h.bf16 %v3827_v44  ;;  %v3828_v48 = vunpack.i.l.bf16 %v3827_v44 }
  0xe8   :  { %1086 = vst.msk [vmem:[#allocation0 + $0x203] ss:$8 sm:$0xf] %vm258_vm0, %v3718_v46   ;;  %1088 = vst.msk [vmem:[#allocation0 + $0x203] ss:$8 sm:$0xf0] %vm258_vm0, %v3718_v46   ;;  %v3833_v46 = vunpack.i.l.bf16 %v3832_v43 }
  0xe9   :  { %1177 = vst.msk [vmem:[#allocation0 + $0x3c3] ss:$8 sm:$0xf] %vm258_vm0, %v3734_v49   ;;  %1179 = vst.msk [vmem:[#allocation0 + $0x3c3] ss:$8 sm:$0xf0] %vm258_vm0, %v3734_v49   ;;  %v3842_v49 = vpop.permute.xlu1 %3841 }
  0xea   :  { %1164 = vst.msk [vmem:[#allocation0 + $0x383] ss:$8 sm:$0xf] %vm258_vm0, %v3733_v50   ;;  %1166 = vst.msk [vmem:[#allocation0 + $0x383] ss:$8 sm:$0xf0] %vm258_vm0, %v3733_v50   ;;  %v3837_v50 = vpop.permute.xlu0 %3836 }
  0xeb   :  { %1151 = vst.msk [vmem:[#allocation0 + $0x343] ss:$8 sm:$0xf] %vm258_vm0, %v3729_v51   ;;  %1153 = vst.msk [vmem:[#allocation0 + $0x343] ss:$8 sm:$0xf0] %vm258_vm0, %v3729_v51   ;;  %v3844_v51 = vunpack.i.h.bf16 %v3842_v49  ;;  %v3839_v53 = vunpack.i.h.bf16 %v3837_v50  ;;  %v3838_v54 = vunpack.i.l.bf16 %v3837_v50 }
  0xec   :  { %1138 = vst.msk [vmem:[#allocation0 + $0x303] ss:$8 sm:$0xf] %vm258_vm0, %v3728_v52   ;;  %1140 = vst.msk [vmem:[#allocation0 + $0x303] ss:$8 sm:$0xf0] %vm258_vm0, %v3728_v52   ;;  %v3843_v52 = vunpack.i.l.bf16 %v3842_v49 }
  0xed   :  { %1228 = vst.msk [vmem:[#allocation0 + $0xc4] ss:$8 sm:$0xf] %vm258_vm0, %v3744_v55   ;;  %1230 = vst.msk [vmem:[#allocation0 + $0xc4] ss:$8 sm:$0xf0] %vm258_vm0, %v3744_v55   ;;  %v3852_v55 = vpop.permute.xlu1 %3851 }
  0xee   :  { %1215 = vst.msk [vmem:[#allocation0 + $0x84] ss:$8 sm:$0xf] %vm258_vm0, %v3743_v56   ;;  %1217 = vst.msk [vmem:[#allocation0 + $0x84] ss:$8 sm:$0xf0] %vm258_vm0, %v3743_v56   ;;  %v3847_v56 = vpop.permute.xlu0 %3846 }
  0xef   :  { %1202 = vst.msk [vmem:[#allocation0 + $0x44] ss:$8 sm:$0xf] %vm258_vm0, %v3739_v57   ;;  %1204 = vst.msk [vmem:[#allocation0 + $0x44] ss:$8 sm:$0xf0] %vm258_vm0, %v3739_v57   ;;  %v3854_v57 = vunpack.i.h.bf16 %v3852_v55  ;;  %v3849_v59 = vunpack.i.h.bf16 %v3847_v56  ;;  %v3848_v60 = vunpack.i.l.bf16 %v3847_v56 }
  0xf0   :  { %1189 = vst.msk [vmem:[#allocation0 + $0x4] ss:$8 sm:$0xf] %vm258_vm0, %v3738_v58   ;;  %1191 = vst.msk [vmem:[#allocation0 + $0x4] ss:$8 sm:$0xf0] %vm258_vm0, %v3738_v58   ;;  %v3853_v58 = vunpack.i.l.bf16 %v3852_v55 }
  0xf1   :  { %1280 = vst.msk [vmem:[#allocation0 + $0x1c4] ss:$8 sm:$0xf] %vm258_vm0, %v3754_v61   ;;  %1282 = vst.msk [vmem:[#allocation0 + $0x1c4] ss:$8 sm:$0xf0] %vm258_vm0, %v3754_v61   ;;  %v3862_v61 = vpop.permute.xlu1 %3861 }
  0xf2   :  { %1267 = vst.msk [vmem:[#allocation0 + $0x184] ss:$8 sm:$0xf] %vm258_vm0, %v3753_v62   ;;  %1269 = vst.msk [vmem:[#allocation0 + $0x184] ss:$8 sm:$0xf0] %vm258_vm0, %v3753_v62   ;;  %v3857_v62 = vpop.permute.xlu0 %3856 }
  0xf3   :  { %1254 = vst.msk [vmem:[#allocation0 + $0x144] ss:$8 sm:$0xf] %vm258_vm0, %v3749_v63   ;;  %1256 = vst.msk [vmem:[#allocation0 + $0x144] ss:$8 sm:$0xf0] %vm258_vm0, %v3749_v63   ;;  %v3864_v63 = vunpack.i.h.bf16 %v3862_v61  ;;  %v3859_v1 = vunpack.i.h.bf16 %v3857_v62  ;;  %v3858_v2 = vunpack.i.l.bf16 %v3857_v62 }
  0xf4   :  { %1241 = vst.msk [vmem:[#allocation0 + $0x104] ss:$8 sm:$0xf] %vm258_vm0, %v3748_v0   ;;  %1243 = vst.msk [vmem:[#allocation0 + $0x104] ss:$8 sm:$0xf0] %vm258_vm0, %v3748_v0   ;;  %v3863_v0 = vunpack.i.l.bf16 %v3862_v61 }
  0xf5   :  { %1332 = vst.msk [vmem:[#allocation0 + $0x2c4] ss:$8 sm:$0xf] %vm258_vm0, %v3764_v3   ;;  %1334 = vst.msk [vmem:[#allocation0 + $0x2c4] ss:$8 sm:$0xf0] %vm258_vm0, %v3764_v3   ;;  %v3872_v3 = vpop.permute.xlu1 %3871 }
  0xf6   :  { %1319 = vst.msk [vmem:[#allocation0 + $0x284] ss:$8 sm:$0xf] %vm258_vm0, %v3763_v4   ;;  %1321 = vst.msk [vmem:[#allocation0 + $0x284] ss:$8 sm:$0xf0] %vm258_vm0, %v3763_v4   ;;  %v3867_v4 = vpop.permute.xlu0 %3866 }
  0xf7   :  { %1306 = vst.msk [vmem:[#allocation0 + $0x244] ss:$8 sm:$0xf] %vm258_vm0, %v3759_v5   ;;  %1308 = vst.msk [vmem:[#allocation0 + $0x244] ss:$8 sm:$0xf0] %vm258_vm0, %v3759_v5   ;;  %v3874_v5 = vunpack.i.h.bf16 %v3872_v3  ;;  %v3869_v7 = vunpack.i.h.bf16 %v3867_v4  ;;  %v3868_v8 = vunpack.i.l.bf16 %v3867_v4 }
  0xf8   :  { %1293 = vst.msk [vmem:[#allocation0 + $0x204] ss:$8 sm:$0xf] %vm258_vm0, %v3758_v6   ;;  %1295 = vst.msk [vmem:[#allocation0 + $0x204] ss:$8 sm:$0xf0] %vm258_vm0, %v3758_v6   ;;  %v3873_v6 = vunpack.i.l.bf16 %v3872_v3 }
  0xf9   :  { %1384 = vst.msk [vmem:[#allocation0 + $0x3c4] ss:$8 sm:$0xf] %vm258_vm0, %v3774_v9   ;;  %1386 = vst.msk [vmem:[#allocation0 + $0x3c4] ss:$8 sm:$0xf0] %vm258_vm0, %v3774_v9   ;;  %v3882_v9 = vpop.permute.xlu1 %3881 }
  0xfa   :  { %1371 = vst.msk [vmem:[#allocation0 + $0x384] ss:$8 sm:$0xf] %vm258_vm0, %v3773_v10   ;;  %1373 = vst.msk [vmem:[#allocation0 + $0x384] ss:$8 sm:$0xf0] %vm258_vm0, %v3773_v10   ;;  %v3877_v10 = vpop.permute.xlu0 %3876 }
  0xfb   :  { %1358 = vst.msk [vmem:[#allocation0 + $0x344] ss:$8 sm:$0xf] %vm258_vm0, %v3769_v11   ;;  %1360 = vst.msk [vmem:[#allocation0 + $0x344] ss:$8 sm:$0xf0] %vm258_vm0, %v3769_v11   ;;  %v3884_v11 = vunpack.i.h.bf16 %v3882_v9  ;;  %v3879_v13 = vunpack.i.h.bf16 %v3877_v10  ;;  %v3878_v14 = vunpack.i.l.bf16 %v3877_v10 }
  0xfc   :  { %1345 = vst.msk [vmem:[#allocation0 + $0x304] ss:$8 sm:$0xf] %vm258_vm0, %v3768_v12   ;;  %1347 = vst.msk [vmem:[#allocation0 + $0x304] ss:$8 sm:$0xf0] %vm258_vm0, %v3768_v12   ;;  %v3883_v12 = vunpack.i.l.bf16 %v3882_v9 }
  0xfd   :  { %1435 = vst.msk [vmem:[#allocation0 + $0xc5] ss:$8 sm:$0xf] %vm258_vm0, %v3784_v15   ;;  %1437 = vst.msk [vmem:[#allocation0 + $0xc5] ss:$8 sm:$0xf0] %vm258_vm0, %v3784_v15  }
  0xfe   :  { %1422 = vst.msk [vmem:[#allocation0 + $0x85] ss:$8 sm:$0xf] %vm258_vm0, %v3783_v16   ;;  %1424 = vst.msk [vmem:[#allocation0 + $0x85] ss:$8 sm:$0xf0] %vm258_vm0, %v3783_v16  }
  0xff   :  { %1409 = vst.msk [vmem:[#allocation0 + $0x45] ss:$8 sm:$0xf] %vm258_vm0, %v3779_v17   ;;  %1411 = vst.msk [vmem:[#allocation0 + $0x45] ss:$8 sm:$0xf0] %vm258_vm0, %v3779_v17  }
 0x100   :  { %1396 = vst.msk [vmem:[#allocation0 + $0x5] ss:$8 sm:$0xf] %vm258_vm0, %v3778_v18   ;;  %1398 = vst.msk [vmem:[#allocation0 + $0x5] ss:$8 sm:$0xf0] %vm258_vm0, %v3778_v18  }
 0x101   :  { %1487 = vst.msk [vmem:[#allocation0 + $0x1c5] ss:$8 sm:$0xf] %vm258_vm0, %v3794_v21   ;;  %1489 = vst.msk [vmem:[#allocation0 + $0x1c5] ss:$8 sm:$0xf0] %vm258_vm0, %v3794_v21  }
 0x102   :  { %1474 = vst.msk [vmem:[#allocation0 + $0x185] ss:$8 sm:$0xf] %vm258_vm0, %v3793_v22   ;;  %1476 = vst.msk [vmem:[#allocation0 + $0x185] ss:$8 sm:$0xf0] %vm258_vm0, %v3793_v22  }
 0x103   :  { %1461 = vst.msk [vmem:[#allocation0 + $0x145] ss:$8 sm:$0xf] %vm258_vm0, %v3789_v23   ;;  %1463 = vst.msk [vmem:[#allocation0 + $0x145] ss:$8 sm:$0xf0] %vm258_vm0, %v3789_v23  }
 0x104   :  { %1448 = vst.msk [vmem:[#allocation0 + $0x105] ss:$8 sm:$0xf] %vm258_vm0, %v3788_v24   ;;  %1450 = vst.msk [vmem:[#allocation0 + $0x105] ss:$8 sm:$0xf0] %vm258_vm0, %v3788_v24  }
 0x105   :  { %1539 = vst.msk [vmem:[#allocation0 + $0x2c5] ss:$8 sm:$0xf] %vm258_vm0, %v3804_v27   ;;  %1541 = vst.msk [vmem:[#allocation0 + $0x2c5] ss:$8 sm:$0xf0] %vm258_vm0, %v3804_v27   ;;  %v3892_v27 = vpop.permute.xlu1 %3891 }
 0x106   :  { %1526 = vst.msk [vmem:[#allocation0 + $0x285] ss:$8 sm:$0xf] %vm258_vm0, %v3803_v28   ;;  %1528 = vst.msk [vmem:[#allocation0 + $0x285] ss:$8 sm:$0xf0] %vm258_vm0, %v3803_v28   ;;  %v3887_v28 = vpop.permute.xlu0 %3886 }
 0x107   :  { %1513 = vst.msk [vmem:[#allocation0 + $0x245] ss:$8 sm:$0xf] %vm258_vm0, %v3799_v29   ;;  %1515 = vst.msk [vmem:[#allocation0 + $0x245] ss:$8 sm:$0xf0] %vm258_vm0, %v3799_v29  }
 0x108   :  { %1500 = vst.msk [vmem:[#allocation0 + $0x205] ss:$8 sm:$0xf] %vm258_vm0, %v3798_v30   ;;  %1502 = vst.msk [vmem:[#allocation0 + $0x205] ss:$8 sm:$0xf0] %vm258_vm0, %v3798_v30  }
 0x109   :  { %1591 = vst.msk [vmem:[#allocation0 + $0x3c5] ss:$8 sm:$0xf] %vm258_vm0, %v3814_v33   ;;  %1593 = vst.msk [vmem:[#allocation0 + $0x3c5] ss:$8 sm:$0xf0] %vm258_vm0, %v3814_v33   ;;  %v3894_v33 = vunpack.i.h.bf16 %v3892_v27 }
 0x10a   :  { %1578 = vst.msk [vmem:[#allocation0 + $0x385] ss:$8 sm:$0xf] %vm258_vm0, %v3813_v34   ;;  %1580 = vst.msk [vmem:[#allocation0 + $0x385] ss:$8 sm:$0xf0] %vm258_vm0, %v3813_v34   ;;  %v3893_v34 = vunpack.i.l.bf16 %v3892_v27 }
 0x10b   :  { %1565 = vst.msk [vmem:[#allocation0 + $0x345] ss:$8 sm:$0xf] %vm258_vm0, %v3809_v35   ;;  %1567 = vst.msk [vmem:[#allocation0 + $0x345] ss:$8 sm:$0xf0] %vm258_vm0, %v3809_v35   ;;  %v3889_v35 = vunpack.i.h.bf16 %v3887_v28 }
 0x10c   :  { %1552 = vst.msk [vmem:[#allocation0 + $0x305] ss:$8 sm:$0xf] %vm258_vm0, %v3808_v36   ;;  %1554 = vst.msk [vmem:[#allocation0 + $0x305] ss:$8 sm:$0xf0] %vm258_vm0, %v3808_v36  }
 0x10d   :  { %1642 = vst.msk [vmem:[#allocation0 + $0xc6] ss:$8 sm:$0xf] %vm258_vm0, %v3824_v39   ;;  %1644 = vst.msk [vmem:[#allocation0 + $0xc6] ss:$8 sm:$0xf0] %vm258_vm0, %v3824_v39  }
 0x10e   :  { %1629 = vst.msk [vmem:[#allocation0 + $0x86] ss:$8 sm:$0xf] %vm258_vm0, %v3823_v40   ;;  %1631 = vst.msk [vmem:[#allocation0 + $0x86] ss:$8 sm:$0xf0] %vm258_vm0, %v3823_v40  }
 0x10f   :  { %1616 = vst.msk [vmem:[#allocation0 + $0x46] ss:$8 sm:$0xf] %vm258_vm0, %v3819_v41   ;;  %1618 = vst.msk [vmem:[#allocation0 + $0x46] ss:$8 sm:$0xf0] %vm258_vm0, %v3819_v41   ;;  %v3888_v41 = vunpack.i.l.bf16 %v3887_v28 }
 0x110   :  { %1603 = vst.msk [vmem:[#allocation0 + $0x6] ss:$8 sm:$0xf] %vm258_vm0, %v3818_v42   ;;  %1605 = vst.msk [vmem:[#allocation0 + $0x6] ss:$8 sm:$0xf0] %vm258_vm0, %v3818_v42  }
 0x111   :  { %1694 = vst.msk [vmem:[#allocation0 + $0x1c6] ss:$8 sm:$0xf] %vm258_vm0, %v3834_v45   ;;  %1696 = vst.msk [vmem:[#allocation0 + $0x1c6] ss:$8 sm:$0xf0] %vm258_vm0, %v3834_v45  }
 0x112   :  { %1681 = vst.msk [vmem:[#allocation0 + $0x186] ss:$8 sm:$0xf] %vm258_vm0, %v3833_v46   ;;  %1683 = vst.msk [vmem:[#allocation0 + $0x186] ss:$8 sm:$0xf0] %vm258_vm0, %v3833_v46  }
 0x113   :  { %1668 = vst.msk [vmem:[#allocation0 + $0x146] ss:$8 sm:$0xf] %vm258_vm0, %v3829_v47   ;;  %1670 = vst.msk [vmem:[#allocation0 + $0x146] ss:$8 sm:$0xf0] %vm258_vm0, %v3829_v47  }
 0x114   :  { %1655 = vst.msk [vmem:[#allocation0 + $0x106] ss:$8 sm:$0xf] %vm258_vm0, %v3828_v48   ;;  %1657 = vst.msk [vmem:[#allocation0 + $0x106] ss:$8 sm:$0xf0] %vm258_vm0, %v3828_v48  }
 0x115   :  { %1746 = vst.msk [vmem:[#allocation0 + $0x2c6] ss:$8 sm:$0xf] %vm258_vm0, %v3844_v51   ;;  %1748 = vst.msk [vmem:[#allocation0 + $0x2c6] ss:$8 sm:$0xf0] %vm258_vm0, %v3844_v51  }
 0x116   :  { %1733 = vst.msk [vmem:[#allocation0 + $0x286] ss:$8 sm:$0xf] %vm258_vm0, %v3843_v52   ;;  %1735 = vst.msk [vmem:[#allocation0 + $0x286] ss:$8 sm:$0xf0] %vm258_vm0, %v3843_v52  }
 0x117   :  { %1720 = vst.msk [vmem:[#allocation0 + $0x246] ss:$8 sm:$0xf] %vm258_vm0, %v3839_v53   ;;  %1722 = vst.msk [vmem:[#allocation0 + $0x246] ss:$8 sm:$0xf0] %vm258_vm0, %v3839_v53  }
 0x118   :  { %1707 = vst.msk [vmem:[#allocation0 + $0x206] ss:$8 sm:$0xf] %vm258_vm0, %v3838_v54   ;;  %1709 = vst.msk [vmem:[#allocation0 + $0x206] ss:$8 sm:$0xf0] %vm258_vm0, %v3838_v54  }
 0x119   :  { %1798 = vst.msk [vmem:[#allocation0 + $0x3c6] ss:$8 sm:$0xf] %vm258_vm0, %v3854_v57   ;;  %1800 = vst.msk [vmem:[#allocation0 + $0x3c6] ss:$8 sm:$0xf0] %vm258_vm0, %v3854_v57  }
 0x11a   :  { %1785 = vst.msk [vmem:[#allocation0 + $0x386] ss:$8 sm:$0xf] %vm258_vm0, %v3853_v58   ;;  %1787 = vst.msk [vmem:[#allocation0 + $0x386] ss:$8 sm:$0xf0] %vm258_vm0, %v3853_v58  }
 0x11b   :  { %1772 = vst.msk [vmem:[#allocation0 + $0x346] ss:$8 sm:$0xf] %vm258_vm0, %v3849_v59   ;;  %1774 = vst.msk [vmem:[#allocation0 + $0x346] ss:$8 sm:$0xf0] %vm258_vm0, %v3849_v59  }
 0x11c   :  { %1759 = vst.msk [vmem:[#allocation0 + $0x306] ss:$8 sm:$0xf] %vm258_vm0, %v3848_v60   ;;  %1761 = vst.msk [vmem:[#allocation0 + $0x306] ss:$8 sm:$0xf0] %vm258_vm0, %v3848_v60  }
 0x11d   :  { %1849 = vst.msk [vmem:[#allocation0 + $0xc7] ss:$8 sm:$0xf] %vm258_vm0, %v3864_v63   ;;  %1851 = vst.msk [vmem:[#allocation0 + $0xc7] ss:$8 sm:$0xf0] %vm258_vm0, %v3864_v63  }
 0x11e   :  { %1836 = vst.msk [vmem:[#allocation0 + $0x87] ss:$8 sm:$0xf] %vm258_vm0, %v3863_v0   ;;  %1838 = vst.msk [vmem:[#allocation0 + $0x87] ss:$8 sm:$0xf0] %vm258_vm0, %v3863_v0  }
 0x11f   :  { %1823 = vst.msk [vmem:[#allocation0 + $0x47] ss:$8 sm:$0xf] %vm258_vm0, %v3859_v1   ;;  %1825 = vst.msk [vmem:[#allocation0 + $0x47] ss:$8 sm:$0xf0] %vm258_vm0, %v3859_v1  }
 0x120   :  { %1810 = vst.msk [vmem:[#allocation0 + $0x7] ss:$8 sm:$0xf] %vm258_vm0, %v3858_v2   ;;  %1812 = vst.msk [vmem:[#allocation0 + $0x7] ss:$8 sm:$0xf0] %vm258_vm0, %v3858_v2  }
 0x121   :  { %1901 = vst.msk [vmem:[#allocation0 + $0x1c7] ss:$8 sm:$0xf] %vm258_vm0, %v3874_v5   ;;  %1903 = vst.msk [vmem:[#allocation0 + $0x1c7] ss:$8 sm:$0xf0] %vm258_vm0, %v3874_v5  }
 0x122   :  { %1888 = vst.msk [vmem:[#allocation0 + $0x187] ss:$8 sm:$0xf] %vm258_vm0, %v3873_v6   ;;  %1890 = vst.msk [vmem:[#allocation0 + $0x187] ss:$8 sm:$0xf0] %vm258_vm0, %v3873_v6  }
 0x123   :  { %1875 = vst.msk [vmem:[#allocation0 + $0x147] ss:$8 sm:$0xf] %vm258_vm0, %v3869_v7   ;;  %1877 = vst.msk [vmem:[#allocation0 + $0x147] ss:$8 sm:$0xf0] %vm258_vm0, %v3869_v7  }
 0x124   :  { %1862 = vst.msk [vmem:[#allocation0 + $0x107] ss:$8 sm:$0xf] %vm258_vm0, %v3868_v8   ;;  %1864 = vst.msk [vmem:[#allocation0 + $0x107] ss:$8 sm:$0xf0] %vm258_vm0, %v3868_v8  }
 0x125   :  { %v2121_v15 = vld [vmem:[#allocation0 + $0x80] sm:$0xff]  ;;  %v2128_v16 = vld [vmem:[#allocation0 + $0x88] sm:$0xff]  ;;  %v2135_v17 = vld [vmem:[#allocation0 + $0x90] sm:$0xff]  ;;  %1953 = vst.msk [vmem:[#allocation0 + $0x2c7] ss:$8 sm:$0xf] %vm258_vm0, %v3884_v11  }
 0x126   :  { %v2142_v18 = vld [vmem:[#allocation0 + $0x98] sm:$0xff]  ;;  %v2149_v19 = vld [vmem:[#allocation0 + $0xa0] sm:$0xff]  ;;  %v2156_v20 = vld [vmem:[#allocation0 + $0xa8] sm:$0xff]  ;;  %v3261_v21 = vpack.c.bf16 %v2128_v16, %v2121_v15  ;;  %1955 = vst.msk [vmem:[#allocation0 + $0x2c7] ss:$8 sm:$0xf0] %vm258_vm0, %v3884_v11  }
 0x127   :  { %1940 = vst.msk [vmem:[#allocation0 + $0x287] ss:$8 sm:$0xf] %vm258_vm0, %v3883_v12   ;;  %1942 = vst.msk [vmem:[#allocation0 + $0x287] ss:$8 sm:$0xf0] %vm258_vm0, %v3883_v12   ;;  %v3266_v25 = vpack.c.bf16 %v2142_v18, %v2135_v17  ;;  %v3271_v26 = vpack.c.bf16 %v2156_v20, %v2149_v19 }
 0x128   :  { %1927 = vst.msk [vmem:[#allocation0 + $0x247] ss:$8 sm:$0xf] %vm258_vm0, %v3879_v13   ;;  %1929 = vst.msk [vmem:[#allocation0 + $0x247] ss:$8 sm:$0xf0] %vm258_vm0, %v3879_v13  }
 0x129   :  { %1914 = vst.msk [vmem:[#allocation0 + $0x207] ss:$8 sm:$0xf] %vm258_vm0, %v3878_v14   ;;  %1916 = vst.msk [vmem:[#allocation0 + $0x207] ss:$8 sm:$0xf0] %vm258_vm0, %v3878_v14  }
 0x12a   :  { %v2163_v22 = vld [vmem:[#allocation0 + $0xb0] sm:$0xff]  ;;  %v2170_v23 = vld [vmem:[#allocation0 + $0xb8] sm:$0xff]  ;;  %v2177_v24 = vld [vmem:[#allocation0 + $0xc0] sm:$0xff]  ;;  %3552 = vst [vmem:[%s4661_s1 + $0x40] sm:$0xff] %v3261_v21  }
 0x12b   :  { %v2184_v29 = vld [vmem:[#allocation0 + $0xc8] sm:$0xff]  ;;  %v2191_v30 = vld [vmem:[#allocation0 + $0xd0] sm:$0xff]  ;;  %v2198_v31 = vld [vmem:[#allocation0 + $0xd8] sm:$0xff]  ;;  %v3276_v32 = vpack.c.bf16 %v2170_v23, %v2163_v22  ;;  %3553 = vst [vmem:[%s4661_s1 + $0x48] sm:$0xff] %v3266_v25  }
 0x12c   :  { %v2205_v36 = vld [vmem:[#allocation0 + $0xe0] sm:$0xff]  ;;  %v2212_v37 = vld [vmem:[#allocation0 + $0xe8] sm:$0xff]  ;;  %v2219_v38 = vld [vmem:[#allocation0 + $0xf0] sm:$0xff]  ;;  %v3281_v39 = vpack.c.bf16 %v2184_v29, %v2177_v24  ;;  %v3286_v40 = vpack.c.bf16 %v2198_v31, %v2191_v30  ;;  %3554 = vst [vmem:[%s4661_s1 + $0x50] sm:$0xff] %v3271_v26  }
 0x12d   :  { %v2226_v42 = vld [vmem:[#allocation0 + $0xf8] sm:$0xff]  ;;  %v2012_v43 = vld [vmem:[#allocation0] sm:$0xff]  ;;  %v2017_v44 = vld [vmem:[#allocation0 + $0x8] sm:$0xff]  ;;  %v3291_v45 = vpack.c.bf16 %v2212_v37, %v2205_v36  ;;  %3555 = vst [vmem:[%s4661_s1 + $0x58] sm:$0xff] %v3276_v32  }
 0x12e   :  { %2005 = vst.msk [vmem:[#allocation0 + $0x3c7] ss:$8 sm:$0xf] %vm258_vm0, %v3894_v33   ;;  %2007 = vst.msk [vmem:[#allocation0 + $0x3c7] ss:$8 sm:$0xf0] %vm258_vm0, %v3894_v33   ;;  %v3296_v49 = vpack.c.bf16 %v2226_v42, %v2219_v38  ;;  %v3221_v50 = vpack.c.bf16 %v2017_v44, %v2012_v43 }
 0x12f   :  { %1992 = vst.msk [vmem:[#allocation0 + $0x387] ss:$8 sm:$0xf] %vm258_vm0, %v3893_v34   ;;  %1994 = vst.msk [vmem:[#allocation0 + $0x387] ss:$8 sm:$0xf0] %vm258_vm0, %v3893_v34  }
 0x130   :  { %1979 = vst.msk [vmem:[#allocation0 + $0x347] ss:$8 sm:$0xf] %vm258_vm0, %v3889_v35   ;;  %1981 = vst.msk [vmem:[#allocation0 + $0x347] ss:$8 sm:$0xf0] %vm258_vm0, %v3889_v35  }
 0x131   :  { %v2023_v46 = vld [vmem:[#allocation0 + $0x10] sm:$0xff]  ;;  %v2030_v47 = vld [vmem:[#allocation0 + $0x18] sm:$0xff]  ;;  %v2037_v48 = vld [vmem:[#allocation0 + $0x20] sm:$0xff]  ;;  %3556 = vst [vmem:[%s4661_s1 + $0x60] sm:$0xff] %v3281_v39  }
 0x132   :  { %3557 = vst [vmem:[%s4661_s1 + $0x68] sm:$0xff] %v3286_v40   ;;  %1966 = vst.msk [vmem:[#allocation0 + $0x307] ss:$8 sm:$0xf] %vm258_vm0, %v3888_v41   ;;  %v2044_v51 = vld [vmem:[#allocation0 + $0x28] sm:$0xff]  ;;  %v2051_v52 = vld [vmem:[#allocation0 + $0x30] sm:$0xff]  ;;  %v3226_v54 = vpack.c.bf16 %v2030_v47, %v2023_v46 }
 0x133   :  { %1968 = vst.msk [vmem:[#allocation0 + $0x307] ss:$8 sm:$0xf0] %vm258_vm0, %v3888_v41   ;;  %v2058_v53 = vld [vmem:[#allocation0 + $0x38] sm:$0xff]  ;;  %3558 = vst [vmem:[%s4661_s1 + $0x70] sm:$0xff] %v3291_v45   ;;  %v2065_v55 = vld [vmem:[#allocation0 + $0x40] sm:$0xff]  ;;  %v3231_v58 = vpack.c.bf16 %v2044_v51, %v2037_v48 }
 0x134   :  { %v2072_v56 = vld [vmem:[#allocation0 + $0x48] sm:$0xff]  ;;  %v2079_v57 = vld [vmem:[#allocation0 + $0x50] sm:$0xff]  ;;  %v3236_v59 = vpack.c.bf16 %v2058_v53, %v2051_v52  ;;  %3559 = vst [vmem:[%s4661_s1 + $0x78] sm:$0xff] %v3296_v49   ;;  %3222 = vst [vmem:[%s4661_s1] sm:$0xff] %v3221_v50  }
 0x135   :  { %v2086_v60 = vld [vmem:[#allocation0 + $0x58] sm:$0xff]  ;;  %v2093_v61 = vld [vmem:[#allocation0 + $0x60] sm:$0xff]  ;;  %v2100_v62 = vld [vmem:[#allocation0 + $0x68] sm:$0xff]  ;;  %v3241_v63 = vpack.c.bf16 %v2072_v56, %v2065_v55  ;;  %3545 = vst [vmem:[%s4661_s1 + $0x8] sm:$0xff] %v3226_v54  }
 0x136   :  { %v2107_v0 = vld [vmem:[#allocation0 + $0x70] sm:$0xff]  ;;  %v2114_v1 = vld [vmem:[#allocation0 + $0x78] sm:$0xff]  ;;  %v2429_v2 = vld [vmem:[#allocation0 + $0x1e0] sm:$0xff]  ;;  %v3246_v3 = vpack.c.bf16 %v2086_v60, %v2079_v57  ;;  %v3251_v4 = vpack.c.bf16 %v2100_v62, %v2093_v61  ;;  %3546 = vst [vmem:[%s4661_s1 + $0x10] sm:$0xff] %v3231_v58  }
 0x137   :  { %3547 = vst [vmem:[%s4661_s1 + $0x18] sm:$0xff] %v3236_v59   ;;  %v2436_v5 = vld [vmem:[#allocation0 + $0x1e8] sm:$0xff]  ;;  %v2443_v6 = vld [vmem:[#allocation0 + $0x1f0] sm:$0xff]  ;;  %v2450_v7 = vld [vmem:[#allocation0 + $0x1f8] sm:$0xff]  ;;  %v3256_v8 = vpack.c.bf16 %v2114_v1, %v2107_v0 }
 0x138   :  { %3548 = vst [vmem:[%s4661_s1 + $0x20] sm:$0xff] %v3241_v63   ;;  %v3371_v9 = vpack.c.bf16 %v2436_v5, %v2429_v2  ;;  %v3376_v10 = vpack.c.bf16 %v2450_v7, %v2443_v6  ;;  %v2345_v11 = vld [vmem:[#allocation0 + $0x180] sm:$0xff]  ;;  %v2352_v12 = vld [vmem:[#allocation0 + $0x188] sm:$0xff]  ;;  %v2359_v13 = vld [vmem:[#allocation0 + $0x190] sm:$0xff] }
 0x139   :  { %3549 = vst [vmem:[%s4661_s1 + $0x28] sm:$0xff] %v3246_v3   ;;  %3550 = vst [vmem:[%s4661_s1 + $0x30] sm:$0xff] %v3251_v4   ;;  %v2366_v14 = vld [vmem:[#allocation0 + $0x198] sm:$0xff]  ;;  %v2373_v15 = vld [vmem:[#allocation0 + $0x1a0] sm:$0xff]  ;;  %v3341_v17 = vpack.c.bf16 %v2352_v12, %v2345_v11 }
 0x13a   :  { %v2380_v16 = vld [vmem:[#allocation0 + $0x1a8] sm:$0xff]  ;;  %3551 = vst [vmem:[%s4661_s1 + $0x38] sm:$0xff] %v3256_v8   ;;  %3574 = vst [vmem:[%s4661_s1 + $0xf0] sm:$0xff] %v3371_v9   ;;  %v2387_v18 = vld [vmem:[#allocation0 + $0x1b0] sm:$0xff]  ;;  %v3346_v21 = vpack.c.bf16 %v2366_v14, %v2359_v13 }
 0x13b   :  { %3575 = vst [vmem:[%s4661_s1 + $0xf8] sm:$0xff] %v3376_v10   ;;  %v2394_v19 = vld [vmem:[#allocation0 + $0x1b8] sm:$0xff]  ;;  %v2401_v20 = vld [vmem:[#allocation0 + $0x1c0] sm:$0xff]  ;;  %v3351_v22 = vpack.c.bf16 %v2380_v16, %v2373_v15  ;;  %v2408_v23 = vld [vmem:[#allocation0 + $0x1c8] sm:$0xff] }
 0x13c   :  { %v2415_v24 = vld [vmem:[#allocation0 + $0x1d0] sm:$0xff]  ;;  %v2422_v25 = vld [vmem:[#allocation0 + $0x1d8] sm:$0xff]  ;;  %v3356_v26 = vpack.c.bf16 %v2394_v19, %v2387_v18  ;;  %3568 = vst [vmem:[%s4661_s1 + $0xc0] sm:$0xff] %v3341_v17   ;;  %v2233_v27 = vld [vmem:[#allocation0 + $0x100] sm:$0xff]  ;;  %v3361_v30 = vpack.c.bf16 %v2408_v23, %v2401_v20 }
 0x13d   :  { %v2240_v28 = vld [vmem:[#allocation0 + $0x108] sm:$0xff]  ;;  %v2247_v29 = vld [vmem:[#allocation0 + $0x110] sm:$0xff]  ;;  %v3366_v31 = vpack.c.bf16 %v2422_v25, %v2415_v24  ;;  %3569 = vst [vmem:[%s4661_s1 + $0xc8] sm:$0xff] %v3346_v21   ;;  %3570 = vst [vmem:[%s4661_s1 + $0xd0] sm:$0xff] %v3351_v22  }
 0x13e   :  { %v2254_v32 = vld [vmem:[#allocation0 + $0x118] sm:$0xff]  ;;  %v2261_v33 = vld [vmem:[#allocation0 + $0x120] sm:$0xff]  ;;  %v2268_v34 = vld [vmem:[#allocation0 + $0x128] sm:$0xff]  ;;  %v3301_v35 = vpack.c.bf16 %v2240_v28, %v2233_v27  ;;  %3571 = vst [vmem:[%s4661_s1 + $0xd8] sm:$0xff] %v3356_v26  }
 0x13f   :  { %v2275_v36 = vld [vmem:[#allocation0 + $0x130] sm:$0xff]  ;;  %v2282_v37 = vld [vmem:[#allocation0 + $0x138] sm:$0xff]  ;;  %v2289_v38 = vld [vmem:[#allocation0 + $0x140] sm:$0xff]  ;;  %v3306_v39 = vpack.c.bf16 %v2254_v32, %v2247_v29  ;;  %v3311_v40 = vpack.c.bf16 %v2268_v34, %v2261_v33  ;;  %3572 = vst [vmem:[%s4661_s1 + $0xe0] sm:$0xff] %v3361_v30  }
 0x140   :  { %3573 = vst [vmem:[%s4661_s1 + $0xe8] sm:$0xff] %v3366_v31   ;;  %v2296_v41 = vld [vmem:[#allocation0 + $0x148] sm:$0xff]  ;;  %v2303_v42 = vld [vmem:[#allocation0 + $0x150] sm:$0xff]  ;;  %v2310_v43 = vld [vmem:[#allocation0 + $0x158] sm:$0xff]  ;;  %v3316_v44 = vpack.c.bf16 %v2282_v37, %v2275_v36 }
 0x141   :  { %3560 = vst [vmem:[%s4661_s1 + $0x80] sm:$0xff] %v3301_v35   ;;  %v2317_v45 = vld [vmem:[#allocation0 + $0x160] sm:$0xff]  ;;  %v2324_v46 = vld [vmem:[#allocation0 + $0x168] sm:$0xff]  ;;  %v2331_v47 = vld [vmem:[#allocation0 + $0x170] sm:$0xff]  ;;  %v3321_v48 = vpack.c.bf16 %v2296_v41, %v2289_v38  ;;  %v3326_v49 = vpack.c.bf16 %v2310_v43, %v2303_v42 }
 0x142   :  { %3561 = vst [vmem:[%s4661_s1 + $0x88] sm:$0xff] %v3306_v39   ;;  %3562 = vst [vmem:[%s4661_s1 + $0x90] sm:$0xff] %v3311_v40   ;;  %v2338_v50 = vld [vmem:[#allocation0 + $0x178] sm:$0xff]  ;;  %v2625_v51 = vld [vmem:[#allocation0 + $0x2c0] sm:$0xff]  ;;  %v3331_v53 = vpack.c.bf16 %v2324_v46, %v2317_v45 }
 0x143   :  { %v2632_v52 = vld [vmem:[#allocation0 + $0x2c8] sm:$0xff]  ;;  %3563 = vst [vmem:[%s4661_s1 + $0x98] sm:$0xff] %v3316_v44   ;;  %v2639_v55 = vld [vmem:[#allocation0 + $0x2d0] sm:$0xff]  ;;  %v2646_v56 = vld [vmem:[#allocation0 + $0x2d8] sm:$0xff]  ;;  %v3336_v57 = vpack.c.bf16 %v2338_v50, %v2331_v47 }
 0x144   :  { %v3441_v54 = vpack.c.bf16 %v2632_v52, %v2625_v51  ;;  %v2569_v58 = vld [vmem:[#allocation0 + $0x280] sm:$0xff]  ;;  %3564 = vst [vmem:[%s4661_s1 + $0xa0] sm:$0xff] %v3321_v48   ;;  %3565 = vst [vmem:[%s4661_s1 + $0xa8] sm:$0xff] %v3326_v49   ;;  %v3446_v59 = vpack.c.bf16 %v2646_v56, %v2639_v55  ;;  %v2576_v60 = vld [vmem:[#allocation0 + $0x288] sm:$0xff] }
 0x145   :  { %v2583_v61 = vld [vmem:[#allocation0 + $0x290] sm:$0xff]  ;;  %v2590_v62 = vld [vmem:[#allocation0 + $0x298] sm:$0xff]  ;;  %3566 = vst [vmem:[%s4661_s1 + $0xb0] sm:$0xff] %v3331_v53   ;;  %v2597_v63 = vld [vmem:[#allocation0 + $0x2a0] sm:$0xff]  ;;  %v3421_v2 = vpack.c.bf16 %v2576_v60, %v2569_v58 }
 0x146   :  { %3588 = vst [vmem:[%s4661_s1 + $0x160] sm:$0xff] %v3441_v54   ;;  %v2604_v0 = vld [vmem:[#allocation0 + $0x2a8] sm:$0xff]  ;;  %v2611_v1 = vld [vmem:[#allocation0 + $0x2b0] sm:$0xff]  ;;  %3567 = vst [vmem:[%s4661_s1 + $0xb8] sm:$0xff] %v3336_v57   ;;  %v3426_v3 = vpack.c.bf16 %v2590_v62, %v2583_v61 }
 0x147   :  { %3589 = vst [vmem:[%s4661_s1 + $0x168] sm:$0xff] %v3446_v59   ;;  %v2618_v4 = vld [vmem:[#allocation0 + $0x2b8] sm:$0xff]  ;;  %v2653_v5 = vld [vmem:[#allocation0 + $0x2e0] sm:$0xff]  ;;  %v2660_v6 = vld [vmem:[#allocation0 + $0x2e8] sm:$0xff]  ;;  %v3431_v7 = vpack.c.bf16 %v2604_v0, %v2597_v63 }
 0x148   :  { %v2667_v8 = vld [vmem:[#allocation0 + $0x2f0] sm:$0xff]  ;;  %v2674_v9 = vld [vmem:[#allocation0 + $0x2f8] sm:$0xff]  ;;  %v2457_v10 = vld [vmem:[#allocation0 + $0x200] sm:$0xff]  ;;  %v3436_v11 = vpack.c.bf16 %v2618_v4, %v2611_v1  ;;  %v3451_v12 = vpack.c.bf16 %v2660_v6, %v2653_v5  ;;  %3584 = vst [vmem:[%s4661_s1 + $0x140] sm:$0xff] %v3421_v2  }
 0x149   :  { %3585 = vst [vmem:[%s4661_s1 + $0x148] sm:$0xff] %v3426_v3   ;;  %v2464_v13 = vld [vmem:[#allocation0 + $0x208] sm:$0xff]  ;;  %v2471_v14 = vld [vmem:[#allocation0 + $0x210] sm:$0xff]  ;;  %v2478_v15 = vld [vmem:[#allocation0 + $0x218] sm:$0xff]  ;;  %v3456_v16 = vpack.c.bf16 %v2674_v9, %v2667_v8 }
 0x14a   :  { %3586 = vst [vmem:[%s4661_s1 + $0x150] sm:$0xff] %v3431_v7   ;;  %v2485_v17 = vld [vmem:[#allocation0 + $0x220] sm:$0xff]  ;;  %v2492_v18 = vld [vmem:[#allocation0 + $0x228] sm:$0xff]  ;;  %v2499_v19 = vld [vmem:[#allocation0 + $0x230] sm:$0xff]  ;;  %v3381_v20 = vpack.c.bf16 %v2464_v13, %v2457_v10  ;;  %v3386_v21 = vpack.c.bf16 %v2478_v15, %v2471_v14 }
 0x14b   :  { %3587 = vst [vmem:[%s4661_s1 + $0x158] sm:$0xff] %v3436_v11   ;;  %3590 = vst [vmem:[%s4661_s1 + $0x170] sm:$0xff] %v3451_v12   ;;  %v2506_v22 = vld [vmem:[#allocation0 + $0x238] sm:$0xff]  ;;  %v2513_v23 = vld [vmem:[#allocation0 + $0x240] sm:$0xff]  ;;  %v3391_v25 = vpack.c.bf16 %v2492_v18, %v2485_v17 }
 0x14c   :  { %v2520_v24 = vld [vmem:[#allocation0 + $0x248] sm:$0xff]  ;;  %3591 = vst [vmem:[%s4661_s1 + $0x178] sm:$0xff] %v3456_v16   ;;  %v2527_v26 = vld [vmem:[#allocation0 + $0x250] sm:$0xff]  ;;  %v2534_v27 = vld [vmem:[#allocation0 + $0x258] sm:$0xff]  ;;  %v3396_v29 = vpack.c.bf16 %v2506_v22, %v2499_v19 }
 0x14d   :  { %v2541_v28 = vld [vmem:[#allocation0 + $0x260] sm:$0xff]  ;;  %v3401_v30 = vpack.c.bf16 %v2520_v24, %v2513_v23  ;;  %3576 = vst [vmem:[%s4661_s1 + $0x100] sm:$0xff] %v3381_v20   ;;  %3577 = vst [vmem:[%s4661_s1 + $0x108] sm:$0xff] %v3386_v21   ;;  %v2548_v31 = vld [vmem:[#allocation0 + $0x268] sm:$0xff]  ;;  %v3406_v34 = vpack.c.bf16 %v2534_v27, %v2527_v26 }
 0x14e   :  { %v2555_v32 = vld [vmem:[#allocation0 + $0x270] sm:$0xff]  ;;  %v2562_v33 = vld [vmem:[#allocation0 + $0x278] sm:$0xff]  ;;  %3578 = vst [vmem:[%s4661_s1 + $0x110] sm:$0xff] %v3391_v25   ;;  %v2793_v35 = vld [vmem:[#allocation0 + $0x380] sm:$0xff]  ;;  %v3411_v38 = vpack.c.bf16 %v2548_v31, %v2541_v28 }
 0x14f   :  { %v2800_v36 = vld [vmem:[#allocation0 + $0x388] sm:$0xff]  ;;  %v2807_v37 = vld [vmem:[#allocation0 + $0x390] sm:$0xff]  ;;  %v3416_v39 = vpack.c.bf16 %v2562_v33, %v2555_v32  ;;  %3579 = vst [vmem:[%s4661_s1 + $0x118] sm:$0xff] %v3396_v29   ;;  %3580 = vst [vmem:[%s4661_s1 + $0x120] sm:$0xff] %v3401_v30  }
 0x150   :  { %v3501_v40 = vpack.c.bf16 %v2800_v36, %v2793_v35  ;;  %v2814_v41 = vld [vmem:[#allocation0 + $0x398] sm:$0xff]  ;;  %v2821_v42 = vld [vmem:[#allocation0 + $0x3a0] sm:$0xff]  ;;  %v2828_v43 = vld [vmem:[#allocation0 + $0x3a8] sm:$0xff]  ;;  %3581 = vst [vmem:[%s4661_s1 + $0x128] sm:$0xff] %v3406_v34  }
 0x151   :  { %v3506_v44 = vpack.c.bf16 %v2814_v41, %v2807_v37  ;;  %v3511_v45 = vpack.c.bf16 %v2828_v43, %v2821_v42  ;;  %v2835_v46 = vld [vmem:[#allocation0 + $0x3b0] sm:$0xff]  ;;  %v2842_v47 = vld [vmem:[#allocation0 + $0x3b8] sm:$0xff]  ;;  %v2849_v48 = vld [vmem:[#allocation0 + $0x3c0] sm:$0xff]  ;;  %3582 = vst [vmem:[%s4661_s1 + $0x130] sm:$0xff] %v3411_v38  }
 0x152   :  { %3583 = vst [vmem:[%s4661_s1 + $0x138] sm:$0xff] %v3416_v39   ;;  %3600 = vst [vmem:[%s4661_s1 + $0x1c0] sm:$0xff] %v3501_v40   ;;  %v3516_v49 = vpack.c.bf16 %v2842_v47, %v2835_v46  ;;  %v2856_v50 = vld [vmem:[#allocation0 + $0x3c8] sm:$0xff]  ;;  %v2863_v51 = vld [vmem:[#allocation0 + $0x3d0] sm:$0xff] }
 0x153   :  { %v2870_v52 = vld [vmem:[#allocation0 + $0x3d8] sm:$0xff]  ;;  %3601 = vst [vmem:[%s4661_s1 + $0x1c8] sm:$0xff] %v3506_v44   ;;  %3602 = vst [vmem:[%s4661_s1 + $0x1d0] sm:$0xff] %v3511_v45   ;;  %v3521_v53 = vpack.c.bf16 %v2856_v50, %v2849_v48  ;;  %v2877_v55 = vld [vmem:[#allocation0 + $0x3e0] sm:$0xff] }
 0x154   :  { %v3526_v54 = vpack.c.bf16 %v2870_v52, %v2863_v51  ;;  %v2884_v56 = vld [vmem:[#allocation0 + $0x3e8] sm:$0xff]  ;;  %v2891_v57 = vld [vmem:[#allocation0 + $0x3f0] sm:$0xff]  ;;  %3603 = vst [vmem:[%s4661_s1 + $0x1d8] sm:$0xff] %v3516_v49   ;;  %v2898_v59 = vld [vmem:[#allocation0 + $0x3f8] sm:$0xff] }
 0x155   :  { %v3531_v58 = vpack.c.bf16 %v2884_v56, %v2877_v55  ;;  %v2681_v60 = vld [vmem:[#allocation0 + $0x300] sm:$0xff]  ;;  %v2688_v61 = vld [vmem:[#allocation0 + $0x308] sm:$0xff]  ;;  %3604 = vst [vmem:[%s4661_s1 + $0x1e0] sm:$0xff] %v3521_v53   ;;  %v3536_v62 = vpack.c.bf16 %v2898_v59, %v2891_v57  ;;  %v2695_v0 = vld [vmem:[#allocation0 + $0x310] sm:$0xff] }
 0x156   :  { %3605 = vst [vmem:[%s4661_s1 + $0x1e8] sm:$0xff] %v3526_v54   ;;  %v3461_v63 = vpack.c.bf16 %v2688_v61, %v2681_v60  ;;  %v2702_v1 = vld [vmem:[#allocation0 + $0x318] sm:$0xff]  ;;  %v2709_v2 = vld [vmem:[#allocation0 + $0x320] sm:$0xff]  ;;  %v2716_v4 = vld [vmem:[#allocation0 + $0x328] sm:$0xff] }
 0x157   :  { %3606 = vst [vmem:[%s4661_s1 + $0x1f0] sm:$0xff] %v3531_v58   ;;  %v3466_v3 = vpack.c.bf16 %v2702_v1, %v2695_v0  ;;  %v2723_v5 = vld [vmem:[#allocation0 + $0x330] sm:$0xff]  ;;  %v2730_v6 = vld [vmem:[#allocation0 + $0x338] sm:$0xff]  ;;  %3607 = vst [vmem:[%s4661_s1 + $0x1f8] sm:$0xff] %v3536_v62   ;;  %v3471_v7 = vpack.c.bf16 %v2716_v4, %v2709_v2 }
 0x158   :  { %3592 = vst [vmem:[%s4661_s1 + $0x180] sm:$0xff] %v3461_v63   ;;  %v3476_v8 = vpack.c.bf16 %v2730_v6, %v2723_v5  ;;  %v2737_v9 = vld [vmem:[#allocation0 + $0x340] sm:$0xff]  ;;  %v2744_v10 = vld [vmem:[#allocation0 + $0x348] sm:$0xff]  ;;  %v2751_v11 = vld [vmem:[#allocation0 + $0x350] sm:$0xff] }
 0x159   :  { %3593 = vst [vmem:[%s4661_s1 + $0x188] sm:$0xff] %v3466_v3   ;;  %v3481_v12 = vpack.c.bf16 %v2744_v10, %v2737_v9  ;;  %v2758_v13 = vld [vmem:[#allocation0 + $0x358] sm:$0xff]  ;;  %v2765_v14 = vld [vmem:[#allocation0 + $0x360] sm:$0xff]  ;;  %v2772_v15 = vld [vmem:[#allocation0 + $0x368] sm:$0xff] }
 0x15a   :  { %3594 = vst [vmem:[%s4661_s1 + $0x190] sm:$0xff] %v3471_v7   ;;  %3595 = vst [vmem:[%s4661_s1 + $0x198] sm:$0xff] %v3476_v8   ;;  %v3486_v16 = vpack.c.bf16 %v2758_v13, %v2751_v11  ;;  %v3491_v17 = vpack.c.bf16 %v2772_v15, %v2765_v14  ;;  %v2779_v18 = vld [vmem:[#allocation0 + $0x370] sm:$0xff]  ;;  %v2786_v19 = vld [vmem:[#allocation0 + $0x378] sm:$0xff] }
 0x15b   :  { %3596 = vst [vmem:[%s4661_s1 + $0x1a0] sm:$0xff] %v3481_v12   ;;  %v3496_v20 = vpack.c.bf16 %v2786_v19, %v2779_v18 }
 0x15c   :  { %3597 = vst [vmem:[%s4661_s1 + $0x1a8] sm:$0xff] %v3486_v16   ;;  %3598 = vst [vmem:[%s4661_s1 + $0x1b0] sm:$0xff] %v3491_v17  }
 0x15d   :  { %3599 = vst [vmem:[%s4661_s1 + $0x1b8] sm:$0xff] %v3496_v20  }

// kernel: generator_forward.16
= control target key start
LH: loop header
LB: loop body
LE: loop exit
PB: predicated region body
PF: predicated region fallthrough
CT: control target
= control target key end

     0   :  { %v716_v0 = vmov 0   ;;  %vm138_vm0 = vcmask 130048   ;;  %s920_s3 = inlined_call_operand.vmem [shape: f32[16,1], index: 3, kind: input, shape index: {}]   ;;  %s921_s2 = inlined_call_operand.vmem [shape: f32[16,1], index: 2, kind: input, shape index: {}]   ;;  %s922_s0 = inlined_call_operand.vmem [shape: bf16[128,16], index: 0, kind: input, shape index: {}]   ;;  %s923_s1 = inlined_call_operand.vmem [shape: bf16[16,512], index: 1, kind: input, shape index: {}]   ;;  %s924_s4 = inlined_call_operand.vmem [shape: bf16[128,512], index: 4, kind: output, shape index: {}]  }
   0x1   :  { %707 = vset.pattern.permute.xlu1 %v716_v0  ;;  %706 = vset.pattern.permute.xlu0 %v716_v0  ;;  %v50_v1 = vld [vmem:[%s920_s3] sm:$0xff]  ;;  %v51_v3 = vld [vmem:[%s920_s3 + $0x8] sm:$0xff]  ;;  %v20_v9 = vld [vmem:[%s923_s1 + $0x10] sm:$0xff] }
   0x2   :  { %v30_v2 = vld [vmem:[%s921_s2] sm:$0xff]  ;;  %54 = vperm.xlu1 %707, %v50_v1   ;;  %v31_v4 = vld [vmem:[%s921_s2 + $0x8] sm:$0xff]  ;;  %195 = vmatprep.mubr.bf16.mxu0 %v716_v0  ;;  %v21_v10 = vld [vmem:[%s923_s1 + $0x18] sm:$0xff]  ;;  %v26_v15 = vunpack.c.l.bf16 %v20_v9  ;;  %v27_v16 = vunpack.c.h.bf16 %v20_v9 }
   0x3   :  { %34 = vperm.xlu0 %706, %v30_v2   ;;  %308 = vmatprep.mubr.bf16.mxu1 %v716_v0  ;;  %v18_v5 = vld [vmem:[%s923_s1] sm:$0xff]  ;;  %v19_v6 = vld [vmem:[%s923_s1 + $0x8] sm:$0xff]  ;;  %v28_v17 = vunpack.c.l.bf16 %v21_v10  ;;  %v29_v18 = vunpack.c.h.bf16 %v21_v10  ;;  %v710_v51 = vld [vmem:[%s922_s0 + $0x10] sm:$0xff]  }
   0x4   :  { %v22_v7 = vunpack.c.l.bf16 %v18_v5  ;;  %v24_v8 = vunpack.c.l.bf16 %v19_v6  ;;  %v23_v11 = vunpack.c.h.bf16 %v18_v5  ;;  %v25_v12 = vunpack.c.h.bf16 %v19_v6  ;;  %v708_v49 = vld [vmem:[%s922_s0] sm:$0xff]   ;;  %v709_v50 = vld [vmem:[%s922_s0 + $0x8] sm:$0xff]   ;;  %v711_v52 = vld [vmem:[%s922_s0 + $0x18] sm:$0xff]  }
   0x5   :  { %v712_v53 = vld [vmem:[%s922_s0 + $0x20] sm:$0xff]   ;;  %v713_v54 = vld [vmem:[%s922_s0 + $0x28] sm:$0xff]   ;;  %v714_v55 = vld [vmem:[%s922_s0 + $0x30] sm:$0xff]  }
   0x6   :  { %59 = vperm.xlu1 %707, %v51_v3   ;;  %v715_v56 = vld [vmem:[%s922_s0 + $0x38] sm:$0xff]  }
   0x7   :  { %39 = vperm.xlu0 %706, %v31_v4  }
  0x81   :  { %v55_v13 = vpop.permute.xlu1 %54 }
  0x82   :  { %v35_v14 = vpop.permute.xlu0 %34 }
  0x83   :  { %v42_v19 = vmul.f32 %v35_v14, %v22_v7  ;;  %v44_v20 = vmul.f32 %v35_v14, %v24_v8  ;;  %v43_v21 = vmul.f32 %v35_v14, %v23_v11  ;;  %v45_v22 = vmul.f32 %v35_v14, %v25_v12 }
  0x85   :  { %v63_v24 = vadd.f32 %v55_v13, %v43_v21  ;;  %v65_v25 = vadd.f32 %v55_v13, %v45_v22  ;;  %v62_v26 = vadd.f32 %v55_v13, %v42_v19  ;;  %v64_v27 = vadd.f32 %v55_v13, %v44_v20  ;;  %v60_v32 = vpop.permute.xlu1 %59 }
  0x86   :  { %v40_v23 = vpop.permute.xlu0 %39 }
  0x87   :  { %v46_v28 = vmul.f32 %v40_v23, %v26_v15  ;;  %v47_v29 = vmul.f32 %v40_v23, %v27_v16  ;;  %v48_v30 = vmul.f32 %v40_v23, %v28_v17  ;;  %v49_v31 = vmul.f32 %v40_v23, %v29_v18 }
  0x88   :  { %v71_v37 = vmax.f32 %v63_v24, 0.0  ;;  %v73_v38 = vmax.f32 %v65_v25, 0.0  ;;  %v70_v39 = vmax.f32 %v62_v26, 0.0  ;;  %v72_v40 = vmax.f32 %v64_v27, 0.0 }
  0x89   :  { %v67_v33 = vadd.f32 %v60_v32, %v47_v29  ;;  %v69_v34 = vadd.f32 %v60_v32, %v49_v31  ;;  %v66_v35 = vadd.f32 %v60_v32, %v46_v28  ;;  %v68_v36 = vadd.f32 %v60_v32, %v48_v30 }
  0x8b   :  { %v75_v41 = vmax.f32 %v67_v33, 0.0  ;;  %v77_v42 = vmax.f32 %v69_v34, 0.0  ;;  %v74_v43 = vmax.f32 %v66_v35, 0.0  ;;  %v76_v44 = vmax.f32 %v68_v36, 0.0 }
  0x8d   :  { %v79_v45 = vpack.c.bf16 %v75_v41, %v71_v37  ;;  %v81_v46 = vpack.c.bf16 %v77_v42, %v73_v38  ;;  %v78_v47 = vpack.c.bf16 %v74_v43, %v70_v39  ;;  %v80_v48 = vpack.c.bf16 %v76_v44, %v72_v40 }
  0x8f   :  { %163 = vmatprep.subr.bf16.mxu0 %v79_v45  ;;  %276 = vmatprep.subr.bf16.mxu1 %v81_v46 }
  0x90   :  { %164 = vmatpush1.bf16.msra.mxu0 %v78_v47  ;;  %277 = vmatpush1.bf16.msra.mxu1 %v80_v48 }
  0x93   :  { %625 = vmatmul.mubr.msk.bf16.vlgmr.msra.gmra.mrb[0].mxu0 %vm138_vm0, %v708_v49  ;;  %633 = vmatmul.mubr.msk.bf16.vlgmr.msra.gmra.mrb[0].mxu1 %vm138_vm0, %v708_v49 }
  0x94   :  { %205 = vmatprep.mubr.bf16.mxu0 %v716_v0  ;;  %318 = vmatprep.mubr.bf16.mxu1 %v716_v0 }
  0x9b   :  { %626 = vmatmul.mubr.msk.bf16.gmra.mrb[4].mxu0 %vm138_vm0, %v709_v50  ;;  %634 = vmatmul.mubr.msk.bf16.gmra.mrb[4].mxu1 %vm138_vm0, %v709_v50 }
  0x9c   :  { %215 = vmatprep.mubr.bf16.mxu0 %v716_v0  ;;  %328 = vmatprep.mubr.bf16.mxu1 %v716_v0 }
  0xa3   :  { %627 = vmatmul.mubr.msk.bf16.gmra.mrb[8].mxu0 %vm138_vm0, %v710_v51  ;;  %635 = vmatmul.mubr.msk.bf16.gmra.mrb[8].mxu1 %vm138_vm0, %v710_v51 }
  0xa4   :  { %225 = vmatprep.mubr.bf16.mxu0 %v716_v0  ;;  %338 = vmatprep.mubr.bf16.mxu1 %v716_v0 }
  0xab   :  { %628 = vmatmul.mubr.msk.bf16.gmra.mrb[12].mxu0 %vm138_vm0, %v711_v52  ;;  %636 = vmatmul.mubr.msk.bf16.gmra.mrb[12].mxu1 %vm138_vm0, %v711_v52 }
  0xac   :  { %235 = vmatprep.mubr.bf16.mxu0 %v716_v0  ;;  %348 = vmatprep.mubr.bf16.mxu1 %v716_v0 }
  0xb3   :  { %629 = vmatmul.mubr.msk.bf16.gmra.mrb[16].mxu0 %vm138_vm0, %v712_v53  ;;  %637 = vmatmul.mubr.msk.bf16.gmra.mrb[16].mxu1 %vm138_vm0, %v712_v53 }
  0xb4   :  { %245 = vmatprep.mubr.bf16.mxu0 %v716_v0  ;;  %358 = vmatprep.mubr.bf16.mxu1 %v716_v0 }
  0xbb   :  { %630 = vmatmul.mubr.msk.bf16.gmra.mrb[20].mxu0 %vm138_vm0, %v713_v54  ;;  %638 = vmatmul.mubr.msk.bf16.gmra.mrb[20].mxu1 %vm138_vm0, %v713_v54 }
  0xbc   :  { %255 = vmatprep.mubr.bf16.mxu0 %v716_v0  ;;  %368 = vmatprep.mubr.bf16.mxu1 %v716_v0 }
  0xc3   :  { %631 = vmatmul.mubr.msk.bf16.gmra.mrb[24].mxu0 %vm138_vm0, %v714_v55  ;;  %639 = vmatmul.mubr.msk.bf16.gmra.mrb[24].mxu1 %vm138_vm0, %v714_v55 }
  0xc4   :  { %265 = vmatprep.mubr.bf16.mxu0 %v716_v0  ;;  %378 = vmatprep.mubr.bf16.mxu1 %v716_v0 }
  0xcb   :  { %632 = vmatmul.mubr.msk.bf16.gmra.mrb[28].mxu0 %vm138_vm0, %v715_v56  ;;  %640 = vmatmul.mubr.msk.bf16.gmra.mrb[28].mxu1 %vm138_vm0, %v715_v56 }
 0x166   :  { %v197_v57 = vpop.f32.mrb[0].mxu0  ;;  %v310_v58 = vpop.f32.mrb[0].mxu1 }
 0x167   :  { %v199_v59 = vpop.f32.mrb[1].mxu0  ;;  %v312_v60 = vpop.f32.mrb[1].mxu1 }
 0x168   :  { %v673_v61 = vpack.c.bf16 %v199_v59, %v197_v57  ;;  %v674_v62 = vpack.c.bf16 %v312_v60, %v310_v58  ;;  %v201_v63 = vpop.f32.mrb[2].mxu0  ;;  %v314_v1 = vpop.f32.mrb[2].mxu1 }
 0x169   :  { %v203_v2 = vpop.f32.mrb[3].mxu0  ;;  %v316_v3 = vpop.f32.mrb[3].mxu1 }
 0x16a   :  { %581 = vst [vmem:[%s924_s4] sm:$0xff] %v673_v61  ;;  %582 = vst [vmem:[%s924_s4 + $0x8] sm:$0xff] %v674_v62  ;;  %v675_v0 = vpack.c.bf16 %v203_v2, %v201_v63  ;;  %v676_v4 = vpack.c.bf16 %v316_v3, %v314_v1 }
 0x16c   :  { %583 = vst [vmem:[%s924_s4 + $0x10] sm:$0xff] %v675_v0  ;;  %584 = vst [vmem:[%s924_s4 + $0x18] sm:$0xff] %v676_v4 }
 0x16e   :  { %v207_v5 = vpop.f32.mrb[4].mxu0  ;;  %v320_v6 = vpop.f32.mrb[4].mxu1 }
 0x16f   :  { %v209_v7 = vpop.f32.mrb[5].mxu0  ;;  %v322_v8 = vpop.f32.mrb[5].mxu1 }
 0x170   :  { %v677_v9 = vpack.c.bf16 %v209_v7, %v207_v5  ;;  %v678_v10 = vpack.c.bf16 %v322_v8, %v320_v6  ;;  %v211_v11 = vpop.f32.mrb[6].mxu0  ;;  %v324_v12 = vpop.f32.mrb[6].mxu1 }
 0x171   :  { %v213_v13 = vpop.f32.mrb[7].mxu0  ;;  %v326_v14 = vpop.f32.mrb[7].mxu1 }
 0x172   :  { %585 = vst [vmem:[%s924_s4 + $0x20] sm:$0xff] %v677_v9  ;;  %586 = vst [vmem:[%s924_s4 + $0x28] sm:$0xff] %v678_v10  ;;  %v679_v15 = vpack.c.bf16 %v213_v13, %v211_v11  ;;  %v680_v16 = vpack.c.bf16 %v326_v14, %v324_v12 }
 0x174   :  { %587 = vst [vmem:[%s924_s4 + $0x30] sm:$0xff] %v679_v15  ;;  %588 = vst [vmem:[%s924_s4 + $0x38] sm:$0xff] %v680_v16 }
 0x176   :  { %v217_v17 = vpop.f32.mrb[8].mxu0  ;;  %v330_v18 = vpop.f32.mrb[8].mxu1 }
 0x177   :  { %v219_v19 = vpop.f32.mrb[9].mxu0  ;;  %v332_v20 = vpop.f32.mrb[9].mxu1 }
 0x178   :  { %v681_v21 = vpack.c.bf16 %v219_v19, %v217_v17  ;;  %v682_v22 = vpack.c.bf16 %v332_v20, %v330_v18  ;;  %v221_v23 = vpop.f32.mrb[10].mxu0  ;;  %v334_v24 = vpop.f32.mrb[10].mxu1 }
 0x179   :  { %v223_v25 = vpop.f32.mrb[11].mxu0  ;;  %v336_v26 = vpop.f32.mrb[11].mxu1 }
 0x17a   :  { %589 = vst [vmem:[%s924_s4 + $0x40] sm:$0xff] %v681_v21  ;;  %590 = vst [vmem:[%s924_s4 + $0x48] sm:$0xff] %v682_v22  ;;  %v683_v27 = vpack.c.bf16 %v223_v25, %v221_v23  ;;  %v684_v28 = vpack.c.bf16 %v336_v26, %v334_v24 }
 0x17c   :  { %591 = vst [vmem:[%s924_s4 + $0x50] sm:$0xff] %v683_v27  ;;  %592 = vst [vmem:[%s924_s4 + $0x58] sm:$0xff] %v684_v28 }
 0x17e   :  { %v227_v29 = vpop.f32.mrb[12].mxu0  ;;  %v340_v30 = vpop.f32.mrb[12].mxu1 }
 0x17f   :  { %v229_v31 = vpop.f32.mrb[13].mxu0  ;;  %v342_v32 = vpop.f32.mrb[13].mxu1 }
 0x180   :  { %v685_v33 = vpack.c.bf16 %v229_v31, %v227_v29  ;;  %v686_v34 = vpack.c.bf16 %v342_v32, %v340_v30  ;;  %v231_v35 = vpop.f32.mrb[14].mxu0  ;;  %v344_v36 = vpop.f32.mrb[14].mxu1 }
 0x181   :  { %v233_v37 = vpop.f32.mrb[15].mxu0  ;;  %v346_v38 = vpop.f32.mrb[15].mxu1 }
 0x182   :  { %593 = vst [vmem:[%s924_s4 + $0x60] sm:$0xff] %v685_v33  ;;  %594 = vst [vmem:[%s924_s4 + $0x68] sm:$0xff] %v686_v34  ;;  %v687_v39 = vpack.c.bf16 %v233_v37, %v231_v35  ;;  %v688_v40 = vpack.c.bf16 %v346_v38, %v344_v36 }
 0x184   :  { %595 = vst [vmem:[%s924_s4 + $0x70] sm:$0xff] %v687_v39  ;;  %596 = vst [vmem:[%s924_s4 + $0x78] sm:$0xff] %v688_v40 }
 0x186   :  { %v237_v41 = vpop.f32.mrb[16].mxu0  ;;  %v350_v42 = vpop.f32.mrb[16].mxu1 }
 0x187   :  { %v239_v43 = vpop.f32.mrb[17].mxu0  ;;  %v352_v44 = vpop.f32.mrb[17].mxu1 }
 0x188   :  { %v689_v45 = vpack.c.bf16 %v239_v43, %v237_v41  ;;  %v690_v46 = vpack.c.bf16 %v352_v44, %v350_v42  ;;  %v241_v47 = vpop.f32.mrb[18].mxu0  ;;  %v354_v48 = vpop.f32.mrb[18].mxu1 }
 0x189   :  { %v243_v49 = vpop.f32.mrb[19].mxu0  ;;  %v356_v50 = vpop.f32.mrb[19].mxu1 }
 0x18a   :  { %597 = vst [vmem:[%s924_s4 + $0x80] sm:$0xff] %v689_v45  ;;  %598 = vst [vmem:[%s924_s4 + $0x88] sm:$0xff] %v690_v46  ;;  %v691_v51 = vpack.c.bf16 %v243_v49, %v241_v47  ;;  %v692_v52 = vpack.c.bf16 %v356_v50, %v354_v48 }
 0x18c   :  { %599 = vst [vmem:[%s924_s4 + $0x90] sm:$0xff] %v691_v51  ;;  %600 = vst [vmem:[%s924_s4 + $0x98] sm:$0xff] %v692_v52 }
 0x18e   :  { %v247_v53 = vpop.f32.mrb[20].mxu0  ;;  %v360_v54 = vpop.f32.mrb[20].mxu1 }
 0x18f   :  { %v249_v55 = vpop.f32.mrb[21].mxu0  ;;  %v362_v56 = vpop.f32.mrb[21].mxu1 }
 0x190   :  { %v693_v57 = vpack.c.bf16 %v249_v55, %v247_v53  ;;  %v694_v58 = vpack.c.bf16 %v362_v56, %v360_v54  ;;  %v251_v59 = vpop.f32.mrb[22].mxu0  ;;  %v364_v60 = vpop.f32.mrb[22].mxu1 }
 0x191   :  { %v253_v61 = vpop.f32.mrb[23].mxu0  ;;  %v366_v62 = vpop.f32.mrb[23].mxu1 }
 0x192   :  { %601 = vst [vmem:[%s924_s4 + $0xa0] sm:$0xff] %v693_v57  ;;  %602 = vst [vmem:[%s924_s4 + $0xa8] sm:$0xff] %v694_v58  ;;  %v695_v63 = vpack.c.bf16 %v253_v61, %v251_v59  ;;  %v696_v1 = vpack.c.bf16 %v366_v62, %v364_v60 }
 0x194   :  { %603 = vst [vmem:[%s924_s4 + $0xb0] sm:$0xff] %v695_v63  ;;  %604 = vst [vmem:[%s924_s4 + $0xb8] sm:$0xff] %v696_v1 }
 0x196   :  { %v257_v2 = vpop.f32.mrb[24].mxu0  ;;  %v370_v3 = vpop.f32.mrb[24].mxu1 }
 0x197   :  { %v259_v0 = vpop.f32.mrb[25].mxu0  ;;  %v372_v4 = vpop.f32.mrb[25].mxu1 }
 0x198   :  { %v697_v5 = vpack.c.bf16 %v259_v0, %v257_v2  ;;  %v698_v6 = vpack.c.bf16 %v372_v4, %v370_v3  ;;  %v261_v7 = vpop.f32.mrb[26].mxu0  ;;  %v374_v8 = vpop.f32.mrb[26].mxu1 }
 0x199   :  { %v263_v9 = vpop.f32.mrb[27].mxu0  ;;  %v376_v10 = vpop.f32.mrb[27].mxu1 }
 0x19a   :  { %605 = vst [vmem:[%s924_s4 + $0xc0] sm:$0xff] %v697_v5  ;;  %606 = vst [vmem:[%s924_s4 + $0xc8] sm:$0xff] %v698_v6  ;;  %v699_v11 = vpack.c.bf16 %v263_v9, %v261_v7  ;;  %v700_v12 = vpack.c.bf16 %v376_v10, %v374_v8 }
 0x19c   :  { %607 = vst [vmem:[%s924_s4 + $0xd0] sm:$0xff] %v699_v11  ;;  %608 = vst [vmem:[%s924_s4 + $0xd8] sm:$0xff] %v700_v12 }
 0x19e   :  { %v267_v13 = vpop.f32.mrb[28].mxu0  ;;  %v380_v14 = vpop.f32.mrb[28].mxu1 }
 0x19f   :  { %v269_v15 = vpop.f32.mrb[29].mxu0  ;;  %v382_v16 = vpop.f32.mrb[29].mxu1 }
 0x1a0   :  { %v701_v17 = vpack.c.bf16 %v269_v15, %v267_v13  ;;  %v702_v18 = vpack.c.bf16 %v382_v16, %v380_v14  ;;  %v271_v19 = vpop.f32.mrb[30].mxu0  ;;  %v384_v20 = vpop.f32.mrb[30].mxu1 }
 0x1a1   :  { %v273_v21 = vpop.f32.mrb[31].mxu0  ;;  %v386_v22 = vpop.f32.mrb[31].mxu1 }
 0x1a2   :  { %609 = vst [vmem:[%s924_s4 + $0xe0] sm:$0xff] %v701_v17  ;;  %610 = vst [vmem:[%s924_s4 + $0xe8] sm:$0xff] %v702_v18  ;;  %v703_v23 = vpack.c.bf16 %v273_v21, %v271_v19  ;;  %v704_v24 = vpack.c.bf16 %v386_v22, %v384_v20 }
 0x1a4   :  { %611 = vst [vmem:[%s924_s4 + $0xf0] sm:$0xff] %v703_v23  ;;  %612 = vst [vmem:[%s924_s4 + $0xf8] sm:$0xff] %v704_v24 }

// kernel: generator_forward.17
= control target key start
LH: loop header
LB: loop body
LE: loop exit
PB: predicated region body
PF: predicated region fallthrough
CT: control target
= control target key end

     0   :  { %s239_s9 = smov 0   ;;  %s271_s0 = inlined_call_operand.vmem [shape: bf16[8,2048], index: 0, kind: input, shape index: {}]   ;;  %s272_s1 = inlined_call_operand.vmem [shape: f32[8,1], index: 1, kind: output, shape index: {0}]   ;;  %s273_s2 = inlined_call_operand.vmem [shape: f32[8,1], index: 2, kind: output, shape index: {1}]  }
   0x1 LB: > { %s197_s10 = sadd.s32 4294967295, %s221_s9   ;;  %p200_p0 = scmp.ge.s32.totalorder %s221_s9, 1  ;;  %s221_s9 = sphi %s239_s9, %s13_s9  }
   0x2   : > { %p106_p1 = scmp.lt.s32.totalorder %s221_s9, 5 }
   0x4   : > { %p107_p2 = pnand %p200_p0, %p106_p1 }
   0x5   : > { %s201_s11 = sshll.u32 (!%p107_p2), %s197_s10, 2  ;;  %p203_p4 = scmp.ne.s32.totalorder (!%p107_p2), %s197_s10, 0 }
   0x6   : > { %110 = sbr.rel (%p107_p2) target bundleno = 178 (0xb2), region = 24  ;;  %p124_p3 = scmp.lt.s32.totalorder (!%p107_p2), %s201_s11, 15 }
   0xd   : > { %s275_s11 = smov (!%p124_p3, %s201_s11), 15  ;;  %132 = sbr.rel (%p203_p4) target bundleno = 20 (0x14), region = 28 }
   0xe   : > { %s202_s12 = sshll.u32 %s275_s11, 2  ;;  %vm133_vm0 = vcmask (!%p203_p4), 7168   ;;  %v223_v0 = vmov (!%p203_p4), 0.0  }
   0xf   : > { %s127_s15 = scalar_lea.vmem %s271_s0, %s202_s12  ;;  %134 = vst.msk [vmem:[%s272_s1] sm:$0xff] (!%p203_p4), %vm133_vm0, %v223_v0  ;;  %135 = vst.msk [vmem:[%s273_s2] sm:$0xff] (!%p203_p4), %vm133_vm0, %v223_v0 }
  0x14 PF: > { %v136_v1 = vld [vmem:[%s127_s15] sm:$0xff]  ;;  %v137_v2 = vld [vmem:[%s127_s15 + $0x8] sm:$0xff]  ;;  %vm149_vm1 = vcmask 7168  }
  0x15   : > { %v138_v3 = vunpack.c.l.bf16 %v136_v1  ;;  %v139_v4 = vunpack.c.h.bf16 %v136_v1  ;;  %v140_v5 = vunpack.c.l.bf16 %v137_v2  ;;  %v141_v6 = vunpack.c.h.bf16 %v137_v2 }
  0x16   : > { %v142_v17 = vld [vmem:[%s272_s1] sm:$0xff] }
  0x17   : > { %v143_v7 = vadd.f32 %v139_v4, %v138_v3  ;;  %v152_v8 = vmul.f32 %v138_v3, %v138_v3  ;;  %v153_v9 = vmul.f32 %v139_v4, %v139_v4  ;;  %v154_v10 = vmul.f32 %v140_v5, %v140_v5  ;;  %v151_v20 = vld [vmem:[%s273_s2] sm:$0xff] }
  0x18   : > { %v155_v12 = vmul.f32 %v141_v6, %v141_v6 }
  0x19   : > { %v144_v11 = vadd.f32 %v143_v7, %v140_v5  ;;  %v156_v13 = vadd.f32 %v153_v9, %v152_v8 }
  0x1b   : > { %v145_v14 = vadd.f32 %v144_v11, %v141_v6  ;;  %v157_v15 = vadd.f32 %v156_v13, %v154_v10 }
  0x1d   : > { %146 = vadd.xlane.f32.xlu0 %v145_v14  ;;  %v158_v16 = vadd.f32 %v157_v15, %v155_v12 }
  0x21   : > { %159 = vadd.xlane.f32.xlu0 %v158_v16 }
  0xaa   : > { %v147_v18 = vpop.xlane.xlu0 %146 }
  0xab   : > { %v148_v19 = vadd.f32 %v147_v18, %v142_v17 }
  0xad   : > { %150 = vst.msk [vmem:[%s272_s1] sm:$0xff] %vm149_vm1, %v148_v19 }
  0xae   : > { %v160_v21 = vpop.xlane.xlu0 %159 }
  0xaf   : > { %v161_v22 = vadd.f32 %v160_v21, %v151_v20 }
  0xb1   : > { %162 = vst.msk [vmem:[%s273_s2] sm:$0xff] %vm149_vm1, %v161_v22 }
  0xb2 PF: > { %s13_s9 = sadd.s32 1, %s221_s9  }
  0xb3   : > { %p10_p5 = scmp.ge.s32.totalorder %s13_s9, 6  }
  0xb5   :  { %12 = sbr.rel (!%p10_p5) target bundleno = 1 (0x1), region = 62 }

// kernel: squeeze.87
= control target key start
LH: loop header
LB: loop body
LE: loop exit
PB: predicated region body
PF: predicated region fallthrough
CT: control target
= control target key end

     0   :  { %vm993_vm0 = vcmask 1047556   ;;  %vm514_vm1 = vcmask 261120   ;;  %s3249_s9 = smov 64   ;;  %s3250_s10 = smov 32   ;;  %s4007_s0 = inlined_call_operand.vmem [shape: bf16[12,2048], index: 0, kind: input, shape index: {}]   ;;  %s4008_s1 = inlined_call_operand.vmem [shape: bf16[4,3,2,32,32], index: 1, kind: output, shape index: {}]  }
   0x1   :  { %v3015_v0 = vld [vmem:[%s4007_s0 + $0x18] sm:$0xff]   ;;  %v3016_v1 = vld [vmem:[%s4007_s0 + $0x10] sm:$0xff]   ;;  %v3017_v2 = vld [vmem:[%s4007_s0 + $0x8] sm:$0xff]  }
   0x2   :  { %v3270_v3 = vunpack.c.l.bf16 %v3015_v0  ;;  %v3272_v4 = vunpack.c.h.bf16 %v3015_v0  ;;  %v3274_v5 = vunpack.c.l.bf16 %v3016_v1  ;;  %v3276_v6 = vunpack.c.h.bf16 %v3016_v1  ;;  %v2760_v7 = vld [vmem:[%s4007_s0] sm:$0xff]   ;;  %v3011_v8 = vld [vmem:[%s4007_s0 + $0x38] sm:$0xff]   ;;  %v3012_v9 = vld [vmem:[%s4007_s0 + $0x30] sm:$0xff]  }
   0x3   :  { %v3287_v10 = vunpack.c.l.bf16 %v3017_v2  ;;  %v3289_v11 = vunpack.c.h.bf16 %v3017_v2  ;;  %v3291_v12 = vunpack.c.l.bf16 %v2760_v7  ;;  %v3293_v13 = vunpack.c.h.bf16 %v2760_v7  ;;  %v3013_v14 = vld [vmem:[%s4007_s0 + $0x28] sm:$0xff]   ;;  %v3014_v15 = vld [vmem:[%s4007_s0 + $0x20] sm:$0xff]   ;;  %v3007_v16 = vld [vmem:[%s4007_s0 + $0x58] sm:$0xff]  }
   0x4   :  { %404 = vst [vmem:[#allocation1 + $0x38] sm:$0xff] %v3272_v4  ;;  %420 = vst [vmem:[#allocation1 + $0x30] sm:$0xff] %v3270_v3  ;;  %v3308_v17 = vunpack.c.l.bf16 %v3011_v8  ;;  %v3310_v18 = vunpack.c.h.bf16 %v3011_v8  ;;  %v3312_v19 = vunpack.c.l.bf16 %v3012_v9  ;;  %v3314_v20 = vunpack.c.h.bf16 %v3012_v9  ;;  %v3008_v21 = vld [vmem:[%s4007_s0 + $0x50] sm:$0xff]   ;;  %v3009_v22 = vld [vmem:[%s4007_s0 + $0x48] sm:$0xff]  }
   0x5   :  { %436 = vst [vmem:[#allocation1 + $0x28] sm:$0xff] %v3276_v6  ;;  %452 = vst [vmem:[#allocation1 + $0x20] sm:$0xff] %v3274_v5  ;;  %v3010_v23 = vld [vmem:[%s4007_s0 + $0x40] sm:$0xff]   ;;  %v3329_v24 = vunpack.c.l.bf16 %v3013_v14  ;;  %v3331_v25 = vunpack.c.h.bf16 %v3013_v14  ;;  %v3333_v26 = vunpack.c.l.bf16 %v3014_v15  ;;  %v3335_v27 = vunpack.c.h.bf16 %v3014_v15  ;;  %v3003_v28 = vld [vmem:[%s4007_s0 + $0x78] sm:$0xff]  }
   0x6   :  { %468 = vst [vmem:[#allocation1 + $0x18] sm:$0xff] %v3289_v11  ;;  %484 = vst [vmem:[#allocation1 + $0x10] sm:$0xff] %v3287_v10  ;;  %v3004_v29 = vld [vmem:[%s4007_s0 + $0x70] sm:$0xff]   ;;  %v2717_v30 = vunpack.c.l.bf16 %v3007_v16  ;;  %v2718_v31 = vunpack.c.h.bf16 %v3007_v16  ;;  %v2721_v32 = vunpack.c.l.bf16 %v3008_v21  ;;  %v2722_v33 = vunpack.c.h.bf16 %v3008_v21  ;;  %v3005_v34 = vld [vmem:[%s4007_s0 + $0x68] sm:$0xff]  }
   0x7   :  { %499 = vst [vmem:[#allocation1 + $0x8] sm:$0xff] %v3293_v13  ;;  %512 = vst [vmem:[#allocation1] sm:$0xff] %v3291_v12  ;;  %v3006_v35 = vld [vmem:[%s4007_s0 + $0x60] sm:$0xff]   ;;  %v2725_v36 = vunpack.c.l.bf16 %v3009_v22  ;;  %v2726_v37 = vunpack.c.h.bf16 %v3009_v22  ;;  %v2729_v38 = vunpack.c.l.bf16 %v3010_v23  ;;  %v2730_v39 = vunpack.c.h.bf16 %v3010_v23  ;;  %s3248_s0 = smov 96  }
   0x8   :  { %276 = vst [vmem:[#allocation1 + $0x78] sm:$0xff] %v3310_v18  ;;  %292 = vst [vmem:[#allocation1 + $0x70] sm:$0xff] %v3308_v17  ;;  %v2701_v40 = vunpack.c.l.bf16 %v3003_v28  ;;  %v2702_v41 = vunpack.c.h.bf16 %v3003_v28  ;;  %v2705_v42 = vunpack.c.l.bf16 %v3004_v29  ;;  %v2706_v43 = vunpack.c.h.bf16 %v3004_v29 }
   0x9   :  { %308 = vst [vmem:[#allocation1 + $0x68] sm:$0xff] %v3314_v20  ;;  %324 = vst [vmem:[#allocation1 + $0x60] sm:$0xff] %v3312_v19  ;;  %v2709_v44 = vunpack.c.l.bf16 %v3005_v34  ;;  %v2710_v45 = vunpack.c.h.bf16 %v3005_v34  ;;  %v2713_v46 = vunpack.c.l.bf16 %v3006_v35  ;;  %v2714_v47 = vunpack.c.h.bf16 %v3006_v35 }
   0xa   :  { %340 = vst [vmem:[#allocation1 + $0x58] sm:$0xff] %v3331_v25  ;;  %356 = vst [vmem:[#allocation1 + $0x50] sm:$0xff] %v3329_v24 }
   0xb   :  { %372 = vst [vmem:[#allocation1 + $0x48] sm:$0xff] %v3335_v27  ;;  %388 = vst [vmem:[#allocation1 + $0x40] sm:$0xff] %v3333_v26 }
   0xc   :  { %148 = vst [vmem:[#allocation1 + $0xb8] sm:$0xff] %v2718_v31  ;;  %164 = vst [vmem:[#allocation1 + $0xb0] sm:$0xff] %v2717_v30  ;;  %v3357_v48 = vld [vmem:[#allocation1 + $0x4] ss:$8 sm:$0xf0]  }
   0xd   :  { %180 = vst [vmem:[#allocation1 + $0xa8] sm:$0xff] %v2722_v33  ;;  %196 = vst [vmem:[#allocation1 + $0xa0] sm:$0xff] %v2721_v32  ;;  %v3359_v49 = vld [vmem:[#allocation1 + $0x5] ss:$8 sm:$0xf0]  }
   0xe   :  { %212 = vst [vmem:[#allocation1 + $0x98] sm:$0xff] %v2726_v37  ;;  %228 = vst [vmem:[#allocation1 + $0x90] sm:$0xff] %v2725_v36  ;;  %v1034_v50 = vld [vmem:[#allocation1 + $0x4] ss:$8 sm:$0xf]  }
   0xf   :  { %244 = vst [vmem:[#allocation1 + $0x88] sm:$0xff] %v2730_v39  ;;  %260 = vst [vmem:[#allocation1 + $0x80] sm:$0xff] %v2729_v38  ;;  %v1045_v51 = vld [vmem:[#allocation1 + $0x5] ss:$8 sm:$0xf]   ;;  %v1038_v52 = vsel %vm993_vm0, %v3357_v48, %v1034_v50 }
  0x10   :  { %20 = vst [vmem:[#allocation1 + $0xf8] sm:$0xff] %v2702_v41  ;;  %36 = vst [vmem:[#allocation1 + $0xf0] sm:$0xff] %v2701_v40  ;;  %v1049_v53 = vsel %vm993_vm0, %v3359_v49, %v1045_v51  ;;  %v991_v54 = vld [vmem:[#allocation1] ss:$8 sm:$0xf]  }
  0x11   :  { %52 = vst [vmem:[#allocation1 + $0xe8] sm:$0xff] %v2706_v43  ;;  %68 = vst [vmem:[#allocation1 + $0xe0] sm:$0xff] %v2705_v42  ;;  %v992_v55 = vld [vmem:[#allocation1] ss:$8 sm:$0xf0]   ;;  %v3078_v56 = vpack.i.bf16 %v1049_v53, %v1038_v52 }
  0x12   :  { %84 = vst [vmem:[#allocation1 + $0xd8] sm:$0xff] %v2710_v45  ;;  %100 = vst [vmem:[#allocation1 + $0xd0] sm:$0xff] %v2709_v44  ;;  %v994_v57 = vsel %vm993_vm0, %v992_v55, %v991_v54  ;;  %v1001_v58 = vld [vmem:[#allocation1 + $0x1] ss:$8 sm:$0xf]  }
  0x13   :  { %116 = vst [vmem:[#allocation1 + $0xc8] sm:$0xff] %v2714_v47  ;;  %132 = vst [vmem:[#allocation1 + $0xc0] sm:$0xff] %v2713_v46  ;;  %v1003_v59 = vld [vmem:[#allocation1 + $0x1] ss:$8 sm:$0xf0]   ;;  %3079 = vrot.lane.b32.xlu1 %v3078_v56, %s3248_s0 }
  0x14   :  { %515 = vst.msk [vmem:[#allocation0] sm:$0x1] %vm514_vm1, %v3291_v12   ;;  %517 = vst.msk [vmem:[#allocation0 + $0x3f] sm:$0x2] %vm514_vm1, %v3291_v12   ;;  %v1005_v60 = vsel %vm993_vm0, %v1003_v59, %v1001_v58 }
  0x15   :  { %534 = vst.msk [vmem:[#allocation0 + $0x4] sm:$0x1] %vm514_vm1, %v3293_v13   ;;  %536 = vst.msk [vmem:[#allocation0 + $0x43] sm:$0x2] %vm514_vm1, %v3293_v13   ;;  %v3068_v63 = vpack.i.bf16 %v1005_v60, %v994_v57 }
  0x16   :  { %553 = vst.msk [vmem:[#allocation0 + $0x8] sm:$0x1] %vm514_vm1, %v3287_v10   ;;  %555 = vst.msk [vmem:[#allocation0 + $0x47] sm:$0x2] %vm514_vm1, %v3287_v10  }
  0x17   :  { %572 = vst.msk [vmem:[#allocation0 + $0xc] sm:$0x1] %vm514_vm1, %v3289_v11   ;;  %574 = vst.msk [vmem:[#allocation0 + $0x4b] sm:$0x2] %vm514_vm1, %v3289_v11   ;;  %3069 = vrot.lane.b32.xlu0 %v3068_v63, %s3248_s0 }
  0x18   :  { %591 = vst.msk [vmem:[#allocation0 + $0x10] sm:$0x1] %vm514_vm1, %v3274_v5   ;;  %593 = vst.msk [vmem:[#allocation0 + $0x4f] sm:$0x2] %vm514_vm1, %v3274_v5  }
  0x19   :  { %610 = vst.msk [vmem:[#allocation0 + $0x14] sm:$0x1] %vm514_vm1, %v3276_v6   ;;  %612 = vst.msk [vmem:[#allocation0 + $0x53] sm:$0x2] %vm514_vm1, %v3276_v6  }
  0x1a   :  { %648 = vst.msk [vmem:[#allocation0 + $0x1c] sm:$0x1] %vm514_vm1, %v3272_v4   ;;  %650 = vst.msk [vmem:[#allocation0 + $0x5b] sm:$0x2] %vm514_vm1, %v3272_v4  }
  0x1b   :  { %629 = vst.msk [vmem:[#allocation0 + $0x18] sm:$0x1] %vm514_vm1, %v3270_v3   ;;  %631 = vst.msk [vmem:[#allocation0 + $0x57] sm:$0x2] %vm514_vm1, %v3270_v3  }
  0x1c   :  { %519 = vst.msk [vmem:[#allocation0 + $0x7e] sm:$0x4] %vm514_vm1, %v3291_v12   ;;  %521 = vst.msk [vmem:[#allocation0 + $0xbd] sm:$0x8] %vm514_vm1, %v3291_v12  }
  0x1d   :  { %523 = vst.msk [vmem:[#allocation0 + $0xfc] sm:$0x10] %vm514_vm1, %v3291_v12   ;;  %525 = vst.msk [vmem:[#allocation0 + $0x13b] sm:$0x20] %vm514_vm1, %v3291_v12  }
  0x1e   :  { %527 = vst.msk [vmem:[#allocation0 + $0x17a] sm:$0x40] %vm514_vm1, %v3291_v12   ;;  %529 = vst.msk [vmem:[#allocation0 + $0x1b9] sm:$0x80] %vm514_vm1, %v3291_v12  }
  0x1f   :  { %538 = vst.msk [vmem:[#allocation0 + $0x82] sm:$0x4] %vm514_vm1, %v3293_v13   ;;  %540 = vst.msk [vmem:[#allocation0 + $0xc1] sm:$0x8] %vm514_vm1, %v3293_v13  }
  0x20   :  { %542 = vst.msk [vmem:[#allocation0 + $0x100] sm:$0x10] %vm514_vm1, %v3293_v13   ;;  %544 = vst.msk [vmem:[#allocation0 + $0x13f] sm:$0x20] %vm514_vm1, %v3293_v13  }
  0x21   :  { %546 = vst.msk [vmem:[#allocation0 + $0x17e] sm:$0x40] %vm514_vm1, %v3293_v13   ;;  %548 = vst.msk [vmem:[#allocation0 + $0x1bd] sm:$0x80] %vm514_vm1, %v3293_v13  }
  0x22   :  { %557 = vst.msk [vmem:[#allocation0 + $0x86] sm:$0x4] %vm514_vm1, %v3287_v10   ;;  %559 = vst.msk [vmem:[#allocation0 + $0xc5] sm:$0x8] %vm514_vm1, %v3287_v10  }
  0x23   :  { %561 = vst.msk [vmem:[#allocation0 + $0x104] sm:$0x10] %vm514_vm1, %v3287_v10   ;;  %563 = vst.msk [vmem:[#allocation0 + $0x143] sm:$0x20] %vm514_vm1, %v3287_v10  }
  0x24   :  { %565 = vst.msk [vmem:[#allocation0 + $0x182] sm:$0x40] %vm514_vm1, %v3287_v10   ;;  %567 = vst.msk [vmem:[#allocation0 + $0x1c1] sm:$0x80] %vm514_vm1, %v3287_v10  }
  0x25   :  { %576 = vst.msk [vmem:[#allocation0 + $0x8a] sm:$0x4] %vm514_vm1, %v3289_v11   ;;  %578 = vst.msk [vmem:[#allocation0 + $0xc9] sm:$0x8] %vm514_vm1, %v3289_v11  }
  0x26   :  { %580 = vst.msk [vmem:[#allocation0 + $0x108] sm:$0x10] %vm514_vm1, %v3289_v11   ;;  %582 = vst.msk [vmem:[#allocation0 + $0x147] sm:$0x20] %vm514_vm1, %v3289_v11  }
  0x27   :  { %584 = vst.msk [vmem:[#allocation0 + $0x186] sm:$0x40] %vm514_vm1, %v3289_v11   ;;  %586 = vst.msk [vmem:[#allocation0 + $0x1c5] sm:$0x80] %vm514_vm1, %v3289_v11  }
  0x28   :  { %595 = vst.msk [vmem:[#allocation0 + $0x8e] sm:$0x4] %vm514_vm1, %v3274_v5   ;;  %597 = vst.msk [vmem:[#allocation0 + $0xcd] sm:$0x8] %vm514_vm1, %v3274_v5  }
  0x29   :  { %599 = vst.msk [vmem:[#allocation0 + $0x10c] sm:$0x10] %vm514_vm1, %v3274_v5   ;;  %601 = vst.msk [vmem:[#allocation0 + $0x14b] sm:$0x20] %vm514_vm1, %v3274_v5  }
  0x2a   :  { %603 = vst.msk [vmem:[#allocation0 + $0x18a] sm:$0x40] %vm514_vm1, %v3274_v5   ;;  %605 = vst.msk [vmem:[#allocation0 + $0x1c9] sm:$0x80] %vm514_vm1, %v3274_v5  }
  0x2b   :  { %614 = vst.msk [vmem:[#allocation0 + $0x92] sm:$0x4] %vm514_vm1, %v3276_v6   ;;  %616 = vst.msk [vmem:[#allocation0 + $0xd1] sm:$0x8] %vm514_vm1, %v3276_v6  }
  0x2c   :  { %618 = vst.msk [vmem:[#allocation0 + $0x110] sm:$0x10] %vm514_vm1, %v3276_v6   ;;  %620 = vst.msk [vmem:[#allocation0 + $0x14f] sm:$0x20] %vm514_vm1, %v3276_v6  }
  0x2d   :  { %622 = vst.msk [vmem:[#allocation0 + $0x18e] sm:$0x40] %vm514_vm1, %v3276_v6   ;;  %624 = vst.msk [vmem:[#allocation0 + $0x1cd] sm:$0x80] %vm514_vm1, %v3276_v6  }
  0x2e   :  { %633 = vst.msk [vmem:[#allocation0 + $0x96] sm:$0x4] %vm514_vm1, %v3270_v3   ;;  %635 = vst.msk [vmem:[#allocation0 + $0xd5] sm:$0x8] %vm514_vm1, %v3270_v3  }
  0x2f   :  { %637 = vst.msk [vmem:[#allocation0 + $0x114] sm:$0x10] %vm514_vm1, %v3270_v3   ;;  %639 = vst.msk [vmem:[#allocation0 + $0x153] sm:$0x20] %vm514_vm1, %v3270_v3  }
  0x30   :  { %641 = vst.msk [vmem:[#allocation0 + $0x192] sm:$0x40] %vm514_vm1, %v3270_v3   ;;  %643 = vst.msk [vmem:[#allocation0 + $0x1d1] sm:$0x80] %vm514_vm1, %v3270_v3  }
  0x31   :  { %652 = vst.msk [vmem:[#allocation0 + $0x9a] sm:$0x4] %vm514_vm1, %v3272_v4   ;;  %654 = vst.msk [vmem:[#allocation0 + $0xd9] sm:$0x8] %vm514_vm1, %v3272_v4  }
  0x32   :  { %656 = vst.msk [vmem:[#allocation0 + $0x118] sm:$0x10] %vm514_vm1, %v3272_v4   ;;  %658 = vst.msk [vmem:[#allocation0 + $0x157] sm:$0x20] %vm514_vm1, %v3272_v4  }
  0x33   :  { %660 = vst.msk [vmem:[#allocation0 + $0x196] sm:$0x40] %vm514_vm1, %v3272_v4   ;;  %662 = vst.msk [vmem:[#allocation0 + $0x1d5] sm:$0x80] %vm514_vm1, %v3272_v4  }
  0x34   :  { %677 = vst.msk [vmem:[#allocation0 + $0x15b] sm:$0x20] %vm514_vm1, %v3333_v26   ;;  %696 = vst.msk [vmem:[#allocation0 + $0x15f] sm:$0x20] %vm514_vm1, %v3335_v27  }
  0x35   :  { %715 = vst.msk [vmem:[#allocation0 + $0x163] sm:$0x20] %vm514_vm1, %v3329_v24   ;;  %734 = vst.msk [vmem:[#allocation0 + $0x167] sm:$0x20] %vm514_vm1, %v3331_v25  }
  0x36   :  { %753 = vst.msk [vmem:[#allocation0 + $0x16b] sm:$0x20] %vm514_vm1, %v3312_v19   ;;  %772 = vst.msk [vmem:[#allocation0 + $0x16f] sm:$0x20] %vm514_vm1, %v3314_v20  }
  0x37   :  { %810 = vst.msk [vmem:[#allocation0 + $0x177] sm:$0x20] %vm514_vm1, %v3310_v18   ;;  %791 = vst.msk [vmem:[#allocation0 + $0x173] sm:$0x20] %vm514_vm1, %v3308_v17  }
  0x38   :  { %667 = vst.msk [vmem:[#allocation0 + $0x20] sm:$0x1] %vm514_vm1, %v3333_v26   ;;  %669 = vst.msk [vmem:[#allocation0 + $0x5f] sm:$0x2] %vm514_vm1, %v3333_v26  }
  0x39   :  { %671 = vst.msk [vmem:[#allocation0 + $0x9e] sm:$0x4] %vm514_vm1, %v3333_v26   ;;  %673 = vst.msk [vmem:[#allocation0 + $0xdd] sm:$0x8] %vm514_vm1, %v3333_v26  }
  0x3a   :  { %675 = vst.msk [vmem:[#allocation0 + $0x11c] sm:$0x10] %vm514_vm1, %v3333_v26   ;;  %679 = vst.msk [vmem:[#allocation0 + $0x19a] sm:$0x40] %vm514_vm1, %v3333_v26  }
  0x3b   :  { %681 = vst.msk [vmem:[#allocation0 + $0x1d9] sm:$0x80] %vm514_vm1, %v3333_v26   ;;  %686 = vst.msk [vmem:[#allocation0 + $0x24] sm:$0x1] %vm514_vm1, %v3335_v27  }
  0x3c   :  { %688 = vst.msk [vmem:[#allocation0 + $0x63] sm:$0x2] %vm514_vm1, %v3335_v27   ;;  %690 = vst.msk [vmem:[#allocation0 + $0xa2] sm:$0x4] %vm514_vm1, %v3335_v27  }
  0x3d   :  { %692 = vst.msk [vmem:[#allocation0 + $0xe1] sm:$0x8] %vm514_vm1, %v3335_v27   ;;  %694 = vst.msk [vmem:[#allocation0 + $0x120] sm:$0x10] %vm514_vm1, %v3335_v27  }
  0x3e   :  { %698 = vst.msk [vmem:[#allocation0 + $0x19e] sm:$0x40] %vm514_vm1, %v3335_v27   ;;  %700 = vst.msk [vmem:[#allocation0 + $0x1dd] sm:$0x80] %vm514_vm1, %v3335_v27  }
  0x3f   :  { %705 = vst.msk [vmem:[#allocation0 + $0x28] sm:$0x1] %vm514_vm1, %v3329_v24   ;;  %707 = vst.msk [vmem:[#allocation0 + $0x67] sm:$0x2] %vm514_vm1, %v3329_v24  }
  0x40   :  { %709 = vst.msk [vmem:[#allocation0 + $0xa6] sm:$0x4] %vm514_vm1, %v3329_v24   ;;  %711 = vst.msk [vmem:[#allocation0 + $0xe5] sm:$0x8] %vm514_vm1, %v3329_v24  }
  0x41   :  { %713 = vst.msk [vmem:[#allocation0 + $0x124] sm:$0x10] %vm514_vm1, %v3329_v24   ;;  %717 = vst.msk [vmem:[#allocation0 + $0x1a2] sm:$0x40] %vm514_vm1, %v3329_v24  }
  0x42   :  { %719 = vst.msk [vmem:[#allocation0 + $0x1e1] sm:$0x80] %vm514_vm1, %v3329_v24   ;;  %724 = vst.msk [vmem:[#allocation0 + $0x2c] sm:$0x1] %vm514_vm1, %v3331_v25  }
  0x43   :  { %726 = vst.msk [vmem:[#allocation0 + $0x6b] sm:$0x2] %vm514_vm1, %v3331_v25   ;;  %728 = vst.msk [vmem:[#allocation0 + $0xaa] sm:$0x4] %vm514_vm1, %v3331_v25  }
  0x44   :  { %730 = vst.msk [vmem:[#allocation0 + $0xe9] sm:$0x8] %vm514_vm1, %v3331_v25   ;;  %732 = vst.msk [vmem:[#allocation0 + $0x128] sm:$0x10] %vm514_vm1, %v3331_v25  }
  0x45   :  { %736 = vst.msk [vmem:[#allocation0 + $0x1a6] sm:$0x40] %vm514_vm1, %v3331_v25   ;;  %738 = vst.msk [vmem:[#allocation0 + $0x1e5] sm:$0x80] %vm514_vm1, %v3331_v25  }
  0x46   :  { %743 = vst.msk [vmem:[#allocation0 + $0x30] sm:$0x1] %vm514_vm1, %v3312_v19   ;;  %745 = vst.msk [vmem:[#allocation0 + $0x6f] sm:$0x2] %vm514_vm1, %v3312_v19  }
  0x47   :  { %747 = vst.msk [vmem:[#allocation0 + $0xae] sm:$0x4] %vm514_vm1, %v3312_v19   ;;  %749 = vst.msk [vmem:[#allocation0 + $0xed] sm:$0x8] %vm514_vm1, %v3312_v19  }
  0x48   :  { %751 = vst.msk [vmem:[#allocation0 + $0x12c] sm:$0x10] %vm514_vm1, %v3312_v19   ;;  %755 = vst.msk [vmem:[#allocation0 + $0x1aa] sm:$0x40] %vm514_vm1, %v3312_v19  }
  0x49   :  { %757 = vst.msk [vmem:[#allocation0 + $0x1e9] sm:$0x80] %vm514_vm1, %v3312_v19   ;;  %762 = vst.msk [vmem:[#allocation0 + $0x34] sm:$0x1] %vm514_vm1, %v3314_v20  }
  0x4a   :  { %764 = vst.msk [vmem:[#allocation0 + $0x73] sm:$0x2] %vm514_vm1, %v3314_v20   ;;  %766 = vst.msk [vmem:[#allocation0 + $0xb2] sm:$0x4] %vm514_vm1, %v3314_v20  }
  0x4b   :  { %768 = vst.msk [vmem:[#allocation0 + $0xf1] sm:$0x8] %vm514_vm1, %v3314_v20   ;;  %770 = vst.msk [vmem:[#allocation0 + $0x130] sm:$0x10] %vm514_vm1, %v3314_v20  }
  0x4c   :  { %774 = vst.msk [vmem:[#allocation0 + $0x1ae] sm:$0x40] %vm514_vm1, %v3314_v20   ;;  %776 = vst.msk [vmem:[#allocation0 + $0x1ed] sm:$0x80] %vm514_vm1, %v3314_v20  }
  0x4d   :  { %781 = vst.msk [vmem:[#allocation0 + $0x38] sm:$0x1] %vm514_vm1, %v3308_v17   ;;  %783 = vst.msk [vmem:[#allocation0 + $0x77] sm:$0x2] %vm514_vm1, %v3308_v17  }
  0x4e   :  { %785 = vst.msk [vmem:[#allocation0 + $0xb6] sm:$0x4] %vm514_vm1, %v3308_v17   ;;  %787 = vst.msk [vmem:[#allocation0 + $0xf5] sm:$0x8] %vm514_vm1, %v3308_v17  }
  0x4f   :  { %789 = vst.msk [vmem:[#allocation0 + $0x134] sm:$0x10] %vm514_vm1, %v3308_v17   ;;  %793 = vst.msk [vmem:[#allocation0 + $0x1b2] sm:$0x40] %vm514_vm1, %v3308_v17  }
  0x50   :  { %795 = vst.msk [vmem:[#allocation0 + $0x1f1] sm:$0x80] %vm514_vm1, %v3308_v17   ;;  %800 = vst.msk [vmem:[#allocation0 + $0x3c] sm:$0x1] %vm514_vm1, %v3310_v18  }
  0x51   :  { %802 = vst.msk [vmem:[#allocation0 + $0x7b] sm:$0x2] %vm514_vm1, %v3310_v18   ;;  %804 = vst.msk [vmem:[#allocation0 + $0xba] sm:$0x4] %vm514_vm1, %v3310_v18  }
  0x52   :  { %806 = vst.msk [vmem:[#allocation0 + $0xf9] sm:$0x8] %vm514_vm1, %v3310_v18   ;;  %808 = vst.msk [vmem:[#allocation0 + $0x138] sm:$0x10] %vm514_vm1, %v3310_v18  }
  0x53   :  { %812 = vst.msk [vmem:[#allocation0 + $0x1b6] sm:$0x40] %vm514_vm1, %v3310_v18   ;;  %814 = vst.msk [vmem:[#allocation0 + $0x1f5] sm:$0x80] %vm514_vm1, %v3310_v18  }
  0x54   :  { %v1056_v61 = vld [vmem:[#allocation1 + $0x6] ss:$8 sm:$0xf]   ;;  %v1067_v1 = vld [vmem:[#allocation1 + $0x7] ss:$8 sm:$0xf]  }
  0x55   :  { %v1058_v62 = vld [vmem:[#allocation1 + $0x6] ss:$8 sm:$0xf0]   ;;  %v1069_v2 = vld [vmem:[#allocation1 + $0x7] ss:$8 sm:$0xf0]  }
  0x56   :  { %v1060_v0 = vsel %vm993_vm0, %v1058_v62, %v1056_v61  ;;  %v1071_v3 = vsel %vm993_vm0, %v1069_v2, %v1067_v1  ;;  %v1012_v4 = vld [vmem:[#allocation1 + $0x2] ss:$8 sm:$0xf]   ;;  %v1023_v8 = vld [vmem:[#allocation1 + $0x3] ss:$8 sm:$0xf]  }
  0x57   :  { %v1014_v5 = vld [vmem:[#allocation1 + $0x2] ss:$8 sm:$0xf0]   ;;  %v3083_v6 = vpack.i.bf16 %v1071_v3, %v1060_v0  ;;  %v1025_v9 = vld [vmem:[#allocation1 + $0x3] ss:$8 sm:$0xf0]  }
  0x58   :  { %v1016_v7 = vsel %vm993_vm0, %v1014_v5, %v1012_v4  ;;  %v1027_v10 = vsel %vm993_vm0, %v1025_v9, %v1023_v8  ;;  %v1100_v11 = vld [vmem:[#allocation1 + $0x42] ss:$8 sm:$0xf]   ;;  %v1111_v15 = vld [vmem:[#allocation1 + $0x43] ss:$8 sm:$0xf]  }
  0x59   :  { %v1102_v12 = vld [vmem:[#allocation1 + $0x42] ss:$8 sm:$0xf0]   ;;  %3084 = vrot.lane.b32.xlu1 %v3083_v6, %s3248_s0  ;;  %v3073_v13 = vpack.i.bf16 %v1027_v10, %v1016_v7  ;;  %v1113_v16 = vld [vmem:[#allocation1 + $0x43] ss:$8 sm:$0xf0]  }
  0x5a   :  { %v1104_v14 = vsel %vm993_vm0, %v1102_v12, %v1100_v11  ;;  %v1115_v17 = vsel %vm993_vm0, %v1113_v16, %v1111_v15  ;;  %v1078_v18 = vld [vmem:[#allocation1 + $0x40] ss:$8 sm:$0xf]   ;;  %v1089_v22 = vld [vmem:[#allocation1 + $0x41] ss:$8 sm:$0xf]  }
  0x5b   :  { %v1080_v19 = vld [vmem:[#allocation1 + $0x40] ss:$8 sm:$0xf0]   ;;  %3074 = vrot.lane.b32.xlu0 %v3073_v13, %s3248_s0  ;;  %v3093_v20 = vpack.i.bf16 %v1115_v17, %v1104_v14  ;;  %v1091_v23 = vld [vmem:[#allocation1 + $0x41] ss:$8 sm:$0xf0]  }
  0x5c   :  { %v1082_v21 = vsel %vm993_vm0, %v1080_v19, %v1078_v18  ;;  %v1093_v24 = vsel %vm993_vm0, %v1091_v23, %v1089_v22  ;;  %v1144_v25 = vld [vmem:[#allocation1 + $0x46] ss:$8 sm:$0xf]   ;;  %v1155_v29 = vld [vmem:[#allocation1 + $0x47] ss:$8 sm:$0xf]  }
  0x5d   :  { %v1146_v26 = vld [vmem:[#allocation1 + $0x46] ss:$8 sm:$0xf0]   ;;  %3094 = vrot.lane.b32.xlu1 %v3093_v20, %s3248_s0  ;;  %v3088_v27 = vpack.i.bf16 %v1093_v24, %v1082_v21  ;;  %v1157_v30 = vld [vmem:[#allocation1 + $0x47] ss:$8 sm:$0xf0]  }
  0x5e   :  { %v1148_v28 = vsel %vm993_vm0, %v1146_v26, %v1144_v25  ;;  %v1159_v31 = vsel %vm993_vm0, %v1157_v30, %v1155_v29  ;;  %v1122_v32 = vld [vmem:[#allocation1 + $0x44] ss:$8 sm:$0xf]   ;;  %v1133_v36 = vld [vmem:[#allocation1 + $0x45] ss:$8 sm:$0xf]  }
  0x5f   :  { %v1124_v33 = vld [vmem:[#allocation1 + $0x44] ss:$8 sm:$0xf0]   ;;  %3089 = vrot.lane.b32.xlu0 %v3088_v27, %s3248_s0  ;;  %v3103_v34 = vpack.i.bf16 %v1159_v31, %v1148_v28  ;;  %v1135_v37 = vld [vmem:[#allocation1 + $0x45] ss:$8 sm:$0xf0]  }
  0x60   :  { %v1126_v35 = vsel %vm993_vm0, %v1124_v33, %v1122_v32  ;;  %v1137_v38 = vsel %vm993_vm0, %v1135_v37, %v1133_v36  ;;  %v1188_v39 = vld [vmem:[#allocation1 + $0x82] ss:$8 sm:$0xf]   ;;  %v1199_v43 = vld [vmem:[#allocation1 + $0x83] ss:$8 sm:$0xf]  }
  0x61   :  { %v1190_v40 = vld [vmem:[#allocation1 + $0x82] ss:$8 sm:$0xf0]   ;;  %3104 = vrot.lane.b32.xlu1 %v3103_v34, %s3248_s0  ;;  %v3098_v41 = vpack.i.bf16 %v1137_v38, %v1126_v35  ;;  %v1201_v44 = vld [vmem:[#allocation1 + $0x83] ss:$8 sm:$0xf0]  }
  0x62   :  { %v1192_v42 = vsel %vm993_vm0, %v1190_v40, %v1188_v39  ;;  %v1203_v45 = vsel %vm993_vm0, %v1201_v44, %v1199_v43  ;;  %v1166_v46 = vld [vmem:[#allocation1 + $0x80] ss:$8 sm:$0xf]   ;;  %v1177_v50 = vld [vmem:[#allocation1 + $0x81] ss:$8 sm:$0xf]  }
  0x63   :  { %v1168_v47 = vld [vmem:[#allocation1 + $0x80] ss:$8 sm:$0xf0]   ;;  %3099 = vrot.lane.b32.xlu0 %v3098_v41, %s3248_s0  ;;  %v3113_v48 = vpack.i.bf16 %v1203_v45, %v1192_v42  ;;  %v1179_v51 = vld [vmem:[#allocation1 + $0x81] ss:$8 sm:$0xf0]  }
  0x64   :  { %v1170_v49 = vsel %vm993_vm0, %v1168_v47, %v1166_v46  ;;  %v1181_v52 = vsel %vm993_vm0, %v1179_v51, %v1177_v50  ;;  %v1232_v53 = vld [vmem:[#allocation1 + $0xc2] ss:$8 sm:$0xf]   ;;  %v1243_v57 = vld [vmem:[#allocation1 + $0xc3] ss:$8 sm:$0xf]  }
  0x65   :  { %v1234_v54 = vld [vmem:[#allocation1 + $0xc2] ss:$8 sm:$0xf0]   ;;  %3114 = vrot.lane.b32.xlu1 %v3113_v48, %s3248_s0  ;;  %v3108_v55 = vpack.i.bf16 %v1181_v52, %v1170_v49  ;;  %v1245_v58 = vld [vmem:[#allocation1 + $0xc3] ss:$8 sm:$0xf0]  }
  0x66   :  { %v1236_v56 = vsel %vm993_vm0, %v1234_v54, %v1232_v53  ;;  %v1247_v59 = vsel %vm993_vm0, %v1245_v58, %v1243_v57  ;;  %v1210_v60 = vld [vmem:[#allocation1 + $0xc0] ss:$8 sm:$0xf]   ;;  %v1221_v0 = vld [vmem:[#allocation1 + $0xc1] ss:$8 sm:$0xf]  }
  0x67   :  { %v1212_v61 = vld [vmem:[#allocation1 + $0xc0] ss:$8 sm:$0xf0]   ;;  %3109 = vrot.lane.b32.xlu0 %v3108_v55, %s3248_s0  ;;  %v3123_v62 = vpack.i.bf16 %v1247_v59, %v1236_v56  ;;  %v1223_v1 = vld [vmem:[#allocation1 + $0xc1] ss:$8 sm:$0xf0]  }
  0x68   :  { %v1214_v63 = vsel %vm993_vm0, %v1212_v61, %v1210_v60  ;;  %v1225_v2 = vsel %vm993_vm0, %v1223_v1, %v1221_v0  ;;  %v1274_v3 = vld [vmem:[#allocation1 + $0x2] ss:$8 sm:$0xf]   ;;  %v1285_v7 = vld [vmem:[#allocation1 + $0x3] ss:$8 sm:$0xf]  }
  0x69   :  { %v1276_v4 = vld [vmem:[#allocation1 + $0x2] ss:$8 sm:$0xf0]   ;;  %3124 = vrot.lane.b32.xlu1 %v3123_v62, %s3248_s0  ;;  %v3118_v5 = vpack.i.bf16 %v1225_v2, %v1214_v63  ;;  %v1287_v8 = vld [vmem:[#allocation1 + $0x3] ss:$8 sm:$0xf0]  }
  0x6a   :  { %v1278_v6 = vsel %vm993_vm0, %v1276_v4, %v1274_v3  ;;  %v1289_v9 = vsel %vm993_vm0, %v1287_v8, %v1285_v7  ;;  %v1253_v10 = vld [vmem:[#allocation1] ss:$8 sm:$0xf]   ;;  %v1263_v14 = vld [vmem:[#allocation1 + $0x1] ss:$8 sm:$0xf]  }
  0x6b   :  { %v1254_v11 = vld [vmem:[#allocation1] ss:$8 sm:$0xf0]   ;;  %3119 = vrot.lane.b32.xlu0 %v3118_v5, %s3248_s0  ;;  %v3133_v12 = vpack.i.bf16 %v1289_v9, %v1278_v6  ;;  %v1265_v15 = vld [vmem:[#allocation1 + $0x1] ss:$8 sm:$0xf0]  }
  0x6c   :  { %v1256_v13 = vsel %vm993_vm0, %v1254_v11, %v1253_v10  ;;  %v1267_v16 = vsel %vm993_vm0, %v1265_v15, %v1263_v14  ;;  %v1318_v17 = vld [vmem:[#allocation1 + $0x6] ss:$8 sm:$0xf]   ;;  %v1329_v21 = vld [vmem:[#allocation1 + $0x7] ss:$8 sm:$0xf]  }
  0x6d   :  { %v1320_v18 = vld [vmem:[#allocation1 + $0x6] ss:$8 sm:$0xf0]   ;;  %3134 = vrot.lane.b32.xlu1 %v3133_v12, %s3249_s9  ;;  %v3128_v19 = vpack.i.bf16 %v1267_v16, %v1256_v13  ;;  %v1331_v22 = vld [vmem:[#allocation1 + $0x7] ss:$8 sm:$0xf0]  }
  0x6e   :  { %v1322_v20 = vsel %vm993_vm0, %v1320_v18, %v1318_v17  ;;  %v1333_v23 = vsel %vm993_vm0, %v1331_v22, %v1329_v21  ;;  %v1296_v24 = vld [vmem:[#allocation1 + $0x4] ss:$8 sm:$0xf]   ;;  %v1307_v28 = vld [vmem:[#allocation1 + $0x5] ss:$8 sm:$0xf]  }
  0x6f   :  { %v1298_v25 = vld [vmem:[#allocation1 + $0x4] ss:$8 sm:$0xf0]   ;;  %3129 = vrot.lane.b32.xlu0 %v3128_v19, %s3249_s9  ;;  %v3143_v26 = vpack.i.bf16 %v1333_v23, %v1322_v20  ;;  %v1309_v29 = vld [vmem:[#allocation1 + $0x5] ss:$8 sm:$0xf0]  }
  0x70   :  { %v1300_v27 = vsel %vm993_vm0, %v1298_v25, %v1296_v24  ;;  %v1311_v30 = vsel %vm993_vm0, %v1309_v29, %v1307_v28  ;;  %v1362_v31 = vld [vmem:[#allocation1 + $0x42] ss:$8 sm:$0xf]   ;;  %v1373_v35 = vld [vmem:[#allocation1 + $0x43] ss:$8 sm:$0xf]  }
  0x71   :  { %v1364_v32 = vld [vmem:[#allocation1 + $0x42] ss:$8 sm:$0xf0]   ;;  %3144 = vrot.lane.b32.xlu1 %v3143_v26, %s3249_s9  ;;  %v3138_v33 = vpack.i.bf16 %v1311_v30, %v1300_v27  ;;  %v1375_v36 = vld [vmem:[#allocation1 + $0x43] ss:$8 sm:$0xf0]  }
  0x72   :  { %v1366_v34 = vsel %vm993_vm0, %v1364_v32, %v1362_v31  ;;  %v1377_v37 = vsel %vm993_vm0, %v1375_v36, %v1373_v35  ;;  %v1340_v38 = vld [vmem:[#allocation1 + $0x40] ss:$8 sm:$0xf]   ;;  %v1351_v42 = vld [vmem:[#allocation1 + $0x41] ss:$8 sm:$0xf]  }
  0x73   :  { %v1342_v39 = vld [vmem:[#allocation1 + $0x40] ss:$8 sm:$0xf0]   ;;  %3139 = vrot.lane.b32.xlu0 %v3138_v33, %s3249_s9  ;;  %v3153_v40 = vpack.i.bf16 %v1377_v37, %v1366_v34  ;;  %v1353_v43 = vld [vmem:[#allocation1 + $0x41] ss:$8 sm:$0xf0]  }
  0x74   :  { %v1344_v41 = vsel %vm993_vm0, %v1342_v39, %v1340_v38  ;;  %v1355_v44 = vsel %vm993_vm0, %v1353_v43, %v1351_v42  ;;  %v1406_v45 = vld [vmem:[#allocation1 + $0x46] ss:$8 sm:$0xf]   ;;  %v1417_v49 = vld [vmem:[#allocation1 + $0x47] ss:$8 sm:$0xf]  }
  0x75   :  { %v1408_v46 = vld [vmem:[#allocation1 + $0x46] ss:$8 sm:$0xf0]   ;;  %3154 = vrot.lane.b32.xlu1 %v3153_v40, %s3249_s9  ;;  %v3148_v47 = vpack.i.bf16 %v1355_v44, %v1344_v41  ;;  %v1419_v50 = vld [vmem:[#allocation1 + $0x47] ss:$8 sm:$0xf0]  }
  0x76   :  { %v1410_v48 = vsel %vm993_vm0, %v1408_v46, %v1406_v45  ;;  %v1421_v51 = vsel %vm993_vm0, %v1419_v50, %v1417_v49  ;;  %v1384_v52 = vld [vmem:[#allocation1 + $0x44] ss:$8 sm:$0xf]   ;;  %v1395_v56 = vld [vmem:[#allocation1 + $0x45] ss:$8 sm:$0xf]  }
  0x77   :  { %v1386_v53 = vld [vmem:[#allocation1 + $0x44] ss:$8 sm:$0xf0]   ;;  %3149 = vrot.lane.b32.xlu0 %v3148_v47, %s3249_s9  ;;  %v3163_v54 = vpack.i.bf16 %v1421_v51, %v1410_v48  ;;  %v1397_v57 = vld [vmem:[#allocation1 + $0x45] ss:$8 sm:$0xf0]  }
  0x78   :  { %v1388_v55 = vsel %vm993_vm0, %v1386_v53, %v1384_v52  ;;  %v1399_v58 = vsel %vm993_vm0, %v1397_v57, %v1395_v56  ;;  %v1450_v59 = vld [vmem:[#allocation1 + $0x82] ss:$8 sm:$0xf]   ;;  %v1461_v63 = vld [vmem:[#allocation1 + $0x83] ss:$8 sm:$0xf]  }
  0x79   :  { %v1452_v60 = vld [vmem:[#allocation1 + $0x82] ss:$8 sm:$0xf0]   ;;  %3164 = vrot.lane.b32.xlu1 %v3163_v54, %s3249_s9  ;;  %v3158_v61 = vpack.i.bf16 %v1399_v58, %v1388_v55  ;;  %v1463_v0 = vld [vmem:[#allocation1 + $0x83] ss:$8 sm:$0xf0]  }
  0x7a   :  { %v1454_v62 = vsel %vm993_vm0, %v1452_v60, %v1450_v59  ;;  %v1465_v1 = vsel %vm993_vm0, %v1463_v0, %v1461_v63  ;;  %v1428_v2 = vld [vmem:[#allocation1 + $0x80] ss:$8 sm:$0xf]   ;;  %v1439_v6 = vld [vmem:[#allocation1 + $0x81] ss:$8 sm:$0xf]  }
  0x7b   :  { %v1430_v3 = vld [vmem:[#allocation1 + $0x80] ss:$8 sm:$0xf0]   ;;  %3159 = vrot.lane.b32.xlu0 %v3158_v61, %s3249_s9  ;;  %v3173_v4 = vpack.i.bf16 %v1465_v1, %v1454_v62  ;;  %v1441_v7 = vld [vmem:[#allocation1 + $0x81] ss:$8 sm:$0xf0]  }
  0x7c   :  { %v1432_v5 = vsel %vm993_vm0, %v1430_v3, %v1428_v2  ;;  %v1443_v8 = vsel %vm993_vm0, %v1441_v7, %v1439_v6  ;;  %v1494_v9 = vld [vmem:[#allocation1 + $0xc2] ss:$8 sm:$0xf]   ;;  %v1505_v13 = vld [vmem:[#allocation1 + $0xc3] ss:$8 sm:$0xf]  }
  0x7d   :  { %v1496_v10 = vld [vmem:[#allocation1 + $0xc2] ss:$8 sm:$0xf0]   ;;  %3174 = vrot.lane.b32.xlu1 %v3173_v4, %s3249_s9  ;;  %v3168_v11 = vpack.i.bf16 %v1443_v8, %v1432_v5  ;;  %v1507_v14 = vld [vmem:[#allocation1 + $0xc3] ss:$8 sm:$0xf0]  }
  0x7e   :  { %v1498_v12 = vsel %vm993_vm0, %v1496_v10, %v1494_v9  ;;  %v1509_v15 = vsel %vm993_vm0, %v1507_v14, %v1505_v13  ;;  %v1472_v16 = vld [vmem:[#allocation1 + $0xc0] ss:$8 sm:$0xf]   ;;  %v1483_v20 = vld [vmem:[#allocation1 + $0xc1] ss:$8 sm:$0xf]  }
  0x7f   :  { %v1474_v17 = vld [vmem:[#allocation1 + $0xc0] ss:$8 sm:$0xf0]   ;;  %3169 = vrot.lane.b32.xlu0 %v3168_v11, %s3249_s9  ;;  %v3183_v18 = vpack.i.bf16 %v1509_v15, %v1498_v12  ;;  %v1485_v21 = vld [vmem:[#allocation1 + $0xc1] ss:$8 sm:$0xf0]  }
  0x80   :  { %v1476_v19 = vsel %vm993_vm0, %v1474_v17, %v1472_v16  ;;  %v1487_v22 = vsel %vm993_vm0, %v1485_v21, %v1483_v20  ;;  %v1536_v23 = vld [vmem:[#allocation1 + $0x2] ss:$8 sm:$0xf]   ;;  %v1547_v27 = vld [vmem:[#allocation1 + $0x3] ss:$8 sm:$0xf]  }
  0x81   :  { %v1538_v24 = vld [vmem:[#allocation1 + $0x2] ss:$8 sm:$0xf0]   ;;  %3184 = vrot.lane.b32.xlu1 %v3183_v18, %s3249_s9  ;;  %v3178_v25 = vpack.i.bf16 %v1487_v22, %v1476_v19  ;;  %v1549_v28 = vld [vmem:[#allocation1 + $0x3] ss:$8 sm:$0xf0]  }
  0x82   :  { %v1540_v26 = vsel %vm993_vm0, %v1538_v24, %v1536_v23  ;;  %v1551_v29 = vsel %vm993_vm0, %v1549_v28, %v1547_v27  ;;  %v1515_v30 = vld [vmem:[#allocation1] ss:$8 sm:$0xf]   ;;  %v1525_v34 = vld [vmem:[#allocation1 + $0x1] ss:$8 sm:$0xf]  }
  0x83   :  { %v1516_v31 = vld [vmem:[#allocation1] ss:$8 sm:$0xf0]   ;;  %3179 = vrot.lane.b32.xlu0 %v3178_v25, %s3249_s9  ;;  %v3193_v32 = vpack.i.bf16 %v1551_v29, %v1540_v26  ;;  %v1527_v35 = vld [vmem:[#allocation1 + $0x1] ss:$8 sm:$0xf0]  }
  0x84   :  { %v1518_v33 = vsel %vm993_vm0, %v1516_v31, %v1515_v30  ;;  %v1529_v36 = vsel %vm993_vm0, %v1527_v35, %v1525_v34  ;;  %v1580_v37 = vld [vmem:[#allocation1 + $0x6] ss:$8 sm:$0xf]   ;;  %v1591_v41 = vld [vmem:[#allocation1 + $0x7] ss:$8 sm:$0xf]  }
  0x85   :  { %v1582_v38 = vld [vmem:[#allocation1 + $0x6] ss:$8 sm:$0xf0]   ;;  %3194 = vrot.lane.b32.xlu1 %v3193_v32, %s3250_s10  ;;  %v3188_v39 = vpack.i.bf16 %v1529_v36, %v1518_v33  ;;  %v1593_v42 = vld [vmem:[#allocation1 + $0x7] ss:$8 sm:$0xf0]  }
  0x86   :  { %v1584_v40 = vsel %vm993_vm0, %v1582_v38, %v1580_v37  ;;  %v1595_v43 = vsel %vm993_vm0, %v1593_v42, %v1591_v41  ;;  %v1558_v44 = vld [vmem:[#allocation1 + $0x4] ss:$8 sm:$0xf]   ;;  %v1569_v48 = vld [vmem:[#allocation1 + $0x5] ss:$8 sm:$0xf]  }
  0x87   :  { %v1560_v45 = vld [vmem:[#allocation1 + $0x4] ss:$8 sm:$0xf0]   ;;  %3189 = vrot.lane.b32.xlu0 %v3188_v39, %s3250_s10  ;;  %v3203_v46 = vpack.i.bf16 %v1595_v43, %v1584_v40  ;;  %v1571_v49 = vld [vmem:[#allocation1 + $0x5] ss:$8 sm:$0xf0]  }
  0x88   :  { %v1562_v47 = vsel %vm993_vm0, %v1560_v45, %v1558_v44  ;;  %v1573_v50 = vsel %vm993_vm0, %v1571_v49, %v1569_v48  ;;  %v1624_v51 = vld [vmem:[#allocation1 + $0x42] ss:$8 sm:$0xf]   ;;  %v1635_v55 = vld [vmem:[#allocation1 + $0x43] ss:$8 sm:$0xf]  }
  0x89   :  { %v1626_v52 = vld [vmem:[#allocation1 + $0x42] ss:$8 sm:$0xf0]   ;;  %3204 = vrot.lane.b32.xlu1 %v3203_v46, %s3250_s10  ;;  %v3198_v53 = vpack.i.bf16 %v1573_v50, %v1562_v47  ;;  %v1637_v56 = vld [vmem:[#allocation1 + $0x43] ss:$8 sm:$0xf0]  }
  0x8a   :  { %v1628_v54 = vsel %vm993_vm0, %v1626_v52, %v1624_v51  ;;  %v1639_v57 = vsel %vm993_vm0, %v1637_v56, %v1635_v55  ;;  %v1602_v58 = vld [vmem:[#allocation1 + $0x40] ss:$8 sm:$0xf]   ;;  %v1613_v62 = vld [vmem:[#allocation1 + $0x41] ss:$8 sm:$0xf]  }
  0x8b   :  { %v1604_v59 = vld [vmem:[#allocation1 + $0x40] ss:$8 sm:$0xf0]   ;;  %3199 = vrot.lane.b32.xlu0 %v3198_v53, %s3250_s10  ;;  %v3213_v60 = vpack.i.bf16 %v1639_v57, %v1628_v54  ;;  %v1615_v63 = vld [vmem:[#allocation1 + $0x41] ss:$8 sm:$0xf0]  }
  0x8c   :  { %v1606_v61 = vsel %vm993_vm0, %v1604_v59, %v1602_v58  ;;  %v1617_v0 = vsel %vm993_vm0, %v1615_v63, %v1613_v62  ;;  %v1668_v1 = vld [vmem:[#allocation1 + $0x46] ss:$8 sm:$0xf]   ;;  %v1679_v5 = vld [vmem:[#allocation1 + $0x47] ss:$8 sm:$0xf]   ;;  %v3070_v63 = vpop.permute.xlu0 %3069 }
  0x8d   :  { %v1670_v2 = vld [vmem:[#allocation1 + $0x46] ss:$8 sm:$0xf0]   ;;  %3214 = vrot.lane.b32.xlu1 %v3213_v60, %s3250_s10  ;;  %v3208_v3 = vpack.i.bf16 %v1617_v0, %v1606_v61  ;;  %v1681_v6 = vld [vmem:[#allocation1 + $0x47] ss:$8 sm:$0xf0]   ;;  %v3080_v60 = vpop.permute.xlu1 %3079  ;;  %v3072_v0 = vunpack.i.h.bf16 %v3070_v63 }
  0x8e   :  { %v1672_v4 = vsel %vm993_vm0, %v1670_v2, %v1668_v1  ;;  %v1683_v7 = vsel %vm993_vm0, %v1681_v6, %v1679_v5  ;;  %v1646_v8 = vld [vmem:[#allocation1 + $0x44] ss:$8 sm:$0xf]   ;;  %v1657_v12 = vld [vmem:[#allocation1 + $0x45] ss:$8 sm:$0xf]   ;;  %v3082_v61 = vunpack.i.h.bf16 %v3080_v60  ;;  %v3081_v62 = vunpack.i.l.bf16 %v3080_v60 }
  0x8f   :  { %v1648_v9 = vld [vmem:[#allocation1 + $0x44] ss:$8 sm:$0xf0]   ;;  %3209 = vrot.lane.b32.xlu0 %v3208_v3, %s3250_s10  ;;  %v3223_v10 = vpack.i.bf16 %v1683_v7, %v1672_v4  ;;  %v1659_v13 = vld [vmem:[#allocation1 + $0x45] ss:$8 sm:$0xf0]   ;;  %v3071_v1 = vunpack.i.l.bf16 %v3070_v63 }
  0x90   :  { %v1650_v11 = vsel %vm993_vm0, %v1648_v9, %v1646_v8  ;;  %v1661_v14 = vsel %vm993_vm0, %v1659_v13, %v1657_v12  ;;  %v1712_v15 = vld [vmem:[#allocation1 + $0x82] ss:$8 sm:$0xf]   ;;  %v1723_v19 = vld [vmem:[#allocation1 + $0x83] ss:$8 sm:$0xf]  }
  0x91   :  { %v1714_v16 = vld [vmem:[#allocation1 + $0x82] ss:$8 sm:$0xf0]   ;;  %3224 = vrot.lane.b32.xlu1 %v3223_v10, %s3250_s10  ;;  %v3218_v17 = vpack.i.bf16 %v1661_v14, %v1650_v11  ;;  %v1725_v20 = vld [vmem:[#allocation1 + $0x83] ss:$8 sm:$0xf0]  }
  0x92   :  { %v1716_v18 = vsel %vm993_vm0, %v1714_v16, %v1712_v15  ;;  %v1727_v21 = vsel %vm993_vm0, %v1725_v20, %v1723_v19  ;;  %v1690_v22 = vld [vmem:[#allocation1 + $0x80] ss:$8 sm:$0xf]   ;;  %v1701_v26 = vld [vmem:[#allocation1 + $0x81] ss:$8 sm:$0xf]  }
  0x93   :  { %v1692_v23 = vld [vmem:[#allocation1 + $0x80] ss:$8 sm:$0xf0]   ;;  %3219 = vrot.lane.b32.xlu0 %v3218_v17, %s3250_s10  ;;  %v3233_v24 = vpack.i.bf16 %v1727_v21, %v1716_v18  ;;  %v1703_v27 = vld [vmem:[#allocation1 + $0x81] ss:$8 sm:$0xf0]  }
  0x94   :  { %v1694_v25 = vsel %vm993_vm0, %v1692_v23, %v1690_v22  ;;  %v1705_v28 = vsel %vm993_vm0, %v1703_v27, %v1701_v26  ;;  %v1756_v29 = vld [vmem:[#allocation1 + $0xc2] ss:$8 sm:$0xf]   ;;  %v1767_v33 = vld [vmem:[#allocation1 + $0xc3] ss:$8 sm:$0xf]  }
  0x95   :  { %v1758_v30 = vld [vmem:[#allocation1 + $0xc2] ss:$8 sm:$0xf0]   ;;  %3234 = vrot.lane.b32.xlu1 %v3233_v24, %s3250_s10  ;;  %v3228_v31 = vpack.i.bf16 %v1705_v28, %v1694_v25  ;;  %v1769_v34 = vld [vmem:[#allocation1 + $0xc3] ss:$8 sm:$0xf0]  }
  0x96   :  { %v1760_v32 = vsel %vm993_vm0, %v1758_v30, %v1756_v29  ;;  %v1771_v35 = vsel %vm993_vm0, %v1769_v34, %v1767_v33  ;;  %v1734_v36 = vld [vmem:[#allocation1 + $0xc0] ss:$8 sm:$0xf]   ;;  %v1745_v40 = vld [vmem:[#allocation1 + $0xc1] ss:$8 sm:$0xf]  }
  0x97   :  { %v1736_v37 = vld [vmem:[#allocation1 + $0xc0] ss:$8 sm:$0xf0]   ;;  %3229 = vrot.lane.b32.xlu0 %v3228_v31, %s3250_s10  ;;  %v3243_v38 = vpack.i.bf16 %v1771_v35, %v1760_v32  ;;  %v1747_v41 = vld [vmem:[#allocation1 + $0xc1] ss:$8 sm:$0xf0]  }
  0x98   :  { %v1738_v39 = vsel %vm993_vm0, %v1736_v37, %v1734_v36  ;;  %v1749_v42 = vsel %vm993_vm0, %v1747_v41, %v1745_v40  ;;  %v816_v43 = vld [vmem:[#allocation1 + $0x80] sm:$0xf]   ;;  %v827_v44 = vld [vmem:[#allocation1 + $0x88] sm:$0xf]   ;;  %v838_v45 = vld [vmem:[#allocation1 + $0x90] sm:$0xf]  }
  0x99   :  { %3244 = vrot.lane.b32.xlu1 %v3243_v38, %s3250_s10  ;;  %v3238_v46 = vpack.i.bf16 %v1749_v42, %v1738_v39  ;;  %819 = vst.msk [vmem:[#allocation0 + $0x200] sm:$0x1] %vm514_vm1, %v816_v43   ;;  %830 = vst.msk [vmem:[#allocation0 + $0x204] sm:$0x1] %vm514_vm1, %v827_v44   ;;  %v849_v47 = vld [vmem:[#allocation1 + $0x98] sm:$0xf]  }
  0x9a   :  { %841 = vst.msk [vmem:[#allocation0 + $0x208] sm:$0x1] %vm514_vm1, %v838_v45   ;;  %v860_v48 = vld [vmem:[#allocation1 + $0xa0] sm:$0xf]   ;;  %v871_v49 = vld [vmem:[#allocation1 + $0xa8] sm:$0xf]  }
  0x9b   :  { %821 = vst.msk [vmem:[#allocation0 + $0x23f] sm:$0x2] %vm514_vm1, %v816_v43   ;;  %823 = vst.msk [vmem:[#allocation0 + $0x27e] sm:$0x4] %vm514_vm1, %v816_v43   ;;  %v893_v50 = vld [vmem:[#allocation1 + $0xb8] sm:$0xf]   ;;  %3239 = vrot.lane.b32.xlu0 %v3238_v46, %s3250_s10 }
  0x9c   :  { %825 = vst.msk [vmem:[#allocation0 + $0x2bd] sm:$0x8] %vm514_vm1, %v816_v43   ;;  %832 = vst.msk [vmem:[#allocation0 + $0x243] sm:$0x2] %vm514_vm1, %v827_v44   ;;  %v882_v51 = vld [vmem:[#allocation1 + $0xb0] sm:$0xf]  }
  0x9d   :  { %834 = vst.msk [vmem:[#allocation0 + $0x282] sm:$0x4] %vm514_vm1, %v827_v44   ;;  %836 = vst.msk [vmem:[#allocation0 + $0x2c1] sm:$0x8] %vm514_vm1, %v827_v44   ;;  %v904_v52 = vld [vmem:[#allocation1 + $0xc0] sm:$0xf]  }
  0x9e   :  { %843 = vst.msk [vmem:[#allocation0 + $0x247] sm:$0x2] %vm514_vm1, %v838_v45   ;;  %845 = vst.msk [vmem:[#allocation0 + $0x286] sm:$0x4] %vm514_vm1, %v838_v45   ;;  %v915_v53 = vld [vmem:[#allocation1 + $0xc8] sm:$0xf]  }
  0x9f   :  { %847 = vst.msk [vmem:[#allocation0 + $0x2c5] sm:$0x8] %vm514_vm1, %v838_v45   ;;  %852 = vst.msk [vmem:[#allocation0 + $0x20c] sm:$0x1] %vm514_vm1, %v849_v47   ;;  %v926_v54 = vld [vmem:[#allocation1 + $0xd0] sm:$0xf]  }
  0xa0   :  { %863 = vst.msk [vmem:[#allocation0 + $0x210] sm:$0x1] %vm514_vm1, %v860_v48   ;;  %874 = vst.msk [vmem:[#allocation0 + $0x214] sm:$0x1] %vm514_vm1, %v871_v49   ;;  %v937_v55 = vld [vmem:[#allocation1 + $0xd8] sm:$0xf]  }
  0xa1   :  { %854 = vst.msk [vmem:[#allocation0 + $0x24b] sm:$0x2] %vm514_vm1, %v849_v47   ;;  %856 = vst.msk [vmem:[#allocation0 + $0x28a] sm:$0x4] %vm514_vm1, %v849_v47   ;;  %v948_v56 = vld [vmem:[#allocation1 + $0xe0] sm:$0xf]  }
  0xa2   :  { %858 = vst.msk [vmem:[#allocation0 + $0x2c9] sm:$0x8] %vm514_vm1, %v849_v47   ;;  %865 = vst.msk [vmem:[#allocation0 + $0x24f] sm:$0x2] %vm514_vm1, %v860_v48   ;;  %v959_v57 = vld [vmem:[#allocation1 + $0xe8] sm:$0xf]  }
  0xa3   :  { %867 = vst.msk [vmem:[#allocation0 + $0x28e] sm:$0x4] %vm514_vm1, %v860_v48   ;;  %869 = vst.msk [vmem:[#allocation0 + $0x2cd] sm:$0x8] %vm514_vm1, %v860_v48   ;;  %v981_v58 = vld [vmem:[#allocation1 + $0xf8] sm:$0xf]  }
  0xa4   :  { %876 = vst.msk [vmem:[#allocation0 + $0x253] sm:$0x2] %vm514_vm1, %v871_v49   ;;  %878 = vst.msk [vmem:[#allocation0 + $0x292] sm:$0x4] %vm514_vm1, %v871_v49   ;;  %v970_v59 = vld [vmem:[#allocation1 + $0xf0] sm:$0xf]  }
  0xa5   :  { %880 = vst.msk [vmem:[#allocation0 + $0x2d1] sm:$0x8] %vm514_vm1, %v871_v49   ;;  %896 = vst.msk [vmem:[#allocation0 + $0x21c] sm:$0x1] %vm514_vm1, %v893_v50  }
  0xa6   :  { %885 = vst.msk [vmem:[#allocation0 + $0x218] sm:$0x1] %vm514_vm1, %v882_v51   ;;  %887 = vst.msk [vmem:[#allocation0 + $0x257] sm:$0x2] %vm514_vm1, %v882_v51  }
  0xa7   :  { %889 = vst.msk [vmem:[#allocation0 + $0x296] sm:$0x4] %vm514_vm1, %v882_v51   ;;  %891 = vst.msk [vmem:[#allocation0 + $0x2d5] sm:$0x8] %vm514_vm1, %v882_v51  }
  0xa8   :  { %898 = vst.msk [vmem:[#allocation0 + $0x25b] sm:$0x2] %vm514_vm1, %v893_v50   ;;  %900 = vst.msk [vmem:[#allocation0 + $0x29a] sm:$0x4] %vm514_vm1, %v893_v50  }
  0xa9   :  { %902 = vst.msk [vmem:[#allocation0 + $0x2d9] sm:$0x8] %vm514_vm1, %v893_v50   ;;  %911 = vst.msk [vmem:[#allocation0 + $0x29e] sm:$0x4] %vm514_vm1, %v904_v52  }
  0xaa   :  { %913 = vst.msk [vmem:[#allocation0 + $0x2dd] sm:$0x8] %vm514_vm1, %v904_v52   ;;  %907 = vst.msk [vmem:[#allocation0 + $0x220] sm:$0x1] %vm514_vm1, %v904_v52  }
  0xab   :  { %909 = vst.msk [vmem:[#allocation0 + $0x25f] sm:$0x2] %vm514_vm1, %v904_v52   ;;  %922 = vst.msk [vmem:[#allocation0 + $0x2a2] sm:$0x4] %vm514_vm1, %v915_v53  }
  0xac   :  { %924 = vst.msk [vmem:[#allocation0 + $0x2e1] sm:$0x8] %vm514_vm1, %v915_v53   ;;  %933 = vst.msk [vmem:[#allocation0 + $0x2a6] sm:$0x4] %vm514_vm1, %v926_v54  }
  0xad   :  { %935 = vst.msk [vmem:[#allocation0 + $0x2e5] sm:$0x8] %vm514_vm1, %v926_v54   ;;  %944 = vst.msk [vmem:[#allocation0 + $0x2aa] sm:$0x4] %vm514_vm1, %v937_v55  }
  0xae   :  { %946 = vst.msk [vmem:[#allocation0 + $0x2e9] sm:$0x8] %vm514_vm1, %v937_v55   ;;  %918 = vst.msk [vmem:[#allocation0 + $0x224] sm:$0x1] %vm514_vm1, %v915_v53  }
  0xaf   :  { %920 = vst.msk [vmem:[#allocation0 + $0x263] sm:$0x2] %vm514_vm1, %v915_v53   ;;  %929 = vst.msk [vmem:[#allocation0 + $0x228] sm:$0x1] %vm514_vm1, %v926_v54  }
  0xb0   :  { %931 = vst.msk [vmem:[#allocation0 + $0x267] sm:$0x2] %vm514_vm1, %v926_v54   ;;  %940 = vst.msk [vmem:[#allocation0 + $0x22c] sm:$0x1] %vm514_vm1, %v937_v55  }
  0xb1   :  { %942 = vst.msk [vmem:[#allocation0 + $0x26b] sm:$0x2] %vm514_vm1, %v937_v55   ;;  %955 = vst.msk [vmem:[#allocation0 + $0x2ae] sm:$0x4] %vm514_vm1, %v948_v56  }
  0xb2   :  { %957 = vst.msk [vmem:[#allocation0 + $0x2ed] sm:$0x8] %vm514_vm1, %v948_v56   ;;  %966 = vst.msk [vmem:[#allocation0 + $0x2b2] sm:$0x4] %vm514_vm1, %v959_v57  }
  0xb3   :  { %968 = vst.msk [vmem:[#allocation0 + $0x2f1] sm:$0x8] %vm514_vm1, %v959_v57   ;;  %988 = vst.msk [vmem:[#allocation0 + $0x2ba] sm:$0x4] %vm514_vm1, %v981_v58  }
  0xb4   :  { %990 = vst.msk [vmem:[#allocation0 + $0x2f9] sm:$0x8] %vm514_vm1, %v981_v58   ;;  %951 = vst.msk [vmem:[#allocation0 + $0x230] sm:$0x1] %vm514_vm1, %v948_v56  }
  0xb5   :  { %953 = vst.msk [vmem:[#allocation0 + $0x26f] sm:$0x2] %vm514_vm1, %v948_v56   ;;  %962 = vst.msk [vmem:[#allocation0 + $0x234] sm:$0x1] %vm514_vm1, %v959_v57  }
  0xb6   :  { %964 = vst.msk [vmem:[#allocation0 + $0x273] sm:$0x2] %vm514_vm1, %v959_v57   ;;  %984 = vst.msk [vmem:[#allocation0 + $0x23c] sm:$0x1] %vm514_vm1, %v981_v58  }
  0xb7   :  { %986 = vst.msk [vmem:[#allocation0 + $0x27b] sm:$0x2] %vm514_vm1, %v981_v58   ;;  %977 = vst.msk [vmem:[#allocation0 + $0x2b6] sm:$0x4] %vm514_vm1, %v970_v59  }
  0xb8   :  { %979 = vst.msk [vmem:[#allocation0 + $0x2f5] sm:$0x8] %vm514_vm1, %v970_v59   ;;  %973 = vst.msk [vmem:[#allocation0 + $0x238] sm:$0x1] %vm514_vm1, %v970_v59  }
  0xb9   :  { %975 = vst.msk [vmem:[#allocation0 + $0x277] sm:$0x2] %vm514_vm1, %v970_v59   ;;  %1054 = vst.msk [vmem:[#allocation0 + $0x141] ss:$4 sm:$0xff] %vm514_vm1, %v3082_v61  }
  0xba   :  { %1043 = vst.msk [vmem:[#allocation0 + $0x101] ss:$4 sm:$0xff] %vm514_vm1, %v3081_v62   ;;  %1010 = vst.msk [vmem:[#allocation0 + $0x41] ss:$4 sm:$0xff] %vm514_vm1, %v3072_v0  }
  0xbb   :  { %999 = vst.msk [vmem:[#allocation0 + $0x1] ss:$4 sm:$0xff] %vm514_vm1, %v3071_v1  }
  0xcb   :  { %v3085_v2 = vpop.permute.xlu1 %3084 }
  0xcc   :  { %v3087_v3 = vunpack.i.h.bf16 %v3085_v2  ;;  %v3086_v4 = vunpack.i.l.bf16 %v3085_v2 }
  0xcd   :  { %v3075_v5 = vpop.permute.xlu0 %3074 }
  0xce   :  { %1076 = vst.msk [vmem:[#allocation0 + $0x1c1] ss:$4 sm:$0xff] %vm514_vm1, %v3087_v3   ;;  %1065 = vst.msk [vmem:[#allocation0 + $0x181] ss:$4 sm:$0xff] %vm514_vm1, %v3086_v4   ;;  %v3077_v6 = vunpack.i.h.bf16 %v3075_v5  ;;  %v3076_v7 = vunpack.i.l.bf16 %v3075_v5 }
  0xcf   :  { %v3095_v8 = vpop.permute.xlu1 %3094 }
  0xd0   :  { %1032 = vst.msk [vmem:[#allocation0 + $0xc1] ss:$4 sm:$0xff] %vm514_vm1, %v3077_v6   ;;  %1021 = vst.msk [vmem:[#allocation0 + $0x81] ss:$4 sm:$0xff] %vm514_vm1, %v3076_v7   ;;  %v3097_v9 = vunpack.i.h.bf16 %v3095_v8  ;;  %v3096_v10 = vunpack.i.l.bf16 %v3095_v8 }
  0xd1   :  { %v3090_v11 = vpop.permute.xlu0 %3089 }
  0xd2   :  { %1120 = vst.msk [vmem:[#allocation0 + $0xe1] ss:$4 sm:$0xff] %vm514_vm1, %v3097_v9   ;;  %1109 = vst.msk [vmem:[#allocation0 + $0xa1] ss:$4 sm:$0xff] %vm514_vm1, %v3096_v10   ;;  %v3092_v12 = vunpack.i.h.bf16 %v3090_v11  ;;  %v3091_v13 = vunpack.i.l.bf16 %v3090_v11 }
  0xd3   :  { %v3105_v14 = vpop.permute.xlu1 %3104 }
  0xd4   :  { %1098 = vst.msk [vmem:[#allocation0 + $0x61] ss:$4 sm:$0xff] %vm514_vm1, %v3092_v12   ;;  %1087 = vst.msk [vmem:[#allocation0 + $0x21] ss:$4 sm:$0xff] %vm514_vm1, %v3091_v13   ;;  %v3107_v15 = vunpack.i.h.bf16 %v3105_v14  ;;  %v3106_v16 = vunpack.i.l.bf16 %v3105_v14 }
  0xd5   :  { %v3100_v17 = vpop.permute.xlu0 %3099 }
  0xd6   :  { %1164 = vst.msk [vmem:[#allocation0 + $0x1e1] ss:$4 sm:$0xff] %vm514_vm1, %v3107_v15   ;;  %1153 = vst.msk [vmem:[#allocation0 + $0x1a1] ss:$4 sm:$0xff] %vm514_vm1, %v3106_v16   ;;  %v3102_v18 = vunpack.i.h.bf16 %v3100_v17  ;;  %v3101_v19 = vunpack.i.l.bf16 %v3100_v17 }
  0xd7   :  { %v3115_v20 = vpop.permute.xlu1 %3114 }
  0xd8   :  { %1142 = vst.msk [vmem:[#allocation0 + $0x161] ss:$4 sm:$0xff] %vm514_vm1, %v3102_v18   ;;  %1131 = vst.msk [vmem:[#allocation0 + $0x121] ss:$4 sm:$0xff] %vm514_vm1, %v3101_v19   ;;  %v3117_v21 = vunpack.i.h.bf16 %v3115_v20  ;;  %v3116_v22 = vunpack.i.l.bf16 %v3115_v20 }
  0xd9   :  { %v3110_v23 = vpop.permute.xlu0 %3109 }
  0xda   :  { %1208 = vst.msk [vmem:[#allocation0 + $0x2c1] ss:$4 sm:$0xff] %vm514_vm1, %v3117_v21   ;;  %1197 = vst.msk [vmem:[#allocation0 + $0x281] ss:$4 sm:$0xff] %vm514_vm1, %v3116_v22   ;;  %v3112_v24 = vunpack.i.h.bf16 %v3110_v23  ;;  %v3111_v25 = vunpack.i.l.bf16 %v3110_v23 }
  0xdb   :  { %v3125_v26 = vpop.permute.xlu1 %3124 }
  0xdc   :  { %1186 = vst.msk [vmem:[#allocation0 + $0x241] ss:$4 sm:$0xff] %vm514_vm1, %v3112_v24   ;;  %1175 = vst.msk [vmem:[#allocation0 + $0x201] ss:$4 sm:$0xff] %vm514_vm1, %v3111_v25   ;;  %v3127_v27 = vunpack.i.h.bf16 %v3125_v26  ;;  %v3126_v28 = vunpack.i.l.bf16 %v3125_v26 }
  0xdd   :  { %v3120_v29 = vpop.permute.xlu0 %3119 }
  0xde   :  { %1252 = vst.msk [vmem:[#allocation0 + $0x2e1] ss:$4 sm:$0xff] %vm514_vm1, %v3127_v27   ;;  %1241 = vst.msk [vmem:[#allocation0 + $0x2a1] ss:$4 sm:$0xff] %vm514_vm1, %v3126_v28   ;;  %v3122_v30 = vunpack.i.h.bf16 %v3120_v29  ;;  %v3121_v31 = vunpack.i.l.bf16 %v3120_v29 }
  0xdf   :  { %v3135_v32 = vpop.permute.xlu1 %3134 }
  0xe0   :  { %1230 = vst.msk [vmem:[#allocation0 + $0x261] ss:$4 sm:$0xff] %vm514_vm1, %v3122_v30   ;;  %1219 = vst.msk [vmem:[#allocation0 + $0x221] ss:$4 sm:$0xff] %vm514_vm1, %v3121_v31   ;;  %v3137_v33 = vunpack.i.h.bf16 %v3135_v32  ;;  %v3136_v34 = vunpack.i.l.bf16 %v3135_v32 }
  0xe1   :  { %v3130_v35 = vpop.permute.xlu0 %3129 }
  0xe2   :  { %1294 = vst.msk [vmem:[#allocation0 + $0xc2] ss:$4 sm:$0xff] %vm514_vm1, %v3137_v33   ;;  %1283 = vst.msk [vmem:[#allocation0 + $0x82] ss:$4 sm:$0xff] %vm514_vm1, %v3136_v34   ;;  %v3132_v36 = vunpack.i.h.bf16 %v3130_v35  ;;  %v3131_v37 = vunpack.i.l.bf16 %v3130_v35 }
  0xe3   :  { %v3145_v38 = vpop.permute.xlu1 %3144 }
  0xe4   :  { %1272 = vst.msk [vmem:[#allocation0 + $0x42] ss:$4 sm:$0xff] %vm514_vm1, %v3132_v36   ;;  %1261 = vst.msk [vmem:[#allocation0 + $0x2] ss:$4 sm:$0xff] %vm514_vm1, %v3131_v37   ;;  %v3147_v39 = vunpack.i.h.bf16 %v3145_v38  ;;  %v3146_v40 = vunpack.i.l.bf16 %v3145_v38 }
  0xe5   :  { %v3140_v41 = vpop.permute.xlu0 %3139 }
  0xe6   :  { %1338 = vst.msk [vmem:[#allocation0 + $0x1c2] ss:$4 sm:$0xff] %vm514_vm1, %v3147_v39   ;;  %1327 = vst.msk [vmem:[#allocation0 + $0x182] ss:$4 sm:$0xff] %vm514_vm1, %v3146_v40   ;;  %v3142_v42 = vunpack.i.h.bf16 %v3140_v41  ;;  %v3141_v43 = vunpack.i.l.bf16 %v3140_v41 }
  0xe7   :  { %v3155_v44 = vpop.permute.xlu1 %3154 }
  0xe8   :  { %1316 = vst.msk [vmem:[#allocation0 + $0x142] ss:$4 sm:$0xff] %vm514_vm1, %v3142_v42   ;;  %1305 = vst.msk [vmem:[#allocation0 + $0x102] ss:$4 sm:$0xff] %vm514_vm1, %v3141_v43   ;;  %v3157_v45 = vunpack.i.h.bf16 %v3155_v44  ;;  %v3156_v46 = vunpack.i.l.bf16 %v3155_v44 }
  0xe9   :  { %v3150_v47 = vpop.permute.xlu0 %3149 }
  0xea   :  { %1382 = vst.msk [vmem:[#allocation0 + $0xe2] ss:$4 sm:$0xff] %vm514_vm1, %v3157_v45   ;;  %1371 = vst.msk [vmem:[#allocation0 + $0xa2] ss:$4 sm:$0xff] %vm514_vm1, %v3156_v46   ;;  %v3152_v48 = vunpack.i.h.bf16 %v3150_v47  ;;  %v3151_v49 = vunpack.i.l.bf16 %v3150_v47 }
  0xeb   :  { %v3165_v50 = vpop.permute.xlu1 %3164 }
  0xec   :  { %1360 = vst.msk [vmem:[#allocation0 + $0x62] ss:$4 sm:$0xff] %vm514_vm1, %v3152_v48   ;;  %1349 = vst.msk [vmem:[#allocation0 + $0x22] ss:$4 sm:$0xff] %vm514_vm1, %v3151_v49   ;;  %v3167_v51 = vunpack.i.h.bf16 %v3165_v50  ;;  %v3166_v52 = vunpack.i.l.bf16 %v3165_v50 }
  0xed   :  { %v3160_v53 = vpop.permute.xlu0 %3159 }
  0xee   :  { %1426 = vst.msk [vmem:[#allocation0 + $0x1e2] ss:$4 sm:$0xff] %vm514_vm1, %v3167_v51   ;;  %1415 = vst.msk [vmem:[#allocation0 + $0x1a2] ss:$4 sm:$0xff] %vm514_vm1, %v3166_v52   ;;  %v3162_v54 = vunpack.i.h.bf16 %v3160_v53  ;;  %v3161_v55 = vunpack.i.l.bf16 %v3160_v53 }
  0xef   :  { %v3175_v56 = vpop.permute.xlu1 %3174 }
  0xf0   :  { %1404 = vst.msk [vmem:[#allocation0 + $0x162] ss:$4 sm:$0xff] %vm514_vm1, %v3162_v54   ;;  %1393 = vst.msk [vmem:[#allocation0 + $0x122] ss:$4 sm:$0xff] %vm514_vm1, %v3161_v55   ;;  %v3177_v57 = vunpack.i.h.bf16 %v3175_v56  ;;  %v3176_v58 = vunpack.i.l.bf16 %v3175_v56 }
  0xf1   :  { %v3170_v59 = vpop.permute.xlu0 %3169 }
  0xf2   :  { %1470 = vst.msk [vmem:[#allocation0 + $0x2c2] ss:$4 sm:$0xff] %vm514_vm1, %v3177_v57   ;;  %1459 = vst.msk [vmem:[#allocation0 + $0x282] ss:$4 sm:$0xff] %vm514_vm1, %v3176_v58   ;;  %v3172_v60 = vunpack.i.h.bf16 %v3170_v59  ;;  %v3171_v61 = vunpack.i.l.bf16 %v3170_v59 }
  0xf3   :  { %v3185_v62 = vpop.permute.xlu1 %3184 }
  0xf4   :  { %1448 = vst.msk [vmem:[#allocation0 + $0x242] ss:$4 sm:$0xff] %vm514_vm1, %v3172_v60   ;;  %1437 = vst.msk [vmem:[#allocation0 + $0x202] ss:$4 sm:$0xff] %vm514_vm1, %v3171_v61   ;;  %v3187_v63 = vunpack.i.h.bf16 %v3185_v62  ;;  %v3186_v0 = vunpack.i.l.bf16 %v3185_v62 }
  0xf5   :  { %v3180_v1 = vpop.permute.xlu0 %3179 }
  0xf6   :  { %1514 = vst.msk [vmem:[#allocation0 + $0x2e2] ss:$4 sm:$0xff] %vm514_vm1, %v3187_v63   ;;  %1503 = vst.msk [vmem:[#allocation0 + $0x2a2] ss:$4 sm:$0xff] %vm514_vm1, %v3186_v0   ;;  %v3182_v2 = vunpack.i.h.bf16 %v3180_v1  ;;  %v3181_v3 = vunpack.i.l.bf16 %v3180_v1 }
  0xf7   :  { %v3195_v4 = vpop.permute.xlu1 %3194 }
  0xf8   :  { %1492 = vst.msk [vmem:[#allocation0 + $0x262] ss:$4 sm:$0xff] %vm514_vm1, %v3182_v2   ;;  %1481 = vst.msk [vmem:[#allocation0 + $0x222] ss:$4 sm:$0xff] %vm514_vm1, %v3181_v3   ;;  %v3197_v5 = vunpack.i.h.bf16 %v3195_v4  ;;  %v3196_v6 = vunpack.i.l.bf16 %v3195_v4 }
  0xf9   :  { %v3190_v7 = vpop.permute.xlu0 %3189 }
  0xfa   :  { %1556 = vst.msk [vmem:[#allocation0 + $0xc3] ss:$4 sm:$0xff] %vm514_vm1, %v3197_v5   ;;  %1545 = vst.msk [vmem:[#allocation0 + $0x83] ss:$4 sm:$0xff] %vm514_vm1, %v3196_v6   ;;  %v3192_v8 = vunpack.i.h.bf16 %v3190_v7  ;;  %v3191_v9 = vunpack.i.l.bf16 %v3190_v7 }
  0xfb   :  { %v3205_v10 = vpop.permute.xlu1 %3204 }
  0xfc   :  { %1534 = vst.msk [vmem:[#allocation0 + $0x43] ss:$4 sm:$0xff] %vm514_vm1, %v3192_v8   ;;  %1523 = vst.msk [vmem:[#allocation0 + $0x3] ss:$4 sm:$0xff] %vm514_vm1, %v3191_v9   ;;  %v3207_v11 = vunpack.i.h.bf16 %v3205_v10  ;;  %v3206_v12 = vunpack.i.l.bf16 %v3205_v10 }
  0xfd   :  { %v3200_v13 = vpop.permute.xlu0 %3199 }
  0xfe   :  { %1600 = vst.msk [vmem:[#allocation0 + $0x1c3] ss:$4 sm:$0xff] %vm514_vm1, %v3207_v11   ;;  %1589 = vst.msk [vmem:[#allocation0 + $0x183] ss:$4 sm:$0xff] %vm514_vm1, %v3206_v12   ;;  %v3202_v14 = vunpack.i.h.bf16 %v3200_v13  ;;  %v3201_v15 = vunpack.i.l.bf16 %v3200_v13 }
  0xff   :  { %v3215_v16 = vpop.permute.xlu1 %3214 }
 0x100   :  { %1578 = vst.msk [vmem:[#allocation0 + $0x143] ss:$4 sm:$0xff] %vm514_vm1, %v3202_v14   ;;  %1567 = vst.msk [vmem:[#allocation0 + $0x103] ss:$4 sm:$0xff] %vm514_vm1, %v3201_v15   ;;  %v3217_v17 = vunpack.i.h.bf16 %v3215_v16  ;;  %v3216_v18 = vunpack.i.l.bf16 %v3215_v16 }
 0x101   :  { %v1890_v19 = vld [vmem:[#allocation0 + $0x80] sm:$0xff]  ;;  %v1897_v20 = vld [vmem:[#allocation0 + $0x88] sm:$0xff]  ;;  %v1904_v21 = vld [vmem:[#allocation0 + $0x90] sm:$0xff]  ;;  %v3210_v22 = vpop.permute.xlu0 %3209 }
 0x102   :  { %v1911_v23 = vld [vmem:[#allocation0 + $0x98] sm:$0xff]  ;;  %v1946_v24 = vld [vmem:[#allocation0 + $0xc0] sm:$0xff]  ;;  %v1953_v25 = vld [vmem:[#allocation0 + $0xc8] sm:$0xff]  ;;  %v2806_v26 = vpack.c.bf16 %v1897_v20, %v1890_v19  ;;  %1644 = vst.msk [vmem:[#allocation0 + $0xe3] ss:$4 sm:$0xff] %vm514_vm1, %v3217_v17   ;;  %v3212_v27 = vunpack.i.h.bf16 %v3210_v22  ;;  %v3211_v28 = vunpack.i.l.bf16 %v3210_v22 }
 0x103   :  { %1633 = vst.msk [vmem:[#allocation0 + $0xa3] ss:$4 sm:$0xff] %vm514_vm1, %v3216_v18   ;;  %v1960_v29 = vld [vmem:[#allocation0 + $0xd0] sm:$0xff]  ;;  %v1967_v30 = vld [vmem:[#allocation0 + $0xd8] sm:$0xff]  ;;  %v1781_v31 = vld [vmem:[#allocation0] sm:$0xff]  ;;  %v2811_v32 = vpack.c.bf16 %v1911_v23, %v1904_v21  ;;  %v2826_v33 = vpack.c.bf16 %v1953_v25, %v1946_v24  ;;  %v3225_v34 = vpop.permute.xlu1 %3224 }
 0x104   :  { %v1786_v35 = vld [vmem:[#allocation0 + $0x8] sm:$0xff]  ;;  %v1792_v36 = vld [vmem:[#allocation0 + $0x10] sm:$0xff]  ;;  %v1799_v37 = vld [vmem:[#allocation0 + $0x18] sm:$0xff]  ;;  %v2831_v38 = vpack.c.bf16 %v1967_v30, %v1960_v29  ;;  %3025 = vst [vmem:[%s4008_s1 + $0x40] sm:$0xff] %v2806_v26   ;;  %v3227_v39 = vunpack.i.h.bf16 %v3225_v34  ;;  %v3226_v40 = vunpack.i.l.bf16 %v3225_v34 }
 0x105   :  { %1622 = vst.msk [vmem:[#allocation0 + $0x63] ss:$4 sm:$0xff] %vm514_vm1, %v3212_v27   ;;  %1611 = vst.msk [vmem:[#allocation0 + $0x23] ss:$4 sm:$0xff] %vm514_vm1, %v3211_v28   ;;  %v1834_v41 = vld [vmem:[#allocation0 + $0x40] sm:$0xff]  ;;  %v1841_v42 = vld [vmem:[#allocation0 + $0x48] sm:$0xff]  ;;  %v2766_v44 = vpack.c.bf16 %v1786_v35, %v1781_v31  ;;  %v2771_v45 = vpack.c.bf16 %v1799_v37, %v1792_v36  ;;  %v3220_v46 = vpop.permute.xlu0 %3219 }
 0x106   :  { %v1848_v43 = vld [vmem:[#allocation0 + $0x50] sm:$0xff]  ;;  %3026 = vst [vmem:[%s4008_s1 + $0x48] sm:$0xff] %v2811_v32   ;;  %3029 = vst [vmem:[%s4008_s1 + $0x60] sm:$0xff] %v2826_v33   ;;  %v1855_v47 = vld [vmem:[#allocation0 + $0x58] sm:$0xff]  ;;  %v2786_v48 = vpack.c.bf16 %v1841_v42, %v1834_v41  ;;  %v3222_v51 = vunpack.i.h.bf16 %v3220_v46  ;;  %v3221_v52 = vunpack.i.l.bf16 %v3220_v46 }
 0x107   :  { %3030 = vst [vmem:[%s4008_s1 + $0x68] sm:$0xff] %v2831_v38   ;;  %v2114_v49 = vld [vmem:[#allocation0 + $0x180] sm:$0xff]  ;;  %v2121_v50 = vld [vmem:[#allocation0 + $0x188] sm:$0xff]  ;;  %1688 = vst.msk [vmem:[#allocation0 + $0x1e3] ss:$4 sm:$0xff] %vm514_vm1, %v3227_v39   ;;  %v2791_v53 = vpack.c.bf16 %v1855_v47, %v1848_v43  ;;  %v3235_v58 = vpop.permute.xlu1 %3234 }
 0x108   :  { %1677 = vst.msk [vmem:[#allocation0 + $0x1a3] ss:$4 sm:$0xff] %vm514_vm1, %v3226_v40   ;;  %v2128_v54 = vld [vmem:[#allocation0 + $0x190] sm:$0xff]  ;;  %v2135_v55 = vld [vmem:[#allocation0 + $0x198] sm:$0xff]  ;;  %v2170_v56 = vld [vmem:[#allocation0 + $0x1c0] sm:$0xff]  ;;  %v2886_v57 = vpack.c.bf16 %v2121_v50, %v2114_v49  ;;  %v3237_v63 = vunpack.i.h.bf16 %v3235_v58  ;;  %v3236_v0 = vunpack.i.l.bf16 %v3235_v58 }
 0x109   :  { %2767 = vst [vmem:[%s4008_s1] sm:$0xff] %v2766_v44   ;;  %3018 = vst [vmem:[%s4008_s1 + $0x8] sm:$0xff] %v2771_v45   ;;  %v2177_v59 = vld [vmem:[#allocation0 + $0x1c8] sm:$0xff]  ;;  %v2184_v60 = vld [vmem:[#allocation0 + $0x1d0] sm:$0xff]  ;;  %v2891_v62 = vpack.c.bf16 %v2135_v55, %v2128_v54  ;;  %v3230_v6 = vpop.permute.xlu0 %3229 }
 0x10a   :  { %v2191_v61 = vld [vmem:[#allocation0 + $0x1d8] sm:$0xff]  ;;  %3021 = vst [vmem:[%s4008_s1 + $0x20] sm:$0xff] %v2786_v48   ;;  %1666 = vst.msk [vmem:[#allocation0 + $0x163] ss:$4 sm:$0xff] %vm514_vm1, %v3222_v51   ;;  %v2002_v1 = vld [vmem:[#allocation0 + $0x100] sm:$0xff]  ;;  %v2906_v4 = vpack.c.bf16 %v2177_v59, %v2170_v56  ;;  %v3232_v11 = vunpack.i.h.bf16 %v3230_v6  ;;  %v3231_v12 = vunpack.i.l.bf16 %v3230_v6 }
 0x10b   :  { %1655 = vst.msk [vmem:[#allocation0 + $0x123] ss:$4 sm:$0xff] %vm514_vm1, %v3221_v52   ;;  %v2009_v2 = vld [vmem:[#allocation0 + $0x108] sm:$0xff]  ;;  %v2016_v3 = vld [vmem:[#allocation0 + $0x110] sm:$0xff]  ;;  %3022 = vst [vmem:[%s4008_s1 + $0x28] sm:$0xff] %v2791_v53   ;;  %v2911_v5 = vpack.c.bf16 %v2191_v61, %v2184_v60  ;;  %v3245_v18 = vpop.permute.xlu1 %3244 }
 0x10c   :  { %3041 = vst [vmem:[%s4008_s1 + $0xc0] sm:$0xff] %v2886_v57   ;;  %v2846_v7 = vpack.c.bf16 %v2009_v2, %v2002_v1  ;;  %v2023_v8 = vld [vmem:[#allocation0 + $0x118] sm:$0xff]  ;;  %v2058_v9 = vld [vmem:[#allocation0 + $0x140] sm:$0xff]  ;;  %v2065_v10 = vld [vmem:[#allocation0 + $0x148] sm:$0xff]  ;;  %v3247_v23 = vunpack.i.h.bf16 %v3245_v18  ;;  %v3246_v24 = vunpack.i.l.bf16 %v3245_v18 }
 0x10d   :  { %3042 = vst [vmem:[%s4008_s1 + $0xc8] sm:$0xff] %v2891_v62   ;;  %1732 = vst.msk [vmem:[#allocation0 + $0x2c3] ss:$4 sm:$0xff] %vm514_vm1, %v3237_v63   ;;  %v2851_v13 = vpack.c.bf16 %v2023_v8, %v2016_v3  ;;  %v2866_v14 = vpack.c.bf16 %v2065_v10, %v2058_v9  ;;  %v2072_v15 = vld [vmem:[#allocation0 + $0x150] sm:$0xff]  ;;  %v2079_v16 = vld [vmem:[#allocation0 + $0x158] sm:$0xff]  ;;  %v3240_v30 = vpop.permute.xlu0 %3239 }
 0x10e   :  { %1721 = vst.msk [vmem:[#allocation0 + $0x283] ss:$4 sm:$0xff] %vm514_vm1, %v3236_v0   ;;  %v1918_v17 = vld [vmem:[#allocation0 + $0xa0] sm:$0xff]  ;;  %3045 = vst [vmem:[%s4008_s1 + $0xe0] sm:$0xff] %v2906_v4   ;;  %v2871_v19 = vpack.c.bf16 %v2079_v16, %v2072_v15  ;;  %v1925_v20 = vld [vmem:[#allocation0 + $0xa8] sm:$0xff]  ;;  %v3242_v35 = vunpack.i.h.bf16 %v3240_v30  ;;  %v3241_v36 = vunpack.i.l.bf16 %v3240_v30 }
 0x10f   :  { %3046 = vst [vmem:[%s4008_s1 + $0xe8] sm:$0xff] %v2911_v5   ;;  %3033 = vst [vmem:[%s4008_s1 + $0x80] sm:$0xff] %v2846_v7   ;;  %v1932_v21 = vld [vmem:[#allocation0 + $0xb0] sm:$0xff]  ;;  %v1939_v22 = vld [vmem:[#allocation0 + $0xb8] sm:$0xff]  ;;  %v2816_v25 = vpack.c.bf16 %v1925_v20, %v1918_v17 }
 0x110   :  { %1710 = vst.msk [vmem:[#allocation0 + $0x243] ss:$4 sm:$0xff] %vm514_vm1, %v3232_v11   ;;  %1699 = vst.msk [vmem:[#allocation0 + $0x203] ss:$4 sm:$0xff] %vm514_vm1, %v3231_v12   ;;  %v2821_v26 = vpack.c.bf16 %v1939_v22, %v1932_v21  ;;  %v1974_v27 = vld [vmem:[#allocation0 + $0xe0] sm:$0xff]  ;;  %v1981_v28 = vld [vmem:[#allocation0 + $0xe8] sm:$0xff] }
 0x111   :  { %3034 = vst [vmem:[%s4008_s1 + $0x88] sm:$0xff] %v2851_v13   ;;  %3037 = vst [vmem:[%s4008_s1 + $0xa0] sm:$0xff] %v2866_v14   ;;  %v1988_v29 = vld [vmem:[#allocation0 + $0xf0] sm:$0xff]  ;;  %v2836_v31 = vpack.c.bf16 %v1981_v28, %v1974_v27  ;;  %v1995_v32 = vld [vmem:[#allocation0 + $0xf8] sm:$0xff] }
 0x112   :  { %3038 = vst [vmem:[%s4008_s1 + $0xa8] sm:$0xff] %v2871_v19   ;;  %v1806_v33 = vld [vmem:[#allocation0 + $0x20] sm:$0xff]  ;;  %v1813_v34 = vld [vmem:[#allocation0 + $0x28] sm:$0xff]  ;;  %1776 = vst.msk [vmem:[#allocation0 + $0x2e3] ss:$4 sm:$0xff] %vm514_vm1, %v3247_v23   ;;  %v2841_v37 = vpack.c.bf16 %v1995_v32, %v1988_v29 }
 0x113   :  { %1765 = vst.msk [vmem:[#allocation0 + $0x2a3] ss:$4 sm:$0xff] %vm514_vm1, %v3246_v24   ;;  %3027 = vst [vmem:[%s4008_s1 + $0x50] sm:$0xff] %v2816_v25   ;;  %v2776_v38 = vpack.c.bf16 %v1813_v34, %v1806_v33  ;;  %v1820_v39 = vld [vmem:[#allocation0 + $0x30] sm:$0xff]  ;;  %v1827_v40 = vld [vmem:[#allocation0 + $0x38] sm:$0xff] }
 0x114   :  { %3028 = vst [vmem:[%s4008_s1 + $0x58] sm:$0xff] %v2821_v26   ;;  %v1862_v41 = vld [vmem:[#allocation0 + $0x60] sm:$0xff]  ;;  %3031 = vst [vmem:[%s4008_s1 + $0x70] sm:$0xff] %v2836_v31   ;;  %v2781_v42 = vpack.c.bf16 %v1827_v40, %v1820_v39  ;;  %v1869_v43 = vld [vmem:[#allocation0 + $0x68] sm:$0xff] }
 0x115   :  { %v1876_v44 = vld [vmem:[#allocation0 + $0x70] sm:$0xff]  ;;  %v1883_v45 = vld [vmem:[#allocation0 + $0x78] sm:$0xff]  ;;  %1754 = vst.msk [vmem:[#allocation0 + $0x263] ss:$4 sm:$0xff] %vm514_vm1, %v3242_v35   ;;  %1743 = vst.msk [vmem:[#allocation0 + $0x223] ss:$4 sm:$0xff] %vm514_vm1, %v3241_v36   ;;  %v2796_v46 = vpack.c.bf16 %v1869_v43, %v1862_v41 }
 0x116   :  { %3032 = vst [vmem:[%s4008_s1 + $0x78] sm:$0xff] %v2841_v37   ;;  %3019 = vst [vmem:[%s4008_s1 + $0x10] sm:$0xff] %v2776_v38   ;;  %v2801_v47 = vpack.c.bf16 %v1883_v45, %v1876_v44  ;;  %v2142_v48 = vld [vmem:[#allocation0 + $0x1a0] sm:$0xff]  ;;  %v2149_v49 = vld [vmem:[#allocation0 + $0x1a8] sm:$0xff] }
 0x117   :  { %v2156_v50 = vld [vmem:[#allocation0 + $0x1b0] sm:$0xff]  ;;  %3020 = vst [vmem:[%s4008_s1 + $0x18] sm:$0xff] %v2781_v42   ;;  %v2896_v51 = vpack.c.bf16 %v2149_v49, %v2142_v48  ;;  %v2163_v52 = vld [vmem:[#allocation0 + $0x1b8] sm:$0xff]  ;;  %v2198_v53 = vld [vmem:[#allocation0 + $0x1e0] sm:$0xff] }
 0x118   :  { %v2205_v54 = vld [vmem:[#allocation0 + $0x1e8] sm:$0xff]  ;;  %3023 = vst [vmem:[%s4008_s1 + $0x30] sm:$0xff] %v2796_v46   ;;  %3024 = vst [vmem:[%s4008_s1 + $0x38] sm:$0xff] %v2801_v47   ;;  %v2901_v55 = vpack.c.bf16 %v2163_v52, %v2156_v50  ;;  %v2212_v57 = vld [vmem:[#allocation0 + $0x1f0] sm:$0xff] }
 0x119   :  { %v2916_v56 = vpack.c.bf16 %v2205_v54, %v2198_v53  ;;  %v2219_v58 = vld [vmem:[#allocation0 + $0x1f8] sm:$0xff]  ;;  %v2030_v59 = vld [vmem:[#allocation0 + $0x120] sm:$0xff]  ;;  %3043 = vst [vmem:[%s4008_s1 + $0xd0] sm:$0xff] %v2896_v51   ;;  %v2037_v61 = vld [vmem:[#allocation0 + $0x128] sm:$0xff] }
 0x11a   :  { %v2921_v60 = vpack.c.bf16 %v2219_v58, %v2212_v57  ;;  %v2044_v62 = vld [vmem:[#allocation0 + $0x130] sm:$0xff]  ;;  %v2051_v63 = vld [vmem:[#allocation0 + $0x138] sm:$0xff]  ;;  %3044 = vst [vmem:[%s4008_s1 + $0xd8] sm:$0xff] %v2901_v55   ;;  %v2856_v0 = vpack.c.bf16 %v2037_v61, %v2030_v59  ;;  %v2086_v2 = vld [vmem:[#allocation0 + $0x160] sm:$0xff] }
 0x11b   :  { %3047 = vst [vmem:[%s4008_s1 + $0xf0] sm:$0xff] %v2916_v56   ;;  %v2861_v1 = vpack.c.bf16 %v2051_v63, %v2044_v62  ;;  %v2093_v3 = vld [vmem:[#allocation0 + $0x168] sm:$0xff]  ;;  %v2100_v4 = vld [vmem:[#allocation0 + $0x170] sm:$0xff]  ;;  %v2107_v5 = vld [vmem:[#allocation0 + $0x178] sm:$0xff] }
 0x11c   :  { %3048 = vst [vmem:[%s4008_s1 + $0xf8] sm:$0xff] %v2921_v60   ;;  %v2338_v6 = vld [vmem:[#allocation0 + $0x280] sm:$0xff]  ;;  %v2345_v7 = vld [vmem:[#allocation0 + $0x288] sm:$0xff]  ;;  %v2876_v8 = vpack.c.bf16 %v2093_v3, %v2086_v2  ;;  %3035 = vst [vmem:[%s4008_s1 + $0x90] sm:$0xff] %v2856_v0   ;;  %v2881_v12 = vpack.c.bf16 %v2107_v5, %v2100_v4 }
 0x11d   :  { %3036 = vst [vmem:[%s4008_s1 + $0x98] sm:$0xff] %v2861_v1   ;;  %v2966_v9 = vpack.c.bf16 %v2345_v7, %v2338_v6  ;;  %v2352_v10 = vld [vmem:[#allocation0 + $0x290] sm:$0xff]  ;;  %v2359_v11 = vld [vmem:[#allocation0 + $0x298] sm:$0xff]  ;;  %v2394_v13 = vld [vmem:[#allocation0 + $0x2c0] sm:$0xff] }
 0x11e   :  { %v2971_v14 = vpack.c.bf16 %v2359_v11, %v2352_v10  ;;  %v2401_v15 = vld [vmem:[#allocation0 + $0x2c8] sm:$0xff]  ;;  %v2408_v16 = vld [vmem:[#allocation0 + $0x2d0] sm:$0xff]  ;;  %v2415_v17 = vld [vmem:[#allocation0 + $0x2d8] sm:$0xff]  ;;  %3039 = vst [vmem:[%s4008_s1 + $0xb0] sm:$0xff] %v2876_v8  }
 0x11f   :  { %3057 = vst [vmem:[%s4008_s1 + $0x140] sm:$0xff] %v2966_v9   ;;  %v2282_v18 = vld [vmem:[#allocation0 + $0x240] sm:$0xff]  ;;  %v2289_v19 = vld [vmem:[#allocation0 + $0x248] sm:$0xff]  ;;  %v2296_v20 = vld [vmem:[#allocation0 + $0x250] sm:$0xff]  ;;  %v2986_v21 = vpack.c.bf16 %v2401_v15, %v2394_v13  ;;  %v2991_v22 = vpack.c.bf16 %v2415_v17, %v2408_v16 }
 0x120   :  { %3040 = vst [vmem:[%s4008_s1 + $0xb8] sm:$0xff] %v2881_v12   ;;  %3058 = vst [vmem:[%s4008_s1 + $0x148] sm:$0xff] %v2971_v14   ;;  %v2946_v23 = vpack.c.bf16 %v2289_v19, %v2282_v18  ;;  %v2303_v24 = vld [vmem:[#allocation0 + $0x258] sm:$0xff]  ;;  %v2226_v25 = vld [vmem:[#allocation0 + $0x200] sm:$0xff] }
 0x121   :  { %v2233_v26 = vld [vmem:[#allocation0 + $0x208] sm:$0xff]  ;;  %v2951_v27 = vpack.c.bf16 %v2303_v24, %v2296_v20  ;;  %v2240_v28 = vld [vmem:[#allocation0 + $0x210] sm:$0xff]  ;;  %v2247_v29 = vld [vmem:[#allocation0 + $0x218] sm:$0xff]  ;;  %3061 = vst [vmem:[%s4008_s1 + $0x160] sm:$0xff] %v2986_v21  }
 0x122   :  { %v2366_v30 = vld [vmem:[#allocation0 + $0x2a0] sm:$0xff]  ;;  %v2926_v31 = vpack.c.bf16 %v2233_v26, %v2226_v25  ;;  %3062 = vst [vmem:[%s4008_s1 + $0x168] sm:$0xff] %v2991_v22   ;;  %3053 = vst [vmem:[%s4008_s1 + $0x120] sm:$0xff] %v2946_v23   ;;  %v2373_v32 = vld [vmem:[#allocation0 + $0x2a8] sm:$0xff]  ;;  %v2931_v35 = vpack.c.bf16 %v2247_v29, %v2240_v28 }
 0x123   :  { %v2380_v33 = vld [vmem:[#allocation0 + $0x2b0] sm:$0xff]  ;;  %v2387_v34 = vld [vmem:[#allocation0 + $0x2b8] sm:$0xff]  ;;  %3054 = vst [vmem:[%s4008_s1 + $0x128] sm:$0xff] %v2951_v27   ;;  %v2976_v36 = vpack.c.bf16 %v2373_v32, %v2366_v30  ;;  %v2422_v38 = vld [vmem:[#allocation0 + $0x2e0] sm:$0xff] }
 0x124   :  { %v2981_v37 = vpack.c.bf16 %v2387_v34, %v2380_v33  ;;  %v2429_v39 = vld [vmem:[#allocation0 + $0x2e8] sm:$0xff]  ;;  %v2436_v40 = vld [vmem:[#allocation0 + $0x2f0] sm:$0xff]  ;;  %3049 = vst [vmem:[%s4008_s1 + $0x100] sm:$0xff] %v2926_v31   ;;  %v2443_v42 = vld [vmem:[#allocation0 + $0x2f8] sm:$0xff] }
 0x125   :  { %v2996_v41 = vpack.c.bf16 %v2429_v39, %v2422_v38  ;;  %v2254_v43 = vld [vmem:[#allocation0 + $0x220] sm:$0xff]  ;;  %v2261_v44 = vld [vmem:[#allocation0 + $0x228] sm:$0xff]  ;;  %3050 = vst [vmem:[%s4008_s1 + $0x108] sm:$0xff] %v2931_v35   ;;  %3059 = vst [vmem:[%s4008_s1 + $0x150] sm:$0xff] %v2976_v36   ;;  %v3001_v45 = vpack.c.bf16 %v2443_v42, %v2436_v40 }
 0x126   :  { %3060 = vst [vmem:[%s4008_s1 + $0x158] sm:$0xff] %v2981_v37   ;;  %v2936_v46 = vpack.c.bf16 %v2261_v44, %v2254_v43  ;;  %v2268_v47 = vld [vmem:[#allocation0 + $0x230] sm:$0xff]  ;;  %v2275_v48 = vld [vmem:[#allocation0 + $0x238] sm:$0xff]  ;;  %v2310_v49 = vld [vmem:[#allocation0 + $0x260] sm:$0xff] }
 0x127   :  { %3063 = vst [vmem:[%s4008_s1 + $0x170] sm:$0xff] %v2996_v41   ;;  %v2941_v50 = vpack.c.bf16 %v2275_v48, %v2268_v47  ;;  %v2317_v51 = vld [vmem:[#allocation0 + $0x268] sm:$0xff]  ;;  %v2324_v52 = vld [vmem:[#allocation0 + $0x270] sm:$0xff]  ;;  %v2331_v53 = vld [vmem:[#allocation0 + $0x278] sm:$0xff] }
 0x128   :  { %3064 = vst [vmem:[%s4008_s1 + $0x178] sm:$0xff] %v3001_v45   ;;  %3051 = vst [vmem:[%s4008_s1 + $0x110] sm:$0xff] %v2936_v46   ;;  %v2956_v54 = vpack.c.bf16 %v2317_v51, %v2310_v49  ;;  %v2961_v55 = vpack.c.bf16 %v2331_v53, %v2324_v52 }
 0x129   :  { %3052 = vst [vmem:[%s4008_s1 + $0x118] sm:$0xff] %v2941_v50  }
 0x12a   :  { %3055 = vst [vmem:[%s4008_s1 + $0x130] sm:$0xff] %v2956_v54   ;;  %3056 = vst [vmem:[%s4008_s1 + $0x138] sm:$0xff] %v2961_v55  }

// kernel: generator_forward.18
= control target key start
LH: loop header
LB: loop body
LE: loop exit
PB: predicated region body
PF: predicated region fallthrough
CT: control target
= control target key end

     0   :  { %s690_s15 = smov 0   ;;  %s692_s16 = smov 0   ;;  %s799_s0 = inlined_call_operand.vmem [shape: bf16[48,8], index: 0, kind: input, shape index: {}]   ;;  %s800_s1 = inlined_call_operand.vmem [shape: bf16[8,2048], index: 1, kind: input, shape index: {}]   ;;  %s801_s2 = inlined_call_operand.vmem [shape: f32[8,1], index: 2, kind: input, shape index: {}]   ;;  %s802_s3 = inlined_call_operand.vmem [shape: f32[8,1], index: 3, kind: input, shape index: {}]   ;;  %s803_s4 = inlined_call_operand.vmem [shape: bf16[48,2048], index: 4, kind: output, shape index: {}]  }
   0x1   :  { %s694_s17 = smov 0   ;;  %s696_s18 = smov 0  }
   0x2   :  { %s698_s19 = smov 0   ;;  %s700_s20 = smov 0  }
   0x3   :  { %s702_s21 = smov 0  }
   0x4 LB: > { %s23_s22 = sadd.s32 1, %s654_s19  ;;  %s26_s23 = sadd.s32 1, %s658_s20  ;;  %s662_s21 = sphi %s702_s21, %s14_s21   ;;  %s658_s20 = sphi %s700_s20, %s810_s20   ;;  %s654_s19 = sphi %s698_s19, %s809_s19   ;;  %s650_s18 = sphi %s696_s18, %s808_s18   ;;  %s646_s17 = sphi %s694_s17, %s807_s17   ;;  %s642_s16 = sphi %s692_s16, %s806_s16   ;;  %s638_s15 = sphi %s690_s15, %s805_s15  }
   0x5   : > { %p24_p0 = scmp.ge.s32.totalorder %s23_s22, 4  ;;  %s518_s24 = sadd.s32 4294967295, %s662_s21  }
   0x6   : > { %p139_p1 = scmp.ne.s32.totalorder %s642_s16, %s638_s15  ;;  %p140_p2 = scmp.eq.s32.totalorder %s518_s24, 11 }
   0x7   : > { %s812_s22 = smov (%p24_p0, %s23_s22), 0  ;;  %s814_s23 = smov (!%p24_p0, %s26_s23), %s658_s20 }
   0x8   : > { %s125_s25 = ssub.s32 %s654_s19, %s812_s22  ;;  %p28_p3 = scmp.ge.s32.totalorder %s814_s23, 3 }
   0x9   : > { %p522_p4 = scmp.ge.s32.totalorder %s662_s21, 1  ;;  %p736_p5 = por %p140_p2, %p139_p1 }
   0xa   : > { %p188_p6 = scmp.lt.s32.totalorder %s662_s21, 13  ;;  %s816_s23 = smov (%p28_p3, %s814_s23), 0 }
   0xb   : > { %s124_s27 = ssub.s32 %s658_s20, %s816_s23  ;;  %s129_s29 = sadd.s32 1, %s642_s16 }
   0xc   : > { %p189_p7 = pnand %p522_p4, %p188_p6  ;;  %s126_s28 = sor.u32 %s125_s25, %s124_s27 }
   0xd   : > { %p127_p8 = scmp.eq.s32.totalorder %s126_s28, 0  ;;  %v239_v0 = vld [vmem:[%s801_s2] sm:$0xff] (!%p189_p7)  ;;  %v664_v1 = vmov (!%p189_p7), 0   ;;  %s524_s9 = sshll.u32 (!%p189_p7), %s650_s18, 1  ;;  %vm278_vm0 = vcmask (!%p189_p7), 1043456   ;;  %vm274_vm1 = vcmask (!%p189_p7), 64512  }
   0xe   : > { %192 = sbr.rel (%p189_p7) target bundleno = 384 (0x180), region = 36  ;;  %606 = vset.pattern.permute.xlu0 (!%p189_p7), %v664_v1  ;;  %323 = vmatprep.mubr.bf16.mxu0 (!%p189_p7), %v664_v1  ;;  %v249_v2 = vld [vmem:[%s802_s3] sm:$0xff] (!%p189_p7)  ;;  %p219_p9 = scmp.lt.s32.totalorder (!%p189_p7), %s524_s9, 5 }
   0xf   : > { %s747_s30 = scalar_select %p127_p8, %s642_s16, %s129_s29  }
  0x10   : > { %242 = vperm.xlu0 (!%p189_p7), %606, %v239_v0   ;;  %366 = vmatprep.mubr.bf16.mxu1 (!%p189_p7), %v664_v1  ;;  %s762_s14 = sshll.u32 (!%p189_p7), %s646_s17, 2  ;;  %s215_s17 = sand.u32 (!%p189_p7), 1, %s638_s15  }
  0x11   : > { %p225_p10 = scmp.lt.s32.totalorder (!%p189_p7), %s762_s14, 15  ;;  %s523_s5 = sshll.u32 (!%p189_p7), %s215_s17, 5 }
  0x12   : > { %s217_s6 = scalar_lea.vmem (!%p189_p7), [#allocation2], %s523_s5 }
  0x14   : > { %252 = vperm.xlu0 (!%p189_p7), %606, %v249_v2  }
  0x15   : > { %s818_s9 = smov (!%p219_p9, %s524_s9), 5  ;;  %s548_s15 = sshll.u32 (%p736_p5), %s650_s18, 5 }
  0x16   : > { %s525_s10 = sshll.u32 %s818_s9, 2  ;;  %s415_s7 = sadd.s32 (%p736_p5), %s548_s15, %s762_s14 }
  0x17   : > { %s759_s13 = scalar_lea.vmem %s799_s0, %s525_s10  ;;  %s541_s8 = sshll.u32 (%p736_p5), %s415_s7, 2 }
  0x18   : > { %s226_s24 = scalar_select %p225_p10, %s762_s14, 15  ;;  %v607_v29 = vld [vmem:[%s759_s13] sm:$0xff]  }
  0x19   : > { %s417_s11 = scalar_lea.vmem (%p736_p5), %s803_s4, %s541_s8 }
  0x1a   : > { %s527_s25 = sshll.u32 %s226_s24, 2 }
  0x1b   : > { %s228_s29 = scalar_lea.vmem %s800_s1, %s527_s25 }
  0x1c   : > { %v233_v3 = vld [vmem:[%s228_s29] sm:$0xff]  ;;  %v234_v4 = vld [vmem:[%s228_s29 + $0x8] sm:$0xff] }
  0x1d   : > { %v236_v5 = vunpack.c.h.bf16 %v233_v3  ;;  %v238_v6 = vunpack.c.h.bf16 %v234_v4  ;;  %v235_v7 = vunpack.c.l.bf16 %v233_v3  ;;  %v237_v8 = vunpack.c.l.bf16 %v234_v4 }
  0x8f   : > { %v243_v9 = vpop.permute.xlu0 %242 }
  0x90   : > { %v246_v10 = vmul.f32 %v243_v9, %v236_v5  ;;  %v248_v11 = vmul.f32 %v243_v9, %v238_v6  ;;  %v245_v12 = vmul.f32 %v243_v9, %v235_v7  ;;  %v247_v13 = vmul.f32 %v243_v9, %v237_v8 }
  0x93   : > { %v253_v14 = vpop.permute.xlu0 %252 }
  0x94   : > { %v256_v15 = vadd.f32 %v253_v14, %v246_v10  ;;  %v258_v16 = vadd.f32 %v253_v14, %v248_v11  ;;  %v255_v17 = vadd.f32 %v253_v14, %v245_v12  ;;  %v257_v18 = vadd.f32 %v253_v14, %v247_v13 }
  0x96   : > { %v260_v19 = vmax.f32 %v256_v15, 0.0  ;;  %v262_v20 = vmax.f32 %v258_v16, 0.0  ;;  %v259_v21 = vmax.f32 %v255_v17, 0.0  ;;  %v261_v22 = vmax.f32 %v257_v18, 0.0 }
  0x98   : > { %v264_v23 = vpack.c.bf16 %v260_v19, %v260_v19  ;;  %v266_v24 = vpack.c.bf16 %v262_v20, %v262_v20  ;;  %v263_v25 = vpack.c.bf16 %v259_v21, %v259_v21  ;;  %v265_v26 = vpack.c.bf16 %v261_v22, %v261_v22 }
  0x9a   : > { %529 = vmatprep.subr.msk.bf16.mxu0 %vm278_vm0, %v264_v23  ;;  %531 = vmatprep.subr.msk.bf16.mxu1 %vm278_vm0, %v266_v24  ;;  %v280_v27 = vsel %vm278_vm0, %v263_v25, 0  ;;  %v286_v28 = vsel %vm278_vm0, %v265_v26, 0 }
  0x9b   : > { %292 = vmatpush1.bf16.msra.mxu0 %v280_v27  ;;  %335 = vmatpush1.bf16.msra.mxu1 %v286_v28 }
  0x9e   : > { %530 = vmatmul.mubr.msk.bf16.vlgmr.msra.gmra.mrb[0].mxu0 %vm274_vm1, %v607_v29  ;;  %532 = vmatmul.mubr.msk.bf16.vlgmr.msra.gmra.mrb[0].mxu1 %vm274_vm1, %v607_v29 }
 0x171   : > { %v325_v30 = vpop.f32.mrb[0].mxu0  ;;  %v368_v31 = vpop.f32.mrb[0].mxu1  ;;  %411 = sbr.rel (!%p736_p5) target bundleno = 384 (0x180), region = 40 }
 0x172   : > { %v327_v32 = vpop.f32.mrb[1].mxu0  ;;  %v370_v33 = vpop.f32.mrb[1].mxu1 }
 0x173   : > { %v544_v34 = vpack.c.bf16 %v327_v32, %v325_v30  ;;  %v545_v35 = vpack.c.bf16 %v370_v33, %v368_v31  ;;  %v329_v36 = vpop.f32.mrb[2].mxu0  ;;  %v372_v37 = vpop.f32.mrb[2].mxu1 }
 0x174   : > { %v331_v38 = vpop.f32.mrb[3].mxu0  ;;  %v374_v39 = vpop.f32.mrb[3].mxu1 }
 0x175   : > { %401 = vst [vmem:[%s217_s6] sm:$0xff] %v544_v34  ;;  %402 = vst [vmem:[%s217_s6 + $0x8] sm:$0xff] %v545_v35  ;;  %v546_v40 = vpack.c.bf16 %v331_v38, %v329_v36  ;;  %v547_v41 = vpack.c.bf16 %v374_v39, %v372_v37 }
 0x177   : > { %403 = vst [vmem:[%s217_s6 + $0x10] sm:$0xff] %v546_v40  ;;  %404 = vst [vmem:[%s217_s6 + $0x18] sm:$0xff] %v547_v41 }
 0x17c   : > { %v430_v42 = vld [vmem:[%s217_s6] sm:$0xff]  ;;  %v432_v43 = vld [vmem:[%s217_s6 + $0x8] sm:$0xff] }
 0x17d   : > { %431 = vst [vmem:[%s417_s11] sm:$0xff] %v430_v42  ;;  %433 = vst [vmem:[%s417_s11 + $0x8] sm:$0xff] %v432_v43 }
 0x17e   : > { %v434_v44 = vld [vmem:[%s217_s6 + $0x10] sm:$0xff]  ;;  %v436_v45 = vld [vmem:[%s217_s6 + $0x18] sm:$0xff] }
 0x17f   : > { %435 = vst [vmem:[%s417_s11 + $0x40] sm:$0xff] %v434_v44  ;;  %437 = vst [vmem:[%s417_s11 + $0x48] sm:$0xff] %v436_v45 }
 0x180 PF: > { %s14_s21 = sadd.s32 1, %s662_s21   ;;  %s805_s15 = smov %s642_s16 }
 0x181   : > { %p11_p11 = scmp.ge.s32.totalorder %s14_s21, 14   ;;  %s806_s16 = smov %s747_s30 }
 0x182   : > { %s807_s17 = smov %s654_s19  ;;  %s808_s18 = smov %s658_s20 }
 0x183   : > { %s809_s19 = smov %s812_s22  ;;  %s810_s20 = smov %s816_s23 }
 0x184   :  { %13 = sbr.rel (!%p11_p11) target bundleno = 4 (0x4), region = 92 }

// kernel: generator_forward.19
= control target key start
LH: loop header
LB: loop body
LE: loop exit
PB: predicated region body
PF: predicated region fallthrough
CT: control target
= control target key end

     0   :  { %s276_s9 = smov 0   ;;  %s296_s0 = inlined_call_operand.vmem [shape: bf16[3,8192], index: 0, kind: input, shape index: {}]   ;;  %s297_s1 = inlined_call_operand.vmem [shape: f32[3,1], index: 1, kind: input, shape index: {}]   ;;  %s298_s2 = inlined_call_operand.vmem [shape: f32[3,8192], index: 2, kind: output, shape index: {}]  }
   0x1 LB: > { %s225_s10 = sadd.s32 4294967295, %s257_s9   ;;  %p229_p0 = scmp.ge.s32.totalorder %s257_s9, 1  ;;  %s257_s9 = sphi %s276_s9, %s12_s9  }
   0x2   : > { %p113_p1 = scmp.lt.s32.totalorder %s257_s9, 17 }
   0x4   : > { %p114_p2 = pnand %p229_p0, %p113_p1 }
   0x5   : > { %v150_v0 = vld [vmem:[%s297_s1] sm:$0x7] (!%p114_p2)  ;;  %v259_v1 = vmov (!%p114_p2), 0   ;;  %s230_s13 = sshll.u32 (!%p114_p2), %s225_s10, 2  ;;  %v260_v2 = vmov (!%p114_p2), 839922192   ;;  %v158_v4 = vlaneseq (!%p114_p2) }
   0x6   : > { %117 = sbr.rel (%p114_p2) target bundleno = 152 (0x98), region = 28  ;;  %246 = vset.pattern.permute.xlu0 (!%p114_p2), %v259_v1  ;;  %p136_p3 = scmp.lt.s32.totalorder (!%p114_p2), %s230_s13, 63  ;;  %v156_v3 = vunpack.c.l.s4 (!%p114_p2), %v260_v2 }
   0x7   : > { %153 = vperm.xlu0 (!%p114_p2), %246, %v150_v0   ;;  %v159_v6 = vshrl.u32 (!%p114_p2), %v158_v4, 7 }
   0x8   : > { %v157_v5 = vunpack.c.0.s8 (!%p114_p2), %v156_v3 }
   0xa   : > { %v160_v8 = vsub.s32 (!%p114_p2), %v157_v5, %v159_v6 }
   0xd   : > { %s300_s13 = smov (!%p136_p3, %s230_s13), 63 }
   0xe   : > { %s231_s14 = sshll.u32 %s300_s13, 1  ;;  %s233_s18 = sshll.u32 %s300_s13, 2 }
   0xf   : > { %s139_s17 = scalar_lea.vmem %s296_s0, %s231_s14  ;;  %s145_s21 = scalar_lea.vmem %s298_s2, %s233_s18 }
  0x10   : > { %v147_v7 = vld [vmem:[%s139_s17] sm:$0xff] }
  0x11   : > { %v148_v9 = vunpack.c.l.bf16 %v147_v7  ;;  %v149_v10 = vunpack.c.h.bf16 %v147_v7 }
  0x86   : > { %v154_v11 = vpop.permute.xlu0 %153 }
  0x87   : > { %v161_v12 = vrot.slane %v154_v11, %v160_v8 }
  0x89   : > { %v163_v13 = vadd.f32 %v161_v12, %v148_v9  ;;  %v164_v14 = vadd.f32 %v161_v12, %v149_v10 }
  0x8b   : > { %247 = vtanh.f32 %v163_v13 }
  0x8c   : > { %249 = vtanh.f32 %v164_v14 }
  0x95   : > { %v248_v15 = vpop.eup %247 }
  0x96   : > { %v250_v16 = vpop.eup %249  ;;  %167 = vst [vmem:[%s145_s21] sm:$0x77] %v248_v15 }
  0x97   : > { %168 = vst [vmem:[%s145_s21 + $0x8] sm:$0x77] %v250_v16 }
  0x98 PF: > { %s12_s9 = sadd.s32 1, %s257_s9  }
  0x99   : > { %p9_p4 = scmp.ge.s32.totalorder %s12_s9, 18  }
  0x9b   :  { %11 = sbr.rel (!%p9_p4) target bundleno = 1 (0x1), region = 58 }

</bundles_post_ra>
